<compile_context>
chip_gen: v7x
topology: tpu7x:2x2x1
jax: 0.10.0
libtpu: 0.0.40
codegen_flags: <defaults>
</compile_context>

<pallas_src>
import functools
import math

import jax
import jax.numpy as jnp
from jax.experimental import pallas as pl
from jax.experimental.pallas import tpu as pltpu

BN_EPS = 1e-5
_SQRT_2_OVER_PI = 0.7978845608028654


def _gelu_tanh(x):
    # tanh-approx GELU (routes through the EUP); deviation from exact erf-GELU < 1e-3.
    return 0.5 * x * (1.0 + jnp.tanh(_SQRT_2_OVER_PI * (x + 0.044715 * x * x * x)))


def _bn_train(t, gamma, beta, inv_count):
    # train-mode BatchNorm1d over all B*S rows (biased variance, one pass), folded into
    # a single per-channel FMA:  BN(t) = t*scale + shift.
    mean = jnp.sum(t, axis=0, keepdims=True) * inv_count                    # [1, D]
    var = jnp.maximum(jnp.sum(t * t, axis=0, keepdims=True) * inv_count - mean * mean, 0.0)
    sc = gamma * jax.lax.rsqrt(var + BN_EPS)
    return t * sc + (beta - mean * sc)


# --------------------------- fused whole-encoder kernel ---------------------------

def _encoder_kernel(B, S, H, dk, dv,
                    x_ref, wqkv_ref, bqkv_ref, wo_ref, bo_ref,
                    g1_ref, be1_ref, w1_ref, b1_ref, w2_ref, b2_ref,
                    g2_ref, be2_ref,
                    o_ref, act_ref):
    l = pl.program_id(0)
    R = B * S
    Hdk = H * dk
    inv_r = jnp.float32(1.0 / R)
    scale = jnp.float32(1.0 / math.sqrt(dk))

    # layer 0 reads the encoder input; later layers read the VMEM-resident activation
    @pl.when(l == 0)
    def _():
        act_ref[...] = x_ref[...]

    xcur = act_ref[...]                                  # [R, D] f32
    xb = xcur.astype(jnp.bfloat16)

    # fused Q|K|V projection: one lane-dense matmul, K = D, N = 2*H*dk + H*dv
    qkv = jnp.dot(xb, wqkv_ref[...], preferred_element_type=jnp.float32) + bqkv_ref[...]
    qkvb = qkv.astype(jnp.bfloat16)                      # [R, 2*Hdk + Hdv]

    # (batch, head)-major [B*H, S, d] via static sublane/lane slices (no 3D reshapes)
    qh = jnp.stack([qkvb[b * S:(b + 1) * S, h * dk:(h + 1) * dk]
                    for b in range(B) for h in range(H)], axis=0)
    kh = jnp.stack([qkvb[b * S:(b + 1) * S, Hdk + h * dk:Hdk + (h + 1) * dk]
                    for b in range(B) for h in range(H)], axis=0)
    vh = jnp.stack([qkvb[b * S:(b + 1) * S, 2 * Hdk + h * dv:2 * Hdk + (h + 1) * dv]
                    for b in range(B) for h in range(H)], axis=0)

    # all (batch, head) pairs in one pair of leading-batch einsums
    s = jnp.einsum('hqd,hkd->hqk', qh, kh, preferred_element_type=jnp.float32) * scale
    s = s - jnp.max(s, axis=-1, keepdims=True)
    e = jnp.exp(s)
    p = e * pl.reciprocal(jnp.sum(e, axis=-1, keepdims=True), approx=True)
    ctx = jnp.einsum('hqk,hkd->hqd', p.astype(jnp.bfloat16), vh,
                     preferred_element_type=jnp.float32)            # [B*H, S, dv]

    # concat heads on lanes per batch element, then stack batches on sublanes -> [R, H*dv]
    ctx_rows = [jnp.concatenate([ctx[b * H + h] for h in range(H)], axis=-1)
                for b in range(B)]
    ctx2 = jnp.concatenate(ctx_rows, axis=0)

    attn = jnp.dot(ctx2.astype(jnp.bfloat16), wo_ref[...],
                   preferred_element_type=jnp.float32) + bo_ref[...]

    # residual + BatchNorm (attn)
    y = xcur + attn
    yn = _bn_train(y, g1_ref[...], be1_ref[...], inv_r)

    # GELU FFN + residual + BatchNorm (ffn)
    h1 = jnp.dot(yn.astype(jnp.bfloat16), w1_ref[...],
                 preferred_element_type=jnp.float32) + b1_ref[...]
    h1 = _gelu_tanh(h1)
    f = jnp.dot(h1.astype(jnp.bfloat16), w2_ref[...],
                preferred_element_type=jnp.float32) + b2_ref[...]
    z = yn + f
    zn = _bn_train(z, g2_ref[...], be2_ref[...], inv_r)

    act_ref[...] = zn                                    # carries into the next layer

    @pl.when(l == pl.num_programs(0) - 1)
    def _():
        o_ref[...] = zn


# --------------------------- wrapper ---------------------------

def tst_encoder_forward(x, layer_params, num_heads, dk, dv):
    B, S, D = x.shape
    R = B * S
    L = len(layer_params)
    Hdk, Hdv = num_heads * dk, num_heads * dv
    Dqkv = 2 * Hdk + Hdv
    Dff = layer_params[0]['w1'].shape[1]
    bf = jnp.bfloat16

    # stack per-layer parameters along a leading L axis (pipelined per-layer prefetch)
    WQKV = jnp.stack([jnp.concatenate([p['wq'], p['wk'], p['wv']], axis=1)
                      for p in layer_params]).astype(bf)
    BQKV = jnp.stack([jnp.concatenate([p['bq'], p['bk'], p['bv']], axis=1)
                      for p in layer_params])
    WO = jnp.stack([p['wo'] for p in layer_params]).astype(bf)
    BO = jnp.stack([p['bo'] for p in layer_params])
    G1 = jnp.stack([p['g1'] for p in layer_params])
    BE1 = jnp.stack([p['be1'] for p in layer_params])
    W1 = jnp.stack([p['w1'] for p in layer_params]).astype(bf)
    B1 = jnp.stack([p['b1'] for p in layer_params])
    W2 = jnp.stack([p['w2'] for p in layer_params]).astype(bf)
    B2 = jnp.stack([p['b2'] for p in layer_params])
    G2 = jnp.stack([p['g2'] for p in layer_params])
    BE2 = jnp.stack([p['be2'] for p in layer_params])

    kern = functools.partial(_encoder_kernel, B, S, num_heads, dk, dv)

    def wspec(*shape):
        def imap(l):
            return (l,) + (0,) * len(shape)
        return pl.BlockSpec((None, *shape), imap)

    def full2d(r, c):
        return pl.BlockSpec((r, c), lambda l: (0, 0))

    out2d = pl.pallas_call(
        kern,
        grid=(L,),
        in_specs=[
            full2d(R, D),                                # x (read at layer 0 only)
            wspec(D, Dqkv), wspec(1, Dqkv),              # fused Wq|Wk|Wv, bq|bk|bv
            wspec(Hdv, D), wspec(1, D),                  # Wo, bo
            wspec(1, D), wspec(1, D),                    # BN1 gamma, beta
            wspec(D, Dff), wspec(1, Dff),                # W1, b1
            wspec(Dff, D), wspec(1, D),                  # W2, b2
            wspec(1, D), wspec(1, D),                    # BN2 gamma, beta
        ],
        out_specs=full2d(R, D),
        out_shape=jax.ShapeDtypeStruct((R, D), jnp.float32),
        scratch_shapes=[pltpu.VMEM((R, D), jnp.float32)],   # resident activation
        compiler_params=pltpu.CompilerParams(
            dimension_semantics=("arbitrary",),          # layers are sequential
            vmem_limit_bytes=32 * 1024 * 1024),
    )(x.reshape(R, D), WQKV, BQKV, WO, BO, G1, BE1, W1, B1, W2, B2, G2, BE2)
    return out2d.reshape(B, S, D)


# --------------------------- parameter construction ---------------------------

def init_layer_params(key, D, H, dk, dv, Dff):
    ks = jax.random.split(key, 6)

    def linear(k, fan_in, fan_out):
        # torch nn.Linear default init: U(-1/sqrt(fan_in), 1/sqrt(fan_in))
        bound = 1.0 / (fan_in ** 0.5)
        kw, kb = jax.random.split(k)
        w = jax.random.uniform(kw, (fan_in, fan_out), jnp.float32, -bound, bound)
        b = jax.random.uniform(kb, (1, fan_out), jnp.float32, -bound, bound)
        return w, b

    wq, bq = linear(ks[0], D, H * dk)
    wk, bk = linear(ks[1], D, H * dk)
    wv, bv = linear(ks[2], D, H * dv)
    wo, bo = linear(ks[3], H * dv, D)
    w1, b1 = linear(ks[4], D, Dff)
    w2, b2 = linear(ks[5], Dff, D)
    return dict(
        wq=wq, bq=bq, wk=wk, bk=bk, wv=wv, bv=bv, wo=wo, bo=bo,
        g1=jnp.ones((1, D), jnp.float32), be1=jnp.zeros((1, D), jnp.float32),
        w1=w1, b1=b1, w2=w2, b2=b2,
        g2=jnp.ones((1, D), jnp.float32), be2=jnp.zeros((1, D), jnp.float32),
    )


# --------------------------- pure-JAX reference (f32, exact GELU) ---------------------------

def reference_layer(x, p, H, dk, dv):
    B, S, D = x.shape
    x2 = x.reshape(B * S, D)
    q = (x2 @ p['wq'] + p['bq']).reshape(B, S, H, dk).transpose(0, 2, 1, 3)
    k = (x2 @ p['wk'] + p['bk']).reshape(B, S, H, dk).transpose(0, 2, 1, 3)
    v = (x2 @ p['wv'] + p['bv']).reshape(B, S, H, dv).transpose(0, 2, 1, 3)
    scores = jnp.einsum('bhqd,bhkd->bhqk', q, k, precision='highest') / (dk ** 0.5)
    attn = jax.nn.softmax(scores, axis=-1)
    ctx = jnp.einsum('bhqk,bhkd->bhqd', attn, v, precision='highest')
    ctx = ctx.transpose(0, 2, 1, 3).reshape(B * S, H * dv)
    y = x2 + ctx @ p['wo'] + p['bo']

    def bn(t, g, b):
        m = jnp.mean(t, axis=0, keepdims=True)
        var = jnp.mean((t - m) ** 2, axis=0, keepdims=True)
        return (t - m) / jnp.sqrt(var + BN_EPS) * g + b

    y = bn(y, p['g1'], p['be1'])
    h = jax.nn.gelu(y @ p['w1'] + p['b1'], approximate=False)
    z = y + h @ p['w2'] + p['b2']
    z = bn(z, p['g2'], p['be2'])
    return z.reshape(B, S, D)


def reference_forward(x, layer_params, H, dk, dv):
    out = x
    for p in layer_params:
        out = reference_layer(out, p, H, dk, dv)
    return out


# --------------------------- main ---------------------------

if __name__ == "__main__":
    # lane-dense small shapes: D=128, H*dk=128, Dff=256 (MXU / vst friendly)
    B, S, D = 4, 64, 128          # batch, seq_len, num_hidden
    H = 4                          # num_heads
    dk = dv = D // H               # per-head key/value dims (module defaults) = 32
    Dff = 256                      # num_hidden_ff (TSTEncoderLayer default)
    num_layers = 2

    root = jax.random.PRNGKey(0)
    kx, kp = jax.random.split(root)
    x = jax.random.normal(kx, (B, S, D), jnp.float32)

    layer_keys = jax.random.split(kp, num_layers)
    layer_params = [init_layer_params(k, D, H, dk, dv, Dff) for k in layer_keys]

    fwd = jax.jit(functools.partial(tst_encoder_forward, num_heads=H, dk=dk, dv=dv))
    out = jax.block_until_ready(fwd(x, layer_params))

    ref = jax.block_until_ready(reference_forward(x, layer_params, H, dk, dv))
    max_diff = float(jnp.max(jnp.abs(out - ref)))
    assert out.shape == (B, S, D)
    # tolerance covers bf16 matmul operands (f32 accumulation) + tanh-GELU vs exact erf
    assert max_diff < 5e-2, f"mismatch vs reference: {max_diff}"
    print("KERNEL_OK")
</pallas_src>

<mosaic_0001>
module attributes {stable_mosaic.version = 11 : i64} {
  func.func @_encoder_kernel(%arg0: i32, %arg1: memref<256x128xf32, #tpu.memory_space<vmem>>, %arg2: memref<1x128x384xbf16, #tpu.memory_space<vmem>>, %arg3: memref<1x1x384xf32, #tpu.memory_space<vmem>>, %arg4: memref<1x128x128xbf16, #tpu.memory_space<vmem>>, %arg5: memref<1x1x128xf32, #tpu.memory_space<vmem>>, %arg6: memref<1x1x128xf32, #tpu.memory_space<vmem>>, %arg7: memref<1x1x128xf32, #tpu.memory_space<vmem>>, %arg8: memref<1x128x256xbf16, #tpu.memory_space<vmem>>, %arg9: memref<1x1x256xf32, #tpu.memory_space<vmem>>, %arg10: memref<1x256x128xbf16, #tpu.memory_space<vmem>>, %arg11: memref<1x1x128xf32, #tpu.memory_space<vmem>>, %arg12: memref<1x1x128xf32, #tpu.memory_space<vmem>>, %arg13: memref<1x1x128xf32, #tpu.memory_space<vmem>>, %arg14: memref<256x128xf32, #tpu.memory_space<vmem>>, %arg15: memref<256x128xf32, #tpu.memory_space<vmem>>) attributes {dimension_semantics = [#tpu.dimension_semantics<arbitrary>], iteration_bounds = array<i64: 2>, scalar_prefetch = 0 : i64, scratch_operands = 1 : i64, tpu.core_type = #tpu.core_type<tc>, window_params = [{pipeline_mode = #tpu.pipeline_mode<synchronous>, transform_indices = @transform_0, window_bounds = array<i64: 256, 128>}, {transform_indices = @transform_1, window_bounds = array<i64: 1, 128, 384>}, {transform_indices = @transform_2, window_bounds = array<i64: 1, 1, 384>}, {transform_indices = @transform_3, window_bounds = array<i64: 1, 128, 128>}, {transform_indices = @transform_4, window_bounds = array<i64: 1, 1, 128>}, {transform_indices = @transform_5, window_bounds = array<i64: 1, 1, 128>}, {transform_indices = @transform_6, window_bounds = array<i64: 1, 1, 128>}, {transform_indices = @transform_7, window_bounds = array<i64: 1, 128, 256>}, {transform_indices = @transform_8, window_bounds = array<i64: 1, 1, 256>}, {transform_indices = @transform_9, window_bounds = array<i64: 1, 256, 128>}, {transform_indices = @transform_10, window_bounds = array<i64: 1, 1, 128>}, {transform_indices = @transform_11, window_bounds = array<i64: 1, 1, 128>}, {transform_indices = @transform_12, window_bounds = array<i64: 1, 1, 128>}, {pipeline_mode = #tpu.pipeline_mode<synchronous>, transform_indices = @transform_13, window_bounds = array<i64: 256, 128>}]} {
    %c0_i32 = arith.constant 0 : i32
    %0 = arith.cmpi eq, %arg0, %c0_i32 : i32
    %1 = arith.extui %0 : i1 to i32
    %c0_i32_0 = arith.constant 0 : i32
    %2 = arith.cmpi ne, %1, %c0_i32_0 : i32
    scf.if %2 {
      %c0_65 = arith.constant 0 : index
      %c0_66 = arith.constant 0 : index
      %261 = vector.load %arg1[%c0_65, %c0_66] : memref<256x128xf32, #tpu.memory_space<vmem>>, vector<256x128xf32>
      %c0_67 = arith.constant 0 : index
      %c0_68 = arith.constant 0 : index
      %262 = vector.load %arg15[%c0_67, %c0_68] : memref<256x128xf32, #tpu.memory_space<vmem>>, vector<256x128xf32>
      tpu.vector_store %arg15[%c0_67, %c0_68], %261 {strides = array<i32>} : memref<256x128xf32, #tpu.memory_space<vmem>>, vector<256x128xf32>,
    } else {
    }
    %c0 = arith.constant 0 : index
    %c0_1 = arith.constant 0 : index
    %3 = vector.load %arg15[%c0, %c0_1] : memref<256x128xf32, #tpu.memory_space<vmem>>, vector<256x128xf32>
    %4 = arith.truncf %3 : vector<256x128xf32> to vector<256x128xbf16>
    %c0_2 = arith.constant 0 : index
    %c0_3 = arith.constant 0 : index
    %c0_4 = arith.constant 0 : index
    %5 = vector.load %arg2[%c0_2, %c0_3, %c0_4] : memref<1x128x384xbf16, #tpu.memory_space<vmem>>, vector<1x128x384xbf16>
    %6 = vector.shape_cast %5 : vector<1x128x384xbf16> to vector<128x384xbf16>
    %cst = arith.constant dense<0.000000e+00> : vector<256x384xf32>
    %7 = tpu.matmul %4, %6, %cst {dimension_numbers = #tpu.dot_dimension_numbers<[1], [0], [0], [1], [0, 0, 1, 1], [], []>} : vector<256x128xbf16>, vector<128x384xbf16>, vector<256x384xf32> -> vector<256x384xf32>
    %c0_5 = arith.constant 0 : index
    %c0_6 = arith.constant 0 : index
    %c0_7 = arith.constant 0 : index
    %8 = vector.load %arg3[%c0_5, %c0_6, %c0_7] : memref<1x1x384xf32, #tpu.memory_space<vmem>>, vector<1x1x384xf32>
    %9 = vector.shape_cast %8 : vector<1x1x384xf32> to vector<1x384xf32>
    %10 = vector.broadcast %9 : vector<1x384xf32> to vector<256x384xf32>
    %11 = arith.addf %7, %10 : vector<256x384xf32>
    %12 = arith.truncf %11 : vector<256x384xf32> to vector<256x384xbf16>
    %13 = vector.extract_strided_slice %12 {offsets = [0, 0], sizes = [64, 32], strides = [1, 1]} : vector<256x384xbf16> to vector<64x32xbf16>
    %14 = vector.extract_strided_slice %12 {offsets = [0, 32], sizes = [64, 32], strides = [1, 1]} : vector<256x384xbf16> to vector<64x32xbf16>
    %15 = vector.extract_strided_slice %12 {offsets = [0, 64], sizes = [64, 32], strides = [1, 1]} : vector<256x384xbf16> to vector<64x32xbf16>
    %16 = vector.extract_strided_slice %12 {offsets = [0, 96], sizes = [64, 32], strides = [1, 1]} : vector<256x384xbf16> to vector<64x32xbf16>
    %17 = vector.extract_strided_slice %12 {offsets = [64, 0], sizes = [64, 32], strides = [1, 1]} : vector<256x384xbf16> to vector<64x32xbf16>
    %18 = vector.extract_strided_slice %12 {offsets = [64, 32], sizes = [64, 32], strides = [1, 1]} : vector<256x384xbf16> to vector<64x32xbf16>
    %19 = vector.extract_strided_slice %12 {offsets = [64, 64], sizes = [64, 32], strides = [1, 1]} : vector<256x384xbf16> to vector<64x32xbf16>
    %20 = vector.extract_strided_slice %12 {offsets = [64, 96], sizes = [64, 32], strides = [1, 1]} : vector<256x384xbf16> to vector<64x32xbf16>
    %21 = vector.extract_strided_slice %12 {offsets = [128, 0], sizes = [64, 32], strides = [1, 1]} : vector<256x384xbf16> to vector<64x32xbf16>
    %22 = vector.extract_strided_slice %12 {offsets = [128, 32], sizes = [64, 32], strides = [1, 1]} : vector<256x384xbf16> to vector<64x32xbf16>
    %23 = vector.extract_strided_slice %12 {offsets = [128, 64], sizes = [64, 32], strides = [1, 1]} : vector<256x384xbf16> to vector<64x32xbf16>
    %24 = vector.extract_strided_slice %12 {offsets = [128, 96], sizes = [64, 32], strides = [1, 1]} : vector<256x384xbf16> to vector<64x32xbf16>
    %25 = vector.extract_strided_slice %12 {offsets = [192, 0], sizes = [64, 32], strides = [1, 1]} : vector<256x384xbf16> to vector<64x32xbf16>
    %26 = vector.extract_strided_slice %12 {offsets = [192, 32], sizes = [64, 32], strides = [1, 1]} : vector<256x384xbf16> to vector<64x32xbf16>
    %27 = vector.extract_strided_slice %12 {offsets = [192, 64], sizes = [64, 32], strides = [1, 1]} : vector<256x384xbf16> to vector<64x32xbf16>
    %28 = vector.extract_strided_slice %12 {offsets = [192, 96], sizes = [64, 32], strides = [1, 1]} : vector<256x384xbf16> to vector<64x32xbf16>
    %29 = vector.shape_cast %13 : vector<64x32xbf16> to vector<1x64x32xbf16>
    %30 = vector.shape_cast %14 : vector<64x32xbf16> to vector<1x64x32xbf16>
    %31 = vector.shape_cast %15 : vector<64x32xbf16> to vector<1x64x32xbf16>
    %32 = vector.shape_cast %16 : vector<64x32xbf16> to vector<1x64x32xbf16>
    %33 = vector.shape_cast %17 : vector<64x32xbf16> to vector<1x64x32xbf16>
    %34 = vector.shape_cast %18 : vector<64x32xbf16> to vector<1x64x32xbf16>
    %35 = vector.shape_cast %19 : vector<64x32xbf16> to vector<1x64x32xbf16>
    %36 = vector.shape_cast %20 : vector<64x32xbf16> to vector<1x64x32xbf16>
    %37 = vector.shape_cast %21 : vector<64x32xbf16> to vector<1x64x32xbf16>
    %38 = vector.shape_cast %22 : vector<64x32xbf16> to vector<1x64x32xbf16>
    %39 = vector.shape_cast %23 : vector<64x32xbf16> to vector<1x64x32xbf16>
    %40 = vector.shape_cast %24 : vector<64x32xbf16> to vector<1x64x32xbf16>
    %41 = vector.shape_cast %25 : vector<64x32xbf16> to vector<1x64x32xbf16>
    %42 = vector.shape_cast %26 : vector<64x32xbf16> to vector<1x64x32xbf16>
    %43 = vector.shape_cast %27 : vector<64x32xbf16> to vector<1x64x32xbf16>
    %44 = vector.shape_cast %28 : vector<64x32xbf16> to vector<1x64x32xbf16>
    %45 = tpu.concatenate %29, %30, %31, %32, %33, %34, %35, %36, %37, %38, %39, %40, %41, %42, %43, %44 in 0 : vector<1x64x32xbf16>, vector<1x64x32xbf16>, vector<1x64x32xbf16>, vector<1x64x32xbf16>, vector<1x64x32xbf16>, vector<1x64x32xbf16>, vector<1x64x32xbf16>, vector<1x64x32xbf16>, vector<1x64x32xbf16>, vector<1x64x32xbf16>, vector<1x64x32xbf16>, vector<1x64x32xbf16>, vector<1x64x32xbf16>, vector<1x64x32xbf16>, vector<1x64x32xbf16>, vector<1x64x32xbf16> -> vector<16x64x32xbf16>
    %46 = vector.extract_strided_slice %12 {offsets = [0, 128], sizes = [64, 32], strides = [1, 1]} : vector<256x384xbf16> to vector<64x32xbf16>
    %47 = vector.extract_strided_slice %12 {offsets = [0, 160], sizes = [64, 32], strides = [1, 1]} : vector<256x384xbf16> to vector<64x32xbf16>
    %48 = vector.extract_strided_slice %12 {offsets = [0, 192], sizes = [64, 32], strides = [1, 1]} : vector<256x384xbf16> to vector<64x32xbf16>
    %49 = vector.extract_strided_slice %12 {offsets = [0, 224], sizes = [64, 32], strides = [1, 1]} : vector<256x384xbf16> to vector<64x32xbf16>
    %50 = vector.extract_strided_slice %12 {offsets = [64, 128], sizes = [64, 32], strides = [1, 1]} : vector<256x384xbf16> to vector<64x32xbf16>
    %51 = vector.extract_strided_slice %12 {offsets = [64, 160], sizes = [64, 32], strides = [1, 1]} : vector<256x384xbf16> to vector<64x32xbf16>
    %52 = vector.extract_strided_slice %12 {offsets = [64, 192], sizes = [64, 32], strides = [1, 1]} : vector<256x384xbf16> to vector<64x32xbf16>
    %53 = vector.extract_strided_slice %12 {offsets = [64, 224], sizes = [64, 32], strides = [1, 1]} : vector<256x384xbf16> to vector<64x32xbf16>
    %54 = vector.extract_strided_slice %12 {offsets = [128, 128], sizes = [64, 32], strides = [1, 1]} : vector<256x384xbf16> to vector<64x32xbf16>
    %55 = vector.extract_strided_slice %12 {offsets = [128, 160], sizes = [64, 32], strides = [1, 1]} : vector<256x384xbf16> to vector<64x32xbf16>
    %56 = vector.extract_strided_slice %12 {offsets = [128, 192], sizes = [64, 32], strides = [1, 1]} : vector<256x384xbf16> to vector<64x32xbf16>
    %57 = vector.extract_strided_slice %12 {offsets = [128, 224], sizes = [64, 32], strides = [1, 1]} : vector<256x384xbf16> to vector<64x32xbf16>
    %58 = vector.extract_strided_slice %12 {offsets = [192, 128], sizes = [64, 32], strides = [1, 1]} : vector<256x384xbf16> to vector<64x32xbf16>
    %59 = vector.extract_strided_slice %12 {offsets = [192, 160], sizes = [64, 32], strides = [1, 1]} : vector<256x384xbf16> to vector<64x32xbf16>
    %60 = vector.extract_strided_slice %12 {offsets = [192, 192], sizes = [64, 32], strides = [1, 1]} : vector<256x384xbf16> to vector<64x32xbf16>
    %61 = vector.extract_strided_slice %12 {offsets = [192, 224], sizes = [64, 32], strides = [1, 1]} : vector<256x384xbf16> to vector<64x32xbf16>
    %62 = vector.shape_cast %46 : vector<64x32xbf16> to vector<1x64x32xbf16>
    %63 = vector.shape_cast %47 : vector<64x32xbf16> to vector<1x64x32xbf16>
    %64 = vector.shape_cast %48 : vector<64x32xbf16> to vector<1x64x32xbf16>
    %65 = vector.shape_cast %49 : vector<64x32xbf16> to vector<1x64x32xbf16>
    %66 = vector.shape_cast %50 : vector<64x32xbf16> to vector<1x64x32xbf16>
    %67 = vector.shape_cast %51 : vector<64x32xbf16> to vector<1x64x32xbf16>
    %68 = vector.shape_cast %52 : vector<64x32xbf16> to vector<1x64x32xbf16>
    %69 = vector.shape_cast %53 : vector<64x32xbf16> to vector<1x64x32xbf16>
    %70 = vector.shape_cast %54 : vector<64x32xbf16> to vector<1x64x32xbf16>
    %71 = vector.shape_cast %55 : vector<64x32xbf16> to vector<1x64x32xbf16>
    %72 = vector.shape_cast %56 : vector<64x32xbf16> to vector<1x64x32xbf16>
    %73 = vector.shape_cast %57 : vector<64x32xbf16> to vector<1x64x32xbf16>
    %74 = vector.shape_cast %58 : vector<64x32xbf16> to vector<1x64x32xbf16>
    %75 = vector.shape_cast %59 : vector<64x32xbf16> to vector<1x64x32xbf16>
    %76 = vector.shape_cast %60 : vector<64x32xbf16> to vector<1x64x32xbf16>
    %77 = vector.shape_cast %61 : vector<64x32xbf16> to vector<1x64x32xbf16>
    %78 = tpu.concatenate %62, %63, %64, %65, %66, %67, %68, %69, %70, %71, %72, %73, %74, %75, %76, %77 in 0 : vector<1x64x32xbf16>, vector<1x64x32xbf16>, vector<1x64x32xbf16>, vector<1x64x32xbf16>, vector<1x64x32xbf16>, vector<1x64x32xbf16>, vector<1x64x32xbf16>, vector<1x64x32xbf16>, vector<1x64x32xbf16>, vector<1x64x32xbf16>, vector<1x64x32xbf16>, vector<1x64x32xbf16>, vector<1x64x32xbf16>, vector<1x64x32xbf16>, vector<1x64x32xbf16>, vector<1x64x32xbf16> -> vector<16x64x32xbf16>
    %79 = vector.extract_strided_slice %12 {offsets = [0, 256], sizes = [64, 32], strides = [1, 1]} : vector<256x384xbf16> to vector<64x32xbf16>
    %80 = vector.extract_strided_slice %12 {offsets = [0, 288], sizes = [64, 32], strides = [1, 1]} : vector<256x384xbf16> to vector<64x32xbf16>
    %81 = vector.extract_strided_slice %12 {offsets = [0, 320], sizes = [64, 32], strides = [1, 1]} : vector<256x384xbf16> to vector<64x32xbf16>
    %82 = vector.extract_strided_slice %12 {offsets = [0, 352], sizes = [64, 32], strides = [1, 1]} : vector<256x384xbf16> to vector<64x32xbf16>
    %83 = vector.extract_strided_slice %12 {offsets = [64, 256], sizes = [64, 32], strides = [1, 1]} : vector<256x384xbf16> to vector<64x32xbf16>
    %84 = vector.extract_strided_slice %12 {offsets = [64, 288], sizes = [64, 32], strides = [1, 1]} : vector<256x384xbf16> to vector<64x32xbf16>
    %85 = vector.extract_strided_slice %12 {offsets = [64, 320], sizes = [64, 32], strides = [1, 1]} : vector<256x384xbf16> to vector<64x32xbf16>
    %86 = vector.extract_strided_slice %12 {offsets = [64, 352], sizes = [64, 32], strides = [1, 1]} : vector<256x384xbf16> to vector<64x32xbf16>
    %87 = vector.extract_strided_slice %12 {offsets = [128, 256], sizes = [64, 32], strides = [1, 1]} : vector<256x384xbf16> to vector<64x32xbf16>
    %88 = vector.extract_strided_slice %12 {offsets = [128, 288], sizes = [64, 32], strides = [1, 1]} : vector<256x384xbf16> to vector<64x32xbf16>
    %89 = vector.extract_strided_slice %12 {offsets = [128, 320], sizes = [64, 32], strides = [1, 1]} : vector<256x384xbf16> to vector<64x32xbf16>
    %90 = vector.extract_strided_slice %12 {offsets = [128, 352], sizes = [64, 32], strides = [1, 1]} : vector<256x384xbf16> to vector<64x32xbf16>
    %91 = vector.extract_strided_slice %12 {offsets = [192, 256], sizes = [64, 32], strides = [1, 1]} : vector<256x384xbf16> to vector<64x32xbf16>
    %92 = vector.extract_strided_slice %12 {offsets = [192, 288], sizes = [64, 32], strides = [1, 1]} : vector<256x384xbf16> to vector<64x32xbf16>
    %93 = vector.extract_strided_slice %12 {offsets = [192, 320], sizes = [64, 32], strides = [1, 1]} : vector<256x384xbf16> to vector<64x32xbf16>
    %94 = vector.extract_strided_slice %12 {offsets = [192, 352], sizes = [64, 32], strides = [1, 1]} : vector<256x384xbf16> to vector<64x32xbf16>
    %95 = vector.shape_cast %79 : vector<64x32xbf16> to vector<1x64x32xbf16>
    %96 = vector.shape_cast %80 : vector<64x32xbf16> to vector<1x64x32xbf16>
    %97 = vector.shape_cast %81 : vector<64x32xbf16> to vector<1x64x32xbf16>
    %98 = vector.shape_cast %82 : vector<64x32xbf16> to vector<1x64x32xbf16>
    %99 = vector.shape_cast %83 : vector<64x32xbf16> to vector<1x64x32xbf16>
    %100 = vector.shape_cast %84 : vector<64x32xbf16> to vector<1x64x32xbf16>
    %101 = vector.shape_cast %85 : vector<64x32xbf16> to vector<1x64x32xbf16>
    %102 = vector.shape_cast %86 : vector<64x32xbf16> to vector<1x64x32xbf16>
    %103 = vector.shape_cast %87 : vector<64x32xbf16> to vector<1x64x32xbf16>
    %104 = vector.shape_cast %88 : vector<64x32xbf16> to vector<1x64x32xbf16>
    %105 = vector.shape_cast %89 : vector<64x32xbf16> to vector<1x64x32xbf16>
    %106 = vector.shape_cast %90 : vector<64x32xbf16> to vector<1x64x32xbf16>
    %107 = vector.shape_cast %91 : vector<64x32xbf16> to vector<1x64x32xbf16>
    %108 = vector.shape_cast %92 : vector<64x32xbf16> to vector<1x64x32xbf16>
    %109 = vector.shape_cast %93 : vector<64x32xbf16> to vector<1x64x32xbf16>
    %110 = vector.shape_cast %94 : vector<64x32xbf16> to vector<1x64x32xbf16>
    %111 = tpu.concatenate %95, %96, %97, %98, %99, %100, %101, %102, %103, %104, %105, %106, %107, %108, %109, %110 in 0 : vector<1x64x32xbf16>, vector<1x64x32xbf16>, vector<1x64x32xbf16>, vector<1x64x32xbf16>, vector<1x64x32xbf16>, vector<1x64x32xbf16>, vector<1x64x32xbf16>, vector<1x64x32xbf16>, vector<1x64x32xbf16>, vector<1x64x32xbf16>, vector<1x64x32xbf16>, vector<1x64x32xbf16>, vector<1x64x32xbf16>, vector<1x64x32xbf16>, vector<1x64x32xbf16>, vector<1x64x32xbf16> -> vector<16x64x32xbf16>
    "tpu.trace_start"() <{level = 10 : i32, message = "hqd,hkd->hqk"}> : () -> ()
    %cst_8 = arith.constant dense<0.000000e+00> : vector<16x64x64xf32>
    %112 = tpu.matmul %45, %78, %cst_8 {dimension_numbers = #tpu.dot_dimension_numbers<[2], [2], [1], [1], [0, 0, 0, 1, 1, 1], [0], [0]>} : vector<16x64x32xbf16>, vector<16x64x32xbf16>, vector<16x64x64xf32> -> vector<16x64x64xf32>
    "tpu.trace_stop"() : () -> ()
    %cst_9 = arith.constant 0.176776692 : f32
    %113 = vector.broadcast %cst_9 : f32 to vector<16x64x64xf32>
    %114 = arith.mulf %112, %113 : vector<16x64x64xf32>
    %cst_10 = arith.constant dense<0xFF800000> : vector<16x64xf32>
    %115 = vector.multi_reduction <maximumf>, %114, %cst_10 [2] : vector<16x64x64xf32> to vector<16x64xf32>
    %116 = vector.shape_cast %115 : vector<16x64xf32> to vector<16x64x1xf32>
    %117 = vector.broadcast %116 : vector<16x64x1xf32> to vector<16x64x64xf32>
    %118 = arith.subf %114, %117 : vector<16x64x64xf32>
    %119 = math.exp %118 : vector<16x64x64xf32>
    %cst_11 = arith.constant dense<0.000000e+00> : vector<16x64xf32>
    %120 = vector.multi_reduction <add>, %119, %cst_11 [2] : vector<16x64x64xf32> to vector<16x64xf32>
    %121 = vector.shape_cast %120 : vector<16x64xf32> to vector<16x64x1xf32>
    %122 = tpu.reciprocal %121 {approx = true} : vector<16x64x1xf32> -> vector<16x64x1xf32>
    %123 = vector.broadcast %122 : vector<16x64x1xf32> to vector<16x64x64xf32>
    %124 = arith.mulf %119, %123 : vector<16x64x64xf32>
    %125 = arith.truncf %124 : vector<16x64x64xf32> to vector<16x64x64xbf16>
    "tpu.trace_start"() <{level = 10 : i32, message = "hqk,hkd->hqd"}> : () -> ()
    %cst_12 = arith.constant dense<0.000000e+00> : vector<16x64x32xf32>
    %126 = tpu.matmul %125, %111, %cst_12 {dimension_numbers = #tpu.dot_dimension_numbers<[2], [1], [1], [2], [0, 0, 0, 1, 1, 2], [0], [0]>} : vector<16x64x64xbf16>, vector<16x64x32xbf16>, vector<16x64x32xf32> -> vector<16x64x32xf32>
    "tpu.trace_stop"() : () -> ()
    %127 = vector.extract_strided_slice %126 {offsets = [0, 0, 0], sizes = [1, 64, 32], strides = [1, 1, 1]} : vector<16x64x32xf32> to vector<1x64x32xf32>
    %128 = vector.shape_cast %127 : vector<1x64x32xf32> to vector<64x32xf32>
    %129 = vector.extract_strided_slice %126 {offsets = [1, 0, 0], sizes = [1, 64, 32], strides = [1, 1, 1]} : vector<16x64x32xf32> to vector<1x64x32xf32>
    %130 = vector.shape_cast %129 : vector<1x64x32xf32> to vector<64x32xf32>
    %131 = vector.extract_strided_slice %126 {offsets = [2, 0, 0], sizes = [1, 64, 32], strides = [1, 1, 1]} : vector<16x64x32xf32> to vector<1x64x32xf32>
    %132 = vector.shape_cast %131 : vector<1x64x32xf32> to vector<64x32xf32>
    %133 = vector.extract_strided_slice %126 {offsets = [3, 0, 0], sizes = [1, 64, 32], strides = [1, 1, 1]} : vector<16x64x32xf32> to vector<1x64x32xf32>
    %134 = vector.shape_cast %133 : vector<1x64x32xf32> to vector<64x32xf32>
    %135 = tpu.concatenate %128, %130, %132, %134 in 1 : vector<64x32xf32>, vector<64x32xf32>, vector<64x32xf32>, vector<64x32xf32> -> vector<64x128xf32>
    %136 = vector.extract_strided_slice %126 {offsets = [4, 0, 0], sizes = [1, 64, 32], strides = [1, 1, 1]} : vector<16x64x32xf32> to vector<1x64x32xf32>
    %137 = vector.shape_cast %136 : vector<1x64x32xf32> to vector<64x32xf32>
    %138 = vector.extract_strided_slice %126 {offsets = [5, 0, 0], sizes = [1, 64, 32], strides = [1, 1, 1]} : vector<16x64x32xf32> to vector<1x64x32xf32>
    %139 = vector.shape_cast %138 : vector<1x64x32xf32> to vector<64x32xf32>
    %140 = vector.extract_strided_slice %126 {offsets = [6, 0, 0], sizes = [1, 64, 32], strides = [1, 1, 1]} : vector<16x64x32xf32> to vector<1x64x32xf32>
    %141 = vector.shape_cast %140 : vector<1x64x32xf32> to vector<64x32xf32>
    %142 = vector.extract_strided_slice %126 {offsets = [7, 0, 0], sizes = [1, 64, 32], strides = [1, 1, 1]} : vector<16x64x32xf32> to vector<1x64x32xf32>
    %143 = vector.shape_cast %142 : vector<1x64x32xf32> to vector<64x32xf32>
    %144 = tpu.concatenate %137, %139, %141, %143 in 1 : vector<64x32xf32>, vector<64x32xf32>, vector<64x32xf32>, vector<64x32xf32> -> vector<64x128xf32>
    %145 = vector.extract_strided_slice %126 {offsets = [8, 0, 0], sizes = [1, 64, 32], strides = [1, 1, 1]} : vector<16x64x32xf32> to vector<1x64x32xf32>
    %146 = vector.shape_cast %145 : vector<1x64x32xf32> to vector<64x32xf32>
    %147 = vector.extract_strided_slice %126 {offsets = [9, 0, 0], sizes = [1, 64, 32], strides = [1, 1, 1]} : vector<16x64x32xf32> to vector<1x64x32xf32>
    %148 = vector.shape_cast %147 : vector<1x64x32xf32> to vector<64x32xf32>
    %149 = vector.extract_strided_slice %126 {offsets = [10, 0, 0], sizes = [1, 64, 32], strides = [1, 1, 1]} : vector<16x64x32xf32> to vector<1x64x32xf32>
    %150 = vector.shape_cast %149 : vector<1x64x32xf32> to vector<64x32xf32>
    %151 = vector.extract_strided_slice %126 {offsets = [11, 0, 0], sizes = [1, 64, 32], strides = [1, 1, 1]} : vector<16x64x32xf32> to vector<1x64x32xf32>
    %152 = vector.shape_cast %151 : vector<1x64x32xf32> to vector<64x32xf32>
    %153 = tpu.concatenate %146, %148, %150, %152 in 1 : vector<64x32xf32>, vector<64x32xf32>, vector<64x32xf32>, vector<64x32xf32> -> vector<64x128xf32>
    %154 = vector.extract_strided_slice %126 {offsets = [12, 0, 0], sizes = [1, 64, 32], strides = [1, 1, 1]} : vector<16x64x32xf32> to vector<1x64x32xf32>
    %155 = vector.shape_cast %154 : vector<1x64x32xf32> to vector<64x32xf32>
    %156 = vector.extract_strided_slice %126 {offsets = [13, 0, 0], sizes = [1, 64, 32], strides = [1, 1, 1]} : vector<16x64x32xf32> to vector<1x64x32xf32>
    %157 = vector.shape_cast %156 : vector<1x64x32xf32> to vector<64x32xf32>
    %158 = vector.extract_strided_slice %126 {offsets = [14, 0, 0], sizes = [1, 64, 32], strides = [1, 1, 1]} : vector<16x64x32xf32> to vector<1x64x32xf32>
    %159 = vector.shape_cast %158 : vector<1x64x32xf32> to vector<64x32xf32>
    %160 = vector.extract_strided_slice %126 {offsets = [15, 0, 0], sizes = [1, 64, 32], strides = [1, 1, 1]} : vector<16x64x32xf32> to vector<1x64x32xf32>
    %161 = vector.shape_cast %160 : vector<1x64x32xf32> to vector<64x32xf32>
    %162 = tpu.concatenate %155, %157, %159, %161 in 1 : vector<64x32xf32>, vector<64x32xf32>, vector<64x32xf32>, vector<64x32xf32> -> vector<64x128xf32>
    %163 = tpu.concatenate %135, %144, %153, %162 in 0 : vector<64x128xf32>, vector<64x128xf32>, vector<64x128xf32>, vector<64x128xf32> -> vector<256x128xf32>
    %164 = arith.truncf %163 : vector<256x128xf32> to vector<256x128xbf16>
    %c0_13 = arith.constant 0 : index
    %c0_14 = arith.constant 0 : index
    %c0_15 = arith.constant 0 : index
    %165 = vector.load %arg4[%c0_13, %c0_14, %c0_15] : memref<1x128x128xbf16, #tpu.memory_space<vmem>>, vector<1x128x128xbf16>
    %166 = vector.shape_cast %165 : vector<1x128x128xbf16> to vector<128x128xbf16>
    %cst_16 = arith.constant dense<0.000000e+00> : vector<256x128xf32>
    %167 = tpu.matmul %164, %166, %cst_16 {dimension_numbers = #tpu.dot_dimension_numbers<[1], [0], [0], [1], [0, 0, 1, 1], [], []>} : vector<256x128xbf16>, vector<128x128xbf16>, vector<256x128xf32> -> vector<256x128xf32>
    %c0_17 = arith.constant 0 : index
    %c0_18 = arith.constant 0 : index
    %c0_19 = arith.constant 0 : index
    %168 = vector.load %arg5[%c0_17, %c0_18, %c0_19] : memref<1x1x128xf32, #tpu.memory_space<vmem>>, vector<1x1x128xf32>
    %169 = vector.shape_cast %168 : vector<1x1x128xf32> to vector<1x128xf32>
    %170 = vector.broadcast %169 : vector<1x128xf32> to vector<256x128xf32>
    %171 = arith.addf %167, %170 : vector<256x128xf32>
    %172 = arith.addf %3, %171 : vector<256x128xf32>
    %c0_20 = arith.constant 0 : index
    %c0_21 = arith.constant 0 : index
    %c0_22 = arith.constant 0 : index
    %173 = vector.load %arg6[%c0_20, %c0_21, %c0_22] : memref<1x1x128xf32, #tpu.memory_space<vmem>>, vector<1x1x128xf32>
    %174 = vector.shape_cast %173 : vector<1x1x128xf32> to vector<1x128xf32>
    %c0_23 = arith.constant 0 : index
    %c0_24 = arith.constant 0 : index
    %c0_25 = arith.constant 0 : index
    %175 = vector.load %arg7[%c0_23, %c0_24, %c0_25] : memref<1x1x128xf32, #tpu.memory_space<vmem>>, vector<1x1x128xf32>
    %176 = vector.shape_cast %175 : vector<1x1x128xf32> to vector<1x128xf32>
    %cst_26 = arith.constant dense<0.000000e+00> : vector<128xf32>
    %177 = vector.multi_reduction <add>, %172, %cst_26 [0] : vector<256x128xf32> to vector<128xf32>
    %178 = vector.shape_cast %177 : vector<128xf32> to vector<1x128xf32>
    %cst_27 = arith.constant 3.906250e-03 : f32
    %179 = vector.broadcast %cst_27 : f32 to vector<1x128xf32>
    %180 = arith.mulf %178, %179 : vector<1x128xf32>
    %181 = arith.mulf %172, %172 : vector<256x128xf32>
    %cst_28 = arith.constant dense<0.000000e+00> : vector<128xf32>
    %182 = vector.multi_reduction <add>, %181, %cst_28 [0] : vector<256x128xf32> to vector<128xf32>
    %183 = vector.shape_cast %182 : vector<128xf32> to vector<1x128xf32>
    %cst_29 = arith.constant 3.906250e-03 : f32
    %184 = vector.broadcast %cst_29 : f32 to vector<1x128xf32>
    %185 = arith.mulf %183, %184 : vector<1x128xf32>
    %186 = arith.mulf %180, %180 : vector<1x128xf32>
    %187 = arith.subf %185, %186 : vector<1x128xf32>
    %cst_30 = arith.constant 0.000000e+00 : f32
    %188 = vector.broadcast %cst_30 : f32 to vector<1x128xf32>
    %189 = arith.maximumf %187, %188 : vector<1x128xf32>
    %cst_31 = arith.constant 9.99999974E-6 : f32
    %190 = vector.broadcast %cst_31 : f32 to vector<1x128xf32>
    %191 = arith.addf %189, %190 : vector<1x128xf32>
    %192 = math.rsqrt %191 : vector<1x128xf32>
    %193 = arith.mulf %174, %192 : vector<1x128xf32>
    %194 = vector.broadcast %193 : vector<1x128xf32> to vector<256x128xf32>
    %195 = arith.mulf %172, %194 : vector<256x128xf32>
    %196 = arith.mulf %180, %193 : vector<1x128xf32>
    %197 = arith.subf %176, %196 : vector<1x128xf32>
    %198 = vector.broadcast %197 : vector<1x128xf32> to vector<256x128xf32>
    %199 = arith.addf %195, %198 : vector<256x128xf32>
    %200 = arith.truncf %199 : vector<256x128xf32> to vector<256x128xbf16>
    %c0_32 = arith.constant 0 : index
    %c0_33 = arith.constant 0 : index
    %c0_34 = arith.constant 0 : index
    %201 = vector.load %arg8[%c0_32, %c0_33, %c0_34] : memref<1x128x256xbf16, #tpu.memory_space<vmem>>, vector<1x128x256xbf16>
    %202 = vector.shape_cast %201 : vector<1x128x256xbf16> to vector<128x256xbf16>
    %cst_35 = arith.constant dense<0.000000e+00> : vector<256x256xf32>
    %203 = tpu.matmul %200, %202, %cst_35 {dimension_numbers = #tpu.dot_dimension_numbers<[1], [0], [0], [1], [0, 0, 1, 1], [], []>} : vector<256x128xbf16>, vector<128x256xbf16>, vector<256x256xf32> -> vector<256x256xf32>
    %c0_36 = arith.constant 0 : index
    %c0_37 = arith.constant 0 : index
    %c0_38 = arith.constant 0 : index
    %204 = vector.load %arg9[%c0_36, %c0_37, %c0_38] : memref<1x1x256xf32, #tpu.memory_space<vmem>>, vector<1x1x256xf32>
    %205 = vector.shape_cast %204 : vector<1x1x256xf32> to vector<1x256xf32>
    %206 = vector.broadcast %205 : vector<1x256xf32> to vector<256x256xf32>
    %207 = arith.addf %203, %206 : vector<256x256xf32>
    %cst_39 = arith.constant 5.000000e-01 : f32
    %208 = vector.broadcast %cst_39 : f32 to vector<256x256xf32>
    %209 = arith.mulf %208, %207 : vector<256x256xf32>
    %cst_40 = arith.constant 4.471500e-02 : f32
    %210 = vector.broadcast %cst_40 : f32 to vector<256x256xf32>
    %211 = arith.mulf %210, %207 : vector<256x256xf32>
    %212 = arith.mulf %211, %207 : vector<256x256xf32>
    %213 = arith.mulf %212, %207 : vector<256x256xf32>
    %214 = arith.addf %207, %213 : vector<256x256xf32>
    %cst_41 = arith.constant 0.797884583 : f32
    %215 = vector.broadcast %cst_41 : f32 to vector<256x256xf32>
    %216 = arith.mulf %215, %214 : vector<256x256xf32>
    %217 = math.tanh %216 : vector<256x256xf32>
    %cst_42 = arith.constant 1.000000e+00 : f32
    %218 = vector.broadcast %cst_42 : f32 to vector<256x256xf32>
    %219 = arith.addf %218, %217 : vector<256x256xf32>
    %220 = arith.mulf %209, %219 : vector<256x256xf32>
    %221 = arith.truncf %220 : vector<256x256xf32> to vector<256x256xbf16>
    %c0_43 = arith.constant 0 : index
    %c0_44 = arith.constant 0 : index
    %c0_45 = arith.constant 0 : index
    %222 = vector.load %arg10[%c0_43, %c0_44, %c0_45] : memref<1x256x128xbf16, #tpu.memory_space<vmem>>, vector<1x256x128xbf16>
    %223 = vector.shape_cast %222 : vector<1x256x128xbf16> to vector<256x128xbf16>
    %cst_46 = arith.constant dense<0.000000e+00> : vector<256x128xf32>
    %224 = tpu.matmul %221, %223, %cst_46 {dimension_numbers = #tpu.dot_dimension_numbers<[1], [0], [0], [1], [0, 0, 1, 1], [], []>} : vector<256x256xbf16>, vector<256x128xbf16>, vector<256x128xf32> -> vector<256x128xf32>
    %c0_47 = arith.constant 0 : index
    %c0_48 = arith.constant 0 : index
    %c0_49 = arith.constant 0 : index
    %225 = vector.load %arg11[%c0_47, %c0_48, %c0_49] : memref<1x1x128xf32, #tpu.memory_space<vmem>>, vector<1x1x128xf32>
    %226 = vector.shape_cast %225 : vector<1x1x128xf32> to vector<1x128xf32>
    %227 = vector.broadcast %226 : vector<1x128xf32> to vector<256x128xf32>
    %228 = arith.addf %224, %227 : vector<256x128xf32>
    %229 = arith.addf %199, %228 : vector<256x128xf32>
    %c0_50 = arith.constant 0 : index
    %c0_51 = arith.constant 0 : index
    %c0_52 = arith.constant 0 : index
    %230 = vector.load %arg12[%c0_50, %c0_51, %c0_52] : memref<1x1x128xf32, #tpu.memory_space<vmem>>, vector<1x1x128xf32>
    %231 = vector.shape_cast %230 : vector<1x1x128xf32> to vector<1x128xf32>
    %c0_53 = arith.constant 0 : index
    %c0_54 = arith.constant 0 : index
    %c0_55 = arith.constant 0 : index
    %232 = vector.load %arg13[%c0_53, %c0_54, %c0_55] : memref<1x1x128xf32, #tpu.memory_space<vmem>>, vector<1x1x128xf32>
    %233 = vector.shape_cast %232 : vector<1x1x128xf32> to vector<1x128xf32>
    %cst_56 = arith.constant dense<0.000000e+00> : vector<128xf32>
    %234 = vector.multi_reduction <add>, %229, %cst_56 [0] : vector<256x128xf32> to vector<128xf32>
    %235 = vector.shape_cast %234 : vector<128xf32> to vector<1x128xf32>
    %cst_57 = arith.constant 3.906250e-03 : f32
    %236 = vector.broadcast %cst_57 : f32 to vector<1x128xf32>
    %237 = arith.mulf %235, %236 : vector<1x128xf32>
    %238 = arith.mulf %229, %229 : vector<256x128xf32>
    %cst_58 = arith.constant dense<0.000000e+00> : vector<128xf32>
    %239 = vector.multi_reduction <add>, %238, %cst_58 [0] : vector<256x128xf32> to vector<128xf32>
    %240 = vector.shape_cast %239 : vector<128xf32> to vector<1x128xf32>
    %cst_59 = arith.constant 3.906250e-03 : f32
    %241 = vector.broadcast %cst_59 : f32 to vector<1x128xf32>
    %242 = arith.mulf %240, %241 : vector<1x128xf32>
    %243 = arith.mulf %237, %237 : vector<1x128xf32>
    %244 = arith.subf %242, %243 : vector<1x128xf32>
    %cst_60 = arith.constant 0.000000e+00 : f32
    %245 = vector.broadcast %cst_60 : f32 to vector<1x128xf32>
    %246 = arith.maximumf %244, %245 : vector<1x128xf32>
    %cst_61 = arith.constant 9.99999974E-6 : f32
    %247 = vector.broadcast %cst_61 : f32 to vector<1x128xf32>
    %248 = arith.addf %246, %247 : vector<1x128xf32>
    %249 = math.rsqrt %248 : vector<1x128xf32>
    %250 = arith.mulf %231, %249 : vector<1x128xf32>
    %251 = vector.broadcast %250 : vector<1x128xf32> to vector<256x128xf32>
    %252 = arith.mulf %229, %251 : vector<256x128xf32>
    %253 = arith.mulf %237, %250 : vector<1x128xf32>
    %254 = arith.subf %233, %253 : vector<1x128xf32>
    %255 = vector.broadcast %254 : vector<1x128xf32> to vector<256x128xf32>
    %256 = arith.addf %252, %255 : vector<256x128xf32>
    %c0_62 = arith.constant 0 : index
    %c0_63 = arith.constant 0 : index
    %257 = vector.load %arg15[%c0_62, %c0_63] : memref<256x128xf32, #tpu.memory_space<vmem>>, vector<256x128xf32>
    tpu.vector_store %arg15[%c0_62, %c0_63], %256 {strides = array<i32>} : memref<256x128xf32, #tpu.memory_space<vmem>>, vector<256x128xf32>,
    %c1_i32 = arith.constant 1 : i32
    %258 = arith.cmpi eq, %arg0, %c1_i32 : i32
    %259 = arith.extui %258 : i1 to i32
    %c0_i32_64 = arith.constant 0 : i32
    %260 = arith.cmpi ne, %259, %c0_i32_64 : i32
    scf.if %260 {
      %c0_65 = arith.constant 0 : index
      %c0_66 = arith.constant 0 : index
      %261 = vector.load %arg14[%c0_65, %c0_66] : memref<256x128xf32, #tpu.memory_space<vmem>>, vector<256x128xf32>
      tpu.vector_store %arg14[%c0_65, %c0_66], %256 {strides = array<i32>} : memref<256x128xf32, #tpu.memory_space<vmem>>, vector<256x128xf32>,
    } else {
    }
    return
  }
  func.func @transform_0(%arg0: i32) -> (i32, i32) {
    %c0_i32 = arith.constant 0 : i32
    %c0_i32_0 = arith.constant 0 : i32
    %c0_i32_1 = arith.constant 0 : i32
    return %c0_i32, %c0_i32_0 : i32, i32
  }
  func.func @transform_1(%arg0: i32) -> (i32, i32, i32) {
    %c0_i32 = arith.constant 0 : i32
    %c0_i32_0 = arith.constant 0 : i32
    %c0_i32_1 = arith.constant 0 : i32
    return %arg0, %c0_i32, %c0_i32_0 : i32, i32, i32
  }
  func.func @transform_2(%arg0: i32) -> (i32, i32, i32) {
    %c0_i32 = arith.constant 0 : i32
    %c0_i32_0 = arith.constant 0 : i32
    %c0_i32_1 = arith.constant 0 : i32
    return %arg0, %c0_i32, %c0_i32_0 : i32, i32, i32
  }
  func.func @transform_3(%arg0: i32) -> (i32, i32, i32) {
    %c0_i32 = arith.constant 0 : i32
    %c0_i32_0 = arith.constant 0 : i32
    %c0_i32_1 = arith.constant 0 : i32
    return %arg0, %c0_i32, %c0_i32_0 : i32, i32, i32
  }
  func.func @transform_4(%arg0: i32) -> (i32, i32, i32) {
    %c0_i32 = arith.constant 0 : i32
    %c0_i32_0 = arith.constant 0 : i32
    %c0_i32_1 = arith.constant 0 : i32
    return %arg0, %c0_i32, %c0_i32_0 : i32, i32, i32
  }
  func.func @transform_5(%arg0: i32) -> (i32, i32, i32) {
    %c0_i32 = arith.constant 0 : i32
    %c0_i32_0 = arith.constant 0 : i32
    %c0_i32_1 = arith.constant 0 : i32
    return %arg0, %c0_i32, %c0_i32_0 : i32, i32, i32
  }
  func.func @transform_6(%arg0: i32) -> (i32, i32, i32) {
    %c0_i32 = arith.constant 0 : i32
    %c0_i32_0 = arith.constant 0 : i32
    %c0_i32_1 = arith.constant 0 : i32
    return %arg0, %c0_i32, %c0_i32_0 : i32, i32, i32
  }
  func.func @transform_7(%arg0: i32) -> (i32, i32, i32) {
    %c0_i32 = arith.constant 0 : i32
    %c0_i32_0 = arith.constant 0 : i32
    %c0_i32_1 = arith.constant 0 : i32
    return %arg0, %c0_i32, %c0_i32_0 : i32, i32, i32
  }
  func.func @transform_8(%arg0: i32) -> (i32, i32, i32) {
    %c0_i32 = arith.constant 0 : i32
    %c0_i32_0 = arith.constant 0 : i32
    %c0_i32_1 = arith.constant 0 : i32
    return %arg0, %c0_i32, %c0_i32_0 : i32, i32, i32
  }
  func.func @transform_9(%arg0: i32) -> (i32, i32, i32) {
    %c0_i32 = arith.constant 0 : i32
    %c0_i32_0 = arith.constant 0 : i32
    %c0_i32_1 = arith.constant 0 : i32
    return %arg0, %c0_i32, %c0_i32_0 : i32, i32, i32
  }
  func.func @transform_10(%arg0: i32) -> (i32, i32, i32) {
    %c0_i32 = arith.constant 0 : i32
    %c0_i32_0 = arith.constant 0 : i32
    %c0_i32_1 = arith.constant 0 : i32
    return %arg0, %c0_i32, %c0_i32_0 : i32, i32, i32
  }
  func.func @transform_11(%arg0: i32) -> (i32, i32, i32) {
    %c0_i32 = arith.constant 0 : i32
    %c0_i32_0 = arith.constant 0 : i32
    %c0_i32_1 = arith.constant 0 : i32
    return %arg0, %c0_i32, %c0_i32_0 : i32, i32, i32
  }
  func.func @transform_12(%arg0: i32) -> (i32, i32, i32) {
    %c0_i32 = arith.constant 0 : i32
    %c0_i32_0 = arith.constant 0 : i32
    %c0_i32_1 = arith.constant 0 : i32
    return %arg0, %c0_i32, %c0_i32_0 : i32, i32, i32
  }
  func.func @transform_13(%arg0: i32) -> (i32, i32) {
    %c0_i32 = arith.constant 0 : i32
    %c0_i32_0 = arith.constant 0 : i32
    %c0_i32_1 = arith.constant 0 : i32
    return %c0_i32, %c0_i32_0 : i32, i32
  }
}

</mosaic_0001>

<bundles_post_ra>
// kernel: tst_encoder_forward.1
= control target key start
LH: loop header
LB: loop body
LE: loop exit
PB: predicated region body
PF: predicated region fallthrough
CT: control target
= control target key end

     0   :  { %s16391_s0 = inlined_call_operand.vmem [shape: f32[256,128], index: 0, kind: input, shape index: {}]   ;;  %s16392_s1 = inlined_call_operand.vmem [shape: bf16[2,128,384], index: 1, kind: input, shape index: {}]   ;;  %s16393_s2 = inlined_call_operand.vmem [shape: f32[2,1,384], index: 2, kind: input, shape index: {}]   ;;  %s16394_s3 = inlined_call_operand.vmem [shape: bf16[2,128,128], index: 3, kind: input, shape index: {}]   ;;  %s16395_s4 = inlined_call_operand.vmem [shape: f32[2,1,128], index: 4, kind: input, shape index: {}]   ;;  %s16396_s5 = inlined_call_operand.vmem [shape: f32[2,1,128], index: 5, kind: input, shape index: {}]   ;;  %s16397_s6 = inlined_call_operand.vmem [shape: f32[2,1,128], index: 6, kind: input, shape index: {}]   ;;  %s16398_s7 = inlined_call_operand.vmem [shape: bf16[2,128,256], index: 7, kind: input, shape index: {}]   ;;  %s16399_s8 = inlined_call_operand.vmem [shape: f32[2,1,256], index: 8, kind: input, shape index: {}]   ;;  %s16400_s9 = inlined_call_operand.vmem [shape: bf16[2,256,128], index: 9, kind: input, shape index: {}]   ;;  %s16401_s10 = inlined_call_operand.vmem [shape: f32[2,1,128], index: 10, kind: input, shape index: {}]   ;;  %s16402_s11 = inlined_call_operand.vmem [shape: f32[2,1,128], index: 11, kind: input, shape index: {}]   ;;  %s16403_s12 = inlined_call_operand.vmem [shape: f32[2,1,128], index: 12, kind: input, shape index: {}]   ;;  %s16404_s13 = inlined_call_operand.hbm [shape: f32[256,128], index: 13, kind: output, shape index: {}]  }
   0x1   :  { %16673 = sst [smem:[#allocation143_spill]] %s16391_s0 }
   0x2   :  { %16674 = sst [smem:[#allocation144_spill]] %s16392_s1 }
   0x3   :  { %16675 = sst [smem:[#allocation145_spill]] %s16393_s2 }
   0x4   :  { %16676 = sst [smem:[#allocation146_spill]] %s16394_s3 }
   0x5   :  { %16677 = sst [smem:[#allocation147_spill]] %s16398_s7 }
   0x6   :  { %16678 = sst [smem:[#allocation148_spill]] %s16404_s13 }
   0x7   :  { %18 = vsyncpa [#allocation4], 0  ;;  %s11028_s25 = smov 0  }
   0x8 LB: > { %16679 = sst [smem:[#allocation6_spill]] %s10949_s25  ;;  %s11034_s26 = sadd.s32 4294967295, %s10949_s25   ;;  %s10949_s25 = sphi %s11028_s25, %s24_s25  }
   0x9   : > { %p8578_p0 = scmp.ge.s32.totalorder %s10949_s25, 1  ;;  %p479_p1 = scmp.lt.s32.totalorder %s10949_s25, 3 }
   0xb   : > { %p480_p2 = pnand %p8578_p0, %p479_p1 }
   0xd   : > { %483 = sbr.rel (%p480_p2) target bundleno = 3187 (0xc73), region = 72 }
  0x14   : > { %p559_p3 = scmp.lt.s32.totalorder %s11034_s26, 1  ;;  %s16680_s3 = sld [smem:[#allocation146_spill]] }
  0x15   : > { %s16681_s1 = sld [smem:[#allocation144_spill]]  ;;  %s16682_s2 = sld [smem:[#allocation145_spill]] }
  0x16   : > { %s11040_s27 = scalar_select %p559_p3, %s11034_s26, 1 }
  0x17   : > { %s16683_s7 = sld [smem:[#allocation147_spill]]  ;;  %p8587_p4 = scmp.ne.s32.totalorder %s11034_s26, 0 }
  0x18   : > { %s9894_s28 = smul.u32 192, %s11040_s27  ;;  %s8787_s29 = sshll.u32 %s11040_s27, 6 }
  0x19   : > { %s9895_s30 = smul.u32 3, %s11040_s27  ;;  %s8788_s17 = sshll.u32 %s11040_s27, 7 }
  0x1a   : > { %s11048_s16 = scalar_lea.vmem %s16680_s3, %s8787_s29  ;;  %s8584_s20 = sshll.u32 %s11040_s27, 1 }
  0x1b   : > { %s11053_s19 = scalar_lea.vmem %s16681_s1, %s9894_s28  ;;  %s11062_s25 = scalar_lea.vmem %s16682_s2, %s9895_s30 }
  0x1c   : > { %s11082_s30 = scalar_lea.vmem %s16399_s8, %s8584_s20  ;;  %s11087_s0 = scalar_lea.vmem %s16400_s9, %s8788_s17 }
  0x1d   : > { %s11076_s1 = scalar_lea.vmem %s16683_s7, %s8788_s17  ;;  %s598_s15 = scalar_lea.vmem %s16401_s10, %s11040_s27 }
  0x1e   : > { %s601_s28 = scalar_lea.vmem %s16402_s11, %s11040_s27  ;;  %s604_s7 = scalar_lea.vmem %s16403_s12, %s11040_s27 }
  0x1f   : > { %609 = sbr.rel (%p8587_p4) target bundleno = 54 (0x36), region = 76  ;;  %s16684_s21 = sld [smem:[#allocation143_spill]] (!%p8587_p4) }
  0x25   : > { %v610_v0 = vld [vmem:[%s16684_s21] sm:$0xff] (!%p8587_p4)  ;;  %v611_v1 = vld [vmem:[%s16684_s21 + $0x8] sm:$0xff] (!%p8587_p4)  ;;  %v612_v2 = vld [vmem:[%s16684_s21 + $0x10] sm:$0xff] (!%p8587_p4) }
  0x26   : > { %642 = vst [vmem:[#allocation2] sm:$0xff] %v610_v0  ;;  %643 = vst [vmem:[#allocation2 + $0x8] sm:$0xff] %v611_v1  ;;  %v613_v3 = vld [vmem:[%s16684_s21 + $0x18] sm:$0xff]  ;;  %v614_v4 = vld [vmem:[%s16684_s21 + $0x20] sm:$0xff] }
  0x27   : > { %644 = vst [vmem:[#allocation2 + $0x10] sm:$0xff] %v612_v2  ;;  %v615_v5 = vld [vmem:[%s16684_s21 + $0x28] sm:$0xff]  ;;  %645 = vst [vmem:[#allocation2 + $0x18] sm:$0xff] %v613_v3  ;;  %v616_v6 = vld [vmem:[%s16684_s21 + $0x30] sm:$0xff] }
  0x28   : > { %646 = vst [vmem:[#allocation2 + $0x20] sm:$0xff] %v614_v4  ;;  %647 = vst [vmem:[#allocation2 + $0x28] sm:$0xff] %v615_v5  ;;  %v617_v7 = vld [vmem:[%s16684_s21 + $0x38] sm:$0xff]  ;;  %v618_v8 = vld [vmem:[%s16684_s21 + $0x40] sm:$0xff] }
  0x29   : > { %648 = vst [vmem:[#allocation2 + $0x30] sm:$0xff] %v616_v6  ;;  %649 = vst [vmem:[#allocation2 + $0x38] sm:$0xff] %v617_v7  ;;  %v619_v9 = vld [vmem:[%s16684_s21 + $0x48] sm:$0xff]  ;;  %v620_v10 = vld [vmem:[%s16684_s21 + $0x50] sm:$0xff] }
  0x2a   : > { %650 = vst [vmem:[#allocation2 + $0x40] sm:$0xff] %v618_v8  ;;  %v621_v11 = vld [vmem:[%s16684_s21 + $0x58] sm:$0xff]  ;;  %651 = vst [vmem:[#allocation2 + $0x48] sm:$0xff] %v619_v9  ;;  %v622_v12 = vld [vmem:[%s16684_s21 + $0x60] sm:$0xff] }
  0x2b   : > { %652 = vst [vmem:[#allocation2 + $0x50] sm:$0xff] %v620_v10  ;;  %653 = vst [vmem:[#allocation2 + $0x58] sm:$0xff] %v621_v11  ;;  %v623_v13 = vld [vmem:[%s16684_s21 + $0x68] sm:$0xff]  ;;  %v624_v14 = vld [vmem:[%s16684_s21 + $0x70] sm:$0xff] }
  0x2c   : > { %654 = vst [vmem:[#allocation2 + $0x60] sm:$0xff] %v622_v12  ;;  %655 = vst [vmem:[#allocation2 + $0x68] sm:$0xff] %v623_v13  ;;  %v625_v15 = vld [vmem:[%s16684_s21 + $0x78] sm:$0xff]  ;;  %v626_v16 = vld [vmem:[%s16684_s21 + $0x80] sm:$0xff] }
  0x2d   : > { %656 = vst [vmem:[#allocation2 + $0x70] sm:$0xff] %v624_v14  ;;  %v627_v17 = vld [vmem:[%s16684_s21 + $0x88] sm:$0xff]  ;;  %657 = vst [vmem:[#allocation2 + $0x78] sm:$0xff] %v625_v15  ;;  %v628_v18 = vld [vmem:[%s16684_s21 + $0x90] sm:$0xff] }
  0x2e   : > { %658 = vst [vmem:[#allocation2 + $0x80] sm:$0xff] %v626_v16  ;;  %659 = vst [vmem:[#allocation2 + $0x88] sm:$0xff] %v627_v17  ;;  %v629_v19 = vld [vmem:[%s16684_s21 + $0x98] sm:$0xff]  ;;  %v630_v20 = vld [vmem:[%s16684_s21 + $0xa0] sm:$0xff] }
  0x2f   : > { %660 = vst [vmem:[#allocation2 + $0x90] sm:$0xff] %v628_v18  ;;  %661 = vst [vmem:[#allocation2 + $0x98] sm:$0xff] %v629_v19  ;;  %v631_v21 = vld [vmem:[%s16684_s21 + $0xa8] sm:$0xff]  ;;  %v632_v22 = vld [vmem:[%s16684_s21 + $0xb0] sm:$0xff] }
  0x30   : > { %662 = vst [vmem:[#allocation2 + $0xa0] sm:$0xff] %v630_v20  ;;  %v633_v23 = vld [vmem:[%s16684_s21 + $0xb8] sm:$0xff]  ;;  %663 = vst [vmem:[#allocation2 + $0xa8] sm:$0xff] %v631_v21  ;;  %v634_v24 = vld [vmem:[%s16684_s21 + $0xc0] sm:$0xff] }
  0x31   : > { %664 = vst [vmem:[#allocation2 + $0xb0] sm:$0xff] %v632_v22  ;;  %665 = vst [vmem:[#allocation2 + $0xb8] sm:$0xff] %v633_v23  ;;  %v635_v25 = vld [vmem:[%s16684_s21 + $0xc8] sm:$0xff]  ;;  %v636_v26 = vld [vmem:[%s16684_s21 + $0xd0] sm:$0xff] }
  0x32   : > { %666 = vst [vmem:[#allocation2 + $0xc0] sm:$0xff] %v634_v24  ;;  %667 = vst [vmem:[#allocation2 + $0xc8] sm:$0xff] %v635_v25  ;;  %v637_v27 = vld [vmem:[%s16684_s21 + $0xd8] sm:$0xff]  ;;  %v638_v28 = vld [vmem:[%s16684_s21 + $0xe0] sm:$0xff] }
  0x33   : > { %668 = vst [vmem:[#allocation2 + $0xd0] sm:$0xff] %v636_v26  ;;  %v639_v29 = vld [vmem:[%s16684_s21 + $0xe8] sm:$0xff]  ;;  %669 = vst [vmem:[#allocation2 + $0xd8] sm:$0xff] %v637_v27  ;;  %v640_v30 = vld [vmem:[%s16684_s21 + $0xf0] sm:$0xff] }
  0x34   : > { %670 = vst [vmem:[#allocation2 + $0xe0] sm:$0xff] %v638_v28  ;;  %671 = vst [vmem:[#allocation2 + $0xe8] sm:$0xff] %v639_v29  ;;  %v641_v31 = vld [vmem:[%s16684_s21 + $0xf8] sm:$0xff] }
  0x35   : > { %672 = vst [vmem:[#allocation2 + $0xf0] sm:$0xff] %v640_v30  ;;  %673 = vst [vmem:[#allocation2 + $0xf8] sm:$0xff] %v641_v31 }
  0x36 PF: > { %v10157_v32 = vld [vmem:[%s11053_s19 + $0x4] ss:$12 sps:$4 sm:$0xff]   ;;  %v10159_v33 = vld [vmem:[%s11053_s19] ss:$12 sps:$4 sm:$0xff]   ;;  %v16409_v34 = vmov 0   ;;  %v677_v58 = vld [vmem:[#allocation2 + $0x18] sm:$0xff]  ;;  %s17296_s22 = scalar_lea.vmem %s16395_s4, %s11040_s27  ;;  %s17297_s17 = scalar_lea.vmem %s16396_s5, %s11040_s27 }
  0x37   : > { %931 = vmatprep.mubr.bf16.mxu0 %v16409_v34  ;;  %1051 = vmatprep.mubr.bf16.mxu1 %v16409_v34  ;;  %v10160_v35 = vld [vmem:[%s11053_s19 + $0x1c] ss:$12 sps:$4 sm:$0xff]   ;;  %v10162_v36 = vld [vmem:[%s11053_s19 + $0x18] ss:$12 sps:$4 sm:$0xff]   ;;  %v10163_v37 = vld [vmem:[%s11053_s19 + $0x34] ss:$12 sps:$4 sm:$0xff]   ;;  %s17298_s13 = scalar_lea.vmem %s16397_s6, %s11040_s27 }
  0x38   : > { %899 = vmatprep.subr.bf16.mxu0 %v10157_v32  ;;  %9814 = vmatprep.subr.bf16.mxu1 %v10157_v32  ;;  %v10165_v38 = vld [vmem:[%s11053_s19 + $0x30] ss:$12 sps:$4 sm:$0xff]   ;;  %v10166_v39 = vld [vmem:[%s11053_s19 + $0x4c] ss:$12 sps:$4 sm:$0xff]   ;;  %v10168_v40 = vld [vmem:[%s11053_s19 + $0x48] ss:$12 sps:$4 sm:$0xff]  }
  0x39   : > { %900 = vmatpush1.bf16.msra.mxu0 %v10159_v33  ;;  %9822 = vmatpush1.bf16.msra.mxu1 %v10159_v33  ;;  %v10169_v41 = vld [vmem:[%s11053_s19 + $0x64] ss:$12 sps:$4 sm:$0xff]   ;;  %v10171_v42 = vld [vmem:[%s11053_s19 + $0x60] ss:$12 sps:$4 sm:$0xff]   ;;  %v10172_v43 = vld [vmem:[%s11053_s19 + $0x7c] ss:$12 sps:$4 sm:$0xff]  }
  0x3a   : > { %901 = vmatprep.subr.bf16.mxu0 %v10160_v35  ;;  %9815 = vmatprep.subr.bf16.mxu1 %v10160_v35  ;;  %v10174_v44 = vld [vmem:[%s11053_s19 + $0x78] ss:$12 sps:$4 sm:$0xff]   ;;  %v10175_v45 = vld [vmem:[%s11053_s19 + $0x94] ss:$12 sps:$4 sm:$0xff]   ;;  %v10177_v46 = vld [vmem:[%s11053_s19 + $0x90] ss:$12 sps:$4 sm:$0xff]  }
  0x3b   : > { %v10178_v47 = vld [vmem:[%s11053_s19 + $0xac] ss:$12 sps:$4 sm:$0xff]   ;;  %v10180_v48 = vld [vmem:[%s11053_s19 + $0xa8] ss:$12 sps:$4 sm:$0xff]   ;;  %v698_v51 = vld [vmem:[#allocation2 + $0xc0] sm:$0xff]  ;;  %vm1685_vm0 = vcmask 261120  }
  0x3c   : > { %v675_v50 = vld [vmem:[#allocation2 + $0x8] sm:$0xff]  ;;  %v676_v57 = vld [vmem:[#allocation2 + $0x10] sm:$0xff]  ;;  %v701_v60 = vld [vmem:[#allocation2 + $0xd8] sm:$0xff]  ;;  %s10954_s29 = smov 32   ;;  %vm3238_vm1 = vcmask 523264   ;;  %vm6055_vm2 = vcmask 785408  }
  0x3d   : > { %902 = vmatpush1.bf16.msra.mxu0 %v10162_v36  ;;  %9823 = vmatpush1.bf16.msra.mxu1 %v10162_v36  ;;  %v674_v49 = vld [vmem:[#allocation2] sm:$0xff]  ;;  %v699_v52 = vld [vmem:[#allocation2 + $0xc8] sm:$0xff]  ;;  %v700_v59 = vld [vmem:[#allocation2 + $0xd0] sm:$0xff]  ;;  %v707_v62 = vpack.c.bf16 %v677_v58, %v676_v57  ;;  %p8782_p5 = scmp.ne.s32.totalorder %s11034_s26, 1 }
  0x3e   : > { %903 = vmatprep.subr.bf16.mxu0 %v10163_v37  ;;  %9816 = vmatprep.subr.bf16.mxu1 %v10163_v37  ;;  %v10181_v53 = vld [vmem:[%s11053_s19 + $0x8] ss:$12 sps:$4 sm:$0xff]   ;;  %v706_v54 = vpack.c.bf16 %v675_v50, %v674_v49  ;;  %v11217_v55 = vpack.c.bf16 %v699_v52, %v698_v51  ;;  %v10182_v56 = vld [vmem:[%s11053_s19 + $0x20] ss:$12 sps:$4 sm:$0xff]   ;;  %v10183_v61 = vld [vmem:[%s11053_s19 + $0x38] ss:$12 sps:$4 sm:$0xff]   ;;  %v11224_v63 = vpack.c.bf16 %v701_v60, %v700_v59 }
  0x3f   : > { %v10184_v0 = vld [vmem:[%s11053_s19 + $0x50] ss:$12 sps:$4 sm:$0xff]   ;;  %v678_v1 = vld [vmem:[#allocation2 + $0x20] sm:$0xff]  ;;  %v679_v2 = vld [vmem:[#allocation2 + $0x28] sm:$0xff] }
  0x40   : > { %v702_v3 = vld [vmem:[#allocation2 + $0xe0] sm:$0xff]  ;;  %v703_v4 = vld [vmem:[#allocation2 + $0xe8] sm:$0xff]  ;;  %v708_v6 = vpack.c.bf16 %v679_v2, %v678_v1  ;;  %v680_v9 = vld [vmem:[#allocation2 + $0x30] sm:$0xff] }
  0x41   : > { %904 = vmatpush1.bf16.msra.mxu0 %v10165_v38  ;;  %9824 = vmatpush1.bf16.msra.mxu1 %v10165_v38  ;;  %v10185_v5 = vld [vmem:[%s11053_s19 + $0x68] ss:$12 sps:$4 sm:$0xff]   ;;  %v11231_v7 = vpack.c.bf16 %v703_v4, %v702_v3  ;;  %v10186_v8 = vld [vmem:[%s11053_s19 + $0x80] ss:$12 sps:$4 sm:$0xff]   ;;  %v681_v10 = vld [vmem:[#allocation2 + $0x38] sm:$0xff] }
  0x42   : > { %905 = vmatprep.subr.bf16.mxu0 %v10166_v39  ;;  %9817 = vmatprep.subr.bf16.mxu1 %v10166_v39  ;;  %v704_v11 = vld [vmem:[#allocation2 + $0xf0] sm:$0xff]  ;;  %v705_v12 = vld [vmem:[#allocation2 + $0xf8] sm:$0xff]  ;;  %v709_v14 = vpack.c.bf16 %v681_v10, %v680_v9  ;;  %v682_v17 = vld [vmem:[#allocation2 + $0x40] sm:$0xff] }
  0x43   : > { %v10187_v13 = vld [vmem:[%s11053_s19 + $0x98] ss:$12 sps:$4 sm:$0xff]   ;;  %v11238_v15 = vpack.c.bf16 %v705_v12, %v704_v11  ;;  %v10188_v16 = vld [vmem:[%s11053_s19 + $0xb0] ss:$12 sps:$4 sm:$0xff]   ;;  %v683_v18 = vld [vmem:[#allocation2 + $0x48] sm:$0xff]  ;;  %s10953_s19 = smov 96  }
  0x44   : > { %v710_v19 = vpack.c.bf16 %v683_v18, %v682_v17  ;;  %v684_v20 = vld [vmem:[#allocation2 + $0x50] sm:$0xff]  ;;  %v685_v21 = vld [vmem:[#allocation2 + $0x58] sm:$0xff]  ;;  %v686_v23 = vld [vmem:[#allocation2 + $0x60] sm:$0xff] }
  0x45   : > { %906 = vmatpush1.bf16.msra.mxu0 %v10168_v40  ;;  %9825 = vmatpush1.bf16.msra.mxu1 %v10168_v40  ;;  %v711_v22 = vpack.c.bf16 %v685_v21, %v684_v20  ;;  %v687_v24 = vld [vmem:[#allocation2 + $0x68] sm:$0xff]  ;;  %v688_v26 = vld [vmem:[#allocation2 + $0x70] sm:$0xff]  ;;  %v689_v27 = vld [vmem:[#allocation2 + $0x78] sm:$0xff] }
  0x46   : > { %907 = vmatprep.subr.bf16.mxu0 %v10169_v41  ;;  %9818 = vmatprep.subr.bf16.mxu1 %v10169_v41  ;;  %v712_v25 = vpack.c.bf16 %v687_v24, %v686_v23  ;;  %v713_v28 = vpack.c.bf16 %v689_v27, %v688_v26  ;;  %v690_v29 = vld [vmem:[#allocation2 + $0x80] sm:$0xff]  ;;  %v691_v30 = vld [vmem:[#allocation2 + $0x88] sm:$0xff]  ;;  %v692_v32 = vld [vmem:[#allocation2 + $0x90] sm:$0xff] }
  0x47   : > { %v714_v31 = vpack.c.bf16 %v691_v30, %v690_v29  ;;  %v693_v33 = vld [vmem:[#allocation2 + $0x98] sm:$0xff]  ;;  %v694_v35 = vld [vmem:[#allocation2 + $0xa0] sm:$0xff]  ;;  %v695_v36 = vld [vmem:[#allocation2 + $0xa8] sm:$0xff] }
  0x48   : > { %v715_v37 = vpack.c.bf16 %v693_v33, %v692_v32  ;;  %v716_v38 = vpack.c.bf16 %v695_v36, %v694_v35  ;;  %v696_v39 = vld [vmem:[#allocation2 + $0xb0] sm:$0xff]  ;;  %v697_v40 = vld [vmem:[#allocation2 + $0xb8] sm:$0xff] }
  0x49   : > { %908 = vmatpush1.bf16.msra.mxu0 %v10171_v42  ;;  %9826 = vmatpush1.bf16.msra.mxu1 %v10171_v42  ;;  %v717_v41 = vpack.c.bf16 %v697_v40, %v696_v39  ;;  %v756_v42 = vlaneseq }
  0x4a   : > { %909 = vmatprep.subr.bf16.mxu0 %v10172_v43  ;;  %9819 = vmatprep.subr.bf16.mxu1 %v10172_v43 }
  0x4b   : > { %v11254_v43 = vshrl.u32 %v756_v42, 7 }
  0x4d   : > { %910 = vmatpush1.bf16.msra.mxu0 %v10174_v44  ;;  %9827 = vmatpush1.bf16.msra.mxu1 %v10174_v44  ;;  %16685 = vst [vmem:[#allocation7_spill] sm:$0xff] %v11254_v43  ;;  %v11257_v44 = vsub.s32 0, %v11254_v43 }
  0x4e   : > { %911 = vmatprep.subr.bf16.mxu0 %v10175_v45  ;;  %9820 = vmatprep.subr.bf16.mxu1 %v10175_v45  ;;  %v11260_v45 = vld [vmem:[%s11062_s25] sm:$0x7]  ;;  %s10952_s25 = smov 64  }
  0x4f   : > { %16686 = vst [vmem:[#allocation8_spill] sm:$0xff] %v11257_v44 }
  0x51   : > { %912 = vmatpush1.bf16.msra.mxu0 %v10177_v46  ;;  %9828 = vmatpush1.bf16.msra.mxu1 %v10177_v46  ;;  %v16408_v46 = vsub.s32 1, %v11254_v43 }
  0x52   : > { %913 = vmatprep.subr.bf16.mxu0 %v10178_v47  ;;  %9821 = vmatprep.subr.bf16.mxu1 %v10178_v47  ;;  %v11265_v47 = vrot.slane %v11260_v45, %v11257_v44 }
  0x53   : > { %v11270_v49 = vrot.slane %v11260_v45, %v16408_v46 }
  0x55   : > { %914 = vmatpush1.bf16.msra.mxu0 %v10180_v48  ;;  %9829 = vmatpush1.bf16.msra.mxu1 %v10180_v48 }
  0x56   : > { %9206 = vmatprep.subr.bf16.mxu1 %v10181_v53 }
  0x58   : > { %932 = vmatmul.mubr.bf16.vlgmr.msra.gmra.mrb[0].mxu0 %v706_v54  ;;  %1052 = vmatmul.mubr.bf16.vlgmr.msra.gmra.mrb[0].mxu1 %v11217_v55 }
  0x59   : > { %941 = vmatprep.mubr.bf16.mxu0 %v16409_v34  ;;  %1061 = vmatprep.mubr.bf16.mxu1 %v16409_v34 }
  0x5a   : > { %9207 = vmatpush3.bf16.msra.mxu1 %v10181_v53 }
  0x5b   : > { %9208 = vmatprep.subr.bf16.mxu1 %v10182_v56 }
  0x5e   : > { %9209 = vmatpush3.bf16.msra.mxu1 %v10182_v56 }
  0x5f   : > { %9210 = vmatprep.subr.bf16.mxu1 %v10183_v61 }
  0x60   : > { %942 = vmatmul.mubr.bf16.gmra.mrb[4].mxu0 %v707_v62  ;;  %1062 = vmatmul.mubr.bf16.gmra.mrb[4].mxu1 %v11224_v63 }
  0x61   : > { %951 = vmatprep.mubr.bf16.mxu0 %v16409_v34  ;;  %1071 = vmatprep.mubr.bf16.mxu1 %v16409_v34 }
  0x62   : > { %9211 = vmatpush3.bf16.msra.mxu1 %v10183_v61 }
  0x63   : > { %9212 = vmatprep.subr.bf16.mxu1 %v10184_v0 }
  0x66   : > { %9213 = vmatpush3.bf16.msra.mxu1 %v10184_v0 }
  0x67   : > { %9214 = vmatprep.subr.bf16.mxu1 %v10185_v5 }
  0x68   : > { %952 = vmatmul.mubr.bf16.gmra.mrb[8].mxu0 %v708_v6  ;;  %1072 = vmatmul.mubr.bf16.gmra.mrb[8].mxu1 %v11231_v7 }
  0x69   : > { %961 = vmatprep.mubr.bf16.mxu0 %v16409_v34  ;;  %1081 = vmatprep.mubr.bf16.mxu1 %v16409_v34 }
  0x6a   : > { %9215 = vmatpush3.bf16.msra.mxu1 %v10185_v5 }
  0x6b   : > { %9216 = vmatprep.subr.bf16.mxu1 %v10186_v8 }
  0x6e   : > { %9217 = vmatpush3.bf16.msra.mxu1 %v10186_v8 }
  0x6f   : > { %9218 = vmatprep.subr.bf16.mxu1 %v10187_v13 }
  0x70   : > { %962 = vmatmul.mubr.bf16.gmra.mrb[12].mxu0 %v709_v14  ;;  %1082 = vmatmul.mubr.bf16.gmra.mrb[12].mxu1 %v11238_v15 }
  0x71   : > { %971 = vmatprep.mubr.bf16.mxu0 %v16409_v34  ;;  %9222 = vmatprep.mubr.bf16.mxu1 %v706_v54 }
  0x72   : > { %9219 = vmatpush3.bf16.msra.mxu1 %v10187_v13 }
  0x73   : > { %9220 = vmatprep.subr.bf16.mxu1 %v10188_v16 }
  0x76   : > { %9221 = vmatpush3.bf16.msra.mxu1 %v10188_v16 }
  0x78   : > { %972 = vmatmul.mubr.bf16.gmra.mrb[16].mxu0 %v710_v19 }
  0x79   : > { %9223 = vmatmul.mubr.bf16.vlgmr.msra.gmra.mrb[16].mxu1 %v707_v62  ;;  %981 = vmatprep.mubr.bf16.mxu0 %v16409_v34 }
  0x7a   : > { %9226 = vmatprep.mubr.bf16.mxu1 %v708_v6 }
  0x80   : > { %982 = vmatmul.mubr.bf16.gmra.mrb[20].mxu0 %v711_v22 }
  0x81   : > { %9227 = vmatmul.mubr.bf16.gmra.mrb[20].mxu1 %v709_v14  ;;  %991 = vmatprep.mubr.bf16.mxu0 %v16409_v34 }
  0x82   : > { %9230 = vmatprep.mubr.bf16.mxu1 %v710_v19 }
  0x88   : > { %992 = vmatmul.mubr.bf16.gmra.mrb[24].mxu0 %v712_v25 }
  0x89   : > { %9231 = vmatmul.mubr.bf16.gmra.mrb[24].mxu1 %v711_v22  ;;  %1001 = vmatprep.mubr.bf16.mxu0 %v16409_v34 }
  0x8a   : > { %9234 = vmatprep.mubr.bf16.mxu1 %v712_v25 }
  0x90   : > { %1002 = vmatmul.mubr.bf16.gmra.mrb[28].mxu0 %v713_v28 }
  0x91   : > { %1011 = vmatprep.mubr.bf16.mxu0 %v16409_v34  ;;  %9235 = vmatmul.mubr.bf16.gmra.mrb[28].mxu1 %v713_v28 }
  0x92   : > { %9238 = vmatprep.mubr.bf16.mxu1 %v714_v31 }
  0x98   : > { %1012 = vmatmul.mubr.bf16.gmra.mrb[32].mxu0 %v714_v31 }
  0x99   : > { %1021 = vmatprep.mubr.bf16.mxu0 %v16409_v34  ;;  %9239 = vmatmul.mubr.bf16.gmra.mrb[32].mxu1 %v715_v37 }
  0x9a   : > { %9242 = vmatprep.mubr.bf16.mxu1 %v716_v38 }
  0xa0   : > { %1022 = vmatmul.mubr.bf16.gmra.mrb[36].mxu0 %v715_v37 }
  0xa1   : > { %1031 = vmatprep.mubr.bf16.mxu0 %v16409_v34  ;;  %9243 = vmatmul.mubr.bf16.gmra.mrb[36].mxu1 %v717_v41 }
  0xa2   : > { %9246 = vmatprep.mubr.bf16.mxu1 %v11217_v55 }
  0xa8   : > { %1032 = vmatmul.mubr.bf16.gmra.mrb[40].mxu0 %v716_v38 }
  0xa9   : > { %1041 = vmatprep.mubr.bf16.mxu0 %v16409_v34  ;;  %9247 = vmatmul.mubr.bf16.gmra.mrb[40].mxu1 %v11224_v63 }
  0xaa   : > { %9250 = vmatprep.mubr.bf16.mxu1 %v11231_v7 }
  0xb0   : > { %1042 = vmatmul.mubr.bf16.gmra.mrb[44].mxu0 %v717_v41 }
  0xb1   : > { %9251 = vmatmul.mubr.bf16.gmra.mrb[44].mxu1 %v11238_v15 }
 0x12b   : > { %v933_v48 = vpop.f32.mrb[0].mxu0  ;;  %v1053_v50 = vpop.f32.mrb[0].mxu1 }
 0x12c   : > { %v935_v51 = vpop.f32.mrb[1].mxu0  ;;  %v1054_v52 = vadd.f32 %v1053_v50, %v11265_v47  ;;  %v1055_v53 = vpop.f32.mrb[1].mxu1  ;;  %v934_v57 = vadd.f32 %v933_v48, %v11265_v47 }
 0x12d   : > { %v937_v54 = vpop.f32.mrb[2].mxu0  ;;  %v1056_v55 = vadd.f32 %v1055_v53, %v11270_v49  ;;  %v1057_v56 = vpop.f32.mrb[2].mxu1  ;;  %v936_v62 = vadd.f32 %v935_v51, %v11270_v49 }
 0x12e   : > { %v938_v58 = vadd.f32 %v937_v54, %v11265_v47  ;;  %v939_v59 = vpop.f32.mrb[3].mxu0  ;;  %v1058_v60 = vadd.f32 %v1057_v56, %v11265_v47  ;;  %v1059_v61 = vpop.f32.mrb[3].mxu1 }
 0x12f   : > { %v940_v63 = vadd.f32 %v939_v59, %v11270_v49  ;;  %v1060_v0 = vadd.f32 %v1059_v61, %v11270_v49 }
 0x130   : > { %v1253_v1 = vpack.c.bf16 %v938_v58, %v934_v57  ;;  %v11280_v2 = vpack.c.bf16 %v1058_v60, %v1054_v52 }
 0x131   : > { %v11282_v3 = vpack.c.bf16 %v940_v63, %v936_v62  ;;  %v11284_v4 = vpack.c.bf16 %v1060_v0, %v1056_v55 }
 0x132   : > { %1313 = vrot.lane.b32.xlu0 %v1253_v1, %s10952_s25  ;;  %1305 = vrot.lane.b32.xlu1 %v1253_v1, %s10953_s19 }
 0x133   : > { %9262 = vmatprep.mubr.msk.bf16.mxu1 %vm1685_vm0, %v1253_v1  ;;  %v943_v5 = vpop.f32.mrb[4].mxu0  ;;  %9830 = vmatprep.subr.msk.bf16.mxu1 %vm1685_vm0, %v11282_v3  ;;  %v1699_v6 = vsel %vm1685_vm0, %v11282_v3, 0  ;;  %v1063_v7 = vpop.f32.mrb[4].mxu1 }
 0x134   : > { %v944_v8 = vadd.f32 %v943_v5, %v11265_v47  ;;  %v945_v9 = vpop.f32.mrb[5].mxu0  ;;  %9255 = vmatpush3.bf16.xpose.msra.mxu1 %v1699_v6  ;;  %v1064_v10 = vadd.f32 %v1063_v7, %v11265_v47  ;;  %v1065_v11 = vpop.f32.mrb[5].mxu1 }
 0x135   : > { %v946_v12 = vadd.f32 %v945_v9, %v11270_v49  ;;  %v947_v13 = vpop.f32.mrb[6].mxu0  ;;  %v1066_v14 = vadd.f32 %v1065_v11, %v11270_v49  ;;  %v1067_v15 = vpop.f32.mrb[6].mxu1 }
 0x136   : > { %v948_v16 = vadd.f32 %v947_v13, %v11265_v47  ;;  %v949_v17 = vpop.f32.mrb[7].mxu0  ;;  %1321 = vrot.lane.b32.xlu0 %v1253_v1, %s10954_s29  ;;  %1389 = vrot.lane.b32.xlu1 %v11280_v2, %s10953_s19  ;;  %v1068_v18 = vadd.f32 %v1067_v15, %v11265_v47  ;;  %v1069_v19 = vpop.f32.mrb[7].mxu1  ;;  %v766_v1 = vsub.s32 2, %v11254_v43 }
 0x137   : > { %v950_v20 = vadd.f32 %v949_v17, %v11270_v49  ;;  %v1070_v21 = vadd.f32 %v1069_v19, %v11270_v49 }
 0x138   : > { %v11304_v22 = vpack.c.bf16 %v948_v16, %v944_v8  ;;  %v11306_v23 = vpack.c.bf16 %v1068_v18, %v1064_v10  ;;  %v11370_v15 = vrot.slane %v11260_v45, %v766_v1 }
 0x139   : > { %v11308_v24 = vpack.c.bf16 %v950_v20, %v946_v12  ;;  %v11310_v25 = vpack.c.bf16 %v1070_v21, %v1066_v14 }
 0x13a   : > { %1397 = vrot.lane.b32.xlu0 %v11280_v2, %s10952_s25  ;;  %1501 = vrot.lane.b32.xlu1 %v11284_v4, %s10953_s19 }
 0x13b   : > { %v953_v26 = vpop.f32.mrb[8].mxu0  ;;  %9831 = vmatprep.subr.msk.bf16.mxu1 %vm1685_vm0, %v11308_v24  ;;  %v1702_v27 = vsel %vm1685_vm0, %v11308_v24, 0  ;;  %v1073_v28 = vpop.f32.mrb[8].mxu1 }
 0x13c   : > { %v954_v29 = vadd.f32 %v953_v26, %v11265_v47  ;;  %v955_v30 = vpop.f32.mrb[9].mxu0  ;;  %9257 = vmatpush3.bf16.xpose.msra.mxu1 %v1702_v27  ;;  %v1074_v31 = vadd.f32 %v1073_v28, %v11265_v47  ;;  %v1075_v32 = vpop.f32.mrb[9].mxu1 }
 0x13d   : > { %v956_v33 = vadd.f32 %v955_v30, %v11270_v49  ;;  %v957_v35 = vpop.f32.mrb[10].mxu0  ;;  %v1076_v36 = vadd.f32 %v1075_v32, %v11270_v49  ;;  %v1077_v37 = vpop.f32.mrb[10].mxu1 }
 0x13e   : > { %v958_v38 = vadd.f32 %v957_v35, %v11265_v47  ;;  %v959_v39 = vpop.f32.mrb[11].mxu0  ;;  %1405 = vrot.lane.b32.xlu0 %v11280_v2, %s10954_s29  ;;  %1307 = vrot.lane.b32.xlu1 %v11304_v22, %s10953_s19  ;;  %v1078_v40 = vadd.f32 %v1077_v37, %v11265_v47  ;;  %v1079_v41 = vpop.f32.mrb[11].mxu1 }
 0x13f   : > { %v960_v42 = vadd.f32 %v959_v39, %v11270_v49  ;;  %v1080_v48 = vadd.f32 %v1079_v41, %v11270_v49 }
 0x140   : > { %v11332_v50 = vpack.c.bf16 %v958_v38, %v954_v29  ;;  %v11334_v51 = vpack.c.bf16 %v1078_v40, %v1074_v31 }
 0x141   : > { %v11336_v52 = vpack.c.bf16 %v960_v42, %v956_v33  ;;  %v11338_v53 = vpack.c.bf16 %v1080_v48, %v1076_v36 }
 0x142   : > { %1417 = vrot.lane.b32.xlu0 %v11282_v3, %s10953_s19  ;;  %1315 = vrot.lane.b32.xlu1 %v11304_v22, %s10952_s25 }
 0x143   : > { %v963_v54 = vpop.f32.mrb[12].mxu0  ;;  %9832 = vmatprep.subr.msk.bf16.mxu1 %vm1685_vm0, %v11336_v52  ;;  %v1705_v55 = vsel %vm1685_vm0, %v11336_v52, 0  ;;  %v1083_v56 = vpop.f32.mrb[12].mxu1 }
 0x144   : > { %v964_v57 = vadd.f32 %v963_v54, %v11265_v47  ;;  %v965_v58 = vpop.f32.mrb[13].mxu0  ;;  %9259 = vmatpush3.bf16.xpose.msra.mxu1 %v1705_v55  ;;  %v1084_v59 = vadd.f32 %v1083_v56, %v11265_v47  ;;  %v1085_v60 = vpop.f32.mrb[13].mxu1 }
 0x145   : > { %v966_v61 = vadd.f32 %v965_v58, %v11270_v49  ;;  %v967_v62 = vpop.f32.mrb[14].mxu0  ;;  %v1086_v63 = vadd.f32 %v1085_v60, %v11270_v49  ;;  %v1087_v0 = vpop.f32.mrb[14].mxu1 }
 0x146   : > { %v968_v5 = vadd.f32 %v967_v62, %v11265_v47  ;;  %v969_v6 = vpop.f32.mrb[15].mxu0  ;;  %1425 = vrot.lane.b32.xlu0 %v11282_v3, %s10952_s25  ;;  %1391 = vrot.lane.b32.xlu1 %v11306_v23, %s10953_s19  ;;  %v1088_v7 = vadd.f32 %v1087_v0, %v11265_v47  ;;  %v1089_v8 = vpop.f32.mrb[15].mxu1 }
 0x147   : > { %v970_v9 = vadd.f32 %v969_v6, %v11270_v49  ;;  %v1090_v10 = vadd.f32 %v1089_v8, %v11270_v49 }
 0x148   : > { %v11361_v11 = vpack.c.bf16 %v968_v5, %v964_v57  ;;  %v11363_v12 = vpack.c.bf16 %v1088_v7, %v1084_v59 }
 0x149   : > { %v11365_v13 = vpack.c.bf16 %v970_v9, %v966_v61  ;;  %v11367_v14 = vpack.c.bf16 %v1090_v10, %v1086_v63 }
 0x14a   : > { %1433 = vrot.lane.b32.xlu0 %v11282_v3, %s10954_s29  ;;  %1399 = vrot.lane.b32.xlu1 %v11306_v23, %s10952_s25 }
 0x14b   : > { %9833 = vmatprep.subr.msk.bf16.mxu1 %vm1685_vm0, %v11365_v13  ;;  %v1708_v16 = vsel %vm1685_vm0, %v11365_v13, 0  ;;  %v973_v17 = vpop.f32.mrb[16].mxu0 }
 0x14c   : > { %9261 = vmatpush3.bf16.xpose.msra.mxu1 %v1708_v16  ;;  %v974_v18 = vadd.f32 %v973_v17, %v11265_v47  ;;  %v975_v19 = vpop.f32.mrb[17].mxu0  ;;  %v9224_v20 = vpop.f32.mrb[16].mxu1 }
 0x14d   : > { %v976_v45 = vadd.f32 %v975_v19, %v11270_v49  ;;  %v977_v21 = vpop.f32.mrb[18].mxu0  ;;  %v1135_v3 = vadd.f32 %v9224_v20, %v11370_v15  ;;  %v1126_v26 = vpop.f32.mrb[17].mxu1 }
 0x14e   : > { %1509 = vrot.lane.b32.xlu0 %v11284_v4, %s10952_s25  ;;  %1407 = vrot.lane.b32.xlu1 %v11306_v23, %s10954_s29  ;;  %v978_v27 = vadd.f32 %v977_v21, %v11265_v47  ;;  %v1127_v28 = vadd.f32 %v1126_v26, %v11370_v15  ;;  %v9225_v29 = vpop.f32.mrb[18].mxu1  ;;  %v979_v30 = vpop.f32.mrb[19].mxu0 }
 0x14f   : > { %v1138_v31 = vadd.f32 %v9225_v29, %v11370_v15  ;;  %v980_v32 = vadd.f32 %v979_v30, %v11270_v49  ;;  %v1129_v33 = vpop.f32.mrb[19].mxu1 }
 0x150   : > { %v11391_v35 = vpack.c.bf16 %v978_v27, %v974_v18  ;;  %v1130_v36 = vadd.f32 %v1129_v33, %v11370_v15 }
 0x151   : > { %v11394_v37 = vpack.c.bf16 %v1138_v31, %v1135_v3  ;;  %v11396_v38 = vpack.c.bf16 %v980_v32, %v976_v45 }
 0x152   : > { %1517 = vrot.lane.b32.xlu0 %v11284_v4, %s10954_s29  ;;  %1435 = vrot.lane.b32.xlu1 %v11308_v24, %s10954_s29  ;;  %v11402_v39 = vpack.c.bf16 %v1130_v36, %v1127_v28 }
 0x153   : > { %9263 = vmatmul.mubr.msk.bf16.vlgmr.msra.gmra.mrb[48].mxu1 %vm1685_vm0, %v11304_v22  ;;  %v983_v40 = vpop.f32.mrb[20].mxu0 }
 0x154   : > { %9266 = vmatprep.mubr.msk.bf16.mxu1 %vm1685_vm0, %v11332_v50  ;;  %v984_v41 = vadd.f32 %v983_v40, %v11265_v47  ;;  %v985_v42 = vpop.f32.mrb[21].mxu0  ;;  %v9228_v48 = vpop.f32.mrb[20].mxu1 }
 0x155   : > { %v986_v54 = vadd.f32 %v985_v42, %v11270_v49  ;;  %v987_v55 = vpop.f32.mrb[22].mxu0  ;;  %v1151_v56 = vadd.f32 %v9228_v48, %v11370_v15  ;;  %v1142_v57 = vpop.f32.mrb[21].mxu1 }
 0x156   : > { %1323 = vrot.lane.b32.xlu0 %v11304_v22, %s10954_s29  ;;  %1503 = vrot.lane.b32.xlu1 %v11310_v25, %s10953_s19  ;;  %v988_v58 = vadd.f32 %v987_v55, %v11265_v47  ;;  %v1143_v59 = vadd.f32 %v1142_v57, %v11370_v15  ;;  %v9229_v60 = vpop.f32.mrb[22].mxu1  ;;  %v989_v61 = vpop.f32.mrb[23].mxu0 }
 0x157   : > { %v1154_v62 = vadd.f32 %v9229_v60, %v11370_v15  ;;  %v990_v63 = vadd.f32 %v989_v61, %v11270_v49  ;;  %v1145_v0 = vpop.f32.mrb[23].mxu1 }
 0x158   : > { %v11419_v1 = vpack.c.bf16 %v988_v58, %v984_v41  ;;  %v1146_v5 = vadd.f32 %v1145_v0, %v11370_v15 }
 0x159   : > { %v11422_v6 = vpack.c.bf16 %v1154_v62, %v1151_v56  ;;  %v11424_v22 = vpack.c.bf16 %v990_v63, %v986_v54 }
 0x15a   : > { %1419 = vrot.lane.b32.xlu0 %v11308_v24, %s10953_s19  ;;  %1519 = vrot.lane.b32.xlu1 %v11310_v25, %s10954_s29  ;;  %v11430_v7 = vpack.c.bf16 %v1146_v5, %v1143_v59 }
 0x15b   : > { %16687 = vst [vmem:[#allocation9_spill] sm:$0xff] %v11422_v6  ;;  %9267 = vmatmul.mubr.msk.bf16.gmra.mrb[52].mxu1 %vm1685_vm0, %v11361_v11  ;;  %v993_v8 = vpop.f32.mrb[24].mxu0 }
 0x15c   : > { %v994_v9 = vadd.f32 %v993_v8, %v11265_v47  ;;  %v995_v10 = vpop.f32.mrb[25].mxu0  ;;  %v9232_v16 = vpop.f32.mrb[24].mxu1 }
 0x15d   : > { %v996_v17 = vadd.f32 %v995_v10, %v11270_v49  ;;  %v997_v18 = vpop.f32.mrb[26].mxu0  ;;  %v1167_v19 = vadd.f32 %v9232_v16, %v11370_v15  ;;  %v1158_v20 = vpop.f32.mrb[25].mxu1 }
 0x15e   : > { %1427 = vrot.lane.b32.xlu0 %v11308_v24, %s10952_s25  ;;  %1309 = vrot.lane.b32.xlu1 %v11332_v50, %s10953_s19  ;;  %v998_v45 = vadd.f32 %v997_v18, %v11265_v47  ;;  %v999_v21 = vpop.f32.mrb[27].mxu0  ;;  %v1159_v3 = vadd.f32 %v1158_v20, %v11370_v15  ;;  %v9233_v26 = vpop.f32.mrb[26].mxu1 }
 0x15f   : > { %v1000_v27 = vadd.f32 %v999_v21, %v11270_v49  ;;  %v1170_v28 = vadd.f32 %v9233_v26, %v11370_v15  ;;  %v1161_v29 = vpop.f32.mrb[27].mxu1 }
 0x160   : > { %v11445_v30 = vpack.c.bf16 %v998_v45, %v994_v9  ;;  %v1162_v31 = vadd.f32 %v1161_v29, %v11370_v15 }
 0x161   : > { %v11448_v32 = vpack.c.bf16 %v1000_v27, %v996_v17  ;;  %v11450_v24 = vpack.c.bf16 %v1170_v28, %v1167_v19 }
 0x162   : > { %1511 = vrot.lane.b32.xlu0 %v11310_v25, %s10952_s25  ;;  %1317 = vrot.lane.b32.xlu1 %v11332_v50, %s10952_s25  ;;  %v11456_v33 = vpack.c.bf16 %v1162_v31, %v1159_v3 }
 0x163   : > { %16688 = vst [vmem:[#allocation10_spill] sm:$0xff] %v11450_v24  ;;  %v1003_v36 = vpop.f32.mrb[28].mxu0 }
 0x164   : > { %16689 = vst [vmem:[#allocation11_spill] sm:$0xff] %v11456_v33  ;;  %v1004_v40 = vadd.f32 %v1003_v36, %v11265_v47  ;;  %v1005_v41 = vpop.f32.mrb[29].mxu0  ;;  %v9236_v42 = vpop.f32.mrb[28].mxu1 }
 0x165   : > { %v1006_v48 = vadd.f32 %v1005_v41, %v11270_v49  ;;  %v1007_v54 = vpop.f32.mrb[30].mxu0  ;;  %v1183_v55 = vadd.f32 %v9236_v42, %v11370_v15  ;;  %v1174_v56 = vpop.f32.mrb[29].mxu1 }
 0x166   : > { %1393 = vrot.lane.b32.xlu0 %v11334_v51, %s10953_s19  ;;  %1325 = vrot.lane.b32.xlu1 %v11332_v50, %s10954_s29  ;;  %v1008_v57 = vadd.f32 %v1007_v54, %v11265_v47  ;;  %v1009_v58 = vpop.f32.mrb[31].mxu0  ;;  %v1175_v59 = vadd.f32 %v1174_v56, %v11370_v15  ;;  %v9237_v60 = vpop.f32.mrb[30].mxu1 }
 0x167   : > { %v1010_v61 = vadd.f32 %v1009_v58, %v11270_v49  ;;  %v1186_v62 = vadd.f32 %v9237_v60, %v11370_v15  ;;  %v1177_v63 = vpop.f32.mrb[31].mxu1 }
 0x168   : > { %v11469_v0 = vpack.c.bf16 %v1008_v57, %v1004_v40  ;;  %v1178_v5 = vadd.f32 %v1177_v63, %v11370_v15 }
 0x169   : > { %v11472_v8 = vpack.c.bf16 %v1010_v61, %v1006_v48  ;;  %v11474_v9 = vpack.c.bf16 %v1186_v62, %v1183_v55 }
 0x16a   : > { %1401 = vrot.lane.b32.xlu0 %v11334_v51, %s10952_s25  ;;  %1421 = vrot.lane.b32.xlu1 %v11336_v52, %s10953_s19  ;;  %v11480_v50 = vpack.c.bf16 %v1178_v5, %v1175_v59 }
 0x16b   : > { %16690 = vst [vmem:[#allocation12_spill] sm:$0xff] %v11474_v9  ;;  %v1013_v10 = vpop.f32.mrb[32].mxu0 }
 0x16c   : > { %16691 = vst [vmem:[#allocation13_spill] sm:$0xff] %v11480_v50  ;;  %v1014_v16 = vadd.f32 %v1013_v10, %v11265_v47  ;;  %v1015_v17 = vpop.f32.mrb[33].mxu0 }
 0x16d   : > { %v1016_v18 = vadd.f32 %v1015_v17, %v11270_v49  ;;  %v1017_v19 = vpop.f32.mrb[34].mxu0 }
 0x16e   : > { %1409 = vrot.lane.b32.xlu0 %v11334_v51, %s10954_s29  ;;  %1437 = vrot.lane.b32.xlu1 %v11336_v52, %s10954_s29  ;;  %v1018_v20 = vadd.f32 %v1017_v19, %v11265_v47  ;;  %v1019_v45 = vpop.f32.mrb[35].mxu0 }
 0x16f   : > { %v1020_v21 = vadd.f32 %v1019_v45, %v11270_v49 }
 0x170   : > { %v11490_v3 = vpack.c.bf16 %v1018_v20, %v1014_v16 }
 0x171   : > { %v11492_v26 = vpack.c.bf16 %v1020_v21, %v1016_v18 }
 0x172   : > { %1429 = vrot.lane.b32.xlu0 %v11336_v52, %s10952_s25  ;;  %1521 = vrot.lane.b32.xlu1 %v11338_v53, %s10954_s29 }
 0x173   : > { %v1023_v27 = vpop.f32.mrb[36].mxu0 }
 0x174   : > { %v1024_v28 = vadd.f32 %v1023_v27, %v11265_v47  ;;  %v1025_v29 = vpop.f32.mrb[37].mxu0 }
 0x175   : > { %v1026_v31 = vadd.f32 %v1025_v29, %v11270_v49  ;;  %v1027_v36 = vpop.f32.mrb[38].mxu0 }
 0x176   : > { %1505 = vrot.lane.b32.xlu0 %v11338_v53, %s10953_s19  ;;  %1311 = vrot.lane.b32.xlu1 %v11361_v11, %s10953_s19  ;;  %v1028_v40 = vadd.f32 %v1027_v36, %v11265_v47  ;;  %v1029_v41 = vpop.f32.mrb[39].mxu0 }
 0x177   : > { %v1030_v52 = vadd.f32 %v1029_v41, %v11270_v49 }
 0x178   : > { %v11506_v42 = vpack.c.bf16 %v1028_v40, %v1024_v28 }
 0x179   : > { %v11508_v48 = vpack.c.bf16 %v1030_v52, %v1026_v31 }
 0x17a   : > { %1513 = vrot.lane.b32.xlu0 %v11338_v53, %s10952_s25  ;;  %1327 = vrot.lane.b32.xlu1 %v11361_v11, %s10954_s29 }
 0x17b   : > { %v1033_v54 = vpop.f32.mrb[40].mxu0 }
 0x17c   : > { %v1034_v55 = vadd.f32 %v1033_v54, %v11265_v47  ;;  %v1035_v56 = vpop.f32.mrb[41].mxu0 }
 0x17d   : > { %v1036_v57 = vadd.f32 %v1035_v56, %v11270_v49  ;;  %v1037_v58 = vpop.f32.mrb[42].mxu0 }
 0x17e   : > { %1319 = vrot.lane.b32.xlu0 %v11361_v11, %s10952_s25  ;;  %1403 = vrot.lane.b32.xlu1 %v11363_v12, %s10952_s25  ;;  %v1038_v59 = vadd.f32 %v1037_v58, %v11265_v47  ;;  %v1039_v60 = vpop.f32.mrb[43].mxu0 }
 0x17f   : > { %v1040_v61 = vadd.f32 %v1039_v60, %v11270_v49 }
 0x180   : > { %v11522_v62 = vpack.c.bf16 %v1038_v59, %v1034_v55 }
 0x181   : > { %v11524_v63 = vpack.c.bf16 %v1040_v61, %v1036_v57 }
 0x182   : > { %1395 = vrot.lane.b32.xlu0 %v11363_v12, %s10953_s19  ;;  %1411 = vrot.lane.b32.xlu1 %v11363_v12, %s10954_s29 }
 0x183   : > { %v1043_v5 = vpop.f32.mrb[44].mxu0 }
 0x184   : > { %v1044_v11 = vadd.f32 %v1043_v5, %v11265_v47  ;;  %v1045_v10 = vpop.f32.mrb[45].mxu0 }
 0x185   : > { %v1046_v16 = vadd.f32 %v1045_v10, %v11270_v49  ;;  %v1047_v17 = vpop.f32.mrb[46].mxu0 }
 0x186   : > { %1431 = vrot.lane.b32.xlu0 %v11365_v13, %s10952_s25  ;;  %1423 = vrot.lane.b32.xlu1 %v11365_v13, %s10953_s19  ;;  %v1048_v18 = vadd.f32 %v1047_v17, %v11265_v47  ;;  %v1049_v19 = vpop.f32.mrb[47].mxu0  ;;  %v9240_v47 = vpop.f32.mrb[32].mxu1 }
 0x187   : > { %v1050_v20 = vadd.f32 %v1049_v19, %v11270_v49  ;;  %v1199_v49 = vadd.f32 %v9240_v47, %v11370_v15 }
 0x188   : > { %v11538_v45 = vpack.c.bf16 %v1048_v18, %v1044_v11 }
 0x189   : > { %v11540_v21 = vpack.c.bf16 %v1050_v20, %v1046_v16 }
 0x18a   : > { %1439 = vrot.lane.b32.xlu0 %v11365_v13, %s10954_s29  ;;  %1515 = vrot.lane.b32.xlu1 %v11367_v14, %s10952_s25  ;;  %v1190_v13 = vpop.f32.mrb[33].mxu1 }
 0x18b   : > { %v1191_v27 = vadd.f32 %v1190_v13, %v11370_v15  ;;  %v9241_v28 = vpop.f32.mrb[34].mxu1 }
 0x18c   : > { %v1202_v29 = vadd.f32 %v9241_v28, %v11370_v15  ;;  %v1193_v31 = vpop.f32.mrb[35].mxu1 }
 0x18d   : > { %v1194_v36 = vadd.f32 %v1193_v31, %v11370_v15  ;;  %v9244_v40 = vpop.f32.mrb[36].mxu1 }
 0x18e   : > { %1507 = vrot.lane.b32.xlu0 %v11367_v14, %s10953_s19  ;;  %1523 = vrot.lane.b32.xlu1 %v11367_v14, %s10954_s29  ;;  %v11566_v41 = vpack.c.bf16 %v1202_v29, %v1199_v49  ;;  %v1215_v54 = vadd.f32 %v9244_v40, %v11370_v15  ;;  %v1206_v55 = vpop.f32.mrb[37].mxu1 }
 0x18f   : > { %v11568_v52 = vpack.c.bf16 %v1194_v36, %v1191_v27  ;;  %v1207_v56 = vadd.f32 %v1206_v55, %v11370_v15  ;;  %v9245_v57 = vpop.f32.mrb[38].mxu1 }
 0x190   : > { %16692 = vst [vmem:[#allocation14_spill] sm:$0xff] %v11566_v41  ;;  %v1218_v58 = vadd.f32 %v9245_v57, %v11370_v15  ;;  %v1209_v59 = vpop.f32.mrb[39].mxu1 }
 0x191   : > { %16693 = vst [vmem:[#allocation15_spill] sm:$0xff] %v11568_v52  ;;  %v1210_v60 = vadd.f32 %v1209_v59, %v11370_v15  ;;  %v9248_v61 = vpop.f32.mrb[40].mxu1 }
 0x192   : > { %1341 = vrot.lane.b32.xlu0 %v11391_v35, %s10952_s25  ;;  %1333 = vrot.lane.b32.xlu1 %v11391_v35, %s10953_s19  ;;  %v11578_v5 = vpack.c.bf16 %v1218_v58, %v1215_v54  ;;  %v1231_v11 = vadd.f32 %v9248_v61, %v11370_v15  ;;  %v1222_v10 = vpop.f32.mrb[41].mxu1 }
 0x193   : > { %v11585_v16 = vpack.c.bf16 %v1210_v60, %v1207_v56  ;;  %v1223_v17 = vadd.f32 %v1222_v10, %v11370_v15  ;;  %v9249_v18 = vpop.f32.mrb[42].mxu1 }
 0x194   : > { %16694 = vst [vmem:[#allocation16_spill] sm:$0xff] %v11578_v5  ;;  %v1234_v19 = vadd.f32 %v9249_v18, %v11370_v15  ;;  %v1225_v20 = vpop.f32.mrb[43].mxu1 }
 0x195   : > { %16695 = vst [vmem:[#allocation17_spill] sm:$0xff] %v11585_v16  ;;  %v1226_v13 = vadd.f32 %v1225_v20, %v11370_v15  ;;  %v9252_v28 = vpop.f32.mrb[44].mxu1 }
 0x196   : > { %1349 = vrot.lane.b32.xlu0 %v11391_v35, %s10954_s29  ;;  %1531 = vrot.lane.b32.xlu1 %v11394_v37, %s10953_s19  ;;  %v11592_v27 = vpack.c.bf16 %v1234_v19, %v1231_v11  ;;  %v1247_v31 = vadd.f32 %v9252_v28, %v11370_v15  ;;  %v1238_v36 = vpop.f32.mrb[45].mxu1 }
 0x197   : > { %v11598_v29 = vpack.c.bf16 %v1226_v13, %v1223_v17  ;;  %v9253_v40 = vpop.f32.mrb[46].mxu1  ;;  %v1239_v56 = vadd.f32 %v1238_v36, %v11370_v15 }
 0x198   : > { %16696 = vst [vmem:[#allocation18_spill] sm:$0xff] %v11592_v27  ;;  %v1250_v57 = vadd.f32 %v9253_v40, %v11370_v15  ;;  %v1241_v58 = vpop.f32.mrb[47].mxu1 }
 0x199   : > { %16697 = vst [vmem:[#allocation19_spill] sm:$0xff] %v11598_v29  ;;  %v1242_v60 = vadd.f32 %v1241_v58, %v11370_v15 }
 0x19a   : > { %1543 = vrot.lane.b32.xlu0 %v11394_v37, %s10952_s25  ;;  %1555 = vrot.lane.b32.xlu1 %v11394_v37, %s10954_s29  ;;  %v11611_v59 = vpack.c.bf16 %v1250_v57, %v1247_v31 }
 0x19b   : > { %v11618_v10 = vpack.c.bf16 %v1242_v60, %v1239_v56 }
 0x19c   : > { %16698 = vst [vmem:[#allocation20_spill] sm:$0xff] %v11611_v59 }
 0x19d   : > { %16699 = vst [vmem:[#allocation21_spill] sm:$0xff] %v11618_v10 }
 0x19e   : > { %1453 = vrot.lane.b32.xlu0 %v11396_v38, %s10952_s25  ;;  %1445 = vrot.lane.b32.xlu1 %v11396_v38, %s10953_s19 }
 0x1a2   : > { %1461 = vrot.lane.b32.xlu0 %v11396_v38, %s10954_s29  ;;  %1529 = vrot.lane.b32.xlu1 %v11402_v39, %s10953_s19 }
 0x1a4   : > { %v1314_v47 = vpop.permute.xlu0 %1313  ;;  %v1306_v49 = vpop.permute.xlu1 %1305 }
 0x1a5   : > { %9278 = vmatprep.mubr.msk.bf16.mxu1 %vm1685_vm0, %v1306_v49  ;;  %9294 = vmatprep.mubr.msk.bf16.mxu0 %vm1685_vm0, %v1314_v47 }
 0x1a6   : > { %1541 = vrot.lane.b32.xlu0 %v11402_v39, %s10952_s25  ;;  %1553 = vrot.lane.b32.xlu1 %v11402_v39, %s10954_s29 }
 0x1a8   : > { %v11601_v54 = vpop.permute.xlu0 %1321  ;;  %v11603_v55 = vpop.permute.xlu1 %1389 }
 0x1aa   : > { %1351 = vrot.lane.b32.xlu0 %v11419_v1, %s10954_s29  ;;  %1335 = vrot.lane.b32.xlu1 %v11419_v1, %s10953_s19 }
 0x1ac   : > { %v11614_v61 = vpop.permute.xlu0 %1397  ;;  %v11616_v11 = vpop.permute.xlu1 %1501 }
 0x1ae   : > { %1547 = vrot.lane.b32.xlu0 %v11422_v6, %s10952_s25  ;;  %1343 = vrot.lane.b32.xlu1 %v11419_v1, %s10952_s25 }
 0x1b0   : > { %v11624_v17 = vpop.permute.xlu0 %1405  ;;  %v11626_v18 = vpop.permute.xlu1 %1307 }
 0x1b2   : > { %1455 = vrot.lane.b32.xlu0 %v11424_v22, %s10952_s25  ;;  %1535 = vrot.lane.b32.xlu1 %v11422_v6, %s10953_s19 }
 0x1b4   : > { %v1418_v15 = vpop.permute.xlu0 %1417  ;;  %v11632_v19 = vpop.permute.xlu1 %1315 }
 0x1b5   : > { %9834 = vmatprep.subr.msk.bf16.mxu1 %vm1685_vm0, %v1418_v15  ;;  %v1788_v20 = vsel %vm1685_vm0, %v1418_v15, 0 }
 0x1b6   : > { %1533 = vrot.lane.b32.xlu0 %v11430_v7, %s10953_s19  ;;  %1559 = vrot.lane.b32.xlu1 %v11422_v6, %s10954_s29 }
 0x1b7   : > { %9271 = vmatpush3.bf16.xpose.msra.mxu1 %v1788_v20 }
 0x1b8   : > { %v1426_v47 = vpop.permute.xlu0 %1425  ;;  %v11640_v49 = vpop.permute.xlu1 %1391 }
 0x1b9   : > { %9838 = vmatprep.subr.msk.bf16.mxu0 %vm1685_vm0, %v1426_v47  ;;  %v1877_v13 = vsel %vm1685_vm0, %v1426_v47, 0 }
 0x1ba   : > { %1545 = vrot.lane.b32.xlu0 %v11430_v7, %s10952_s25  ;;  %9287 = vmatpush3.bf16.xpose.msra.mxu0 %v1877_v13 }
 0x1bb   : > { %1447 = vrot.lane.b32.xlu1 %v11424_v22, %s10953_s19 }
 0x1bc   : > { %v11648_v28 = vpop.permute.xlu0 %1433  ;;  %v11650_v31 = vpop.permute.xlu1 %1399 }
 0x1be   : > { %1557 = vrot.lane.b32.xlu0 %v11430_v7, %s10954_s29 }
 0x1bf   : > { %1463 = vrot.lane.b32.xlu1 %v11424_v22, %s10954_s29 }
 0x1c0   : > { %v11656_v36 = vpop.permute.xlu0 %1509  ;;  %v11658_v40 = vpop.permute.xlu1 %1407 }
 0x1c1   : > { %16700 = vst [vmem:[#allocation22_spill] sm:$0xff] %v11658_v40 }
 0x1c2   : > { %1449 = vrot.lane.b32.xlu0 %v11448_v32, %s10953_s19 }
 0x1c3   : > { %1337 = vrot.lane.b32.xlu1 %v11445_v30, %s10953_s19 }
 0x1c4   : > { %v11664_v56 = vpop.permute.xlu0 %1517  ;;  %v11666_v57 = vpop.permute.xlu1 %1435 }
 0x1c6   : > { %1457 = vrot.lane.b32.xlu0 %v11448_v32, %s10952_s25 }
 0x1c7   : > { %1345 = vrot.lane.b32.xlu1 %v11445_v30, %s10952_s25 }
 0x1c8   : > { %v11672_v58 = vpop.permute.xlu0 %1323  ;;  %v11674_v60 = vpop.permute.xlu1 %1503 }
 0x1ca   : > { %1569 = vrot.lane.b32.xlu0 %v11456_v33, %s10953_s19 }
 0x1cb   : > { %1353 = vrot.lane.b32.xlu1 %v11445_v30, %s10954_s29 }
 0x1cc   : > { %v1420_v15 = vpop.permute.xlu0 %1419  ;;  %v11680_v20 = vpop.permute.xlu1 %1519 }
 0x1cd   : > { %9835 = vmatprep.subr.msk.bf16.mxu1 %vm1685_vm0, %v1420_v15  ;;  %v1791_v47 = vsel %vm1685_vm0, %v1420_v15, 0 }
 0x1ce   : > { %1347 = vrot.lane.b32.xlu0 %v11469_v0, %s10952_s25  ;;  %9273 = vmatpush3.bf16.xpose.msra.mxu1 %v1791_v47 }
 0x1cf   : > { %1571 = vrot.lane.b32.xlu1 %v11450_v24, %s10953_s19 }
 0x1d0   : > { %v1428_v13 = vpop.permute.xlu0 %1427  ;;  %v11688_v46 = vpop.permute.xlu1 %1309 }
 0x1d1   : > { %9839 = vmatprep.subr.msk.bf16.mxu0 %vm1685_vm0, %v1428_v13  ;;  %v1880_v34 = vsel %vm1685_vm0, %v1428_v13, 0 }
 0x1d2   : > { %1451 = vrot.lane.b32.xlu0 %v11472_v8, %s10953_s19  ;;  %9289 = vmatpush3.bf16.xpose.msra.mxu0 %v1880_v34 }
 0x1d3   : > { %1465 = vrot.lane.b32.xlu1 %v11448_v32, %s10954_s29 }
 0x1d4   : > { %v11696_v15 = vpop.permute.xlu0 %1511  ;;  %v11698_v47 = vpop.permute.xlu1 %1317 }
 0x1d6   : > { %1459 = vrot.lane.b32.xlu0 %v11472_v8, %s10952_s25 }
 0x1d7   : > { %1339 = vrot.lane.b32.xlu1 %v11469_v0, %s10953_s19 }
 0x1d8   : > { %v11704_v43 = vpop.permute.xlu0 %1393  ;;  %v11706_v13 = vpop.permute.xlu1 %1325 }
 0x1da   : > { %1467 = vrot.lane.b32.xlu0 %v11472_v8, %s10954_s29 }
 0x1db   : > { %1355 = vrot.lane.b32.xlu1 %v11469_v0, %s10954_s29 }
 0x1dc   : > { %v11712_v34 = vpop.permute.xlu0 %1401  ;;  %v1422_v44 = vpop.permute.xlu1 %1421 }
 0x1dd   : > { %9836 = vmatprep.subr.msk.bf16.mxu1 %vm1685_vm0, %v1422_v44  ;;  %v1794_v59 = vsel %vm1685_vm0, %v1422_v44, 0 }
 0x1de   : > { %1573 = vrot.lane.b32.xlu0 %v11480_v50, %s10953_s19  ;;  %9275 = vmatpush3.bf16.xpose.msra.mxu1 %v1794_v59 }
 0x1df   : > { %1361 = vrot.lane.b32.xlu1 %v11490_v3, %s10953_s19 }
 0x1e0   : > { %v11720_v10 = vpop.permute.xlu0 %1409  ;;  %v11722_v27 = vpop.permute.xlu1 %1437 }
 0x1e1   : > { %16701 = vst [vmem:[#allocation23_spill] sm:$0xff] %v11720_v10 }
 0x1e2   : > { %1369 = vrot.lane.b32.xlu0 %v11490_v3, %s10952_s25 }
 0x1e3   : > { %1473 = vrot.lane.b32.xlu1 %v11492_v26, %s10953_s19 }
 0x1e4   : > { %v1430_v29 = vpop.permute.xlu0 %1429  ;;  %v11728_v5 = vpop.permute.xlu1 %1521 }
 0x1e5   : > { %9840 = vmatprep.subr.msk.bf16.mxu0 %vm1685_vm0, %v1430_v29  ;;  %v1883_v44 = vsel %vm1685_vm0, %v1430_v29, 0 }
 0x1e6   : > { %1377 = vrot.lane.b32.xlu0 %v11490_v3, %s10954_s29  ;;  %9291 = vmatpush3.bf16.xpose.msra.mxu0 %v1883_v44 }
 0x1e7   : > { %1363 = vrot.lane.b32.xlu1 %v11506_v42, %s10953_s19 }
 0x1e8   : > { %v11736_v59 = vpop.permute.xlu0 %1505  ;;  %v1312_v16 = vpop.permute.xlu1 %1311 }
 0x1ea   : > { %1481 = vrot.lane.b32.xlu0 %v11492_v26, %s10952_s25 }
 0x1eb   : > { %1371 = vrot.lane.b32.xlu1 %v11506_v42, %s10952_s25 }
 0x1ec   : > { %v11742_v41 = vpop.permute.xlu0 %1513  ;;  %v11744_v52 = vpop.permute.xlu1 %1327 }
 0x1ee   : > { %1489 = vrot.lane.b32.xlu0 %v11492_v26, %s10954_s29 }
 0x1ef   : > { %1475 = vrot.lane.b32.xlu1 %v11508_v48, %s10953_s19 }
 0x1f0   : > { %v1320_v29 = vpop.permute.xlu0 %1319  ;;  %v11750_v44 = vpop.permute.xlu1 %1403 }
 0x1f2   : > { %1379 = vrot.lane.b32.xlu0 %v11506_v42, %s10954_s29 }
 0x1f3   : > { %1491 = vrot.lane.b32.xlu1 %v11508_v48, %s10954_s29 }
 0x1f4   : > { %v11756_v9 = vpop.permute.xlu0 %1395  ;;  %v11758_v50 = vpop.permute.xlu1 %1411 }
 0x1f5   : > { %16702 = vst [vmem:[#allocation24_spill] sm:$0xff] %v11758_v50 }
 0x1f6   : > { %1483 = vrot.lane.b32.xlu0 %v11508_v48, %s10952_s25 }
 0x1f7   : > { %1365 = vrot.lane.b32.xlu1 %v11522_v62, %s10953_s19 }
 0x1f8   : > { %v1432_v24 = vpop.permute.xlu0 %1431  ;;  %v1424_v33 = vpop.permute.xlu1 %1423 }
 0x1f9   : > { %9837 = vmatprep.subr.msk.bf16.mxu1 %vm1685_vm0, %v1424_v33  ;;  %9841 = vmatprep.subr.msk.bf16.mxu0 %vm1685_vm0, %v1432_v24  ;;  %v1886_v10 = vsel %vm1685_vm0, %v1432_v24, 0  ;;  %v1797_v40 = vsel %vm1685_vm0, %v1424_v33, 0 }
 0x1fa   : > { %1477 = vrot.lane.b32.xlu0 %v11524_v63, %s10953_s19  ;;  %9293 = vmatpush3.bf16.xpose.msra.mxu0 %v1886_v10  ;;  %v1966_v10 = vsel %vm1685_vm0, %v11648_v28, 0 }
 0x1fb   : > { %1373 = vrot.lane.b32.xlu1 %v11522_v62, %s10952_s25  ;;  %9277 = vmatpush3.bf16.xpose.msra.mxu1 %v1797_v40 }
 0x1fc   : > { %9842 = vmatprep.subr.msk.bf16.mxu1 %vm1685_vm0, %v11648_v28  ;;  %9846 = vmatprep.subr.msk.bf16.mxu0 %vm1685_vm0, %v11396_v38  ;;  %v1440_v50 = vpop.permute.xlu0 %1439  ;;  %v11776_v6 = vpop.permute.xlu1 %1515  ;;  %v1969_v28 = vsel %vm1685_vm0, %v11666_v57, 0 }
 0x1fe   : > { %1485 = vrot.lane.b32.xlu0 %v11524_v63, %s10952_s25 }
 0x1ff   : > { %1381 = vrot.lane.b32.xlu1 %v11522_v62, %s10954_s29 }
 0x200   : > { %v11782_v24 = vpop.permute.xlu0 %1507  ;;  %v11784_v33 = vpop.permute.xlu1 %1523 }
 0x201   : > { %9295 = vmatmul.mubr.msk.bf16.vlgmr.msra.gmra.mrb[48].mxu0 %vm1685_vm0, %v11632_v19  ;;  %v2055_v19 = vsel %vm1685_vm0, %v11396_v38, 0 }
 0x202   : > { %9279 = vmatmul.mubr.msk.bf16.vlgmr.msra.gmra.mrb[56].mxu1 %vm1685_vm0, %v11626_v18  ;;  %1375 = vrot.lane.b32.xlu0 %v11538_v45, %s10952_s25 }
 0x203   : > { %1493 = vrot.lane.b32.xlu1 %v11524_v63, %s10954_s29  ;;  %9282 = vmatprep.mubr.msk.bf16.mxu1 %vm1685_vm0, %v11688_v46 }
 0x204   : > { %9298 = vmatprep.mubr.msk.bf16.mxu0 %vm1685_vm0, %v11698_v47  ;;  %9303 = vmatpush3.bf16.xpose.msra.mxu1 %v1966_v10  ;;  %v11802_v18 = vpop.permute.xlu0 %1341  ;;  %v11804_v40 = vpop.permute.xlu1 %1333  ;;  %v2058_v47 = vsel %vm1685_vm0, %v11424_v22, 0 }
 0x205   : > { %9319 = vmatpush3.bf16.xpose.msra.mxu0 %v2055_v19  ;;  %9843 = vmatprep.subr.msk.bf16.mxu1 %vm1685_vm0, %v11666_v57  ;;  %v1972_v57 = vsel %vm1685_vm0, %v11722_v27, 0 }
 0x206   : > { %9847 = vmatprep.subr.msk.bf16.mxu0 %vm1685_vm0, %v11424_v22  ;;  %1479 = vrot.lane.b32.xlu0 %v11540_v21, %s10953_s19 }
 0x207   : > { %1367 = vrot.lane.b32.xlu1 %v11538_v45, %s10953_s19 }
 0x208   : > { %v11814_v46 = vpop.permute.xlu0 %1349  ;;  %v11816_v38 = vpop.permute.xlu1 %1531 }
 0x209   : > { %16703 = vst [vmem:[#allocation25_spill] sm:$0xff] %v11816_v38  ;;  %9299 = vmatmul.mubr.msk.bf16.gmra.mrb[52].mxu0 %vm1685_vm0, %v1320_v29 }
 0x20a   : > { %9283 = vmatmul.mubr.msk.bf16.gmra.mrb[60].mxu1 %vm1685_vm0, %v1312_v16  ;;  %1487 = vrot.lane.b32.xlu0 %v11540_v21, %s10952_s25 }
 0x20b   : > { %1383 = vrot.lane.b32.xlu1 %v11538_v45, %s10954_s29  ;;  %9326 = vmatprep.mubr.msk.bf16.mxu0 %vm1685_vm0, %v11391_v35 }
 0x20c   : > { %9305 = vmatpush3.bf16.xpose.msra.mxu1 %v1969_v28  ;;  %9310 = vmatprep.mubr.msk.bf16.mxu1 %vm1685_vm0, %v11601_v54  ;;  %v11832_v16 = vpop.permute.xlu0 %1543  ;;  %v11834_v29 = vpop.permute.xlu1 %1555  ;;  %v2061_v54 = vsel %vm1685_vm0, %v11448_v32, 0 }
 0x20d   : > { %16704 = vst [vmem:[#allocation26_spill] sm:$0xff] %v11832_v16  ;;  %16705 = vst [vmem:[#allocation27_spill] sm:$0xff] %v11834_v29  ;;  %9321 = vmatpush3.bf16.xpose.msra.mxu0 %v2058_v47  ;;  %9844 = vmatprep.subr.msk.bf16.mxu1 %vm1685_vm0, %v11722_v27  ;;  %v1975_v27 = vsel %vm1685_vm0, %v1440_v50, 0 }
 0x20e   : > { %9848 = vmatprep.subr.msk.bf16.mxu0 %vm1685_vm0, %v11448_v32  ;;  %1495 = vrot.lane.b32.xlu0 %v11540_v21, %s10954_s29  ;;  %v2064_v32 = vsel %vm1685_vm0, %v11472_v8, 0 }
 0x210   : > { %v1454_v35 = vpop.permute.xlu0 %1453  ;;  %v1446_v22 = vpop.permute.xlu1 %1445 }
 0x214   : > { %9307 = vmatpush3.bf16.xpose.msra.mxu1 %v1972_v57  ;;  %v11846_v10 = vpop.permute.xlu0 %1461  ;;  %v11848_v19 = vpop.permute.xlu1 %1529 }
 0x215   : > { %9323 = vmatpush3.bf16.xpose.msra.mxu0 %v2061_v54  ;;  %9845 = vmatprep.subr.msk.bf16.mxu1 %vm1685_vm0, %v1440_v50 }
 0x216   : > { %9849 = vmatprep.subr.msk.bf16.mxu0 %vm1685_vm0, %v11472_v8  ;;  %v2233_v8 = vsel %vm1685_vm0, %v1454_v35, 0 }
 0x218   : > { %v11853_v28 = vpop.permute.xlu0 %1541  ;;  %v11855_v47 = vpop.permute.xlu1 %1553 }
 0x219   : > { %16706 = vst [vmem:[#allocation28_spill] sm:$0xff] %v11855_v47 }
 0x21c   : > { %9309 = vmatpush3.bf16.xpose.msra.mxu1 %v1975_v27  ;;  %v11860_v57 = vpop.permute.xlu0 %1351  ;;  %v11862_v29 = vpop.permute.xlu1 %1335 }
 0x21d   : > { %9325 = vmatpush3.bf16.xpose.msra.mxu0 %v2064_v32  ;;  %9850 = vmatprep.subr.msk.bf16.mxu1 %vm1685_vm0, %v1446_v22  ;;  %v2144_v32 = vsel %vm1685_vm0, %v1446_v22, 0 }
 0x21e   : > { %9854 = vmatprep.subr.msk.bf16.mxu0 %vm1685_vm0, %v1454_v35 }
 0x220   : > { %v11866_v54 = vpop.permute.xlu0 %1547  ;;  %v11868_v16 = vpop.permute.xlu1 %1343 }
 0x221   : > { %16707 = vst [vmem:[#allocation29_spill] sm:$0xff] %v11866_v54 }
 0x223   : > { %9311 = vmatmul.mubr.msk.bf16.vlgmr.msra.gmra.mrb[64].mxu1 %vm1685_vm0, %v11672_v58 }
 0x224   : > { %9327 = vmatmul.mubr.msk.bf16.vlgmr.msra.gmra.mrb[56].mxu0 %vm1685_vm0, %v11419_v1  ;;  %9314 = vmatprep.mubr.msk.bf16.mxu1 %vm1685_vm0, %v11706_v13  ;;  %v1456_v50 = vpop.permute.xlu0 %1455  ;;  %v11877_v27 = vpop.permute.xlu1 %1535 }
 0x225   : > { %16708 = vst [vmem:[#allocation30_spill] sm:$0xff] %v11877_v27  ;;  %9330 = vmatprep.mubr.msk.bf16.mxu0 %vm1685_vm0, %v11445_v30  ;;  %9351 = vmatpush3.bf16.xpose.msra.mxu0 %v2233_v8 }
 0x226   : > { %9335 = vmatpush3.bf16.xpose.msra.mxu1 %v2144_v32  ;;  %v9264_v54 = vpop.f32.mrb[48].mxu1  ;;  %9855 = vmatprep.subr.msk.bf16.mxu0 %vm1685_vm0, %v1456_v50  ;;  %v2236_v32 = vsel %vm1685_vm0, %v1456_v50, 0 }
 0x227   : > { %v1744_v58 = vpop.f32.mrb[49].mxu1  ;;  %v11883_v1 = vmul.f32 0.17677669, %v9264_v54 }
 0x228   : > { %v11885_v35 = vpop.permute.xlu0 %1533  ;;  %v9265_v47 = vpop.f32.mrb[50].mxu1  ;;  %v11893_v30 = vmul.f32 0.17677669, %v1744_v58 }
 0x229   : > { %v1747_v13 = vpop.f32.mrb[51].mxu1  ;;  %v11887_v38 = vpop.permute.xlu1 %1559  ;;  %v3245_v54 = vsel %vm3238_vm1, %v11883_v1, -inf }
 0x22a   : > { %16709 = vst [vmem:[#allocation31_spill] sm:$0xff] %v11887_v38  ;;  %v11889_v27 = vmul.f32 0.17677669, %v1747_v13  ;;  %16711 = vst [vmem:[#allocation33_spill] sm:$0xff] %v11893_v30  ;;  %v11912_v38 = vmul.f32 0.17677669, %v9265_v47 }
 0x22b   : > { %9315 = vmatmul.mubr.msk.bf16.gmra.mrb[68].mxu1 %vm1685_vm0, %v11744_v52 }
 0x22c   : > { %16710 = vst [vmem:[#allocation32_spill] sm:$0xff] %v11889_v27  ;;  %9331 = vmatmul.mubr.msk.bf16.gmra.mrb[60].mxu0 %vm1685_vm0, %v11469_v0  ;;  %9342 = vmatprep.mubr.msk.bf16.mxu1 %vm1685_vm0, %v11804_v40  ;;  %v11899_v22 = vpop.permute.xlu0 %1545  ;;  %v3242_v8 = vsel %vm3238_vm1, %v11889_v27, -inf  ;;  %v3248_v47 = vsel %vm3238_vm1, %v11912_v38, -inf }
 0x22d   : > { %16712 = vst [vmem:[#allocation34_spill] sm:$0xff] %v11899_v22  ;;  %9358 = vmatprep.mubr.msk.bf16.mxu0 %vm1685_vm0, %v11802_v18  ;;  %3246 = vmax.xlane.f32.xlu0 %v3245_v54  ;;  %v1448_v52 = vpop.permute.xlu1 %1447  ;;  %v3239_v18 = vsel %vm3238_vm1, %v11893_v30, -inf }
 0x22e   : > { %v9268_v58 = vpop.f32.mrb[52].mxu1  ;;  %9851 = vmatprep.subr.msk.bf16.mxu1 %vm1685_vm0, %v1448_v52  ;;  %v2147_v0 = vsel %vm1685_vm0, %v1448_v52, 0  ;;  %9353 = vmatpush3.bf16.xpose.msra.mxu0 %v2236_v32 }
 0x22f   : > { %3243 = vmax.xlane.f32.xlu1 %v3242_v8  ;;  %v11910_v40 = vmul.f32 0.17677669, %v9268_v58  ;;  %v1760_v13 = vpop.f32.mrb[53].mxu1  ;;  %9337 = vmatpush3.bf16.xpose.msra.mxu1 %v2147_v0 }
 0x230   : > { %v11914_v22 = vpop.permute.xlu0 %1557  ;;  %v11918_v54 = vmul.f32 0.17677669, %v1760_v13  ;;  %v9269_v50 = vpop.f32.mrb[54].mxu1 }
 0x231   : > { %16713 = vst [vmem:[#allocation35_spill] sm:$0xff] %v11910_v40  ;;  %16714 = vst [vmem:[#allocation36_spill] sm:$0xff] %v11914_v22  ;;  %3240 = vmax.xlane.f32.xlu0 %v3239_v18  ;;  %v1464_v27 = vpop.permute.xlu1 %1463  ;;  %v3257_v52 = vsel %vm3238_vm1, %v11910_v40, -inf  ;;  %v1763_v8 = vpop.f32.mrb[55].mxu1  ;;  %v11922_v32 = vmul.f32 0.17677669, %v9269_v50 }
 0x232   : > { %16715 = vst [vmem:[#allocation37_spill] sm:$0xff] %v11918_v54  ;;  %v3251_v0 = vsel %vm3238_vm1, %v11918_v54, -inf  ;;  %v11932_v40 = vmul.f32 0.17677669, %v1763_v8 }
 0x233   : > { %16716 = vst [vmem:[#allocation38_spill] sm:$0xff] %v11922_v32  ;;  %3258 = vmax.xlane.f32.xlu1 %v3257_v52  ;;  %v3260_v22 = vsel %vm3238_vm1, %v11922_v32, -inf }
 0x234   : > { %v1450_v58 = vpop.permute.xlu0 %1449 }
 0x235   : > { %3249 = vmax.xlane.f32.xlu0 %v3248_v47  ;;  %v1338_v13 = vpop.permute.xlu1 %1337  ;;  %9852 = vmatprep.subr.msk.bf16.mxu1 %vm1685_vm0, %v1450_v58  ;;  %v2150_v18 = vsel %vm1685_vm0, %v1450_v58, 0  ;;  %v3254_v47 = vsel %vm3238_vm1, %v11932_v40, -inf }
 0x237   : > { %3252 = vmax.xlane.f32.xlu1 %v3251_v0  ;;  %9339 = vmatpush3.bf16.xpose.msra.mxu1 %v2150_v18 }
 0x238   : > { %v1458_v50 = vpop.permute.xlu0 %1457 }
 0x239   : > { %3261 = vmax.xlane.f32.xlu0 %v3260_v22  ;;  %v1346_v52 = vpop.permute.xlu1 %1345  ;;  %9856 = vmatprep.subr.msk.bf16.mxu0 %vm1685_vm0, %v1458_v50  ;;  %v2239_v54 = vsel %vm1685_vm0, %v1458_v50, 0 }
 0x23a   : > { %9355 = vmatpush3.bf16.xpose.msra.mxu0 %v2239_v54 }
 0x23c   : > { %v11938_v30 = vpop.permute.xlu0 %1569 }
 0x23d   : > { %16717 = vst [vmem:[#allocation39_spill] sm:$0xff] %v11938_v30  ;;  %3255 = vmax.xlane.f32.xlu0 %v3254_v47  ;;  %v11940_v58 = vpop.permute.xlu1 %1353 }
 0x240   : > { %v1348_v8 = vpop.permute.xlu0 %1347 }
 0x241   : > { %v11942_v32 = vpop.permute.xlu1 %1571 }
 0x242   : > { %16718 = vst [vmem:[#allocation40_spill] sm:$0xff] %v11942_v32 }
 0x244   : > { %v1452_v0 = vpop.permute.xlu0 %1451 }
 0x245   : > { %9853 = vmatprep.subr.msk.bf16.mxu1 %vm1685_vm0, %v1452_v0  ;;  %v2153_v22 = vsel %vm1685_vm0, %v1452_v0, 0  ;;  %v1466_v18 = vpop.permute.xlu1 %1465  ;;  %v2322_v0 = vsel %vm1685_vm0, %v11846_v10, 0 }
 0x246   : > { %9341 = vmatpush3.bf16.xpose.msra.mxu1 %v2153_v22 }
 0x247   : > { %9858 = vmatprep.subr.msk.bf16.mxu1 %vm1685_vm0, %v11846_v10 }
 0x248   : > { %v1460_v50 = vpop.permute.xlu0 %1459 }
 0x249   : > { %9857 = vmatprep.subr.msk.bf16.mxu0 %vm1685_vm0, %v1460_v50  ;;  %v2242_v54 = vsel %vm1685_vm0, %v1460_v50, 0  ;;  %v1340_v47 = vpop.permute.xlu1 %1339  ;;  %v2411_v50 = vsel %vm1685_vm0, %v11492_v26, 0 }
 0x24a   : > { %9357 = vmatpush3.bf16.xpose.msra.mxu0 %v2242_v54 }
 0x24b   : > { %9862 = vmatprep.subr.msk.bf16.mxu0 %vm1685_vm0, %v11492_v26 }
 0x24c   : > { %v1468_v32 = vpop.permute.xlu0 %1467 }
 0x24d   : > { %9343 = vmatmul.mubr.msk.bf16.vlgmr.msra.gmra.mrb[72].mxu1 %vm1685_vm0, %v11862_v29  ;;  %v1356_v29 = vpop.permute.xlu1 %1355 }
 0x24e   : > { %9346 = vmatprep.mubr.msk.bf16.mxu1 %vm1685_vm0, %v1338_v13  ;;  %9367 = vmatpush3.bf16.xpose.msra.mxu1 %v2322_v0  ;;  %v2325_v13 = vsel %vm1685_vm0, %v1464_v27, 0  ;;  %v2331_v0 = vsel %vm1685_vm0, %v1468_v32, 0 }
 0x24f   : > { %9859 = vmatprep.subr.msk.bf16.mxu1 %vm1685_vm0, %v1464_v27 }
 0x250   : > { %v11958_v22 = vpop.permute.xlu0 %1573 }
 0x251   : > { %16719 = vst [vmem:[#allocation41_spill] sm:$0xff] %v11958_v22  ;;  %9359 = vmatmul.mubr.msk.bf16.vlgmr.msra.gmra.mrb[64].mxu0 %vm1685_vm0, %v11868_v16  ;;  %v1362_v16 = vpop.permute.xlu1 %1361 }
 0x252   : > { %9362 = vmatprep.mubr.msk.bf16.mxu0 %vm1685_vm0, %v1346_v52  ;;  %9383 = vmatpush3.bf16.xpose.msra.mxu0 %v2411_v50  ;;  %v2414_v52 = vsel %vm1685_vm0, %v11508_v48, 0 }
 0x253   : > { %9863 = vmatprep.subr.msk.bf16.mxu0 %vm1685_vm0, %v11508_v48 }
 0x254   : > { %v1370_v10 = vpop.permute.xlu0 %1369 }
 0x255   : > { %9347 = vmatmul.mubr.msk.bf16.gmra.mrb[76].mxu1 %vm1685_vm0, %v1340_v47  ;;  %v1474_v54 = vpop.permute.xlu1 %1473 }
 0x256   : > { %9369 = vmatpush3.bf16.xpose.msra.mxu1 %v2325_v13  ;;  %9374 = vmatprep.mubr.msk.bf16.mxu1 %vm1685_vm0, %v11814_v46  ;;  %v2328_v46 = vsel %vm1685_vm0, %v1466_v18, 0  ;;  %v2420_v13 = vsel %vm1685_vm0, %v11540_v21, 0 }
 0x257   : > { %9860 = vmatprep.subr.msk.bf16.mxu1 %vm1685_vm0, %v1466_v18 }
 0x258   : > { %v11972_v26 = vpop.permute.xlu0 %1377 }
 0x259   : > { %9363 = vmatmul.mubr.msk.bf16.gmra.mrb[68].mxu0 %vm1685_vm0, %v1348_v8  ;;  %v2417_v8 = vsel %vm1685_vm0, %v11524_v63, 0  ;;  %v1364_v48 = vpop.permute.xlu1 %1363 }
 0x25a   : > { %9385 = vmatpush3.bf16.xpose.msra.mxu0 %v2414_v52  ;;  %9390 = vmatprep.mubr.msk.bf16.mxu0 %vm1685_vm0, %v11490_v3  ;;  %v2500_v52 = vsel %vm1685_vm0, %v1474_v54, 0 }
 0x25b   : > { %9864 = vmatprep.subr.msk.bf16.mxu0 %vm1685_vm0, %v11524_v63 }
 0x25c   : > { %v1482_v27 = vpop.permute.xlu0 %1481 }
 0x25d   : > { %v1372_v18 = vpop.permute.xlu1 %1371 }
 0x25e   : > { %9371 = vmatpush3.bf16.xpose.msra.mxu1 %v2328_v46 }
 0x25f   : > { %9861 = vmatprep.subr.msk.bf16.mxu1 %vm1685_vm0, %v1468_v32 }
 0x260   : > { %v1490_v47 = vpop.permute.xlu0 %1489 }
 0x261   : > { %v1476_v32 = vpop.permute.xlu1 %1475 }
 0x262   : > { %9387 = vmatpush3.bf16.xpose.msra.mxu0 %v2417_v8 }
 0x263   : > { %9865 = vmatprep.subr.msk.bf16.mxu0 %vm1685_vm0, %v11540_v21  ;;  %v2589_v21 = vsel %vm1685_vm0, %v1482_v27, 0 }
 0x264   : > { %v11987_v3 = vpop.permute.xlu0 %1379 }
 0x266   : > { %9373 = vmatpush3.bf16.xpose.msra.mxu1 %v2331_v0 }
 0x267   : > { %9866 = vmatprep.subr.msk.bf16.mxu1 %vm1685_vm0, %v1474_v54 }
 0x268   : > { %v1484_v50 = vpop.permute.xlu0 %1483 }
 0x26a   : > { %9389 = vmatpush3.bf16.xpose.msra.mxu0 %v2420_v13  ;;  %v2678_v13 = vsel %vm1685_vm0, %v1490_v47, 0 }
 0x26b   : > { %9870 = vmatprep.subr.msk.bf16.mxu0 %vm1685_vm0, %v1482_v27 }
 0x26c   : > { %v1478_v63 = vpop.permute.xlu0 %1477 }
 0x26d   : > { %9375 = vmatmul.mubr.msk.bf16.vlgmr.msra.gmra.mrb[80].mxu1 %vm1685_vm0, %v11860_v57  ;;  %v2503_v57 = vsel %vm1685_vm0, %v1476_v32, 0  ;;  %v2506_v27 = vsel %vm1685_vm0, %v1478_v63, 0 }
 0x26e   : > { %9378 = vmatprep.mubr.msk.bf16.mxu1 %vm1685_vm0, %v11940_v58  ;;  %9399 = vmatpush3.bf16.xpose.msra.mxu1 %v2500_v52  ;;  %v1492_v58 = vpop.permute.xlu1 %1491  ;;  %v2767_v52 = vsel %vm1685_vm0, %v11284_v4, 0 }
 0x26f   : > { %9867 = vmatprep.subr.msk.bf16.mxu1 %vm1685_vm0, %v1476_v32 }
 0x270   : > { %v1486_v46 = vpop.permute.xlu0 %1485 }
 0x271   : > { %9391 = vmatmul.mubr.msk.bf16.vlgmr.msra.gmra.mrb[72].mxu0 %vm1685_vm0, %v11506_v42  ;;  %v2592_v42 = vsel %vm1685_vm0, %v1484_v50, 0 }
 0x272   : > { %9394 = vmatprep.mubr.msk.bf16.mxu0 %vm1685_vm0, %v11522_v62  ;;  %9415 = vmatpush3.bf16.xpose.msra.mxu0 %v2589_v21  ;;  %v1366_v62 = vpop.permute.xlu1 %1365 }
 0x273   : > { %9871 = vmatprep.subr.msk.bf16.mxu0 %vm1685_vm0, %v1484_v50 }
 0x274   : > { %v1376_v54 = vpop.permute.xlu0 %1375 }
 0x275   : > { %9379 = vmatmul.mubr.msk.bf16.gmra.mrb[84].mxu1 %vm1685_vm0, %v1356_v29 }
 0x276   : > { %9401 = vmatpush3.bf16.xpose.msra.mxu1 %v2503_v57  ;;  %9406 = vmatprep.mubr.msk.bf16.mxu1 %vm1685_vm0, %v1362_v16  ;;  %v2595_v16 = vsel %vm1685_vm0, %v1486_v46, 0  ;;  %v1374_v8 = vpop.permute.xlu1 %1373 }
 0x277   : > { %9868 = vmatprep.subr.msk.bf16.mxu1 %vm1685_vm0, %v1478_v63 }
 0x278   : > { %v1480_v29 = vpop.permute.xlu0 %1479 }
 0x279   : > { %9395 = vmatmul.mubr.msk.bf16.gmra.mrb[76].mxu0 %vm1685_vm0, %v11538_v45  ;;  %v2509_v45 = vsel %vm1685_vm0, %v1480_v29, 0 }
 0x27a   : > { %9417 = vmatpush3.bf16.xpose.msra.mxu0 %v2592_v42  ;;  %9422 = vmatprep.mubr.msk.bf16.mxu0 %vm1685_vm0, %v1370_v10  ;;  %v1382_v10 = vpop.permute.xlu1 %1381 }
 0x27b   : > { %9872 = vmatprep.subr.msk.bf16.mxu0 %vm1685_vm0, %v1486_v46  ;;  %v16720_v46 = vld [vmem:[#allocation9_spill] sm:$0xff] }
 0x27c   : > { %v1488_v0 = vpop.permute.xlu0 %1487 }
 0x27d   : > { %v2598_v50 = vsel %vm1685_vm0, %v1488_v0, 0 }
 0x27e   : > { %9403 = vmatpush3.bf16.xpose.msra.mxu1 %v2506_v27  ;;  %v1494_v63 = vpop.permute.xlu1 %1493 }
 0x27f   : > { %9869 = vmatprep.subr.msk.bf16.mxu1 %vm1685_vm0, %v1480_v29 }
 0x280   : > { %v1496_v32 = vpop.permute.xlu0 %1495 }
 0x282   : > { %9419 = vmatpush3.bf16.xpose.msra.mxu0 %v2595_v16 }
 0x283   : > { %9873 = vmatprep.subr.msk.bf16.mxu0 %vm1685_vm0, %v1488_v0 }
 0x286   : > { %9405 = vmatpush3.bf16.xpose.msra.mxu1 %v2509_v45 }
 0x287   : > { %9874 = vmatprep.subr.msk.bf16.mxu1 %vm1685_vm0, %v1490_v47  ;;  %v2681_v47 = vsel %vm1685_vm0, %v1492_v58, 0 }
 0x28a   : > { %9421 = vmatpush3.bf16.xpose.msra.mxu0 %v2598_v50 }
 0x28b   : > { %9878 = vmatprep.subr.msk.bf16.mxu0 %vm1685_vm0, %v11284_v4  ;;  %v2770_v4 = vsel %vm1685_vm0, %v11310_v25, 0 }
 0x28d   : > { %9407 = vmatmul.mubr.msk.bf16.vlgmr.msra.gmra.mrb[88].mxu1 %vm1685_vm0, %v1364_v48  ;;  %v1368_v48 = vpop.permute.xlu1 %1367 }
 0x28e   : > { %9410 = vmatprep.mubr.msk.bf16.mxu1 %vm1685_vm0, %v1366_v62  ;;  %9431 = vmatpush3.bf16.xpose.msra.mxu1 %v2678_v13 }
 0x28f   : > { %9875 = vmatprep.subr.msk.bf16.mxu1 %vm1685_vm0, %v1492_v58 }
 0x291   : > { %9423 = vmatmul.mubr.msk.bf16.vlgmr.msra.gmra.mrb[80].mxu0 %vm1685_vm0, %v1372_v18  ;;  %v2684_v18 = vsel %vm1685_vm0, %v1494_v63, 0 }
 0x292   : > { %9426 = vmatprep.mubr.msk.bf16.mxu0 %vm1685_vm0, %v1374_v8  ;;  %9447 = vmatpush3.bf16.xpose.msra.mxu0 %v2767_v52 }
 0x293   : > { %9879 = vmatprep.subr.msk.bf16.mxu0 %vm1685_vm0, %v11310_v25  ;;  %v2687_v25 = vsel %vm1685_vm0, %v1496_v32, 0 }
 0x295   : > { %9411 = vmatmul.mubr.msk.bf16.gmra.mrb[92].mxu1 %vm1685_vm0, %v1368_v48 }
 0x296   : > { %9433 = vmatpush3.bf16.xpose.msra.mxu1 %v2681_v47  ;;  %9438 = vmatprep.mubr.msk.bf16.mxu1 %vm1685_vm0, %v11972_v26  ;;  %v2773_v26 = vsel %vm1685_vm0, %v11338_v53, 0 }
 0x297   : > { %9876 = vmatprep.subr.msk.bf16.mxu1 %vm1685_vm0, %v1494_v63  ;;  %v3043_v63 = vsel %vm1685_vm0, %v11784_v33, 0 }
 0x299   : > { %9427 = vmatmul.mubr.msk.bf16.gmra.mrb[84].mxu0 %vm1685_vm0, %v1376_v54 }
 0x29a   : > { %9449 = vmatpush3.bf16.xpose.msra.mxu0 %v2770_v4  ;;  %9454 = vmatprep.mubr.msk.bf16.mxu0 %vm1685_vm0, %v11280_v2  ;;  %v2776_v2 = vsel %vm1685_vm0, %v11367_v14, 0 }
 0x29b   : > { %9880 = vmatprep.subr.msk.bf16.mxu0 %vm1685_vm0, %v11338_v53  ;;  %v2856_v53 = vsel %vm1685_vm0, %v11616_v11, 0 }
 0x29e   : > { %9435 = vmatpush3.bf16.xpose.msra.mxu1 %v2684_v18 }
 0x29f   : > { %9877 = vmatprep.subr.msk.bf16.mxu1 %vm1685_vm0, %v1496_v32 }
 0x2a2   : > { %9451 = vmatpush3.bf16.xpose.msra.mxu0 %v2773_v26 }
 0x2a3   : > { %9881 = vmatprep.subr.msk.bf16.mxu0 %vm1685_vm0, %v11367_v14  ;;  %v2945_v14 = vsel %vm1685_vm0, %v11656_v36, 0 }
 0x2a6   : > { %9437 = vmatpush3.bf16.xpose.msra.mxu1 %v2687_v25  ;;  %v16721_v25 = vld [vmem:[#allocation22_spill] sm:$0xff] }
 0x2a7   : > { %9882 = vmatprep.subr.msk.bf16.mxu1 %vm1685_vm0, %v11616_v11  ;;  %v1384_v11 = vpop.permute.xlu1 %1383 }
 0x2aa   : > { %9453 = vmatpush3.bf16.xpose.msra.mxu0 %v2776_v2 }
 0x2ab   : > { %9886 = vmatprep.subr.msk.bf16.mxu0 %vm1685_vm0, %v11656_v36 }
 0x2ad   : > { %9439 = vmatmul.mubr.msk.bf16.vlgmr.msra.gmra.mrb[96].mxu1 %vm1685_vm0, %v11987_v3  ;;  %v2859_v3 = vsel %vm1685_vm0, %v11674_v60, 0 }
 0x2ae   : > { %9442 = vmatprep.mubr.msk.bf16.mxu1 %vm1685_vm0, %v1382_v10  ;;  %9463 = vmatpush3.bf16.xpose.msra.mxu1 %v2856_v53  ;;  %v16722_v53 = vld [vmem:[#allocation23_spill] sm:$0xff] }
 0x2af   : > { %9883 = vmatprep.subr.msk.bf16.mxu1 %vm1685_vm0, %v11674_v60 }
 0x2b1   : > { %9455 = vmatmul.mubr.msk.bf16.vlgmr.msra.gmra.mrb[88].mxu0 %vm1685_vm0, %v11306_v23  ;;  %v2948_v23 = vsel %vm1685_vm0, %v11696_v15, 0 }
 0x2b2   : > { %9458 = vmatprep.mubr.msk.bf16.mxu0 %vm1685_vm0, %v11334_v51  ;;  %9479 = vmatpush3.bf16.xpose.msra.mxu0 %v2945_v14  ;;  %v2862_v51 = vsel %vm1685_vm0, %v11736_v59, 0 }
 0x2b3   : > { %9887 = vmatprep.subr.msk.bf16.mxu0 %vm1685_vm0, %v11696_v15 }
 0x2b5   : > { %9443 = vmatmul.mubr.msk.bf16.gmra.mrb[100].mxu1 %vm1685_vm0, %v1384_v11  ;;  %v16723_v11 = vld [vmem:[#allocation25_spill] sm:$0xff] }
 0x2b6   : > { %9465 = vmatpush3.bf16.xpose.msra.mxu1 %v2859_v3  ;;  %9470 = vmatprep.mubr.msk.bf16.mxu1 %vm1685_vm0, %v11603_v55  ;;  %v2865_v55 = vsel %vm1685_vm0, %v11782_v24, 0 }
 0x2b7   : > { %9884 = vmatprep.subr.msk.bf16.mxu1 %vm1685_vm0, %v11736_v59 }
 0x2b9   : > { %9459 = vmatmul.mubr.msk.bf16.gmra.mrb[92].mxu0 %vm1685_vm0, %v11363_v12  ;;  %v2951_v12 = vsel %vm1685_vm0, %v11742_v41, 0 }
 0x2ba   : > { %9481 = vmatpush3.bf16.xpose.msra.mxu0 %v2948_v23  ;;  %9486 = vmatprep.mubr.msk.bf16.mxu0 %vm1685_vm0, %v11614_v61  ;;  %v2954_v61 = vsel %vm1685_vm0, %v11776_v6, 0 }
 0x2bb   : > { %9888 = vmatprep.subr.msk.bf16.mxu0 %vm1685_vm0, %v11742_v41  ;;  %v3034_v41 = vsel %vm1685_vm0, %v11664_v56, 0 }
 0x2be   : > { %9467 = vmatpush3.bf16.xpose.msra.mxu1 %v2862_v51 }
 0x2bf   : > { %9885 = vmatprep.subr.msk.bf16.mxu1 %vm1685_vm0, %v11782_v24 }
 0x2c2   : > { %9483 = vmatpush3.bf16.xpose.msra.mxu0 %v2951_v12 }
 0x2c3   : > { %9889 = vmatprep.subr.msk.bf16.mxu0 %vm1685_vm0, %v11776_v6 }
 0x2c6   : > { %9469 = vmatpush3.bf16.xpose.msra.mxu1 %v2865_v55  ;;  %v16724_v55 = vld [vmem:[#allocation24_spill] sm:$0xff] }
 0x2c7   : > { %9890 = vmatprep.subr.msk.bf16.mxu1 %vm1685_vm0, %v11664_v56 }
 0x2ca   : > { %9485 = vmatpush3.bf16.xpose.msra.mxu0 %v2954_v61  ;;  %v3247_v61 = vpop.xlane.xlu0 %3246 }
 0x2cb   : > { %9510 = vmatprep.subr.bf16.mxu0 %v11402_v39 }
 0x2cd   : > { %9471 = vmatmul.mubr.msk.bf16.vlgmr.msra.gmra.mrb[104].mxu1 %vm1685_vm0, %v11640_v49 }
 0x2ce   : > { %9474 = vmatprep.mubr.msk.bf16.mxu1 %vm1685_vm0, %v11704_v43  ;;  %9495 = vmatpush3.bf16.xpose.msra.mxu1 %v3034_v41  ;;  %v3037_v43 = vsel %vm1685_vm0, %v11680_v20, 0 }
 0x2cf   : > { %9891 = vmatprep.subr.msk.bf16.mxu1 %vm1685_vm0, %v11680_v20 }
 0x2d1   : > { %9487 = vmatmul.mubr.msk.bf16.vlgmr.msra.gmra.mrb[96].mxu0 %vm1685_vm0, %v11650_v31 }
 0x2d2   : > { %9490 = vmatprep.mubr.msk.bf16.mxu0 %vm1685_vm0, %v11712_v34  ;;  %9511 = vmatpush3.bf16.msra.mxu0 %v11402_v39 }
 0x2d3   : > { %9512 = vmatprep.subr.bf16.mxu0 %v11394_v37 }
 0x2d4   : > { %v9296_v6 = vpop.f32.mrb[48].mxu0 }
 0x2d5   : > { %v9280_v49 = vpop.f32.mrb[56].mxu1  ;;  %v1922_v36 = vpop.f32.mrb[49].mxu0  ;;  %9475 = vmatmul.mubr.msk.bf16.gmra.mrb[108].mxu1 %vm1685_vm0, %v11756_v9  ;;  %v12129_v34 = vmul.f32 0.17677669, %v9296_v6 }
 0x2d6   : > { %v12122_v56 = vmul.f32 0.17677669, %v9280_v49  ;;  %v1833_v60 = vpop.f32.mrb[57].mxu1  ;;  %v9297_v31 = vpop.f32.mrb[50].mxu0  ;;  %9497 = vmatpush3.bf16.xpose.msra.mxu1 %v3037_v43  ;;  %9502 = vmatprep.mubr.msk.bf16.mxu1 %vm1685_vm0, %v11624_v17  ;;  %v12155_v8 = vmul.f32 0.17677669, %v1922_v36 }
 0x2d7   : > { %v9281_v39 = vpop.f32.mrb[58].mxu1  ;;  %9513 = vmatpush3.bf16.msra.mxu0 %v11394_v37  ;;  %v1925_v15 = vpop.f32.mrb[51].mxu0  ;;  %9892 = vmatprep.subr.msk.bf16.mxu1 %vm1685_vm0, %v11728_v5  ;;  %v12138_v17 = vmul.f32 0.17677669, %v9297_v31  ;;  %v12143_v24 = vmul.f32 0.17677669, %v1833_v60 }
 0x2d8   : > { %v12131_v9 = vmul.f32 0.17677669, %v9281_v39  ;;  %v1836_v20 = vpop.f32.mrb[59].mxu1  ;;  %9514 = vmatprep.subr.bf16.mxu0 %v11430_v7  ;;  %v3269_v59 = vsel %vm3238_vm1, %v12122_v56, -inf  ;;  %v3293_v57 = vsel %vm3238_vm1, %v12129_v34, -inf  ;;  %v3287_v13 = vsel %vm3238_vm1, %v12155_v8, -inf }
 0x2d9   : > { %3270 = vmax.xlane.f32.xlu1 %v3269_v59  ;;  %9491 = vmatmul.mubr.msk.bf16.gmra.mrb[100].mxu0 %vm1685_vm0, %v11750_v44  ;;  %v3040_v44 = vsel %vm1685_vm0, %v11728_v5, 0  ;;  %v12150_v42 = vmul.f32 0.17677669, %v1836_v20  ;;  %v3263_v5 = vsel %vm3238_vm1, %v12143_v24, -inf  ;;  %v12162_v45 = vmul.f32 0.17677669, %v1925_v15 }
 0x2da   : > { %v3272_v37 = vsel %vm3238_vm1, %v12131_v9, -inf  ;;  %v16725_v60 = vld [vmem:[#allocation30_spill] sm:$0xff] }
 0x2db   : > { %9515 = vmatpush3.bf16.msra.mxu0 %v11430_v7  ;;  %3273 = vmax.xlane.f32.xlu0 %v3272_v37  ;;  %v3296_v7 = vsel %vm3238_vm1, %v12138_v17, -inf  ;;  %v3266_v10 = vsel %vm3238_vm1, %v12150_v42, -inf  ;;  %v3290_v48 = vsel %vm3238_vm1, %v12162_v45, -inf }
 0x2dc   : > { %9516 = vmatprep.subr.bf16.mxu0 %v16720_v46  ;;  %v9300_v21 = vpop.f32.mrb[52].mxu0 }
 0x2dd   : > { %3294 = vmax.xlane.f32.xlu1 %v3293_v57  ;;  %v9284_v58 = vpop.f32.mrb[60].mxu1  ;;  %v1938_v54 = vpop.f32.mrb[53].mxu0  ;;  %v12177_v47 = vmul.f32 0.17677669, %v9300_v21 }
 0x2de   : > { %v1849_v62 = vpop.f32.mrb[61].mxu1  ;;  %v9301_v29 = vpop.f32.mrb[54].mxu0  ;;  %9499 = vmatpush3.bf16.xpose.msra.mxu1 %v3040_v44  ;;  %v12166_v50 = vmul.f32 0.17677669, %v9284_v58  ;;  %v12199_v3 = vmul.f32 0.17677669, %v1938_v54 }
 0x2df   : > { %9517 = vmatpush3.bf16.msra.mxu0 %v16720_v46  ;;  %3297 = vmax.xlane.f32.xlu0 %v3296_v7  ;;  %v9285_v27 = vpop.f32.mrb[62].mxu1  ;;  %v1941_v16 = vpop.f32.mrb[55].mxu0  ;;  %v12181_v18 = vmul.f32 0.17677669, %v9301_v29  ;;  %v12185_v32 = vmul.f32 0.17677669, %v1849_v62 }
 0x2e0   : > { %v1852_v0 = vpop.f32.mrb[63].mxu1  ;;  %9893 = vmatprep.subr.msk.bf16.mxu1 %vm1685_vm0, %v11784_v33  ;;  %9542 = vmatprep.subr.bf16.mxu0 %v11853_v28  ;;  %v12172_v52 = vmul.f32 0.17677669, %v9285_v27  ;;  %v3281_v4 = vsel %vm3238_vm1, %v12166_v50, -inf  ;;  %v3305_v26 = vsel %vm3238_vm1, %v12177_v47, -inf  ;;  %v16726_v58 = vld [vmem:[#allocation28_spill] sm:$0xff]  ;;  %v3241_v54 = vpop.xlane.xlu0 %3240 }
 0x2e1   : > { %3264 = vmax.xlane.f32.xlu1 %v3263_v5  ;;  %v12191_v2 = vmul.f32 0.17677669, %v1852_v0  ;;  %v3308_v14 = vsel %vm3238_vm1, %v12181_v18, -inf  ;;  %v3275_v23 = vsel %vm3238_vm1, %v12185_v32, -inf  ;;  %v12203_v51 = vmul.f32 0.17677669, %v1941_v16 }
 0x2e2   : > { %v3284_v33 = vsel %vm3238_vm1, %v12172_v52, -inf }
 0x2e3   : > { %3267 = vmax.xlane.f32.xlu0 %v3266_v10  ;;  %v3278_v12 = vsel %vm3238_vm1, %v12191_v2, -inf  ;;  %v3302_v6 = vsel %vm3238_vm1, %v12203_v51, -inf }
 0x2e5   : > { %3288 = vmax.xlane.f32.xlu1 %v3287_v13 }
 0x2e6   : > { %9501 = vmatpush3.bf16.xpose.msra.mxu1 %v3043_v63 }
 0x2e7   : > { %3291 = vmax.xlane.f32.xlu0 %v3290_v48  ;;  %9526 = vmatprep.subr.bf16.mxu1 %v11848_v19  ;;  %v3244_v48 = vpop.xlane.xlu1 %3243 }
 0x2e9   : > { %3282 = vmax.xlane.f32.xlu1 %v3281_v4 }
 0x2eb   : > { %3285 = vmax.xlane.f32.xlu0 %v3284_v33 }
 0x2ed   : > { %3306 = vmax.xlane.f32.xlu1 %v3305_v26  ;;  %9503 = vmatmul.mubr.msk.bf16.vlgmr.msra.gmra.mrb[112].mxu1 %vm1685_vm0, %v16721_v25  ;;  %v3250_v25 = vpop.xlane.xlu0 %3249 }
 0x2ee   : > { %9506 = vmatprep.mubr.msk.bf16.mxu1 %vm1685_vm0, %v16722_v53  ;;  %9527 = vmatpush3.bf16.msra.mxu1 %v11848_v19  ;;  %v3299_v19 = vsel %vm3238_vm1, %v12199_v3, -inf }
 0x2ef   : > { %3309 = vmax.xlane.f32.xlu0 %v3308_v14  ;;  %9528 = vmatprep.subr.bf16.mxu1 %v16723_v11 }
 0x2f1   : > { %3276 = vmax.xlane.f32.xlu1 %v3275_v23  ;;  %v3626_v23 = vsub.f32 %v11912_v38, %v3250_v25 }
 0x2f2   : > { %9529 = vmatpush3.bf16.msra.mxu1 %v16723_v11  ;;  %v3625_v11 = vsub.f32 %v11883_v1, %v3247_v61  ;;  %v3262_v61 = vpop.xlane.xlu0 %3261 }
 0x2f3   : > { %3279 = vmax.xlane.f32.xlu0 %v3278_v12  ;;  %9530 = vmatprep.subr.bf16.mxu1 %v11885_v35  ;;  %v3757_v38 = vmul.f32 1.442695, %v3626_v23 }
 0x2f5   : > { %3300 = vmax.xlane.f32.xlu1 %v3299_v19  ;;  %9507 = vmatmul.mubr.msk.bf16.gmra.mrb[116].mxu1 %vm1685_vm0, %v16724_v55 }
 0x2f6   : > { %v9312_v41 = vpop.f32.mrb[64].mxu1  ;;  %9531 = vmatpush3.bf16.msra.mxu1 %v11885_v35 }
 0x2f7   : > { %v9328_v49 = vpop.f32.mrb[56].mxu0  ;;  %v12216_v36 = vmul.f32 0.17677669, %v9312_v41  ;;  %v2011_v43 = vpop.f32.mrb[65].mxu1  ;;  %3303 = vmax.xlane.f32.xlu0 %v3302_v6  ;;  %9532 = vmatprep.subr.bf16.mxu1 %v16725_v60  ;;  %v16729_v6 = vld [vmem:[#allocation32_spill] sm:$0xff] }
 0x2f8   : > { %v2100_v31 = vpop.f32.mrb[57].mxu0  ;;  %v9313_v39 = vpop.f32.mrb[66].mxu1  ;;  %v12221_v37 = vmul.f32 0.17677669, %v9328_v49  ;;  %v12231_v44 = vmul.f32 0.17677669, %v2011_v43  ;;  %v3624_v49 = vsub.f32 %v16729_v6, %v3244_v48 }
 0x2f9   : > { %v9329_v15 = vpop.f32.mrb[58].mxu0  ;;  %v12219_v20 = vmul.f32 0.17677669, %v9313_v39  ;;  %v2014_v59 = vpop.f32.mrb[67].mxu1  ;;  %v3317_v35 = vsel %vm3238_vm1, %v12216_v36, -inf }
 0x2fa   : > { %v2103_v46 = vpop.f32.mrb[59].mxu0  ;;  %9533 = vmatpush3.bf16.msra.mxu1 %v16725_v60  ;;  %v12226_v21 = vmul.f32 0.17677669, %v9329_v15  ;;  %3318 = vmax.xlane.f32.xlu1 %v3317_v35  ;;  %v3341_v62 = vsel %vm3238_vm1, %v12221_v37, -inf  ;;  %v12235_v7 = vmul.f32 0.17677669, %v2014_v59  ;;  %v3259_v43 = vpop.xlane.xlu1 %3258 }
 0x2fb   : > { %v3320_v57 = vsel %vm3238_vm1, %v12219_v20, -inf  ;;  %9558 = vmatprep.subr.bf16.mxu1 %v16726_v58  ;;  %v12239_v4 = vmul.f32 0.17677669, %v2100_v31  ;;  %v3311_v26 = vsel %vm3238_vm1, %v12231_v44, -inf  ;;  %v12243_v53 = vmul.f32 0.17677669, %v2103_v46  ;;  %v3256_v48 = vpop.xlane.xlu0 %3255 }
 0x2fc   : > { %3321 = vmax.xlane.f32.xlu0 %v3320_v57  ;;  %16727 = vst [vmem:[#allocation9_spill] sm:$0xff] %v12235_v7  ;;  %v3344_v0 = vsel %vm3238_vm1, %v12226_v21, -inf  ;;  %v3314_v14 = vsel %vm3238_vm1, %v12235_v7, -inf  ;;  %v3755_v60 = vmul.f32 1.442695, %v3625_v11  ;;  %v16730_v31 = vld [vmem:[#allocation33_spill] sm:$0xff] }
 0x2fd   : > { %v3335_v19 = vsel %vm3238_vm1, %v12239_v4, -inf  ;;  %v3338_v41 = vsel %vm3238_vm1, %v12243_v53, -inf  ;;  %v3623_v1 = vsub.f32 %v16730_v31, %v3241_v54  ;;  %v3753_v35 = vmul.f32 1.442695, %v3624_v49  ;;  %v16736_v11 = vld [vmem:[#allocation37_spill] sm:$0xff] }
 0x2fe   : > { %v9316_v29 = vpop.f32.mrb[68].mxu1  ;;  %3342 = vmax.xlane.f32.xlu1 %v3341_v62  ;;  %10237 = vpow2.f32 %v3755_v60  ;;  %v16733_v62 = vld [vmem:[#allocation35_spill] sm:$0xff]  ;;  %v3253_v54 = vpop.xlane.xlu1 %3252 }
 0x2ff   : > { %v9332_v27 = vpop.f32.mrb[60].mxu0  ;;  %v2027_v16 = vpop.f32.mrb[69].mxu1  ;;  %v12249_v12 = vmul.f32 0.17677669, %v9316_v29  ;;  %v3751_v57 = vmul.f32 1.442695, %v3623_v1  ;;  %v3629_v29 = vsub.f32 %v16733_v62, %v3259_v43  ;;  %10239 = vpow2.f32 %v3757_v38 }
 0x300   : > { %v2116_v5 = vpop.f32.mrb[61].mxu0  ;;  %3345 = vmax.xlane.f32.xlu0 %v3344_v0  ;;  %v9317_v10 = vpop.f32.mrb[70].mxu1  ;;  %v12259_v39 = vmul.f32 0.17677669, %v9332_v27  ;;  %v16734_v0 = vld [vmem:[#allocation38_spill] sm:$0xff]  ;;  %10241 = vpow2.f32 %v3753_v35  ;;  %v3627_v23 = vsub.f32 %v16736_v11, %v3253_v54 }
 0x301   : > { %v9333_v13 = vpop.f32.mrb[62].mxu0  ;;  %v2030_v63 = vpop.f32.mrb[71].mxu1  ;;  %v12253_v55 = vmul.f32 0.17677669, %v9317_v10  ;;  %v3329_v15 = vsel %vm3238_vm1, %v12249_v12, -inf  ;;  %v3630_v27 = vsub.f32 %v16734_v0, %v3262_v61  ;;  %10243 = vpow2.f32 %v3751_v57 }
 0x302   : > { %v2119_v33 = vpop.f32.mrb[63].mxu0  ;;  %3312 = vmax.xlane.f32.xlu1 %v3311_v26  ;;  %16731 = vst [vmem:[#allocation23_spill] sm:$0xff] %v12259_v39  ;;  %v12263_v59 = vmul.f32 0.17677669, %v9333_v13  ;;  %v12269_v10 = vmul.f32 0.17677669, %v2027_v16  ;;  %v3628_v16 = vsub.f32 %v11932_v40, %v3256_v48 }
 0x303   : > { %16728 = vst [vmem:[#allocation22_spill] sm:$0xff] %v12253_v55  ;;  %v3332_v46 = vsel %vm3238_vm1, %v12253_v55, -inf  ;;  %v3353_v13 = vsel %vm3238_vm1, %v12259_v39, -inf  ;;  %v12273_v26 = vmul.f32 0.17677669, %v2030_v63 }
 0x304   : > { %3315 = vmax.xlane.f32.xlu0 %v3314_v14  ;;  %16732 = vst [vmem:[#allocation25_spill] sm:$0xff] %v12263_v59  ;;  %v3356_v25 = vsel %vm3238_vm1, %v12263_v59, -inf  ;;  %v3763_v14 = vmul.f32 1.442695, %v3629_v29  ;;  %v3323_v6 = vsel %vm3238_vm1, %v12269_v10, -inf }
 0x305   : > { %16735 = vst [vmem:[#allocation24_spill] sm:$0xff] %v12273_v26  ;;  %v12283_v63 = vmul.f32 0.17677669, %v2119_v33  ;;  %v3326_v49 = vsel %vm3238_vm1, %v12273_v26, -inf  ;;  %v3759_v43 = vmul.f32 1.442695, %v3627_v23 }
 0x306   : > { %3336 = vmax.xlane.f32.xlu1 %v3335_v19  ;;  %v3765_v19 = vmul.f32 1.442695, %v3630_v27  ;;  %10245 = vpow2.f32 %v3763_v14  ;;  %v3761_v60 = vmul.f32 1.442695, %v3628_v16 }
 0x307   : > { %16738 = vst [vmem:[#allocation32_spill] sm:$0xff] %v12283_v63 }
 0x308   : > { %3339 = vmax.xlane.f32.xlu0 %v3338_v41  ;;  %v12279_v41 = vmul.f32 0.17677669, %v2116_v5  ;;  %10247 = vpow2.f32 %v3765_v19  ;;  %v12289_v40 = vpop.eup %10237  ;;  %v3350_v5 = vsel %vm3238_vm1, %v12283_v63, -inf }
 0x309   : > { %v12293_v33 = vpop.eup %10239  ;;  %10249 = vpow2.f32 %v3759_v43  ;;  %v4013_v61 = vsel %vm3238_vm1, %v12289_v40, 0.0 }
 0x30a   : > { %3330 = vmax.xlane.f32.xlu1 %v3329_v15  ;;  %16737 = vst [vmem:[#allocation30_spill] sm:$0xff] %v12279_v41  ;;  %v3347_v31 = vsel %vm3238_vm1, %v12279_v41, -inf  ;;  %v12295_v1 = vpop.eup %10241  ;;  %10251 = vpow2.f32 %v3761_v60  ;;  %v4016_v15 = vsel %vm3238_vm1, %v12293_v33, 0.0 }
 0x30b   : > { %v12299_v38 = vpop.eup %10243  ;;  %v4010_v57 = vsel %vm3238_vm1, %v12295_v1, 0.0 }
 0x30c   : > { %3333 = vmax.xlane.f32.xlu0 %v3332_v46  ;;  %v4007_v46 = vsel %vm3238_vm1, %v12299_v38, 0.0 }
 0x30e   : > { %3354 = vmax.xlane.f32.xlu1 %v3353_v13 }
 0x310   : > { %3357 = vmax.xlane.f32.xlu0 %v3356_v25  ;;  %v12305_v35 = vpop.eup %10245 }
 0x311   : > { %v4025_v0 = vsel %vm3238_vm1, %v12305_v35, 0.0 }
 0x312   : > { %3324 = vmax.xlane.f32.xlu1 %v3323_v6  ;;  %v12309_v62 = vpop.eup %10247 }
 0x313   : > { %v12313_v13 = vpop.eup %10249  ;;  %v4028_v48 = vsel %vm3238_vm1, %v12309_v62, 0.0 }
 0x314   : > { %3327 = vmax.xlane.f32.xlu0 %v3326_v49  ;;  %v12317_v14 = vpop.eup %10251  ;;  %v4019_v16 = vsel %vm3238_vm1, %v12313_v13, 0.0 }
 0x315   : > { %v4022_v43 = vsel %vm3238_vm1, %v12317_v14, 0.0 }
 0x316   : > { %3348 = vmax.xlane.f32.xlu1 %v3347_v31 }
 0x318   : > { %3351 = vmax.xlane.f32.xlu0 %v3350_v5 }
 0x31a   : > { %4014 = vadd.xlane.f32.xlu1 %v4013_v61 }
 0x31c   : > { %4017 = vadd.xlane.f32.xlu0 %v4016_v15 }
 0x31e   : > { %4008 = vadd.xlane.f32.xlu1 %v4007_v46 }
 0x320   : > { %4011 = vadd.xlane.f32.xlu0 %v4010_v57  ;;  %v9344_v29 = vpop.f32.mrb[72].mxu1 }
 0x321   : > { %v2189_v54 = vpop.f32.mrb[73].mxu1  ;;  %v12319_v19 = vmul.f32 0.17677669, %v9344_v29 }
 0x322   : > { %v9345_v27 = vpop.f32.mrb[74].mxu1  ;;  %4026 = vadd.xlane.f32.xlu1 %v4025_v0 }
 0x323   : > { %v2192_v25 = vpop.f32.mrb[75].mxu1  ;;  %16739 = vst [vmem:[#allocation33_spill] sm:$0xff] %v12319_v19  ;;  %v12323_v49 = vmul.f32 0.17677669, %v9345_v27  ;;  %v3365_v15 = vsel %vm3238_vm1, %v12319_v19, -inf }
 0x324   : > { %4029 = vadd.xlane.f32.xlu0 %v4028_v48  ;;  %v9360_v11 = vpop.f32.mrb[64].mxu0  ;;  %v12339_v22 = vmul.f32 0.17677669, %v2192_v25 }
 0x325   : > { %v2278_v23 = vpop.f32.mrb[65].mxu0  ;;  %16740 = vst [vmem:[#allocation35_spill] sm:$0xff] %v12323_v49  ;;  %v12327_v61 = vmul.f32 0.17677669, %v9360_v11  ;;  %v3368_v29 = vsel %vm3238_vm1, %v12323_v49, -inf }
 0x326   : > { %v9361_v6 = vpop.f32.mrb[66].mxu0  ;;  %4020 = vadd.xlane.f32.xlu1 %v4019_v16  ;;  %v12335_v16 = vmul.f32 0.17677669, %v2189_v54  ;;  %16744 = vst [vmem:[#allocation43_spill] sm:$0xff] %v12339_v22  ;;  %v12343_v30 = vmul.f32 0.17677669, %v2278_v23 }
 0x327   : > { %v2281_v60 = vpop.f32.mrb[67].mxu0  ;;  %16741 = vst [vmem:[#allocation38_spill] sm:$0xff] %v12327_v61  ;;  %v12331_v57 = vmul.f32 0.17677669, %v9361_v6  ;;  %v3389_v11 = vsel %vm3238_vm1, %v12327_v61, -inf  ;;  %v3362_v54 = vsel %vm3238_vm1, %v12339_v22, -inf }
 0x328   : > { %4023 = vadd.xlane.f32.xlu0 %v4022_v43  ;;  %v9348_v31 = vpop.f32.mrb[76].mxu1  ;;  %16743 = vst [vmem:[#allocation42_spill] sm:$0xff] %v12335_v16  ;;  %16745 = vst [vmem:[#allocation44_spill] sm:$0xff] %v12343_v30  ;;  %v12347_v58 = vmul.f32 0.17677669, %v2281_v60 }
 0x329   : > { %v2205_v5 = vpop.f32.mrb[77].mxu1  ;;  %16742 = vst [vmem:[#allocation37_spill] sm:$0xff] %v12331_v57  ;;  %v3392_v6 = vsel %vm3238_vm1, %v12331_v57, -inf  ;;  %v12351_v25 = vmul.f32 0.17677669, %v9348_v31 }
 0x32a   : > { %v9349_v46 = vpop.f32.mrb[78].mxu1  ;;  %3366 = vmax.xlane.f32.xlu1 %v3365_v15  ;;  %16746 = vst [vmem:[#allocation45_spill] sm:$0xff] %v12347_v58  ;;  %v3386_v23 = vsel %vm3238_vm1, %v12347_v58, -inf }
 0x32b   : > { %v2208_v0 = vpop.f32.mrb[79].mxu1  ;;  %16747 = vst [vmem:[#allocation46_spill] sm:$0xff] %v12351_v25  ;;  %v12355_v57 = vmul.f32 0.17677669, %v9349_v46  ;;  %v3377_v60 = vsel %vm3238_vm1, %v12351_v25, -inf }
 0x32c   : > { %3369 = vmax.xlane.f32.xlu0 %v3368_v29  ;;  %v9364_v27 = vpop.f32.mrb[68].mxu0  ;;  %v3359_v29 = vsel %vm3238_vm1, %v12335_v16, -inf }
 0x32d   : > { %v2294_v48 = vpop.f32.mrb[69].mxu0  ;;  %16748 = vst [vmem:[#allocation47_spill] sm:$0xff] %v12355_v57  ;;  %v3380_v31 = vsel %vm3238_vm1, %v12355_v57, -inf }
 0x32e   : > { %v9365_v43 = vpop.f32.mrb[70].mxu0  ;;  %3390 = vmax.xlane.f32.xlu1 %v3389_v11  ;;  %v3383_v11 = vsel %vm3238_vm1, %v12343_v30, -inf  ;;  %v12375_v30 = vmul.f32 0.17677669, %v2294_v48 }
 0x32f   : > { %v2297_v15 = vpop.f32.mrb[71].mxu0 }
 0x330   : > { %3393 = vmax.xlane.f32.xlu0 %v3392_v6  ;;  %v12359_v6 = vmul.f32 0.17677669, %v9364_v27  ;;  %16753 = vst [vmem:[#allocation52_spill] sm:$0xff] %v12375_v30  ;;  %v3395_v48 = vsel %vm3238_vm1, %v12375_v30, -inf }
 0x332   : > { %3360 = vmax.xlane.f32.xlu1 %v3359_v29  ;;  %16749 = vst [vmem:[#allocation48_spill] sm:$0xff] %v12359_v6  ;;  %v12363_v29 = vmul.f32 0.17677669, %v9365_v43  ;;  %v3401_v46 = vsel %vm3238_vm1, %v12359_v6, -inf }
 0x334   : > { %3363 = vmax.xlane.f32.xlu0 %v3362_v54  ;;  %16750 = vst [vmem:[#allocation49_spill] sm:$0xff] %v12363_v29  ;;  %v12367_v54 = vmul.f32 0.17677669, %v2205_v5  ;;  %v3404_v27 = vsel %vm3238_vm1, %v12363_v29, -inf  ;;  %v12379_v5 = vmul.f32 0.17677669, %v2297_v15 }
 0x336   : > { %3384 = vmax.xlane.f32.xlu1 %v3383_v11  ;;  %16751 = vst [vmem:[#allocation50_spill] sm:$0xff] %v12367_v54  ;;  %v12371_v11 = vmul.f32 0.17677669, %v2208_v0  ;;  %16754 = vst [vmem:[#allocation53_spill] sm:$0xff] %v12379_v5  ;;  %v3398_v15 = vsel %vm3238_vm1, %v12379_v5, -inf }
 0x338   : > { %3387 = vmax.xlane.f32.xlu0 %v3386_v23  ;;  %16752 = vst [vmem:[#allocation51_spill] sm:$0xff] %v12371_v11  ;;  %v3374_v0 = vsel %vm3238_vm1, %v12371_v11, -inf }
 0x33a   : > { %3378 = vmax.xlane.f32.xlu1 %v3377_v60  ;;  %v3371_v60 = vsel %vm3238_vm1, %v12367_v54, -inf }
 0x33c   : > { %3381 = vmax.xlane.f32.xlu0 %v3380_v31 }
 0x33e   : > { %3402 = vmax.xlane.f32.xlu1 %v3401_v46 }
 0x340   : > { %3405 = vmax.xlane.f32.xlu0 %v3404_v27  ;;  %v9376_v23 = vpop.f32.mrb[80].mxu1 }
 0x341   : > { %v2367_v43 = vpop.f32.mrb[81].mxu1  ;;  %v12383_v29 = vmul.f32 0.17677669, %v9376_v23 }
 0x342   : > { %v9377_v31 = vpop.f32.mrb[82].mxu1  ;;  %3372 = vmax.xlane.f32.xlu1 %v3371_v60  ;;  %v12399_v57 = vmul.f32 0.17677669, %v2367_v43 }
 0x343   : > { %v2370_v16 = vpop.f32.mrb[83].mxu1  ;;  %16755 = vst [vmem:[#allocation54_spill] sm:$0xff] %v12383_v29  ;;  %v12387_v6 = vmul.f32 0.17677669, %v9377_v31  ;;  %v3413_v23 = vsel %vm3238_vm1, %v12383_v29, -inf }
 0x344   : > { %3375 = vmax.xlane.f32.xlu0 %v3374_v0  ;;  %v9392_v46 = vpop.f32.mrb[72].mxu0  ;;  %16759 = vst [vmem:[#allocation58_spill] sm:$0xff] %v12399_v57  ;;  %v12403_v55 = vmul.f32 0.17677669, %v2370_v16 }
 0x345   : > { %v2456_v61 = vpop.f32.mrb[73].mxu0  ;;  %16756 = vst [vmem:[#allocation55_spill] sm:$0xff] %v12387_v6  ;;  %v12391_v11 = vmul.f32 0.17677669, %v9392_v46  ;;  %v3416_v31 = vsel %vm3238_vm1, %v12387_v6, -inf }
 0x346   : > { %v9393_v27 = vpop.f32.mrb[74].mxu0  ;;  %3396 = vmax.xlane.f32.xlu1 %v3395_v48  ;;  %16760 = vst [vmem:[#allocation59_spill] sm:$0xff] %v12403_v55  ;;  %v12407_v29 = vmul.f32 0.17677669, %v2456_v61  ;;  %v3410_v43 = vsel %vm3238_vm1, %v12403_v55, -inf }
 0x347   : > { %v2459_v60 = vpop.f32.mrb[75].mxu0  ;;  %16757 = vst [vmem:[#allocation56_spill] sm:$0xff] %v12391_v11  ;;  %v12395_v59 = vmul.f32 0.17677669, %v9393_v27  ;;  %v3437_v46 = vsel %vm3238_vm1, %v12391_v11, -inf }
 0x348   : > { %3399 = vmax.xlane.f32.xlu0 %v3398_v15  ;;  %v9380_v54 = vpop.f32.mrb[84].mxu1  ;;  %16761 = vst [vmem:[#allocation60_spill] sm:$0xff] %v12407_v29  ;;  %v12411_v6 = vmul.f32 0.17677669, %v2459_v60 }
 0x349   : > { %v2383_v26 = vpop.f32.mrb[85].mxu1  ;;  %16758 = vst [vmem:[#allocation57_spill] sm:$0xff] %v12395_v59  ;;  %v3440_v27 = vsel %vm3238_vm1, %v12395_v59, -inf  ;;  %v12415_v16 = vmul.f32 0.17677669, %v9380_v54 }
 0x34a   : > { %v9381_v0 = vpop.f32.mrb[86].mxu1  ;;  %3414 = vmax.xlane.f32.xlu1 %v3413_v23  ;;  %16762 = vst [vmem:[#allocation61_spill] sm:$0xff] %v12411_v6  ;;  %v3434_v61 = vsel %vm3238_vm1, %v12411_v6, -inf }
 0x34b   : > { %v2386_v48 = vpop.f32.mrb[87].mxu1  ;;  %16763 = vst [vmem:[#allocation62_spill] sm:$0xff] %v12415_v16  ;;  %v12419_v11 = vmul.f32 0.17677669, %v9381_v0  ;;  %v3425_v60 = vsel %vm3238_vm1, %v12415_v16, -inf }
 0x34c   : > { %3417 = vmax.xlane.f32.xlu0 %v3416_v31  ;;  %v9396_v30 = vpop.f32.mrb[76].mxu0  ;;  %v3407_v31 = vsel %vm3238_vm1, %v12399_v57, -inf }
 0x34d   : > { %v2472_v5 = vpop.f32.mrb[77].mxu0  ;;  %16764 = vst [vmem:[#allocation63_spill] sm:$0xff] %v12419_v11  ;;  %v3428_v54 = vsel %vm3238_vm1, %v12419_v11, -inf }
 0x34e   : > { %v9397_v15 = vpop.f32.mrb[78].mxu0  ;;  %3438 = vmax.xlane.f32.xlu1 %v3437_v46  ;;  %v3431_v46 = vsel %vm3238_vm1, %v12407_v29, -inf  ;;  %v12439_v6 = vmul.f32 0.17677669, %v2472_v5 }
 0x34f   : > { %v2475_v23 = vpop.f32.mrb[79].mxu0 }
 0x350   : > { %3441 = vmax.xlane.f32.xlu0 %v3440_v27  ;;  %v12423_v27 = vmul.f32 0.17677669, %v9396_v30  ;;  %16769 = vst [vmem:[#allocation68_spill] sm:$0xff] %v12439_v6  ;;  %v3443_v5 = vsel %vm3238_vm1, %v12439_v6, -inf }
 0x352   : > { %3408 = vmax.xlane.f32.xlu1 %v3407_v31  ;;  %16765 = vst [vmem:[#allocation64_spill] sm:$0xff] %v12423_v27  ;;  %v12427_v31 = vmul.f32 0.17677669, %v9397_v15  ;;  %v3449_v0 = vsel %vm3238_vm1, %v12423_v27, -inf }
 0x354   : > { %3411 = vmax.xlane.f32.xlu0 %v3410_v43  ;;  %16766 = vst [vmem:[#allocation65_spill] sm:$0xff] %v12427_v31  ;;  %v12431_v43 = vmul.f32 0.17677669, %v2383_v26  ;;  %v3452_v30 = vsel %vm3238_vm1, %v12427_v31, -inf  ;;  %v12443_v26 = vmul.f32 0.17677669, %v2475_v23 }
 0x356   : > { %3432 = vmax.xlane.f32.xlu1 %v3431_v46  ;;  %16767 = vst [vmem:[#allocation66_spill] sm:$0xff] %v12431_v43  ;;  %v12435_v46 = vmul.f32 0.17677669, %v2386_v48  ;;  %16770 = vst [vmem:[#allocation69_spill] sm:$0xff] %v12443_v26  ;;  %v3446_v23 = vsel %vm3238_vm1, %v12443_v26, -inf }
 0x358   : > { %3435 = vmax.xlane.f32.xlu0 %v3434_v61  ;;  %16768 = vst [vmem:[#allocation67_spill] sm:$0xff] %v12435_v46  ;;  %v3422_v48 = vsel %vm3238_vm1, %v12435_v46, -inf }
 0x35a   : > { %3426 = vmax.xlane.f32.xlu1 %v3425_v60  ;;  %v3419_v60 = vsel %vm3238_vm1, %v12431_v43, -inf }
 0x35c   : > { %3429 = vmax.xlane.f32.xlu0 %v3428_v54 }
 0x35e   : > { %3450 = vmax.xlane.f32.xlu1 %v3449_v0 }
 0x360   : > { %3453 = vmax.xlane.f32.xlu0 %v3452_v30  ;;  %v9408_v61 = vpop.f32.mrb[88].mxu1 }
 0x361   : > { %v2545_v15 = vpop.f32.mrb[89].mxu1  ;;  %v12447_v31 = vmul.f32 0.17677669, %v9408_v61 }
 0x362   : > { %v9409_v54 = vpop.f32.mrb[90].mxu1  ;;  %3420 = vmax.xlane.f32.xlu1 %v3419_v60  ;;  %v12467_v58 = vmul.f32 0.17677669, %v2545_v15 }
 0x363   : > { %v2548_v27 = vpop.f32.mrb[91].mxu1  ;;  %16771 = vst [vmem:[#allocation70_spill] sm:$0xff] %v12447_v31  ;;  %v12451_v11 = vmul.f32 0.17677669, %v9409_v54  ;;  %v3461_v61 = vsel %vm3238_vm1, %v12447_v31, -inf }
 0x364   : > { %3423 = vmax.xlane.f32.xlu0 %v3422_v48  ;;  %v9424_v0 = vpop.f32.mrb[80].mxu0  ;;  %16775 = vst [vmem:[#allocation74_spill] sm:$0xff] %v12467_v58  ;;  %v12471_v22 = vmul.f32 0.17677669, %v2548_v27  ;;  %v3455_v15 = vsel %vm3238_vm1, %v12467_v58, -inf }
 0x365   : > { %v2634_v59 = vpop.f32.mrb[81].mxu0  ;;  %16772 = vst [vmem:[#allocation71_spill] sm:$0xff] %v12451_v11  ;;  %v12457_v43 = vmul.f32 0.17677669, %v9424_v0  ;;  %v3464_v54 = vsel %vm3238_vm1, %v12451_v11, -inf }
 0x366   : > { %v3271_v30 = vpop.xlane.xlu1 %3270  ;;  %v9425_v29 = vpop.f32.mrb[82].mxu0  ;;  %3444 = vmax.xlane.f32.xlu1 %v3443_v5  ;;  %16776 = vst [vmem:[#allocation75_spill] sm:$0xff] %v12471_v22  ;;  %v12477_v11 = vmul.f32 0.17677669, %v2634_v59  ;;  %v3458_v27 = vsel %vm3238_vm1, %v12471_v22, -inf }
 0x367   : > { %v2637_v60 = vpop.f32.mrb[83].mxu0  ;;  %16773 = vst [vmem:[#allocation72_spill] sm:$0xff] %v12457_v43  ;;  %v12461_v57 = vmul.f32 0.17677669, %v9425_v29  ;;  %v3485_v0 = vsel %vm3238_vm1, %v12457_v43, -inf }
 0x368   : > { %3447 = vmax.xlane.f32.xlu0 %v3446_v23  ;;  %v12455_v46 = vpop.xlane.xlu0 %3273  ;;  %v9412_v48 = vpop.f32.mrb[92].mxu1  ;;  %16777 = vst [vmem:[#allocation76_spill] sm:$0xff] %v12477_v11  ;;  %v12481_v49 = vmul.f32 0.17677669, %v2637_v60  ;;  %v3479_v43 = vsel %vm3238_vm1, %v12477_v11, -inf }
 0x369   : > { %v2561_v55 = vpop.f32.mrb[93].mxu1  ;;  %16774 = vst [vmem:[#allocation73_spill] sm:$0xff] %v12461_v57  ;;  %v3488_v29 = vsel %vm3238_vm1, %v12461_v57, -inf  ;;  %v3633_v57 = vsub.f32 %v12122_v56, %v3271_v30 }
 0x36a   : > { %v3295_v6 = vpop.xlane.xlu1 %3294  ;;  %v9413_v16 = vpop.f32.mrb[94].mxu1  ;;  %3462 = vmax.xlane.f32.xlu1 %v3461_v61  ;;  %16778 = vst [vmem:[#allocation77_spill] sm:$0xff] %v12481_v49 }
 0x36b   : > { %v2564_v5 = vpop.f32.mrb[95].mxu1  ;;  %v3641_v59 = vsub.f32 %v12129_v34, %v3295_v6  ;;  %v12495_v60 = vmul.f32 0.17677669, %v9413_v16  ;;  %v3771_v22 = vmul.f32 1.442695, %v3633_v57 }
 0x36c   : > { %3465 = vmax.xlane.f32.xlu0 %v3464_v54  ;;  %v12465_v23 = vpop.xlane.xlu0 %3297  ;;  %v9428_v26 = vpop.f32.mrb[84].mxu0 }
 0x36d   : > { %v2650_v25 = vpop.f32.mrb[85].mxu0  ;;  %16780 = vst [vmem:[#allocation79_spill] sm:$0xff] %v12495_v60  ;;  %v3787_v30 = vmul.f32 1.442695, %v3641_v59  ;;  %10253 = vpow2.f32 %v3771_v22  ;;  %v12523_v59 = vmul.f32 0.17677669, %v2564_v5 }
 0x36e   : > { %v3265_v31 = vpop.xlane.xlu1 %3264  ;;  %v9429_v41 = vpop.f32.mrb[86].mxu0  ;;  %3486 = vmax.xlane.f32.xlu1 %v3485_v0 }
 0x36f   : > { %v2653_v61 = vpop.f32.mrb[87].mxu0  ;;  %v3631_v56 = vsub.f32 %v12143_v24, %v3265_v31  ;;  %v3634_v24 = vsub.f32 %v12131_v9, %v12455_v46  ;;  %10255 = vpow2.f32 %v3787_v30  ;;  %16784 = vst [vmem:[#allocation83_spill] sm:$0xff] %v12523_v59  ;;  %v12533_v30 = vmul.f32 0.17677669, %v2650_v25 }
 0x370   : > { %3489 = vmax.xlane.f32.xlu0 %v3488_v29  ;;  %v12475_v54 = vpop.xlane.xlu0 %3267  ;;  %v12488_v29 = vmul.f32 0.17677669, %v9412_v48  ;;  %v12502_v48 = vmul.f32 0.17677669, %v9428_v26 }
 0x371   : > { %v3767_v31 = vmul.f32 1.442695, %v3631_v56  ;;  %v3773_v46 = vmul.f32 1.442695, %v3634_v24  ;;  %v3642_v56 = vsub.f32 %v12138_v17, %v12465_v23  ;;  %16785 = vst [vmem:[#allocation84_spill] sm:$0xff] %v12533_v30  ;;  %v3470_v24 = vsel %vm3238_vm1, %v12523_v59, -inf }
 0x372   : > { %v3289_v39 = vpop.xlane.xlu1 %3288  ;;  %3456 = vmax.xlane.f32.xlu1 %v3455_v15  ;;  %16779 = vst [vmem:[#allocation78_spill] sm:$0xff] %v12488_v29  ;;  %v3482_v15 = vsel %vm3238_vm1, %v12481_v49, -inf  ;;  %16781 = vst [vmem:[#allocation80_spill] sm:$0xff] %v12502_v48  ;;  %v3473_v6 = vsel %vm3238_vm1, %v12488_v29, -inf }
 0x373   : > { %v3639_v34 = vsub.f32 %v12155_v8, %v3289_v39  ;;  %v12517_v8 = vmul.f32 0.17677669, %v2561_v55  ;;  %10257 = vpow2.f32 %v3767_v31 }
 0x374   : > { %3459 = vmax.xlane.f32.xlu0 %v3458_v27  ;;  %v12485_v0 = vpop.xlane.xlu0 %3291 }
 0x375   : > { %16783 = vst [vmem:[#allocation82_spill] sm:$0xff] %v12517_v8  ;;  %v3783_v39 = vmul.f32 1.442695, %v3639_v34  ;;  %v3467_v5 = vsel %vm3238_vm1, %v12517_v8, -inf }
 0x376   : > { %v12493_v58 = vpop.xlane.xlu1 %3282  ;;  %3480 = vmax.xlane.f32.xlu1 %v3479_v43  ;;  %v12509_v43 = vmul.f32 0.17677669, %v9429_v41  ;;  %v3497_v41 = vsel %vm3238_vm1, %v12502_v48, -inf }
 0x377   : > { %10259 = vpow2.f32 %v3783_v39  ;;  %v3789_v39 = vmul.f32 1.442695, %v3642_v56 }
 0x378   : > { %3483 = vmax.xlane.f32.xlu0 %v3482_v15  ;;  %v12499_v27 = vpop.xlane.xlu0 %3285  ;;  %16782 = vst [vmem:[#allocation81_spill] sm:$0xff] %v12509_v43  ;;  %v3476_v15 = vsel %vm3238_vm1, %v12495_v60, -inf  ;;  %10261 = vpow2.f32 %v3773_v46 }
 0x379   : > { %10263 = vpow2.f32 %v3789_v39 }
 0x37a   : > { %v12507_v16 = vpop.xlane.xlu1 %3306  ;;  %3474 = vmax.xlane.f32.xlu1 %v3473_v6  ;;  %v3500_v6 = vsel %vm3238_vm1, %v12509_v43, -inf  ;;  %v12557_v43 = vpop.eup %10253 }
 0x37b   : > { %16787 = vst [vmem:[#allocation86_spill] sm:$0xff] %v12557_v43  ;;  %v12563_v11 = vpop.eup %10255 }
 0x37c   : > { %3477 = vmax.xlane.f32.xlu0 %v3476_v15  ;;  %v12513_v57 = vpop.xlane.xlu0 %3309  ;;  %16788 = vst [vmem:[#allocation87_spill] sm:$0xff] %v12563_v11 }
 0x37d   : > { %v12579_v8 = vpop.eup %10257 }
 0x37e   : > { %v12521_v26 = vpop.xlane.xlu1 %3276  ;;  %3498 = vmax.xlane.f32.xlu1 %v3497_v41  ;;  %v12541_v41 = vmul.f32 0.17677669, %v2653_v61  ;;  %v3491_v61 = vsel %vm3238_vm1, %v12533_v30, -inf  ;;  %16789 = vst [vmem:[#allocation88_spill] sm:$0xff] %v12579_v8 }
 0x380   : > { %3501 = vmax.xlane.f32.xlu0 %v3500_v6  ;;  %v12527_v22 = vpop.xlane.xlu0 %3279  ;;  %v9440_v9 = vpop.f32.mrb[96].mxu1  ;;  %16786 = vst [vmem:[#allocation85_spill] sm:$0xff] %v12541_v41  ;;  %v3632_v6 = vsub.f32 %v12150_v42, %v12475_v54 }
 0x381   : > { %v12529_v55 = vpop.f32.mrb[97].mxu1  ;;  %v12585_v29 = vpop.eup %10259 }
 0x382   : > { %v12537_v34 = vpop.xlane.xlu1 %3300  ;;  %v12539_v15 = vpop.f32.mrb[98].mxu1  ;;  %3468 = vmax.xlane.f32.xlu1 %v3467_v5  ;;  %v3769_v30 = vmul.f32 1.442695, %v3632_v6  ;;  %16790 = vst [vmem:[#allocation89_spill] sm:$0xff] %v12585_v29 }
 0x383   : > { %v12545_v31 = vpop.f32.mrb[99].mxu1 }
 0x384   : > { %3471 = vmax.xlane.f32.xlu0 %v3470_v24  ;;  %v12547_v17 = vpop.xlane.xlu0 %3303  ;;  %v9456_v25 = vpop.f32.mrb[88].mxu0  ;;  %v3494_v24 = vsel %vm3238_vm1, %v12541_v41, -inf  ;;  %v4037_v41 = vsel %vm3238_vm1, %v12557_v43, 0.0  ;;  %10265 = vpow2.f32 %v3769_v30  ;;  %v12597_v43 = vmul.f32 0.17677669, %v9440_v9 }
 0x385   : > { %v12549_v23 = vpop.f32.mrb[89].mxu0  ;;  %v3645_v9 = vsub.f32 %v12177_v47, %v12507_v16  ;;  %v3635_v47 = vsub.f32 %v12185_v32, %v12521_v26  ;;  %v3643_v32 = vsub.f32 %v12199_v3, %v12537_v34  ;;  %v3638_v34 = vsub.f32 %v12172_v52, %v12499_v27 }
 0x386   : > { %v12555_v5 = vpop.f32.mrb[90].mxu0  ;;  %3492 = vmax.xlane.f32.xlu1 %v3491_v61  ;;  %v3640_v61 = vsub.f32 %v12162_v45, %v12485_v0  ;;  %v3637_v45 = vsub.f32 %v12166_v50, %v12493_v58  ;;  %16791 = vst [vmem:[#allocation90_spill] sm:$0xff] %v12597_v43  ;;  %v12607_v50 = vpop.eup %10261  ;;  %v3646_v52 = vsub.f32 %v12181_v18, %v12513_v57 }
 0x387   : > { %v12561_v48 = vpop.f32.mrb[91].mxu0  ;;  %v12565_v46 = vpop.xlane.xlu1 %3318  ;;  %16793 = vst [vmem:[#allocation92_spill] sm:$0xff] %v12607_v50 }
 0x388   : > { %3495 = vmax.xlane.f32.xlu0 %v3494_v24  ;;  %v12567_v56 = vpop.f32.mrb[100].mxu1  ;;  %v4061_v24 = vsel %vm3238_vm1, %v12563_v11, 0.0  ;;  %v4031_v11 = vsel %vm3238_vm1, %v12579_v8, 0.0  ;;  %v3779_v30 = vmul.f32 1.442695, %v3637_v45  ;;  %v12621_v63 = vpop.eup %10263 }
 0x389   : > { %v12569_v42 = vpop.xlane.xlu0 %3321  ;;  %v12571_v54 = vpop.f32.mrb[101].mxu1  ;;  %v12615_v8 = vmul.f32 0.17677669, %v9456_v25  ;;  %16795 = vst [vmem:[#allocation94_spill] sm:$0xff] %v12621_v63  ;;  %v3795_v45 = vmul.f32 1.442695, %v3645_v9 }
 0x38a   : > { %v12577_v49 = vpop.f32.mrb[102].mxu1  ;;  %4038 = vadd.xlane.f32.xlu1 %v4037_v41  ;;  %v3785_v41 = vmul.f32 1.442695, %v3640_v61  ;;  %v12630_v25 = vmul.f32 0.17677669, %v12529_v55 }
 0x38b   : > { %v12583_v60 = vpop.f32.mrb[103].mxu1  ;;  %v12587_v39 = vpop.xlane.xlu1 %3342  ;;  %16794 = vst [vmem:[#allocation93_spill] sm:$0xff] %v12615_v8  ;;  %v12645_v55 = vmul.f32 0.17677669, %v12549_v23 }
 0x38c   : > { %4062 = vadd.xlane.f32.xlu0 %v4061_v24  ;;  %v12589_v6 = vpop.f32.mrb[92].mxu0  ;;  %v4055_v24 = vsel %vm3238_vm1, %v12585_v29, 0.0  ;;  %10267 = vpow2.f32 %v3785_v41  ;;  %v4040_v29 = vsel %vm3238_vm1, %v12607_v50, 0.0  ;;  %16796 = vst [vmem:[#allocation95_spill] sm:$0xff] %v12630_v25  ;;  %v3533_v41 = vsel %vm3238_vm1, %v12615_v8, -inf }
 0x38d   : > { %v12593_v0 = vpop.xlane.xlu0 %3345  ;;  %v12595_v59 = vpop.f32.mrb[93].mxu0  ;;  %10269 = vpow2.f32 %v3779_v30  ;;  %v3775_v30 = vmul.f32 1.442695, %v3635_v47  ;;  %16798 = vst [vmem:[#allocation97_spill] sm:$0xff] %v12645_v55  ;;  %v3503_v9 = vsel %vm3238_vm1, %v12630_v25, -inf  ;;  %v3527_v23 = vsel %vm3238_vm1, %v12645_v55, -inf }
 0x38e   : > { %v12601_v19 = vpop.f32.mrb[94].mxu0  ;;  %4032 = vadd.xlane.f32.xlu1 %v4031_v11  ;;  %v3509_v11 = vsel %vm3238_vm1, %v12597_v43, -inf  ;;  %10271 = vpow2.f32 %v3795_v45  ;;  %v3791_v45 = vmul.f32 1.442695, %v3643_v32  ;;  %v3781_v55 = vmul.f32 1.442695, %v3638_v34 }
 0x38f   : > { %v12605_v7 = vpop.f32.mrb[95].mxu0  ;;  %v12609_v58 = vpop.xlane.xlu1 %3312  ;;  %10273 = vpow2.f32 %v3775_v30 }
 0x390   : > { %16792 = vst [vmem:[#allocation91_spill] sm:$0xff] %v12605_v7  ;;  %4056 = vadd.xlane.f32.xlu0 %v4055_v24  ;;  %v4064_v24 = vsel %vm3238_vm1, %v12621_v63, 0.0  ;;  %10275 = vpow2.f32 %v3791_v45 }
 0x391   : > { %v12613_v61 = vpop.xlane.xlu0 %3315  ;;  %10277 = vpow2.f32 %v3781_v55 }
 0x392   : > { %3510 = vmax.xlane.f32.xlu1 %v3509_v11  ;;  %v12636_v11 = vpop.eup %10265 }
 0x393   : > { %v12623_v7 = vpop.xlane.xlu1 %3336  ;;  %16797 = vst [vmem:[#allocation96_spill] sm:$0xff] %v12636_v11 }
 0x394   : > { %4041 = vadd.xlane.f32.xlu0 %v4040_v29 }
 0x395   : > { %v12627_v16 = vpop.xlane.xlu0 %3339 }
 0x396   : > { %3534 = vmax.xlane.f32.xlu1 %v3533_v41  ;;  %v4034_v41 = vsel %vm3238_vm1, %v12636_v11, 0.0  ;;  %v12651_v8 = vpop.eup %10267  ;;  %v12708_v11 = vmul.f32 0.17677669, %v12545_v31  ;;  %v3644_v31 = vsub.f32 %v12203_v51, %v12547_v17 }
 0x397   : > { %v12638_v29 = vpop.xlane.xlu1 %3330  ;;  %16799 = vst [vmem:[#allocation98_spill] sm:$0xff] %v12651_v8  ;;  %v12661_v47 = vpop.eup %10269  ;;  %v4058_v43 = vsel %vm3238_vm1, %v12651_v8, 0.0  ;;  %v12687_v8 = vmul.f32 0.17677669, %v12555_v5 }
 0x398   : > { %4065 = vadd.xlane.f32.xlu0 %v4064_v24  ;;  %16801 = vst [vmem:[#allocation100_spill] sm:$0xff] %v12661_v47  ;;  %16807 = vst [vmem:[#allocation106_spill] sm:$0xff] %v12708_v11 }
 0x399   : > { %v12642_v26 = vpop.xlane.xlu0 %3333  ;;  %16805 = vst [vmem:[#allocation104_spill] sm:$0xff] %v12687_v8 }
 0x39a   : > { %3504 = vmax.xlane.f32.xlu1 %v3503_v9  ;;  %v12664_v9 = vmul.f32 0.17677669, %v12539_v15  ;;  %v3636_v15 = vsub.f32 %v12191_v2, %v12527_v22  ;;  %v3797_v22 = vmul.f32 1.442695, %v3646_v52  ;;  %v3536_v52 = vsel %vm3238_vm1, %v12687_v8, -inf }
 0x39b   : > { %v12653_v24 = vpop.xlane.xlu1 %3354 }
 0x39c   : > { %4035 = vadd.xlane.f32.xlu0 %v4034_v41  ;;  %16802 = vst [vmem:[#allocation101_spill] sm:$0xff] %v12664_v9  ;;  %v3512_v18 = vsel %vm3238_vm1, %v12664_v9, -inf  ;;  %v3777_v63 = vmul.f32 1.442695, %v3636_v15  ;;  %10279 = vpow2.f32 %v3797_v22  ;;  %v3649_v15 = vsub.f32 %v12216_v36, %v12565_v46 }
 0x39d   : > { %v12655_v3 = vpop.xlane.xlu0 %3357  ;;  %v3506_v36 = vsel %vm3238_vm1, %v12708_v11, -inf }
 0x39e   : > { %16800 = vst [vmem:[#allocation99_spill] sm:$0xff] %v12655_v3  ;;  %3528 = vmax.xlane.f32.xlu1 %v3527_v23  ;;  %v4049_v23 = vsel %vm3238_vm1, %v12661_v47, 0.0  ;;  %10281 = vpow2.f32 %v3777_v63  ;;  %v3803_v17 = vmul.f32 1.442695, %v3649_v15 }
 0x39f   : > { %v12668_v41 = vpop.xlane.xlu1 %3324 }
 0x3a0   : > { %4059 = vadd.xlane.f32.xlu0 %v4058_v43  ;;  %v12670_v30 = vpop.f32.mrb[104].mxu1  ;;  %v12684_v43 = vpop.eup %10271 }
 0x3a1   : > { %v12674_v27 = vpop.xlane.xlu0 %3327  ;;  %v12676_v32 = vpop.f32.mrb[105].mxu1  ;;  %16804 = vst [vmem:[#allocation103_spill] sm:$0xff] %v12684_v43  ;;  %v4073_v5 = vsel %vm3238_vm1, %v12684_v43, 0.0 }
 0x3a2   : > { %16803 = vst [vmem:[#allocation102_spill] sm:$0xff] %v12674_v27  ;;  %v12682_v25 = vpop.f32.mrb[106].mxu1  ;;  %4050 = vadd.xlane.f32.xlu1 %v4049_v23  ;;  %v12705_v9 = vpop.eup %10273 }
 0x3a3   : > { %v12691_v57 = vpop.f32.mrb[107].mxu1  ;;  %v12693_v45 = vpop.xlane.xlu1 %3348  ;;  %16806 = vst [vmem:[#allocation105_spill] sm:$0xff] %v12705_v9 }
 0x3a4   : > { %3513 = vmax.xlane.f32.xlu0 %v3512_v18  ;;  %v12695_v2 = vpop.f32.mrb[96].mxu0  ;;  %v12726_v3 = vpop.eup %10275 }
 0x3a5   : > { %v12697_v34 = vpop.xlane.xlu0 %3351  ;;  %v12699_v47 = vpop.f32.mrb[97].mxu0  ;;  %16809 = vst [vmem:[#allocation108_spill] sm:$0xff] %v12726_v3 }
 0x3a6   : > { %v12703_v23 = vpop.f32.mrb[98].mxu0  ;;  %4074 = vadd.xlane.f32.xlu1 %v4073_v5  ;;  %v4043_v5 = vsel %vm3238_vm1, %v12705_v9, 0.0  ;;  %v12750_v15 = vpop.eup %10277 }
 0x3a7   : > { %v12712_v18 = vpop.f32.mrb[99].mxu0  ;;  %v4015_v50 = vpop.xlane.xlu1 %4014  ;;  %16813 = vst [vmem:[#allocation112_spill] sm:$0xff] %v12750_v15 }
 0x3a8   : > { %3537 = vmax.xlane.f32.xlu0 %v3536_v52  ;;  %v12714_v55 = vpop.f32.mrb[108].mxu1  ;;  %v12729_v52 = vmul.f32 0.17677669, %v12561_v48  ;;  %10283 = vrcp.f32 %v4015_v50  ;;  %v12740_v48 = vmul.f32 0.17677669, %v12567_v56  ;;  %v4067_v50 = vsel %vm3238_vm1, %v12726_v3, 0.0  ;;  %v12757_v11 = vpop.eup %10279 }
 0x3a9   : > { %v4018_v43 = vpop.xlane.xlu0 %4017  ;;  %v12718_v27 = vpop.f32.mrb[109].mxu1  ;;  %v12753_v56 = vmul.f32 0.17677669, %v12589_v6  ;;  %16815 = vst [vmem:[#allocation114_spill] sm:$0xff] %v12757_v11 }
 0x3aa   : > { %v12724_v8 = vpop.f32.mrb[110].mxu1  ;;  %16810 = vst [vmem:[#allocation109_spill] sm:$0xff] %v12729_v52  ;;  %4044 = vadd.xlane.f32.xlu1 %v4043_v5  ;;  %10285 = vrcp.f32 %v4018_v43  ;;  %16811 = vst [vmem:[#allocation110_spill] sm:$0xff] %v12740_v48  ;;  %v3530_v43 = vsel %vm3238_vm1, %v12729_v52, -inf  ;;  %v12761_v52 = vpop.eup %10281 }
 0x3ab   : > { %16808 = vst [vmem:[#allocation107_spill] sm:$0xff] %v12724_v8  ;;  %v12733_v46 = vpop.f32.mrb[111].mxu1  ;;  %v4009_v63 = vpop.xlane.xlu1 %4008  ;;  %v3793_v8 = vmul.f32 1.442695, %v3644_v31  ;;  %16814 = vst [vmem:[#allocation113_spill] sm:$0xff] %v12753_v56 }
 0x3ac   : > { %3507 = vmax.xlane.f32.xlu0 %v3506_v36  ;;  %v12735_v51 = vpop.f32.mrb[100].mxu0  ;;  %10287 = vrcp.f32 %v4009_v63 }
 0x3ad   : > { %v4012_v22 = vpop.xlane.xlu0 %4011  ;;  %v12737_v9 = vpop.f32.mrb[101].mxu0 }
 0x3ae   : > { %10289 = vrcp.f32 %v4012_v22  ;;  %v12744_v5 = vpop.f32.mrb[102].mxu0  ;;  %4068 = vadd.xlane.f32.xlu1 %v4067_v50  ;;  %v3521_v22 = vsel %vm3238_vm1, %v12740_v48, -inf  ;;  %v4052_v50 = vsel %vm3238_vm1, %v12750_v15, 0.0  ;;  %v12766_v48 = vmul.f32 0.17677669, %v12571_v54 }
 0x3af   : > { %v12748_v36 = vpop.f32.mrb[103].mxu0  ;;  %v4027_v63 = vpop.xlane.xlu1 %4026  ;;  %10291 = vpow2.f32 %v3803_v17 }
 0x3b0   : > { %16812 = vst [vmem:[#allocation111_spill] sm:$0xff] %v12748_v36  ;;  %3531 = vmax.xlane.f32.xlu0 %v3530_v43  ;;  %10293 = vpow2.f32 %v3793_v8  ;;  %v3658_v8 = vsub.f32 %v12226_v21, %v12593_v0  ;;  %16816 = vst [vmem:[#allocation115_spill] sm:$0xff] %v12766_v48 }
 0x3b1   : > { %v4030_v31 = vpop.xlane.xlu0 %4029 }
 0x3b2   : > { %10295 = vrcp.f32 %v4030_v31  ;;  %3522 = vmax.xlane.f32.xlu1 %v3521_v22  ;;  %v10284_v17 = vpop.eup %10283  ;;  %v3545_v31 = vsel %vm3238_vm1, %v12753_v56, -inf  ;;  %v3821_v21 = vmul.f32 1.442695, %v3658_v8 }
 0x3b3   : > { %10297 = vrcp.f32 %v4027_v63  ;;  %v4021_v43 = vpop.xlane.xlu1 %4020  ;;  %v4076_v63 = vsel %vm3238_vm1, %v12757_v11, 0.0  ;;  %v12785_v11 = vmul.f32 0.17677669, %v12595_v59  ;;  %v12797_v59 = vmul.f32 0.17677669, %v12670_v30 }
 0x3b4   : > { %4053 = vadd.xlane.f32.xlu0 %v4052_v50  ;;  %10299 = vrcp.f32 %v4021_v43  ;;  %v10286_v3 = vpop.eup %10285 }
 0x3b5   : > { %v4024_v6 = vpop.xlane.xlu0 %4023  ;;  %v4522_v15 = vmul.f32 %v10286_v3, %v12293_v33  ;;  %16818 = vst [vmem:[#allocation117_spill] sm:$0xff] %v12785_v11  ;;  %v4046_v33 = vsel %vm3238_vm1, %v12761_v52, 0.0  ;;  %16819 = vst [vmem:[#allocation118_spill] sm:$0xff] %v12797_v59 }
 0x3b6   : > { %10301 = vrcp.f32 %v4024_v6  ;;  %v10288_v22 = vpop.eup %10287  ;;  %3546 = vmax.xlane.f32.xlu1 %v3545_v31  ;;  %v4521_v6 = vmul.f32 %v10284_v17, %v12289_v40  ;;  %v3515_v31 = vsel %vm3238_vm1, %v12766_v48, -inf  ;;  %v12979_v48 = vmul.f32 0.17677669, %v12744_v5 }
 0x3b7   : > { %v12773_v36 = vpop.xlane.xlu1 %3366  ;;  %v4519_v54 = vmul.f32 %v10288_v22, %v12299_v38  ;;  %10303 = vpow2.f32 %v3821_v21 }
 0x3b8   : > { %v10290_v50 = vpop.eup %10289  ;;  %4077 = vadd.xlane.f32.xlu0 %v4076_v63  ;;  %v4648_v38 = vpack.c.bf16 %v4522_v15, %v4521_v6  ;;  %v3539_v15 = vsel %vm3238_vm1, %v12785_v11, -inf }
 0x3b9   : > { %v12775_v0 = vpop.xlane.xlu0 %3369  ;;  %v4520_v43 = vmul.f32 %v10290_v50, %v12295_v1  ;;  %v12782_v56 = vpop.eup %10291 }
 0x3ba   : > { %16817 = vst [vmem:[#allocation116_spill] sm:$0xff] %v12782_v56  ;;  %3516 = vmax.xlane.f32.xlu1 %v3515_v31  ;;  %v12789_v8 = vpop.eup %10293  ;;  %v4085_v63 = vsel %vm3238_vm1, %v12782_v56, 0.0  ;;  %v13001_v56 = vmul.f32 0.17677669, %v12703_v23 }
 0x3bb   : > { %v4647_v3 = vpack.c.bf16 %v4520_v43, %v4519_v54  ;;  %v12791_v22 = vpop.xlane.xlu1 %3390  ;;  %v3657_v54 = vsub.f32 %v12221_v37, %v12587_v39  ;;  %v16820_v43 = vld [vmem:[#allocation26_spill] sm:$0xff]  ;;  %v12822_v39 = vmul.f32 0.17677669, %v12695_v2 }
 0x3bc   : > { %4047 = vadd.xlane.f32.xlu0 %v4046_v33  ;;  %v10296_v40 = vpop.eup %10295 }
 0x3bd   : > { %9518 = vmatprep.mubr.msk.bf16.mxu0 %vm3238_vm1, %v4647_v3  ;;  %v12794_v1 = vpop.xlane.xlu0 %3393  ;;  %v10298_v17 = vpop.eup %10297  ;;  %v4526_v31 = vmul.f32 %v10296_v40, %v12309_v62  ;;  %16821 = vst [vmem:[#allocation26_spill] sm:$0xff] %v12822_v39  ;;  %v3819_v2 = vmul.f32 1.442695, %v3657_v54  ;;  %v16823_v40 = vld [vmem:[#allocation34_spill] sm:$0xff]  ;;  %v3581_v54 = vsel %vm3238_vm1, %v12822_v39, -inf }
 0x3be   : > { %9519 = vmatmul.mubr.msk.bf16.vlgmr.msra.gmra.mrb[104].mxu0 %vm3238_vm1, %v4648_v38  ;;  %v10300_v50 = vpop.eup %10299  ;;  %4086 = vadd.xlane.f32.xlu1 %v4085_v63  ;;  %v3557_v63 = vsel %vm3238_vm1, %v12797_v59, -inf  ;;  %v4525_v62 = vmul.f32 %v10298_v17, %v12305_v35 }
 0x3bf   : > { %9543 = vmatpush3.bf16.msra.mxu0 %v11853_v28  ;;  %v12808_v30 = vpop.xlane.xlu1 %3360  ;;  %v3656_v28 = vsub.f32 %v12243_v53, %v12627_v16  ;;  %v4523_v38 = vmul.f32 %v10300_v50, %v12313_v13  ;;  %v12830_v53 = vmul.f32 0.17677669, %v12577_v49  ;;  %v4070_v13 = vsel %vm3238_vm1, %v12789_v8, 0.0 }
 0x3c0   : > { %v10302_v21 = vpop.eup %10301  ;;  %9544 = vmatprep.subr.bf16.mxu0 %v16820_v43  ;;  %3540 = vmax.xlane.f32.xlu0 %v3539_v15  ;;  %v12810_v6 = vpop.f32.mrb[112].mxu1  ;;  %v3653_v49 = vsub.f32 %v12249_v12, %v12638_v29  ;;  %10305 = vpow2.f32 %v3819_v2  ;;  %v16825_v29 = vld [vmem:[#allocation29_spill] sm:$0xff] }
 0x3c1   : > { %v12815_v33 = vpop.xlane.xlu0 %3363  ;;  %v12817_v3 = vpop.f32.mrb[113].mxu1  ;;  %v4524_v37 = vmul.f32 %v10302_v21, %v12317_v14  ;;  %16822 = vst [vmem:[#allocation119_spill] sm:$0xff] %v12830_v53  ;;  %v4650_v21 = vpack.c.bf16 %v4526_v31, %v4525_v62  ;;  %v3817_v35 = vmul.f32 1.442695, %v3656_v28  ;;  %v12853_v31 = vmul.f32 0.17677669, %v12601_v19 }
 0x3c2   : > { %v12826_v15 = vpop.f32.mrb[114].mxu1  ;;  %3558 = vmax.xlane.f32.xlu1 %v3557_v63  ;;  %v3524_v12 = vsel %vm3238_vm1, %v12830_v53, -inf  ;;  %v3811_v28 = vmul.f32 1.442695, %v3653_v49  ;;  %v3651_v19 = vsub.f32 %v12269_v10, %v12668_v41 }
 0x3c3   : > { %9545 = vmatpush3.bf16.msra.mxu0 %v16820_v43  ;;  %v4649_v14 = vpack.c.bf16 %v4524_v37, %v4523_v38  ;;  %v12835_v16 = vpop.f32.mrb[115].mxu1  ;;  %v12838_v50 = vpop.xlane.xlu1 %3384  ;;  %v3647_v43 = vsub.f32 %v12231_v44, %v12609_v58  ;;  %16824 = vst [vmem:[#allocation34_spill] sm:$0xff] %v12853_v31  ;;  %10307 = vpow2.f32 %v3817_v35  ;;  %v3548_v10 = vsel %vm3238_vm1, %v12853_v31, -inf }
 0x3c4   : > { %9546 = vmatprep.subr.bf16.mxu0 %v16823_v40  ;;  %4071 = vadd.xlane.f32.xlu0 %v4070_v13  ;;  %v12850_v38 = vpop.eup %10303  ;;  %v3655_v13 = vsub.f32 %v12239_v4, %v12623_v7  ;;  %v16828_v7 = vld [vmem:[#allocation11_spill] sm:$0xff]  ;;  %10309 = vpow2.f32 %v3811_v28  ;;  %v3807_v35 = vmul.f32 1.442695, %v3651_v19 }
 0x3c5   : > { %9522 = vmatprep.mubr.msk.bf16.mxu0 %vm3238_vm1, %v4649_v14  ;;  %v12843_v17 = vpop.xlane.xlu0 %3387  ;;  %v3799_v62 = vmul.f32 1.442695, %v3647_v43  ;;  %v12872_v14 = vmul.f32 0.17677669, %v12676_v32  ;;  %v4112_v2 = vsel %vm3238_vm1, %v12850_v38, 0.0  ;;  %v3650_v32 = vsub.f32 %v12219_v20, %v12569_v42  ;;  %v16832_v42 = vld [vmem:[#allocation32_spill] sm:$0xff] }
 0x3c6   : > { %9523 = vmatmul.mubr.msk.bf16.gmra.mrb[108].mxu0 %vm3238_vm1, %v4650_v21  ;;  %3582 = vmax.xlane.f32.xlu1 %v3581_v54  ;;  %v12879_v21 = vmul.f32 0.17677669, %v12583_v60  ;;  %v3815_v49 = vmul.f32 1.442695, %v3655_v13  ;;  %v12894_v43 = vmul.f32 0.17677669, %v12699_v47  ;;  %v3660_v28 = vsub.f32 %v16832_v42, %v12697_v34 }
 0x3c7   : > { %9547 = vmatpush3.bf16.msra.mxu0 %v16823_v40  ;;  %v12859_v44 = vpop.xlane.xlu1 %3378  ;;  %16826 = vst [vmem:[#allocation29_spill] sm:$0xff] %v12872_v14  ;;  %10311 = vpow2.f32 %v3799_v62  ;;  %v3551_v54 = vsel %vm3238_vm1, %v12872_v14, -inf  ;;  %v3805_v62 = vmul.f32 1.442695, %v3650_v32  ;;  %v16833_v13 = vld [vmem:[#allocation9_spill] sm:$0xff] }
 0x3c8   : > { %9548 = vmatprep.subr.bf16.mxu0 %v16825_v29  ;;  %3525 = vmax.xlane.f32.xlu0 %v3524_v12  ;;  %v12861_v58 = vpop.f32.mrb[116].mxu1  ;;  %16827 = vst [vmem:[#allocation120_spill] sm:$0xff] %v12879_v21  ;;  %16829 = vst [vmem:[#allocation11_spill] sm:$0xff] %v12894_v43  ;;  %v16830_v12 = vld [vmem:[#allocation91_spill] sm:$0xff]  ;;  %10313 = vpow2.f32 %v3807_v35  ;;  %v3825_v34 = vmul.f32 1.442695, %v3660_v28 }
 0x3c9   : > { %v12865_v37 = vpop.xlane.xlu0 %3381  ;;  %v12867_v63 = vpop.f32.mrb[117].mxu1  ;;  %10315 = vpow2.f32 %v3815_v49  ;;  %v16835_v28 = vld [vmem:[#allocation33_spill] sm:$0xff] }
 0x3ca   : > { %v12876_v40 = vpop.f32.mrb[118].mxu1  ;;  %4113 = vadd.xlane.f32.xlu1 %v4112_v2  ;;  %v3518_v2 = vsel %vm3238_vm1, %v12879_v21, -inf  ;;  %v12909_v47 = vpop.eup %10305  ;;  %10317 = vpow2.f32 %v3805_v62 }
 0x3cb   : > { %9549 = vmatpush3.bf16.msra.mxu0 %v16825_v29  ;;  %v12884_v41 = vpop.f32.mrb[119].mxu1  ;;  %v12887_v4 = vpop.xlane.xlu1 %3402  ;;  %v12899_v29 = vmul.f32 0.17677669, %v16830_v12  ;;  %10319 = vpow2.f32 %v3825_v34 }
 0x3cc   : > { %9574 = vmatprep.subr.bf16.mxu0 %v16828_v7  ;;  %3549 = vmax.xlane.f32.xlu0 %v3548_v10  ;;  %v3648_v10 = vsub.f32 %v16833_v13, %v12613_v61  ;;  %v4109_v13 = vsel %vm3238_vm1, %v12909_v47, 0.0 }
 0x3cd   : > { %v12891_v60 = vpop.xlane.xlu0 %3405  ;;  %16831 = vst [vmem:[#allocation91_spill] sm:$0xff] %v12899_v29  ;;  %v12915_v12 = vpop.eup %10307  ;;  %v3542_v35 = vsel %vm3238_vm1, %v12899_v29, -inf }
 0x3ce   : > { %3552 = vmax.xlane.f32.xlu1 %v3551_v54  ;;  %v3575_v54 = vsel %vm3238_vm1, %v12894_v43, -inf  ;;  %v3801_v32 = vmul.f32 1.442695, %v3648_v10  ;;  %v4106_v61 = vsel %vm3238_vm1, %v12915_v12, 0.0  ;;  %v12925_v49 = vpop.eup %10309 }
 0x3cf   : > { %v12903_v20 = vpop.xlane.xlu1 %3372  ;;  %16834 = vst [vmem:[#allocation32_spill] sm:$0xff] %v12925_v49  ;;  %v4097_v10 = vsel %vm3238_vm1, %v12925_v49, 0.0 }
 0x3d0   : > { %3519 = vmax.xlane.f32.xlu0 %v3518_v2  ;;  %10321 = vpow2.f32 %v3801_v32 }
 0x3d1   : > { %v12907_v19 = vpop.xlane.xlu0 %3375 }
 0x3d2   : > { %3576 = vmax.xlane.f32.xlu1 %v3575_v54  ;;  %v12929_v54 = vpop.eup %10311 }
 0x3d3   : > { %v12919_v2 = vpop.xlane.xlu1 %3396  ;;  %v12939_v43 = vpop.eup %10313 }
 0x3d4   : > { %3543 = vmax.xlane.f32.xlu0 %v3542_v35  ;;  %v3665_v35 = vsub.f32 %v16835_v28, %v12773_v36  ;;  %16836 = vst [vmem:[#allocation9_spill] sm:$0xff] %v12939_v43  ;;  %v12943_v29 = vpop.eup %10315  ;;  %v12950_v36 = vmul.f32 0.17677669, %v12737_v9  ;;  %v4091_v32 = vsel %vm3238_vm1, %v12939_v43, 0.0  ;;  %v16844_v43 = vld [vmem:[#allocation30_spill] sm:$0xff] }
 0x3d5   : > { %v12921_v42 = vpop.xlane.xlu0 %3399  ;;  %v4103_v28 = vsel %vm3238_vm1, %v12943_v29, 0.0  ;;  %16846 = vst [vmem:[#allocation30_spill] sm:$0xff] %v13001_v56 }
 0x3d6   : > { %4107 = vadd.xlane.f32.xlu1 %v4106_v61  ;;  %v4079_v61 = vsel %vm3238_vm1, %v12929_v54, 0.0  ;;  %v3835_v34 = vmul.f32 1.442695, %v3665_v35  ;;  %16837 = vst [vmem:[#allocation33_spill] sm:$0xff] %v12950_v36  ;;  %v16838_v35 = vld [vmem:[#allocation35_spill] sm:$0xff]  ;;  %v3587_v9 = vsel %vm3238_vm1, %v12950_v36, -inf }
 0x3d7   : > { %v12931_v39 = vpop.xlane.xlu1 %3414  ;;  %v12984_v36 = vmul.f32 0.17677669, %v12682_v25  ;;  %v3596_v25 = vsel %vm3238_vm1, %v12979_v48, -inf }
 0x3d8   : > { %4110 = vadd.xlane.f32.xlu0 %v4109_v13  ;;  %10323 = vpow2.f32 %v3835_v34 }
 0x3d9   : > { %v12935_v62 = vpop.xlane.xlu0 %3417  ;;  %16842 = vst [vmem:[#allocation121_spill] sm:$0xff] %v12984_v36 }
 0x3da   : > { %4098 = vadd.xlane.f32.xlu1 %v4097_v10  ;;  %v12956_v10 = vpop.eup %10317 }
 0x3db   : > { %v12945_v31 = vpop.xlane.xlu1 %3438  ;;  %v12966_v59 = vpop.eup %10319 }
 0x3dc   : > { %4080 = vadd.xlane.f32.xlu0 %v4079_v61  ;;  %v3666_v61 = vsub.f32 %v16838_v35, %v12775_v0  ;;  %16839 = vst [vmem:[#allocation35_spill] sm:$0xff] %v12966_v59  ;;  %v12970_v53 = vpop.eup %10321  ;;  %v16840_v0 = vld [vmem:[#allocation23_spill] sm:$0xff] }
 0x3dd   : > { %v12947_v13 = vpop.xlane.xlu0 %3441  ;;  %v3661_v35 = vsub.f32 %v16840_v0, %v12653_v24  ;;  %16841 = vst [vmem:[#allocation23_spill] sm:$0xff] %v12979_v48  ;;  %v4082_v49 = vsel %vm3238_vm1, %v12970_v53, 0.0  ;;  %v13012_v48 = vmul.f32 0.17677669, %v12810_v6 }
 0x3de   : > { %4092 = vadd.xlane.f32.xlu1 %v4091_v32  ;;  %v4088_v32 = vsel %vm3238_vm1, %v12956_v10, 0.0  ;;  %v3837_v34 = vmul.f32 1.442695, %v3666_v61  ;;  %v16843_v61 = vld [vmem:[#allocation43_spill] sm:$0xff] }
 0x3df   : > { %v12958_v11 = vpop.xlane.xlu1 %3408  ;;  %v3664_v24 = vsub.f32 %v16843_v61, %v12815_v33  ;;  %v3827_v5 = vmul.f32 1.442695, %v3661_v35  ;;  %v16847_v35 = vld [vmem:[#allocation45_spill] sm:$0xff] }
 0x3e0   : > { %4104 = vadd.xlane.f32.xlu0 %v4103_v28  ;;  %10325 = vpow2.f32 %v3837_v34  ;;  %v3672_v61 = vsub.f32 %v16847_v35, %v12843_v17  ;;  %16848 = vst [vmem:[#allocation45_spill] sm:$0xff] %v13012_v48  ;;  %v16851_v35 = vld [vmem:[#allocation22_spill] sm:$0xff] }
 0x3e1   : > { %v12962_v14 = vpop.xlane.xlu0 %3411  ;;  %v3833_v33 = vmul.f32 1.442695, %v3664_v24  ;;  %10327 = vpow2.f32 %v3827_v5  ;;  %v3584_v24 = vsel %vm3238_vm1, %v13001_v56, -inf  ;;  %v13034_v56 = vmul.f32 0.17677669, %v12712_v18 }
 0x3e2   : > { %3588 = vmax.xlane.f32.xlu1 %v3587_v9  ;;  %v4118_v9 = vsel %vm3238_vm1, %v12966_v59, 0.0  ;;  %v3659_v59 = vsub.f32 %v16844_v43, %v12693_v45  ;;  %v3849_v17 = vmul.f32 1.442695, %v3672_v61 }
 0x3e3   : > { %v12972_v21 = vpop.xlane.xlu1 %3432  ;;  %10329 = vpow2.f32 %v3833_v33  ;;  %16853 = vst [vmem:[#allocation22_spill] sm:$0xff] %v13034_v56  ;;  %v3578_v18 = vsel %vm3238_vm1, %v13034_v56, -inf }
 0x3e4   : > { %4089 = vadd.xlane.f32.xlu0 %v4088_v32  ;;  %v3823_v43 = vmul.f32 1.442695, %v3659_v59  ;;  %v16850_v59 = vld [vmem:[#allocation46_spill] sm:$0xff] }
 0x3e5   : > { %v12974_v28 = vpop.xlane.xlu0 %3435  ;;  %v3669_v5 = vsub.f32 %v16850_v59, %v12859_v44 }
 0x3e6   : > { %4119 = vadd.xlane.f32.xlu1 %v4118_v9  ;;  %v12998_v9 = vpop.eup %10323  ;;  %10331 = vpow2.f32 %v3823_v43  ;;  %v13043_v43 = vmul.f32 0.17677669, %v12817_v3  ;;  %v16856_v3 = vld [vmem:[#allocation99_spill] sm:$0xff] }
 0x3e7   : > { %v12988_v32 = vpop.xlane.xlu1 %3426  ;;  %16845 = vst [vmem:[#allocation43_spill] sm:$0xff] %v12998_v9  ;;  %v4133_v23 = vsel %vm3238_vm1, %v12998_v9, 0.0  ;;  %10333 = vpow2.f32 %v3849_v17  ;;  %v3843_v44 = vmul.f32 1.442695, %v3669_v5  ;;  %v16855_v17 = vld [vmem:[#allocation47_spill] sm:$0xff] }
 0x3e8   : > { %4083 = vadd.xlane.f32.xlu0 %v4082_v49  ;;  %v3560_v49 = vsel %vm3238_vm1, %v12984_v36, -inf  ;;  %v3654_v36 = vsub.f32 %v16851_v35, %v12642_v26  ;;  %16854 = vst [vmem:[#allocation123_spill] sm:$0xff] %v13043_v43  ;;  %v3670_v5 = vsub.f32 %v16855_v17, %v12865_v37 }
 0x3e9   : > { %v12992_v0 = vpop.xlane.xlu0 %3429  ;;  %10335 = vpow2.f32 %v3843_v44 }
 0x3ea   : > { %3597 = vmax.xlane.f32.xlu1 %v3596_v25  ;;  %v13017_v25 = vmul.f32 0.17677669, %v12691_v57  ;;  %v3605_v57 = vsel %vm3238_vm1, %v13012_v48, -inf  ;;  %v3813_v26 = vmul.f32 1.442695, %v3654_v36 }
 0x3eb   : > { %v13005_v34 = vpop.xlane.xlu1 %3450  ;;  %v3845_v37 = vmul.f32 1.442695, %v3670_v5 }
 0x3ec   : > { %3561 = vmax.xlane.f32.xlu0 %v3560_v49  ;;  %16849 = vst [vmem:[#allocation122_spill] sm:$0xff] %v13017_v25  ;;  %v3554_v33 = vsel %vm3238_vm1, %v13017_v25, -inf  ;;  %10337 = vpow2.f32 %v3813_v26  ;;  %v16860_v26 = vld [vmem:[#allocation51_spill] sm:$0xff] }
 0x3ed   : > { %v13009_v45 = vpop.xlane.xlu0 %3453  ;;  %v3668_v17 = vsub.f32 %v16860_v26, %v12907_v19  ;;  %10339 = vpow2.f32 %v3845_v37  ;;  %v16865_v26 = vld [vmem:[#allocation24_spill] sm:$0xff] }
 0x3ee   : > { %4134 = vadd.xlane.f32.xlu1 %v4133_v23  ;;  %v13031_v23 = vpop.eup %10325 }
 0x3ef   : > { %v13021_v49 = vpop.xlane.xlu1 %3420  ;;  %16852 = vst [vmem:[#allocation46_spill] sm:$0xff] %v13031_v23  ;;  %v4136_v59 = vsel %vm3238_vm1, %v13031_v23, 0.0  ;;  %v13049_v35 = vpop.eup %10327  ;;  %v3841_v19 = vmul.f32 1.442695, %v3668_v17 }
 0x3f0   : > { %3585 = vmax.xlane.f32.xlu0 %v3584_v24  ;;  %v13061_v25 = vpop.eup %10329  ;;  %v4121_v56 = vsel %vm3238_vm1, %v13049_v35, 0.0 }
 0x3f1   : > { %v13025_v6 = vpop.xlane.xlu0 %3423  ;;  %16858 = vst [vmem:[#allocation47_spill] sm:$0xff] %v13061_v25 }
 0x3f2   : > { %3606 = vmax.xlane.f32.xlu1 %v3605_v57 }
 0x3f3   : > { %v13038_v61 = vpop.xlane.xlu1 %3444 }
 0x3f4   : > { %3555 = vmax.xlane.f32.xlu0 %v3554_v33  ;;  %v16857_v33 = vld [vmem:[#allocation25_spill] sm:$0xff] }
 0x3f5   : > { %v13040_v24 = vpop.xlane.xlu0 %3447  ;;  %v3662_v48 = vsub.f32 %v16857_v33, %v16856_v3  ;;  %v4130_v33 = vsel %vm3238_vm1, %v13061_v25, 0.0 }
 0x3f6   : > { %4137 = vadd.xlane.f32.xlu1 %v4136_v59  ;;  %v3599_v59 = vsel %vm3238_vm1, %v13043_v43, -inf }
 0x3f7   : > { %v13051_v57 = vpop.xlane.xlu1 %3462  ;;  %v3829_v3 = vmul.f32 1.442695, %v3662_v48  ;;  %v16864_v48 = vld [vmem:[#allocation102_spill] sm:$0xff] }
 0x3f8   : > { %3579 = vmax.xlane.f32.xlu0 %v3578_v18  ;;  %v13065_v18 = vpop.eup %10331 }
 0x3f9   : > { %v13055_v36 = vpop.xlane.xlu0 %3465  ;;  %v13075_v43 = vpop.eup %10333  ;;  %10341 = vpow2.f32 %v3829_v3  ;;  %v13101_v3 = vmul.f32 0.17677669, %v12861_v58 }
 0x3fa   : > { %3600 = vmax.xlane.f32.xlu1 %v3599_v59  ;;  %16862 = vst [vmem:[#allocation51_spill] sm:$0xff] %v13075_v43  ;;  %v13078_v59 = vmul.f32 0.17677669, %v12714_v55  ;;  %v4154_v25 = vsel %vm3238_vm1, %v13075_v43, 0.0  ;;  %v13090_v55 = vpop.eup %10335  ;;  %10343 = vpow2.f32 %v3841_v19  ;;  %v16871_v19 = vld [vmem:[#allocation52_spill] sm:$0xff]  ;;  %v16885_v43 = vld [vmem:[#allocation42_spill] sm:$0xff] }
 0x3fb   : > { %v13067_v44 = vpop.xlane.xlu1 %3486  ;;  %16866 = vst [vmem:[#allocation102_spill] sm:$0xff] %v13090_v55  ;;  %v13094_v23 = vpop.eup %10337  ;;  %16869 = vst [vmem:[#allocation126_spill] sm:$0xff] %v13101_v3  ;;  %v3617_v58 = vsel %vm3238_vm1, %v13101_v3, -inf }
 0x3fc   : > { %16859 = vst [vmem:[#allocation99_spill] sm:$0xff] %v13067_v44  ;;  %4122 = vadd.xlane.f32.xlu0 %v4121_v56  ;;  %16863 = vst [vmem:[#allocation124_spill] sm:$0xff] %v13078_v59  ;;  %v4115_v44 = vsel %vm3238_vm1, %v13065_v18, 0.0 }
 0x3fd   : > { %v13071_v9 = vpop.xlane.xlu0 %3489 }
 0x3fe   : > { %16861 = vst [vmem:[#allocation25_spill] sm:$0xff] %v13071_v9  ;;  %4131 = vadd.xlane.f32.xlu1 %v4130_v33  ;;  %v3652_v9 = vsub.f32 %v16865_v26, %v16864_v48  ;;  %v3569_v33 = vsel %vm3238_vm1, %v13078_v59, -inf  ;;  %v4145_v48 = vsel %vm3238_vm1, %v13090_v55, 0.0  ;;  %v4100_v26 = vsel %vm3238_vm1, %v13094_v23, 0.0 }
 0x3ff   : > { %v13082_v56 = vpop.xlane.xlu1 %3456 }
 0x400   : > { %4116 = vadd.xlane.f32.xlu0 %v4115_v44  ;;  %v3809_v17 = vmul.f32 1.442695, %v3652_v9 }
 0x401   : > { %v13084_v5 = vpop.xlane.xlu0 %3459 }
 0x402   : > { %4155 = vadd.xlane.f32.xlu1 %v4154_v25  ;;  %v13106_v25 = vmul.f32 0.17677669, %v12735_v51  ;;  %10345 = vpow2.f32 %v3809_v17 }
 0x403   : > { %v13096_v44 = vpop.xlane.xlu1 %3480 }
 0x404   : > { %16867 = vst [vmem:[#allocation24_spill] sm:$0xff] %v13096_v44  ;;  %3570 = vmax.xlane.f32.xlu0 %v3569_v33  ;;  %16870 = vst [vmem:[#allocation127_spill] sm:$0xff] %v13106_v25  ;;  %v3675_v33 = vsub.f32 %v16871_v19, %v12919_v2  ;;  %v13118_v44 = vpop.eup %10339  ;;  %v3593_v51 = vsel %vm3238_vm1, %v13106_v25, -inf }
 0x405   : > { %v13098_v37 = vpop.xlane.xlu0 %3483  ;;  %16872 = vst [vmem:[#allocation52_spill] sm:$0xff] %v13118_v44  ;;  %v4148_v17 = vsel %vm3238_vm1, %v13118_v44, 0.0 }
 0x406   : > { %16868 = vst [vmem:[#allocation125_spill] sm:$0xff] %v13098_v37  ;;  %4146 = vadd.xlane.f32.xlu1 %v4145_v48  ;;  %v13122_v48 = vpop.eup %10341  ;;  %v3855_v19 = vmul.f32 1.442695, %v3675_v33 }
 0x407   : > { %v13110_v59 = vpop.xlane.xlu1 %3474  ;;  %v13132_v3 = vpop.eup %10343  ;;  %v4124_v25 = vsel %vm3238_vm1, %v13122_v48, 0.0 }
 0x408   : > { %4101 = vadd.xlane.f32.xlu0 %v4100_v26  ;;  %v16874_v26 = vld [vmem:[#allocation48_spill] sm:$0xff]  ;;  %16876 = vst [vmem:[#allocation129_spill] sm:$0xff] %v13132_v3  ;;  %10347 = vpow2.f32 %v3855_v19 }
 0x409   : > { %v13114_v9 = vpop.xlane.xlu0 %3477  ;;  %v3677_v2 = vsub.f32 %v16874_v26, %v12887_v4  ;;  %v16879_v4 = vld [vmem:[#allocation54_spill] sm:$0xff] }
 0x40a   : > { %3618 = vmax.xlane.f32.xlu1 %v3617_v58  ;;  %v13135_v58 = vmul.f32 0.17677669, %v12718_v27  ;;  %v3681_v33 = vsub.f32 %v16879_v4, %v12931_v39  ;;  %v13148_v27 = vmul.f32 0.17677669, %v12876_v40  ;;  %v16883_v4 = vld [vmem:[#allocation58_spill] sm:$0xff] }
 0x40b   : > { %v13124_v37 = vpop.xlane.xlu1 %3498 }
 0x40c   : > { %16873 = vst [vmem:[#allocation128_spill] sm:$0xff] %v13124_v37  ;;  %3594 = vmax.xlane.f32.xlu0 %v3593_v51  ;;  %16877 = vst [vmem:[#allocation130_spill] sm:$0xff] %v13135_v58  ;;  %v3859_v51 = vmul.f32 1.442695, %v3677_v2  ;;  %v13154_v2 = vpop.eup %10345  ;;  %v3867_v39 = vmul.f32 1.442695, %v3681_v33 }
 0x40d   : > { %v13128_v55 = vpop.xlane.xlu0 %3501  ;;  %16881 = vst [vmem:[#allocation54_spill] sm:$0xff] %v13148_v27  ;;  %v16889_v33 = vld [vmem:[#allocation62_spill] sm:$0xff] }
 0x40e   : > { %16875 = vst [vmem:[#allocation48_spill] sm:$0xff] %v13128_v55  ;;  %4149 = vadd.xlane.f32.xlu1 %v4148_v17  ;;  %v16880_v55 = vld [vmem:[#allocation38_spill] sm:$0xff]  ;;  %v4142_v17 = vsel %vm3238_vm1, %v13132_v3, 0.0  ;;  %10349 = vpow2.f32 %v3859_v51  ;;  %v3663_v3 = vsub.f32 %v16885_v43, %v12808_v30  ;;  %v4094_v51 = vsel %vm3238_vm1, %v13154_v2, 0.0 }
 0x40f   : > { %v13139_v37 = vpop.xlane.xlu1 %3468  ;;  %v3673_v44 = vsub.f32 %v16880_v55, %v12791_v22  ;;  %v3679_v22 = vsub.f32 %v16883_v4, %v12958_v11  ;;  %10351 = vpow2.f32 %v3867_v39  ;;  %v3685_v30 = vsub.f32 %v16889_v33, %v12988_v32 }
 0x410   : > { %16878 = vst [vmem:[#allocation131_spill] sm:$0xff] %v13139_v37  ;;  %4125 = vadd.xlane.f32.xlu0 %v4124_v25  ;;  %v3563_v25 = vsel %vm3238_vm1, %v13135_v58, -inf  ;;  %v3620_v58 = vsel %vm3238_vm1, %v13148_v27, -inf  ;;  %v16887_v37 = vld [vmem:[#allocation107_spill] sm:$0xff]  ;;  %v13183_v27 = vmul.f32 0.17677669, %v12733_v46 }
 0x411   : > { %v13143_v26 = vpop.xlane.xlu0 %3471  ;;  %v3851_v40 = vmul.f32 1.442695, %v3673_v44  ;;  %v3863_v44 = vmul.f32 1.442695, %v3679_v22  ;;  %v3875_v32 = vmul.f32 1.442695, %v3685_v30 }
 0x412   : > { %4143 = vadd.xlane.f32.xlu1 %v4142_v17  ;;  %v13165_v17 = vmul.f32 0.17677669, %v12884_v41  ;;  %v3831_v41 = vmul.f32 1.442695, %v3663_v3  ;;  %v16893_v3 = vld [vmem:[#allocation66_spill] sm:$0xff] }
 0x413   : > { %v13156_v19 = vpop.xlane.xlu1 %3492  ;;  %10353 = vpow2.f32 %v3851_v40  ;;  %v3683_v40 = vsub.f32 %v16893_v3, %v13021_v49 }
 0x414   : > { %16882 = vst [vmem:[#allocation38_spill] sm:$0xff] %v13156_v19  ;;  %3564 = vmax.xlane.f32.xlu0 %v3563_v25  ;;  %16886 = vst [vmem:[#allocation42_spill] sm:$0xff] %v13165_v17  ;;  %v13170_v19 = vmul.f32 0.17677669, %v16887_v37  ;;  %v16890_v25 = vld [vmem:[#allocation44_spill] sm:$0xff]  ;;  %v3614_v37 = vsel %vm3238_vm1, %v13165_v17, -inf  ;;  %10355 = vpow2.f32 %v3863_v44 }
 0x415   : > { %v13160_v55 = vpop.xlane.xlu0 %3495  ;;  %v3671_v4 = vsub.f32 %v16890_v25, %v12838_v50  ;;  %16892 = vst [vmem:[#allocation44_spill] sm:$0xff] %v13183_v27  ;;  %10357 = vpow2.f32 %v3831_v41  ;;  %v16896_v17 = vld [vmem:[#allocation111_spill] sm:$0xff]  ;;  %v3566_v44 = vsel %vm3238_vm1, %v13183_v27, -inf  ;;  %v3871_v49 = vmul.f32 1.442695, %v3683_v40 }
 0x416   : > { %16884 = vst [vmem:[#allocation58_spill] sm:$0xff] %v13160_v55  ;;  %16888 = vst [vmem:[#allocation107_spill] sm:$0xff] %v13170_v19  ;;  %3621 = vmax.xlane.f32.xlu1 %v3620_v58  ;;  %v13180_v58 = vpop.eup %10347  ;;  %v3572_v39 = vsel %vm3238_vm1, %v13170_v19, -inf  ;;  %v13196_v19 = vmul.f32 0.17677669, %v16896_v17  ;;  %10359 = vpow2.f32 %v3875_v32  ;;  %v16916_v55 = vld [vmem:[#allocation96_spill] sm:$0xff] }
 0x417   : > { %v4039_v11 = vpop.xlane.xlu1 %4038  ;;  %16891 = vst [vmem:[#allocation62_spill] sm:$0xff] %v13180_v58  ;;  %v3847_v25 = vmul.f32 1.442695, %v3671_v4  ;;  %v4163_v46 = vsel %vm3238_vm1, %v13180_v58, 0.0  ;;  %v16913_v58 = vld [vmem:[#allocation92_spill] sm:$0xff] }
 0x418   : > { %4095 = vadd.xlane.f32.xlu0 %v4094_v51  ;;  %v16894_v51 = vld [vmem:[#allocation37_spill] sm:$0xff]  ;;  %v3590_v17 = vsel %vm3238_vm1, %v13196_v19, -inf }
 0x419   : > { %v4063_v43 = vpop.xlane.xlu0 %4062  ;;  %v3674_v33 = vsub.f32 %v16894_v51, %v12794_v1  ;;  %16897 = vst [vmem:[#allocation37_spill] sm:$0xff] %v13196_v19  ;;  %10361 = vpow2.f32 %v3847_v25 }
 0x41a   : > { %3615 = vmax.xlane.f32.xlu1 %v3614_v37  ;;  %v13193_v37 = vpop.eup %10349  ;;  %10363 = vpow2.f32 %v3871_v49 }
 0x41b   : > { %v4033_v22 = vpop.xlane.xlu1 %4032  ;;  %16895 = vst [vmem:[#allocation66_spill] sm:$0xff] %v13193_v37  ;;  %v3853_v41 = vmul.f32 1.442695, %v3674_v33  ;;  %v4169_v4 = vsel %vm3238_vm1, %v13193_v37, 0.0 }
 0x41c   : > { %3573 = vmax.xlane.f32.xlu0 %v3572_v39  ;;  %v13204_v39 = vpop.eup %10351 }
 0x41d   : > { %v4057_v50 = vpop.xlane.xlu0 %4056  ;;  %16899 = vst [vmem:[#allocation132_spill] sm:$0xff] %v13204_v39  ;;  %v13208_v3 = vpop.eup %10353  ;;  %10365 = vpow2.f32 %v3853_v41  ;;  %v4181_v40 = vsel %vm3238_vm1, %v13204_v39, 0.0  ;;  %v16915_v39 = vld [vmem:[#allocation88_spill] sm:$0xff] }
 0x41e   : > { %4164 = vadd.xlane.f32.xlu1 %v4163_v46  ;;  %16900 = vst [vmem:[#allocation133_spill] sm:$0xff] %v13208_v3  ;;  %v13214_v33 = vpop.eup %10355  ;;  %v4157_v25 = vsel %vm3238_vm1, %v13208_v3, 0.0 }
 0x41f   : > { %v13200_v30 = vpop.xlane.xlu1 %3510  ;;  %16902 = vst [vmem:[#allocation135_spill] sm:$0xff] %v13214_v33  ;;  %v13218_v46 = vpop.eup %10357  ;;  %v4175_v41 = vsel %vm3238_vm1, %v13214_v33, 0.0  ;;  %v16919_v33 = vld [vmem:[#allocation49_spill] sm:$0xff] }
 0x420   : > { %16898 = vst [vmem:[#allocation111_spill] sm:$0xff] %v13200_v30  ;;  %3567 = vmax.xlane.f32.xlu0 %v3566_v44 }
 0x421   : > { %v4042_v1 = vpop.xlane.xlu0 %4041 }
 0x422   : > { %4170 = vadd.xlane.f32.xlu1 %v4169_v4  ;;  %10367 = vrcp.f32 %v4042_v1  ;;  %v13224_v4 = vpop.eup %10359  ;;  %v16905_v1 = vld [vmem:[#allocation50_spill] sm:$0xff] }
 0x423   : > { %v13210_v51 = vpop.xlane.xlu1 %3534  ;;  %10369 = vrcp.f32 %v4033_v22  ;;  %16904 = vst [vmem:[#allocation137_spill] sm:$0xff] %v13224_v4  ;;  %v13230_v22 = vpop.eup %10361 }
 0x424   : > { %16901 = vst [vmem:[#allocation134_spill] sm:$0xff] %v13210_v51  ;;  %3591 = vmax.xlane.f32.xlu0 %v3590_v17  ;;  %10371 = vrcp.f32 %v4039_v11  ;;  %v3667_v17 = vsub.f32 %v16905_v1, %v12903_v20  ;;  %16906 = vst [vmem:[#allocation50_spill] sm:$0xff] %v13230_v22  ;;  %v13236_v19 = vpop.eup %10363  ;;  %v13249_v51 = vmul.f32 0.17677669, %v12826_v15 }
 0x425   : > { %v4066_v32 = vpop.xlane.xlu0 %4065  ;;  %16908 = vst [vmem:[#allocation139_spill] sm:$0xff] %v13236_v19 }
 0x426   : > { %4182 = vadd.xlane.f32.xlu1 %v4181_v40  ;;  %v4127_v40 = vsel %vm3238_vm1, %v13218_v46, 0.0  ;;  %v3839_v20 = vmul.f32 1.442695, %v3667_v17  ;;  %16911 = vst [vmem:[#allocation142_spill] sm:$0xff] %v13249_v51  ;;  %v16912_v17 = vld [vmem:[#allocation53_spill] sm:$0xff] }
 0x427   : > { %v13220_v44 = vpop.xlane.xlu1 %3504 }
 0x428   : > { %16903 = vst [vmem:[#allocation136_spill] sm:$0xff] %v13220_v44  ;;  %4158 = vadd.xlane.f32.xlu0 %v4157_v25 }
 0x429   : > { %v4036_v49 = vpop.xlane.xlu0 %4035 }
 0x42a   : > { %10373 = vrcp.f32 %v4036_v49  ;;  %4176 = vadd.xlane.f32.xlu1 %v4175_v41  ;;  %v4193_v49 = vsel %vm3238_vm1, %v13224_v4, 0.0  ;;  %v13240_v41 = vpop.eup %10365 }
 0x42b   : > { %10375 = vrcp.f32 %v4066_v32  ;;  %v13232_v25 = vpop.xlane.xlu1 %3528  ;;  %v4151_v32 = vsel %vm3238_vm1, %v13230_v22, 0.0  ;;  %16909 = vst [vmem:[#allocation140_spill] sm:$0xff] %v13240_v41  ;;  %v4160_v37 = vsel %vm3238_vm1, %v13240_v41, 0.0 }
 0x42c   : > { %10377 = vrcp.f32 %v4057_v50  ;;  %16907 = vst [vmem:[#allocation138_spill] sm:$0xff] %v13232_v25  ;;  %4128 = vadd.xlane.f32.xlu0 %v4127_v40  ;;  %v10368_v50 = vpop.eup %10367 }
 0x42d   : > { %10379 = vrcp.f32 %v4063_v43  ;;  %v4060_v11 = vpop.xlane.xlu0 %4059  ;;  %v10370_v43 = vpop.eup %10369  ;;  %v4530_v3 = vmul.f32 %v10368_v50, %v16913_v58  ;;  %v3678_v58 = vsub.f32 %v16919_v33, %v12891_v60  ;;  %v16923_v60 = vld [vmem:[#allocation87_spill] sm:$0xff] }
 0x42e   : > { %10381 = vrcp.f32 %v4060_v11  ;;  %4194 = vadd.xlane.f32.xlu1 %v4193_v49  ;;  %v4187_v11 = vsel %vm3238_vm1, %v13236_v19, 0.0  ;;  %v10372_v27 = vpop.eup %10371  ;;  %v3676_v49 = vsub.f32 %v16912_v17, %v12921_v42  ;;  %v4527_v15 = vmul.f32 %v10370_v43, %v16915_v39  ;;  %v16920_v39 = vld [vmem:[#allocation94_spill] sm:$0xff] }
 0x42f   : > { %v13242_v1 = vpop.xlane.xlu1 %4050  ;;  %10383 = vpow2.f32 %v3839_v20  ;;  %v13263_v42 = vmul.f32 0.17677669, %v12835_v16 }
 0x430   : > { %4152 = vadd.xlane.f32.xlu0 %v4151_v32  ;;  %v3857_v50 = vmul.f32 1.442695, %v3676_v49 }
 0x431   : > { %v13244_v40 = vpop.xlane.xlu0 %3513  ;;  %16917 = vst [vmem:[#allocation92_spill] sm:$0xff] %v13263_v42  ;;  %v3602_v49 = vsel %vm3238_vm1, %v13263_v42, -inf }
 0x432   : > { %16910 = vst [vmem:[#allocation141_spill] sm:$0xff] %v13244_v40  ;;  %4188 = vadd.xlane.f32.xlu1 %v4187_v11  ;;  %v16918_v11 = vld [vmem:[#allocation86_spill] sm:$0xff]  ;;  %10385 = vpow2.f32 %v3857_v50  ;;  %v16930_v50 = vld [vmem:[#allocation36_spill] sm:$0xff] }
 0x433   : > { %v13256_v25 = vpop.xlane.xlu1 %4074  ;;  %v4529_v17 = vmul.f32 %v10372_v27, %v16918_v11  ;;  %v16921_v27 = vld [vmem:[#allocation89_spill] sm:$0xff]  ;;  %v16922_v11 = vld [vmem:[#allocation98_spill] sm:$0xff] }
 0x434   : > { %v10374_v32 = vpop.eup %10373  ;;  %4161 = vadd.xlane.f32.xlu0 %v4160_v37  ;;  %v3608_v37 = vsel %vm3238_vm1, %v13249_v51, -inf }
 0x435   : > { %v10376_v4 = vpop.eup %10375  ;;  %v13258_v19 = vpop.xlane.xlu0 %3537  ;;  %v4528_v20 = vmul.f32 %v10374_v32, %v16916_v55  ;;  %v4652_v44 = vpack.c.bf16 %v4530_v3, %v4529_v17  ;;  %v3861_v3 = vmul.f32 1.442695, %v3678_v58 }
 0x436   : > { %16914 = vst [vmem:[#allocation53_spill] sm:$0xff] %v13258_v19  ;;  %v10378_v40 = vpop.eup %10377  ;;  %v4538_v43 = vmul.f32 %v10376_v4, %v16920_v39  ;;  %v16924_v4 = vld [vmem:[#allocation55_spill] sm:$0xff]  ;;  %v16931_v39 = vld [vmem:[#allocation10_spill] sm:$0xff] }
 0x437   : > { %v10380_v41 = vpop.eup %10379  ;;  %v4651_v30 = vpack.c.bf16 %v4528_v20, %v4527_v15  ;;  %v4045_v55 = vpop.xlane.xlu1 %4044  ;;  %v4535_v32 = vmul.f32 %v10378_v40, %v16921_v27  ;;  %v3682_v15 = vsub.f32 %v16924_v4, %v12935_v62  ;;  %v16925_v20 = vld [vmem:[#allocation28_spill] sm:$0xff]  ;;  %10387 = vpow2.f32 %v3861_v3 }
 0x438   : > { %v10382_v19 = vpop.eup %10381  ;;  %3609 = vmax.xlane.f32.xlu0 %v3608_v37  ;;  %v4537_v33 = vmul.f32 %v10380_v41, %v16923_v60  ;;  %v16926_v37 = vld [vmem:[#allocation27_spill] sm:$0xff] }
 0x439   : > { %9534 = vmatprep.mubr.msk.bf16.mxu1 %vm3238_vm1, %v4651_v30  ;;  %v13272_v16 = vpop.xlane.xlu0 %3507  ;;  %v4536_v22 = vmul.f32 %v10382_v19, %v16922_v11  ;;  %v13284_v19 = vpop.eup %10383  ;;  %v16928_v41 = vld [vmem:[#allocation59_spill] sm:$0xff]  ;;  %v3869_v62 = vmul.f32 1.442695, %v3682_v15  ;;  %v16937_v15 = vld [vmem:[#allocation12_spill] sm:$0xff] }
 0x43a   : > { %9535 = vmatmul.mubr.msk.bf16.vlgmr.msra.gmra.mrb[120].mxu1 %vm3238_vm1, %v4652_v44  ;;  %v4656_v17 = vpack.c.bf16 %v4538_v43, %v4537_v33  ;;  %v3680_v58 = vsub.f32 %v16928_v41, %v12962_v14  ;;  %v4139_v14 = vsel %vm3238_vm1, %v13284_v19, 0.0  ;;  %v16932_v11 = vld [vmem:[#allocation63_spill] sm:$0xff]  ;;  %v16934_v33 = vld [vmem:[#allocation13_spill] sm:$0xff] }
 0x43b   : > { %9559 = vmatpush3.bf16.msra.mxu1 %v16925_v20  ;;  %v4655_v30 = vpack.c.bf16 %v4536_v22, %v4535_v32  ;;  %v4069_v40 = vpop.xlane.xlu1 %4068  ;;  %v13295_v22 = vmul.f32 0.17677669, %v12867_v63  ;;  %10389 = vpow2.f32 %v3869_v62  ;;  %v3686_v60 = vsub.f32 %v16932_v11, %v12992_v0  ;;  %v16933_v63 = vld [vmem:[#allocation31_spill] sm:$0xff] }
 0x43c   : > { %9560 = vmatprep.subr.bf16.mxu1 %v16926_v37  ;;  %3603 = vmax.xlane.f32.xlu0 %v3602_v49  ;;  %v3865_v32 = vmul.f32 1.442695, %v3680_v58  ;;  %v13313_v4 = vpop.eup %10385 }
 0x43d   : > { %9550 = vmatprep.mubr.msk.bf16.mxu0 %vm3238_vm1, %v4655_v30  ;;  %v13287_v44 = vpop.xlane.xlu0 %3531  ;;  %16929 = vst [vmem:[#allocation96_spill] sm:$0xff] %v13295_v22  ;;  %v3611_v3 = vsel %vm3238_vm1, %v13295_v22, -inf  ;;  %16936 = vst [vmem:[#allocation49_spill] sm:$0xff] %v13313_v4  ;;  %v3877_v20 = vmul.f32 1.442695, %v3686_v60  ;;  %v16938_v30 = vld [vmem:[#allocation67_spill] sm:$0xff] }
 0x43e   : > { %16927 = vst [vmem:[#allocation88_spill] sm:$0xff] %v13287_v44  ;;  %9551 = vmatmul.mubr.msk.bf16.vlgmr.msra.gmra.mrb[112].mxu0 %vm3238_vm1, %v4656_v17  ;;  %10391 = vpow2.f32 %v3865_v32  ;;  %v3684_v17 = vsub.f32 %v16938_v30, %v13025_v6  ;;  %v4166_v58 = vsel %vm3238_vm1, %v13313_v4, 0.0 }
 0x43f   : > { %9561 = vmatpush3.bf16.msra.mxu1 %v16926_v37  ;;  %9575 = vmatpush3.bf16.msra.mxu0 %v16828_v7  ;;  %v13299_v43 = vpop.xlane.xlu1 %3522  ;;  %v16939_v37 = vld [vmem:[#allocation39_spill] sm:$0xff] }
 0x440   : > { %9562 = vmatprep.subr.bf16.mxu1 %v16930_v50  ;;  %9576 = vmatprep.subr.bf16.mxu0 %v16931_v39 }
 0x441   : > { %4140 = vadd.xlane.f32.xlu0 %v4139_v14  ;;  %v4054_v27 = vpop.xlane.xlu0 %4053  ;;  %v13327_v62 = vpop.eup %10387 }
 0x442   : > { %10393 = vrcp.f32 %v4054_v27  ;;  %16940 = vst [vmem:[#allocation94_spill] sm:$0xff] %v13327_v62  ;;  %v4172_v14 = vsel %vm3238_vm1, %v13327_v62, 0.0 }
 0x443   : > { %9563 = vmatpush3.bf16.msra.mxu1 %v16930_v50  ;;  %9577 = vmatpush3.bf16.msra.mxu0 %v16931_v39  ;;  %v13309_v49 = vpop.xlane.xlu1 %3546  ;;  %10395 = vrcp.f32 %v4045_v55  ;;  %v3873_v55 = vmul.f32 1.442695, %v3684_v17 }
 0x444   : > { %9564 = vmatprep.subr.bf16.mxu1 %v16933_v63  ;;  %9578 = vmatprep.subr.bf16.mxu0 %v16934_v33  ;;  %16935 = vst [vmem:[#allocation86_spill] sm:$0xff] %v13309_v49  ;;  %10397 = vrcp.f32 %v13242_v1 }
 0x445   : > { %1575 = vrot.lane.b32.xlu1 %v16937_v15, %s10953_s19  ;;  %3612 = vmax.xlane.f32.xlu0 %v3611_v3  ;;  %v4078_v0 = vpop.xlane.xlu0 %4077  ;;  %v13337_v27 = vpop.eup %10389 }
 0x446   : > { %v4184_v60 = vsel %vm3238_vm1, %v13337_v27, 0.0 }
 0x447   : > { %9565 = vmatpush3.bf16.msra.mxu1 %v16933_v63  ;;  %9579 = vmatpush3.bf16.msra.mxu0 %v16934_v33  ;;  %v13323_v41 = vpop.xlane.xlu1 %3516 }
 0x448   : > { %9580 = vmatprep.subr.bf16.mxu0 %v16937_v15  ;;  %9590 = vmatprep.subr.bf16.mxu1 %v16939_v37  ;;  %v13341_v1 = vpop.eup %10391 }
 0x449   : > { %1593 = vrot.lane.b32.xlu1 %v16828_v7, %s10954_s29  ;;  %4167 = vadd.xlane.f32.xlu0 %v4166_v58  ;;  %v4048_v6 = vpop.xlane.xlu0 %4047 }
 0x44a   : > { %10399 = vrcp.f32 %v4048_v6  ;;  %v16944_v6 = vld [vmem:[#allocation112_spill] sm:$0xff] }
 0x44b   : > { %10401 = vpow2.f32 %v3877_v20  ;;  %9581 = vmatpush3.bf16.msra.mxu0 %v16937_v15  ;;  %v13333_v50 = vpop.xlane.xlu1 %4086 }
 0x44c   : > { %10403 = vpow2.f32 %v3873_v55  ;;  %v10394_v63 = vpop.eup %10393 }
 0x44d   : > { %4173 = vadd.xlane.f32.xlu0 %v4172_v14  ;;  %v13339_v32 = vpop.xlane.xlu0 %3540  ;;  %10405 = vrcp.f32 %v4078_v0  ;;  %v10396_v20 = vpop.eup %10395  ;;  %v4178_v0 = vsel %vm3238_vm1, %v13341_v1, 0.0  ;;  %v4534_v55 = vmul.f32 %v10394_v63, %v16944_v6 }
 0x44e   : > { %16941 = vst [vmem:[#allocation89_spill] sm:$0xff] %v13339_v32  ;;  %10407 = vrcp.f32 %v4069_v40  ;;  %v10398_v30 = vpop.eup %10397  ;;  %v16946_v40 = vld [vmem:[#allocation105_spill] sm:$0xff] }
 0x44f   : > { %v13343_v11 = vpop.xlane.xlu1 %3558  ;;  %10409 = vrcp.f32 %v13256_v25  ;;  %v16947_v25 = vld [vmem:[#allocation100_spill] sm:$0xff] }
 0x450   : > { %16942 = vst [vmem:[#allocation98_spill] sm:$0xff] %v13343_v11  ;;  %v4533_v42 = vmul.f32 %v10398_v30, %v16947_v25  ;;  %v16950_v30 = vld [vmem:[#allocation57_spill] sm:$0xff]  ;;  %v16953_v25 = vld [vmem:[#allocation108_spill] sm:$0xff] }
 0x451   : > { %4185 = vadd.xlane.f32.xlu0 %v4184_v60  ;;  %v4072_v3 = vpop.xlane.xlu0 %4071  ;;  %v4531_v60 = vmul.f32 %v10396_v20, %v16946_v40 }
 0x452   : > { %10411 = vrcp.f32 %v4072_v3  ;;  %v16948_v3 = vld [vmem:[#allocation60_spill] sm:$0xff]  ;;  %v4654_v63 = vpack.c.bf16 %v4534_v55, %v4533_v42 }
 0x453   : > { %v13348_v58 = vpop.xlane.xlu1 %3582  ;;  %v3687_v49 = vsub.f32 %v16948_v3, %v12972_v21  ;;  %v3690_v21 = vsub.f32 %v16950_v30, %v12947_v13  ;;  %v16954_v13 = vld [vmem:[#allocation75_spill] sm:$0xff] }
 0x454   : > { %v10400_v17 = vpop.eup %10399  ;;  %16943 = vst [vmem:[#allocation87_spill] sm:$0xff] %v13348_v58  ;;  %v16955_v30 = vld [vmem:[#allocation103_spill] sm:$0xff] }
 0x455   : > { %v13353_v14 = vpop.eup %10401  ;;  %4179 = vadd.xlane.f32.xlu0 %v4178_v0  ;;  %v13355_v22 = vpop.xlane.xlu0 %3525  ;;  %v4532_v51 = vmul.f32 %v10400_v17, %v12761_v52 }
 0x456   : > { %16945 = vst [vmem:[#allocation55_spill] sm:$0xff] %v13353_v14  ;;  %v4196_v44 = vsel %vm3238_vm1, %v13353_v14, 0.0  ;;  %v13364_v6 = vpop.eup %10403  ;;  %v16957_v14 = vld [vmem:[#allocation70_spill] sm:$0xff] }
 0x457   : > { %v4653_v58 = vpack.c.bf16 %v4532_v51, %v4531_v60  ;;  %v4114_v32 = vpop.xlane.xlu1 %4113  ;;  %v10406_v20 = vpop.eup %10405  ;;  %v3879_v51 = vmul.f32 1.442695, %v3687_v49  ;;  %v4190_v42 = vsel %vm3238_vm1, %v13364_v6, 0.0  ;;  %v3696_v49 = vsub.f32 %v16954_v13, %v13084_v5 }
 0x458   : > { %v10408_v52 = vpop.eup %10407 }
 0x459   : > { %4197 = vadd.xlane.f32.xlu0 %v4196_v44  ;;  %9538 = vmatprep.mubr.msk.bf16.mxu1 %vm3238_vm1, %v4653_v58  ;;  %v13367_v0 = vpop.xlane.xlu0 %3549  ;;  %v10410_v17 = vpop.eup %10409  ;;  %v16952_v58 = vld [vmem:[#allocation114_spill] sm:$0xff]  ;;  %v4539_v3 = vmul.f32 %v10408_v52, %v16953_v25  ;;  %10413 = vpow2.f32 %v3879_v51  ;;  %v16958_v51 = vld [vmem:[#allocation71_spill] sm:$0xff] }
 0x45a   : > { %16949 = vst [vmem:[#allocation28_spill] sm:$0xff] %v13367_v0  ;;  %9539 = vmatmul.mubr.msk.bf16.gmra.mrb[124].mxu1 %vm3238_vm1, %v4654_v63  ;;  %v4542_v60 = vmul.f32 %v10406_v20, %v16952_v58  ;;  %v3885_v0 = vmul.f32 1.442695, %v3690_v21  ;;  %v3697_v20 = vsub.f32 %v16957_v14, %v13051_v57 }
 0x45b   : > { %v13372_v40 = vpop.xlane.xlu1 %3552 }
 0x45c   : > { %16951 = vst [vmem:[#allocation27_spill] sm:$0xff] %v13372_v40  ;;  %v10412_v55 = vpop.eup %10411  ;;  %v4541_v40 = vmul.f32 %v10410_v17, %v16955_v30  ;;  %10415 = vpow2.f32 %v3885_v0  ;;  %v3899_v5 = vmul.f32 1.442695, %v3697_v20  ;;  %v3698_v17 = vsub.f32 %v16958_v51, %v13055_v36 }
 0x45d   : > { %4191 = vadd.xlane.f32.xlu0 %v4190_v42  ;;  %v13376_v44 = vpop.xlane.xlu0 %3519  ;;  %v4540_v63 = vmul.f32 %v10412_v55, %v12789_v8  ;;  %v3897_v8 = vmul.f32 1.442695, %v3696_v49 }
 0x45e   : > { %v4658_v42 = vpack.c.bf16 %v4542_v60, %v4541_v40  ;;  %v3901_v57 = vmul.f32 1.442695, %v3698_v17 }
 0x45f   : > { %v13384_v62 = vpop.xlane.xlu1 %3576  ;;  %v4657_v4 = vpack.c.bf16 %v4540_v63, %v4539_v3  ;;  %10417 = vpow2.f32 %v3897_v8 }
 0x460   : > { %16956 = vst [vmem:[#allocation59_spill] sm:$0xff] %v13384_v62  ;;  %10419 = vpow2.f32 %v3899_v5  ;;  %v17000_v62 = vld [vmem:[#allocation43_spill] sm:$0xff] }
 0x461   : > { %v13386_v11 = vpop.xlane.xlu0 %3543  ;;  %9554 = vmatprep.mubr.msk.bf16.mxu0 %vm3238_vm1, %v4657_v4 }
 0x462   : > { %9555 = vmatmul.mubr.msk.bf16.gmra.mrb[116].mxu0 %vm3238_vm1, %v4658_v42 }
 0x463   : > { %v4108_v52 = vpop.xlane.xlu1 %4107  ;;  %v13396_v58 = vpop.eup %10413 }
 0x464   : > { %v4199_v14 = vsel %vm3238_vm1, %v13396_v58, 0.0 }
 0x465   : > { %v4111_v21 = vpop.xlane.xlu0 %4110 }
 0x466   : > { %10421 = vrcp.f32 %v4111_v21  ;;  %v13402_v0 = vpop.eup %10415 }
 0x467   : > { %v13394_v55 = vpop.xlane.xlu1 %4098  ;;  %10423 = vrcp.f32 %v4108_v52  ;;  %v4208_v25 = vsel %vm3238_vm1, %v13402_v0, 0.0 }
 0x468   : > { %10425 = vrcp.f32 %v4114_v32 }
 0x469   : > { %v4081_v40 = vpop.xlane.xlu0 %4080  ;;  %v13408_v3 = vpop.eup %10417 }
 0x46a   : > { %v13412_v13 = vpop.eup %10419  ;;  %v4226_v49 = vsel %vm3238_vm1, %v13408_v3, 0.0 }
 0x46b   : > { %v13398_v4 = vpop.xlane.xlu1 %4092  ;;  %v4229_v5 = vsel %vm3238_vm1, %v13412_v13, 0.0 }
 0x46d   : > { %4200 = vadd.xlane.f32.xlu1 %v4199_v14  ;;  %v4105_v36 = vpop.xlane.xlu0 %4104 }
 0x46e   : > { %10427 = vrcp.f32 %v4105_v36  ;;  %v16961_v36 = vld [vmem:[#allocation61_spill] sm:$0xff] }
 0x46f   : > { %10429 = vpow2.f32 %v3901_v57  ;;  %v13404_v60 = vpop.xlane.xlu1 %3588 }
 0x470   : > { %16959 = vst [vmem:[#allocation36_spill] sm:$0xff] %v13404_v60  ;;  %v10422_v30 = vpop.eup %10421 }
 0x471   : > { %4209 = vadd.xlane.f32.xlu1 %v4208_v25  ;;  %v4090_v63 = vpop.xlane.xlu0 %4089  ;;  %v10424_v20 = vpop.eup %10423  ;;  %v4553_v21 = vmul.f32 %v10422_v30, %v12909_v47  ;;  %v3688_v47 = vsub.f32 %v16961_v36, %v12974_v28 }
 0x472   : > { %10431 = vrcp.f32 %v4090_v63  ;;  %v10426_v8 = vpop.eup %10425  ;;  %v4552_v57 = vmul.f32 %v10424_v20, %v12915_v12 }
 0x473   : > { %1581 = vrot.lane.b32.xlu0 %v16828_v7, %s10952_s25  ;;  %v4120_v32 = vpop.xlane.xlu1 %4119  ;;  %10433 = vrcp.f32 %v4081_v40  ;;  %v3881_v28 = vmul.f32 1.442695, %v3688_v47 }
 0x474   : > { %10435 = vrcp.f32 %v13333_v50  ;;  %v4554_v50 = vmul.f32 %v10426_v8, %v12850_v38 }
 0x475   : > { %4227 = vadd.xlane.f32.xlu1 %v4226_v49  ;;  %v4084_v42 = vpop.xlane.xlu0 %4083 }
 0x476   : > { %10437 = vrcp.f32 %v4084_v42  ;;  %v4664_v25 = vpack.c.bf16 %v4554_v50, %v4553_v21  ;;  %v16963_v42 = vld [vmem:[#allocation56_spill] sm:$0xff] }
 0x477   : > { %v13418_v7 = vpop.xlane.xlu1 %3597  ;;  %v3689_v20 = vsub.f32 %v16963_v42, %v12945_v31  ;;  %v16965_v50 = vld [vmem:[#allocation116_spill] sm:$0xff]  ;;  %10439 = vpow2.f32 %v3881_v28 }
 0x478   : > { %v10428_v52 = vpop.eup %10427  ;;  %16960 = vst [vmem:[#allocation10_spill] sm:$0xff] %v13418_v7 }
 0x479   : > { %v13422_v51 = vpop.eup %10429  ;;  %4230 = vadd.xlane.f32.xlu1 %v4229_v5  ;;  %v13424_v17 = vpop.xlane.xlu0 %3561  ;;  %v4551_v40 = vmul.f32 %v10428_v52, %v12943_v29  ;;  %v3883_v36 = vmul.f32 1.442695, %v3689_v20 }
 0x47a   : > { %v4232_v49 = vsel %vm3238_vm1, %v13422_v51, 0.0 }
 0x47b   : > { %v4663_v14 = vpack.c.bf16 %v4552_v57, %v4551_v40  ;;  %v13431_v63 = vpop.xlane.xlu1 %4134  ;;  %10441 = vpow2.f32 %v3883_v36 }
 0x47c   : > { %v10432_v29 = vpop.eup %10431 }
 0x47d   : > { %4233 = vadd.xlane.f32.xlu1 %v4232_v49  ;;  %9582 = vmatprep.mubr.msk.bf16.mxu0 %vm3238_vm1, %v4663_v14  ;;  %v13436_v30 = vpop.xlane.xlu0 %3585  ;;  %v10434_v12 = vpop.eup %10433  ;;  %v4546_v21 = vmul.f32 %v10432_v29, %v12956_v10  ;;  %v16969_v10 = vld [vmem:[#allocation40_spill] sm:$0xff] }
 0x47e   : > { %16962 = vst [vmem:[#allocation63_spill] sm:$0xff] %v13436_v30  ;;  %9583 = vmatmul.mubr.msk.bf16.vlgmr.msra.gmra.mrb[120].mxu0 %vm3238_vm1, %v4664_v25  ;;  %v10436_v38 = vpop.eup %10435  ;;  %v4543_v40 = vmul.f32 %v10434_v12, %v12929_v54  ;;  %v16966_v25 = vld [vmem:[#allocation74_spill] sm:$0xff]  ;;  %v16970_v12 = vld [vmem:[#allocation41_spill] sm:$0xff] }
 0x47f   : > { %v13441_v8 = vpop.xlane.xlu1 %3606  ;;  %v4545_v14 = vmul.f32 %v10436_v38, %v16965_v50  ;;  %v3695_v49 = vsub.f32 %v16966_v25, %v13082_v56 }
 0x480   : > { %16964 = vst [vmem:[#allocation31_spill] sm:$0xff] %v13441_v8  ;;  %v10438_v52 = vpop.eup %10437 }
 0x481   : > { %v13444_v5 = vpop.xlane.xlu0 %3555  ;;  %v4544_v57 = vmul.f32 %v10438_v52, %v12970_v53  ;;  %v4660_v42 = vpack.c.bf16 %v4546_v21, %v4545_v14  ;;  %v3895_v54 = vmul.f32 1.442695, %v3695_v49  ;;  %v13465_v20 = vpop.eup %10439 }
 0x483   : > { %v13451_v31 = vpop.xlane.xlu1 %4137  ;;  %v4659_v47 = vpack.c.bf16 %v4544_v57, %v4543_v40  ;;  %10443 = vpow2.f32 %v3895_v54 }
 0x484   : > { %10445 = vrcp.f32 %v4120_v32  ;;  %v4202_v32 = vsel %vm3238_vm1, %v13465_v20, 0.0 }
 0x485   : > { %v13453_v7 = vpop.xlane.xlu0 %3579  ;;  %9566 = vmatprep.mubr.msk.bf16.mxu1 %vm3238_vm1, %v4659_v47  ;;  %v13478_v21 = vpop.eup %10441 }
 0x486   : > { %16967 = vst [vmem:[#allocation13_spill] sm:$0xff] %v13453_v7  ;;  %9567 = vmatmul.mubr.msk.bf16.vlgmr.msra.gmra.mrb[128].mxu1 %vm3238_vm1, %v4660_v42  ;;  %v4205_v25 = vsel %vm3238_vm1, %v13478_v21, 0.0 }
 0x487   : > { %9591 = vmatpush3.bf16.msra.mxu1 %v16939_v37  ;;  %v13458_v53 = vpop.xlane.xlu1 %3600 }
 0x488   : > { %16968 = vst [vmem:[#allocation12_spill] sm:$0xff] %v13458_v53  ;;  %9592 = vmatprep.subr.bf16.mxu1 %v16969_v10 }
 0x489   : > { %v4123_v29 = vpop.xlane.xlu0 %4122 }
 0x48b   : > { %9593 = vmatpush3.bf16.msra.mxu1 %v16969_v10  ;;  %v13462_v56 = vpop.xlane.xlu1 %4131 }
 0x48c   : > { %9594 = vmatprep.subr.bf16.mxu1 %v16970_v12 }
 0x48d   : > { %v4117_v38 = vpop.xlane.xlu0 %4116  ;;  %v13490_v49 = vpop.eup %10443 }
 0x48e   : > { %1595 = vrot.lane.b32.xlu1 %v16931_v39, %s10954_s29  ;;  %10447 = vrcp.f32 %v4117_v38  ;;  %v10446_v47 = vpop.eup %10445  ;;  %v4223_v38 = vsel %vm3238_vm1, %v13490_v49, 0.0 }
 0x48f   : > { %9595 = vmatpush3.bf16.msra.mxu1 %v16970_v12  ;;  %v13470_v37 = vpop.xlane.xlu1 %4155  ;;  %10449 = vrcp.f32 %v4123_v29 }
 0x491   : > { %v13472_v28 = vpop.f32.mrb[104].mxu0  ;;  %v13474_v52 = vpop.xlane.xlu0 %3570 }
 0x492   : > { %16971 = vst [vmem:[#allocation67_spill] sm:$0xff] %v13472_v28  ;;  %4203 = vadd.xlane.f32.xlu0 %v4202_v32  ;;  %v13480_v40 = vpop.f32.mrb[105].mxu0 }
 0x493   : > { %16972 = vst [vmem:[#allocation39_spill] sm:$0xff] %v13480_v40  ;;  %v13482_v57 = vpop.f32.mrb[106].mxu0  ;;  %v13484_v50 = vpop.xlane.xlu1 %4146 }
 0x494   : > { %16973 = vst [vmem:[#allocation112_spill] sm:$0xff] %v13482_v57  ;;  %v13486_v14 = vpop.f32.mrb[107].mxu0  ;;  %v16979_v57 = vld [vmem:[#allocation35_spill] sm:$0xff] }
 0x495   : > { %16974 = vst [vmem:[#allocation105_spill] sm:$0xff] %v13486_v14  ;;  %v4102_v36 = vpop.xlane.xlu0 %4101  ;;  %v4556_v40 = vmul.f32 %v10446_v47, %v16979_v57 }
 0x496   : > { %4206 = vadd.xlane.f32.xlu0 %v4205_v25  ;;  %v16980_v25 = vld [vmem:[#allocation68_spill] sm:$0xff] }
 0x497   : > { %v13492_v42 = vpop.xlane.xlu1 %3618  ;;  %v3691_v14 = vsub.f32 %v16980_v25, %v13038_v61 }
 0x498   : > { %16975 = vst [vmem:[#allocation100_spill] sm:$0xff] %v13492_v42  ;;  %v10448_v54 = vpop.eup %10447 }
 0x499   : > { %v13494_v10 = vpop.f32.mrb[108].mxu0  ;;  %v13496_v12 = vpop.xlane.xlu0 %3594  ;;  %v4555_v28 = vmul.f32 %v10448_v54, %v13065_v18  ;;  %v16985_v54 = vld [vmem:[#allocation83_spill] sm:$0xff] }
 0x49a   : > { %16976 = vst [vmem:[#allocation60_spill] sm:$0xff] %v13494_v10  ;;  %16977 = vst [vmem:[#allocation57_spill] sm:$0xff] %v13496_v12  ;;  %4224 = vadd.xlane.f32.xlu0 %v4223_v38  ;;  %v13500_v32 = vpop.f32.mrb[109].mxu0  ;;  %v3887_v38 = vmul.f32 1.442695, %v3691_v14  ;;  %v3700_v25 = vsub.f32 %v16985_v54, %v13143_v26 }
 0x49b   : > { %16978 = vst [vmem:[#allocation114_spill] sm:$0xff] %v13500_v32  ;;  %v13506_v60 = vpop.f32.mrb[110].mxu0  ;;  %v13508_v42 = vpop.xlane.xlu1 %4149  ;;  %v4665_v12 = vpack.c.bf16 %v4556_v40, %v4555_v28  ;;  %v16983_v32 = vld [vmem:[#allocation65_spill] sm:$0xff] }
 0x49c   : > { %16981 = vst [vmem:[#allocation108_spill] sm:$0xff] %v13506_v60  ;;  %v13510_v10 = vpop.f32.mrb[111].mxu0  ;;  %v3694_v18 = vsub.f32 %v16983_v32, %v13009_v45  ;;  %v10450_v45 = vpop.eup %10449  ;;  %v3905_v14 = vmul.f32 1.442695, %v3700_v25 }
 0x49d   : > { %16982 = vst [vmem:[#allocation75_spill] sm:$0xff] %v13510_v10  ;;  %v4126_v30 = vpop.xlane.xlu0 %4125  ;;  %9586 = vmatprep.mubr.msk.bf16.mxu0 %vm3238_vm1, %v4665_v12 }
 0x49e   : > { %10451 = vrcp.f32 %v4126_v30  ;;  %v3893_v61 = vmul.f32 1.442695, %v3694_v18  ;;  %v16987_v30 = vld [vmem:[#allocation78_spill] sm:$0xff]  ;;  %v16989_v18 = vld [vmem:[#allocation79_spill] sm:$0xff] }
 0x49f   : > { %v13515_v57 = vpop.xlane.xlu1 %4143  ;;  %10453 = vpow2.f32 %v3887_v38  ;;  %v3701_v40 = vsub.f32 %v16987_v30, %v13110_v59 }
 0x4a0   : > { %10455 = vrcp.f32 %v4102_v36  ;;  %v4557_v36 = vmul.f32 %v10450_v45, %v13049_v35 }
 0x4a1   : > { %v13517_v47 = vpop.xlane.xlu0 %3564  ;;  %10457 = vrcp.f32 %v13398_v4  ;;  %v3907_v4 = vmul.f32 1.442695, %v3701_v40 }
 0x4a2   : > { %16984 = vst [vmem:[#allocation103_spill] sm:$0xff] %v13517_v47  ;;  %10459 = vrcp.f32 %v13394_v55  ;;  %v3702_v55 = vsub.f32 %v16989_v18, %v13114_v9  ;;  %v16992_v18 = vld [vmem:[#allocation32_spill] sm:$0xff] }
 0x4a3   : > { %v13521_v28 = vpop.xlane.xlu1 %3621 }
 0x4a4   : > { %16986 = vst [vmem:[#allocation70_spill] sm:$0xff] %v13521_v28  ;;  %v3909_v35 = vmul.f32 1.442695, %v3702_v55 }
 0x4a5   : > { %v4096_v29 = vpop.xlane.xlu0 %4095 }
 0x4a6   : > { %10461 = vrcp.f32 %v4096_v29 }
 0x4a7   : > { %10463 = vpow2.f32 %v3893_v61  ;;  %v13527_v12 = vpop.xlane.xlu1 %3615 }
 0x4a8   : > { %16988 = vst [vmem:[#allocation71_spill] sm:$0xff] %v13527_v12  ;;  %v10452_v26 = vpop.eup %10451  ;;  %10465 = vpow2.f32 %v3905_v14 }
 0x4a9   : > { %v13529_v32 = vpop.xlane.xlu0 %3573  ;;  %v4558_v38 = vmul.f32 %v10452_v26, %v13122_v48  ;;  %v13537_v61 = vpop.eup %10453  ;;  %10467 = vpow2.f32 %v3907_v4 }
 0x4aa   : > { %v10456_v29 = vpop.eup %10455  ;;  %v4211_v45 = vsel %vm3238_vm1, %v13537_v61, 0.0  ;;  %10469 = vpow2.f32 %v3909_v35 }
 0x4ab   : > { %v13535_v54 = vpop.xlane.xlu1 %4164  ;;  %v4666_v59 = vpack.c.bf16 %v4558_v38, %v4557_v36  ;;  %v10458_v30 = vpop.eup %10457  ;;  %v4550_v14 = vmul.f32 %v10456_v29, %v13094_v23  ;;  %v16991_v36 = vld [vmem:[#allocation9_spill] sm:$0xff]  ;;  %10471 = vrcp.f32 %v13451_v31 }
 0x4ac   : > { %v10460_v60 = vpop.eup %10459  ;;  %v4547_v38 = vmul.f32 %v10458_v30, %v16991_v36  ;;  %10473 = vrcp.f32 %v13462_v56 }
 0x4ad   : > { %v13539_v25 = vpop.xlane.xlu0 %3567  ;;  %9587 = vmatmul.mubr.msk.bf16.gmra.mrb[124].mxu0 %vm3238_vm1, %v4666_v59  ;;  %v4549_v55 = vmul.f32 %v10460_v60, %v16992_v18  ;;  %10475 = vrcp.f32 %v13431_v63 }
 0x4af   : > { %v13544_v48 = vpop.xlane.xlu1 %4170  ;;  %v4662_v29 = vpack.c.bf16 %v4550_v14, %v4549_v55  ;;  %v16995_v14 = vld [vmem:[#allocation69_spill] sm:$0xff]  ;;  %v16996_v55 = vld [vmem:[#allocation64_spill] sm:$0xff] }
 0x4b0   : > { %1583 = vrot.lane.b32.xlu0 %v16931_v39, %s10952_s25  ;;  %v10462_v9 = vpop.eup %10461  ;;  %v3692_v36 = vsub.f32 %v16995_v14, %v13040_v24  ;;  %v16999_v14 = vld [vmem:[#allocation47_spill] sm:$0xff] }
 0x4b1   : > { %v13548_v40 = vpop.xlane.xlu0 %3591  ;;  %v13551_v26 = vpop.eup %10463  ;;  %v4548_v4 = vmul.f32 %v10462_v9, %v13154_v2 }
 0x4b2   : > { %16990 = vst [vmem:[#allocation61_spill] sm:$0xff] %v13548_v40  ;;  %4212 = vadd.xlane.f32.xlu1 %v4211_v45  ;;  %v4220_v10 = vsel %vm3238_vm1, %v13551_v26, 0.0  ;;  %v13564_v45 = vpop.eup %10465 }
 0x4b3   : > { %v13558_v39 = vpop.xlane.xlu1 %4182  ;;  %v4661_v59 = vpack.c.bf16 %v4548_v4, %v4547_v38  ;;  %v4238_v60 = vsel %vm3238_vm1, %v13564_v45, 0.0 }
 0x4b4   : > { %1585 = vrot.lane.b32.xlu0 %v16934_v33, %s10952_s25 }
 0x4b5   : > { %v13562_v23 = vpop.xlane.xlu0 %4158  ;;  %9570 = vmatprep.mubr.msk.bf16.mxu1 %vm3238_vm1, %v4661_v59  ;;  %v3693_v59 = vsub.f32 %v16996_v55, %v13005_v34 }
 0x4b6   : > { %4221 = vadd.xlane.f32.xlu1 %v4220_v10  ;;  %9571 = vmatmul.mubr.msk.bf16.gmra.mrb[132].mxu1 %vm3238_vm1, %v4662_v29  ;;  %v13577_v10 = vpop.eup %10467 }
 0x4b7   : > { %v13572_v2 = vpop.xlane.xlu1 %4176  ;;  %16993 = vst [vmem:[#allocation56_spill] sm:$0xff] %v13577_v10  ;;  %v4241_v56 = vsel %vm3238_vm1, %v13577_v10, 0.0  ;;  %v13584_v35 = vpop.eup %10469 }
 0x4b8   : > { %1597 = vrot.lane.b32.xlu0 %v16934_v33, %s10954_s29  ;;  %16994 = vst [vmem:[#allocation116_spill] sm:$0xff] %v13584_v35  ;;  %v10472_v9 = vpop.eup %10471  ;;  %v4244_v38 = vsel %vm3238_vm1, %v13584_v35, 0.0 }
 0x4b9   : > { %v4129_v30 = vpop.xlane.xlu0 %4128  ;;  %v10474_v4 = vpop.eup %10473 }
 0x4ba   : > { %4239 = vadd.xlane.f32.xlu1 %v4238_v60  ;;  %10477 = vrcp.f32 %v4129_v30  ;;  %v10476_v18 = vpop.eup %10475  ;;  %v16997_v60 = vld [vmem:[#allocation46_spill] sm:$0xff]  ;;  %v4560_v12 = vmul.f32 %v10474_v4, %v16999_v14 }
 0x4bb   : > { %10479 = vrcp.f32 %v13470_v37  ;;  %v13580_v31 = vpop.xlane.xlu1 %4194  ;;  %v4562_v30 = vmul.f32 %v10472_v9, %v16997_v60  ;;  %v4561_v8 = vmul.f32 %v10476_v18, %v17000_v62  ;;  %v17001_v9 = vld [vmem:[#allocation131_spill] sm:$0xff]  ;;  %v17002_v60 = vld [vmem:[#allocation82_spill] sm:$0xff] }
 0x4bd   : > { %v4153_v33 = vpop.xlane.xlu0 %4152  ;;  %v4668_v34 = vpack.c.bf16 %v4562_v30, %v4561_v8 }
 0x4be   : > { %4242 = vadd.xlane.f32.xlu1 %v4241_v56  ;;  %10481 = vrcp.f32 %v4153_v33  ;;  %v3889_v33 = vmul.f32 1.442695, %v3692_v36  ;;  %v3699_v36 = vsub.f32 %v17002_v60, %v17001_v9 }
 0x4bf   : > { %v13586_v63 = vpop.xlane.xlu1 %4188 }
 0x4c0   : > { %10483 = vpow2.f32 %v3889_v33  ;;  %v3903_v8 = vmul.f32 1.442695, %v3699_v36  ;;  %v17009_v36 = vld [vmem:[#allocation102_spill] sm:$0xff] }
 0x4c1   : > { %v13592_v37 = vpop.xlane.xlu0 %4161 }
 0x4c2   : > { %4245 = vadd.xlane.f32.xlu1 %v4244_v38  ;;  %v3891_v38 = vmul.f32 1.442695, %v3693_v59 }
 0x4c3   : > { %v1576_v56 = vpop.permute.xlu1 %1575 }
 0x4c4   : > { %v10478_v29 = vpop.eup %10477  ;;  %9596 = vmatprep.subr.bf16.mxu1 %v1576_v56  ;;  %10485 = vpow2.f32 %v3891_v38 }
 0x4c5   : > { %v13597_v28 = vpop.xlane.xlu0 %3609  ;;  %v4559_v24 = vmul.f32 %v10478_v29, %v13218_v46  ;;  %v10480_v40 = vpop.eup %10479  ;;  %9597 = vmatpush3.bf16.msra.mxu1 %v1576_v56  ;;  %v17004_v46 = vld [vmem:[#allocation50_spill] sm:$0xff]  ;;  %v17005_v29 = vld [vmem:[#allocation51_spill] sm:$0xff]  ;;  %10487 = vrcp.f32 %v13508_v42  ;;  %v17007_v56 = vld [vmem:[#allocation52_spill] sm:$0xff] }
 0x4c6   : > { %16998 = vst [vmem:[#allocation74_spill] sm:$0xff] %v13597_v28  ;;  %v4568_v14 = vmul.f32 %v10480_v40, %v17005_v29  ;;  %10489 = vrcp.f32 %v13515_v57 }
 0x4c7   : > { %v4667_v53 = vpack.c.bf16 %v4560_v12, %v4559_v24  ;;  %v1594_v55 = vpop.permute.xlu1 %1593  ;;  %10491 = vrcp.f32 %v13484_v50 }
 0x4c8   : > { %v10482_v7 = vpop.eup %10481  ;;  %9622 = vmatprep.subr.bf16.mxu1 %v1594_v55 }
 0x4c9   : > { %9598 = vmatprep.mubr.msk.bf16.mxu1 %vm3238_vm1, %v4667_v53  ;;  %v13605_v28 = vpop.xlane.xlu0 %3603  ;;  %v4567_v4 = vmul.f32 %v10482_v7, %v17004_v46 }
 0x4ca   : > { %17003 = vst [vmem:[#allocation40_spill] sm:$0xff] %v13605_v28  ;;  %9599 = vmatmul.mubr.msk.bf16.vlgmr.msra.gmra.mrb[136].mxu1 %vm3238_vm1, %v4668_v34  ;;  %v13616_v12 = vpop.eup %10483 }
 0x4cb   : > { %9623 = vmatpush3.bf16.msra.mxu1 %v1594_v55  ;;  %v4671_v62 = vpack.c.bf16 %v4568_v14, %v4567_v4  ;;  %v4214_v57 = vsel %vm3238_vm1, %v13616_v12, 0.0  ;;  %v17008_v55 = vld [vmem:[#allocation129_spill] sm:$0xff] }
 0x4cd   : > { %9614 = vmatprep.mubr.msk.bf16.mxu0 %vm3238_vm1, %v4671_v62 }
 0x4ce   : > { %v4141_v53 = vpop.xlane.xlu0 %4140  ;;  %v13620_v40 = vpop.eup %10485 }
 0x4cf   : > { %10493 = vrcp.f32 %v4141_v53  ;;  %v10488_v42 = vpop.eup %10487  ;;  %v4217_v38 = vsel %vm3238_vm1, %v13620_v40, 0.0 }
 0x4d0   : > { %10495 = vpow2.f32 %v3903_v8  ;;  %v10490_v59 = vpop.eup %10489  ;;  %v4566_v33 = vmul.f32 %v10488_v42, %v17007_v56  ;;  %v17011_v8 = vld [vmem:[#allocation77_spill] sm:$0xff] }
 0x4d1   : > { %v10492_v50 = vpop.eup %10491  ;;  %v4564_v9 = vmul.f32 %v10490_v59, %v17008_v55  ;;  %10497 = vrcp.f32 %v13572_v2  ;;  %v17012_v59 = vld [vmem:[#allocation136_spill] sm:$0xff] }
 0x4d2   : > { %v13614_v7 = vpop.xlane.xlu0 %3612  ;;  %v4565_v46 = vmul.f32 %v10492_v50, %v17009_v36  ;;  %v17013_v50 = vld [vmem:[#allocation95_spill] sm:$0xff] }
 0x4d3   : > { %17006 = vst [vmem:[#allocation41_spill] sm:$0xff] %v13614_v7  ;;  %1599 = vrot.lane.b32.xlu1 %v16937_v15, %s10954_s29 }
 0x4d4   : > { %v4670_v29 = vpack.c.bf16 %v4566_v33, %v4565_v46  ;;  %v17014_v33 = vld [vmem:[#allocation111_spill] sm:$0xff] }
 0x4d6   : > { %v13622_v18 = vpop.xlane.xlu0 %4167 }
 0x4d7   : > { %4215 = vadd.xlane.f32.xlu0 %v4214_v57 }
 0x4d9   : > { %v10494_v30 = vpop.eup %10493 }
 0x4da   : > { %v13627_v24 = vpop.xlane.xlu0 %4173  ;;  %v4563_v34 = vmul.f32 %v10494_v30, %v13284_v19  ;;  %v13633_v60 = vpop.eup %10495  ;;  %v17010_v19 = vld [vmem:[#allocation125_spill] sm:$0xff]  ;;  %v3711_v30 = vsub.f32 %v17013_v50, %v17012_v59  ;;  %v17018_v59 = vld [vmem:[#allocation15_spill] sm:$0xff] }
 0x4db   : > { %4218 = vadd.xlane.f32.xlu0 %v4217_v38  ;;  %v4235_v62 = vsel %vm3238_vm1, %v13633_v60, 0.0  ;;  %v3704_v53 = vsub.f32 %v17011_v8, %v17010_v19  ;;  %v17015_v38 = vld [vmem:[#allocation90_spill] sm:$0xff]  ;;  %v10498_v36 = vpop.eup %10497 }
 0x4dc   : > { %v4669_v4 = vpack.c.bf16 %v4564_v9, %v4563_v34  ;;  %v3713_v34 = vsub.f32 %v17015_v38, %v17014_v33  ;;  %v3927_v55 = vmul.f32 1.442695, %v3711_v30  ;;  %v17020_v38 = vld [vmem:[#allocation24_spill] sm:$0xff] }
 0x4dd   : > { %v3913_v57 = vmul.f32 1.442695, %v3704_v53 }
 0x4de   : > { %v13636_v14 = vpop.xlane.xlu0 %4185  ;;  %9602 = vmatprep.mubr.msk.bf16.mxu1 %vm3238_vm1, %v4669_v4  ;;  %v3931_v4 = vmul.f32 1.442695, %v3713_v34  ;;  %v17021_v34 = vld [vmem:[#allocation76_spill] sm:$0xff] }
 0x4df   : > { %4236 = vadd.xlane.f32.xlu0 %v4235_v62  ;;  %9603 = vmatmul.mubr.msk.bf16.gmra.mrb[140].mxu1 %vm3238_vm1, %v4670_v29  ;;  %v17016_v29 = vld [vmem:[#allocation135_spill] sm:$0xff] }
 0x4e0   : > { %v4575_v62 = vmul.f32 %v10498_v36, %v17016_v29 }
 0x4e2   : > { %v4180_v42 = vpop.xlane.xlu0 %4179 }
 0x4e3   : > { %10499 = vrcp.f32 %v4180_v42 }
 0x4e4   : > { %10501 = vpow2.f32 %v3913_v57 }
 0x4e5   : > { %10503 = vpow2.f32 %v3927_v55  ;;  %v3703_v55 = vsub.f32 %v17021_v34, %v17020_v38  ;;  %v17027_v38 = vld [vmem:[#allocation106_spill] sm:$0xff] }
 0x4e6   : > { %v13647_v56 = vpop.xlane.xlu0 %4197  ;;  %10505 = vpow2.f32 %v3931_v4  ;;  %v17023_v4 = vld [vmem:[#allocation72_spill] sm:$0xff]  ;;  %v3712_v34 = vsub.f32 %v17027_v38, %v13272_v16  ;;  %v17033_v16 = vld [vmem:[#allocation141_spill] sm:$0xff] }
 0x4e7   : > { %v3911_v29 = vmul.f32 1.442695, %v3703_v55 }
 0x4e9   : > { %10507 = vpow2.f32 %v3911_v29  ;;  %v17043_v29 = vld [vmem:[#allocation128_spill] sm:$0xff] }
 0x4ea   : > { %v13651_v9 = vpop.xlane.xlu0 %4191 }
 0x4ed   : > { %v10500_v46 = vpop.eup %10499 }
 0x4ee   : > { %v1582_v2 = vpop.permute.xlu0 %1581  ;;  %v4576_v19 = vmul.f32 %v10500_v46, %v13341_v1  ;;  %v13656_v53 = vpop.eup %10501  ;;  %v17022_v46 = vld [vmem:[#allocation99_spill] sm:$0xff] }
 0x4ef   : > { %9606 = vmatprep.subr.bf16.mxu0 %v1582_v2  ;;  %v4250_v42 = vsel %vm3238_vm1, %v13656_v53, 0.0  ;;  %v13662_v57 = vpop.eup %10503 }
 0x4f0   : > { %9607 = vmatpush3.bf16.msra.mxu0 %v1582_v2  ;;  %v4675_v8 = vpack.c.bf16 %v4576_v19, %v4575_v62  ;;  %17017 = vst [vmem:[#allocation35_spill] sm:$0xff] %v13662_v57  ;;  %v4271_v50 = vsel %vm3238_vm1, %v13662_v57, 0.0  ;;  %v13670_v30 = vpop.eup %10505  ;;  %v3705_v2 = vsub.f32 %v17023_v4, %v17022_v46  ;;  %v17030_v46 = vld [vmem:[#allocation14_spill] sm:$0xff] }
 0x4f1   : > { %17019 = vst [vmem:[#allocation68_spill] sm:$0xff] %v13670_v30  ;;  %v17040_v4 = vld [vmem:[#allocation38_spill] sm:$0xff] }
 0x4f2   : > { %9630 = vmatprep.mubr.msk.bf16.mxu1 %vm3238_vm1, %v4675_v8  ;;  %v3915_v19 = vmul.f32 1.442695, %v3705_v2  ;;  %v17024_v8 = vld [vmem:[#allocation25_spill] sm:$0xff] }
 0x4f4   : > { %10509 = vpow2.f32 %v3915_v19 }
 0x4f5   : > { %1587 = vrot.lane.b32.xlu0 %v16937_v15, %s10952_s25  ;;  %v4277_v15 = vsel %vm3238_vm1, %v13670_v30, 0.0 }
 0x4f7   : > { %4251 = vadd.xlane.f32.xlu1 %v4250_v42  ;;  %v17025_v42 = vld [vmem:[#allocation73_spill] sm:$0xff] }
 0x4f9   : > { %1609 = vrot.lane.b32.xlu0 %v17018_v59, %s10953_s19 }
 0x4fa   : > { %v13666_v1 = vpop.xlane.xlu1 %4200 }
 0x4fb   : > { %4272 = vadd.xlane.f32.xlu1 %v4271_v50  ;;  %v3706_v50 = vsub.f32 %v17025_v42, %v17024_v8  ;;  %v17034_v8 = vld [vmem:[#allocation101_spill] sm:$0xff] }
 0x4fc   : > { %v3714_v42 = vsub.f32 %v17034_v8, %v17033_v16 }
 0x4fe   : > { %v13672_v33 = vpop.xlane.xlu1 %4209 }
 0x4ff   : > { %4278 = vadd.xlane.f32.xlu1 %v4277_v15  ;;  %v3917_v15 = vmul.f32 1.442695, %v3706_v50  ;;  %v3929_v50 = vmul.f32 1.442695, %v3712_v34 }
 0x501   : > { %10511 = vpow2.f32 %v3917_v15 }
 0x502   : > { %v13678_v36 = vpop.xlane.xlu1 %4227  ;;  %10513 = vpow2.f32 %v3929_v50 }
 0x506   : > { %v13682_v62 = vpop.xlane.xlu1 %4230 }
 0x50a   : > { %v13686_v7 = vpop.xlane.xlu1 %4233 }
 0x50d   : > { %v13688_v30 = vpop.f32.mrb[120].mxu1 }
 0x50e   : > { %17026 = vst [vmem:[#allocation65_spill] sm:$0xff] %v13688_v30  ;;  %v1596_v28 = vpop.permute.xlu1 %1595  ;;  %v13692_v57 = vpop.f32.mrb[121].mxu1 }
 0x50f   : > { %17028 = vst [vmem:[#allocation83_spill] sm:$0xff] %v13692_v57  ;;  %9624 = vmatprep.subr.bf16.mxu1 %v1596_v28  ;;  %v13694_v55 = vpop.f32.mrb[122].mxu1 }
 0x510   : > { %17029 = vst [vmem:[#allocation78_spill] sm:$0xff] %v13694_v55  ;;  %1611 = vrot.lane.b32.xlu1 %v17030_v46, %s10953_s19  ;;  %9625 = vmatpush3.bf16.msra.mxu1 %v1596_v28  ;;  %v13700_v2 = vpop.f32.mrb[123].mxu1  ;;  %v13712_v28 = vpop.eup %10507  ;;  %v3933_v55 = vmul.f32 1.442695, %v3714_v42 }
 0x511   : > { %17031 = vst [vmem:[#allocation79_spill] sm:$0xff] %v13700_v2  ;;  %v13704_v19 = vpop.f32.mrb[112].mxu0  ;;  %v4247_v15 = vsel %vm3238_vm1, %v13712_v28, 0.0  ;;  %v13722_v34 = vpop.eup %10509 }
 0x512   : > { %17032 = vst [vmem:[#allocation9_spill] sm:$0xff] %v13704_v19  ;;  %v13708_v38 = vpop.f32.mrb[113].mxu0  ;;  %17038 = vst [vmem:[#allocation46_spill] sm:$0xff] %v13722_v34  ;;  %10515 = vpow2.f32 %v3933_v55  ;;  %v4253_v16 = vsel %vm3238_vm1, %v13722_v34, 0.0  ;;  %v13726_v8 = vpop.eup %10511  ;;  %v17041_v19 = vld [vmem:[#allocation84_spill] sm:$0xff] }
 0x513   : > { %17035 = vst [vmem:[#allocation32_spill] sm:$0xff] %v13708_v38  ;;  %v13710_v10 = vpop.f32.mrb[114].mxu0  ;;  %17039 = vst [vmem:[#allocation47_spill] sm:$0xff] %v13726_v8  ;;  %v4256_v42 = vsel %vm3238_vm1, %v13726_v8, 0.0  ;;  %v13734_v50 = vpop.eup %10513 }
 0x514   : > { %17036 = vst [vmem:[#allocation69_spill] sm:$0xff] %v13710_v10  ;;  %v13716_v30 = vpop.f32.mrb[115].mxu0  ;;  %v3707_v10 = vsub.f32 %v17041_v19, %v17040_v4  ;;  %17042 = vst [vmem:[#allocation43_spill] sm:$0xff] %v13734_v50  ;;  %v17046_v19 = vld [vmem:[#allocation115_spill] sm:$0xff] }
 0x515   : > { %17037 = vst [vmem:[#allocation64_spill] sm:$0xff] %v13716_v30  ;;  %v3715_v8 = vsub.f32 %v17046_v19, %v13323_v41 }
 0x516   : > { %v3919_v38 = vmul.f32 1.442695, %v3707_v10  ;;  %v17047_v10 = vld [vmem:[#allocation110_spill] sm:$0xff] }
 0x518   : > { %4248 = vadd.xlane.f32.xlu0 %v4247_v15  ;;  %v17044_v15 = vld [vmem:[#allocation80_spill] sm:$0xff]  ;;  %10517 = vpow2.f32 %v3919_v38 }
 0x519   : > { %v3709_v55 = vsub.f32 %v17044_v15, %v17043_v29  ;;  %v3717_v29 = vsub.f32 %v17047_v10, %v13299_v43  ;;  %v3935_v15 = vmul.f32 1.442695, %v3715_v8 }
 0x51b   : > { %v3923_v4 = vmul.f32 1.442695, %v3709_v55  ;;  %v3939_v55 = vmul.f32 1.442695, %v3717_v29 }
 0x51c   : > { %4254 = vadd.xlane.f32.xlu0 %v4253_v16  ;;  %v4274_v16 = vsel %vm3238_vm1, %v13734_v50, 0.0  ;;  %v13742_v34 = vpop.eup %10515 }
 0x51d   : > { %17045 = vst [vmem:[#allocation131_spill] sm:$0xff] %v13742_v34  ;;  %10519 = vpow2.f32 %v3923_v4 }
 0x51e   : > { %10521 = vpow2.f32 %v3935_v15 }
 0x51f   : > { %v13730_v57 = vpop.xlane.xlu0 %4203  ;;  %10523 = vpow2.f32 %v3939_v55 }
 0x520   : > { %4257 = vadd.xlane.f32.xlu0 %v4256_v42  ;;  %v4280_v42 = vsel %vm3238_vm1, %v13742_v34, 0.0  ;;  %10525 = vrcp.f32 %v13636_v14 }
 0x521   : > { %10527 = vrcp.f32 %v13651_v9  ;;  %v17065_v9 = vld [vmem:[#allocation120_spill] sm:$0xff] }
 0x522   : > { %v13756_v19 = vpop.eup %10517  ;;  %10529 = vrcp.f32 %v13558_v39 }
 0x523   : > { %v13738_v30 = vpop.xlane.xlu0 %4206  ;;  %17051 = vst [vmem:[#allocation52_spill] sm:$0xff] %v13756_v19  ;;  %10531 = vrcp.f32 %v13586_v63 }
 0x524   : > { %4275 = vadd.xlane.f32.xlu0 %v4274_v16 }
 0x527   : > { %v4225_v2 = vpop.xlane.xlu0 %4224  ;;  %v13766_v10 = vpop.eup %10519 }
 0x528   : > { %4281 = vadd.xlane.f32.xlu0 %v4280_v42  ;;  %v4259_v42 = vsel %vm3238_vm1, %v13756_v19, 0.0  ;;  %17053 = vst [vmem:[#allocation102_spill] sm:$0xff] %v13766_v10  ;;  %v4265_v4 = vsel %vm3238_vm1, %v13766_v10, 0.0  ;;  %v17060_v10 = vld [vmem:[#allocation17_spill] sm:$0xff] }
 0x52b   : > { %v1584_v35 = vpop.permute.xlu0 %1583 }
 0x52c   : > { %9608 = vmatprep.subr.bf16.mxu0 %v1584_v35 }
 0x52d   : > { %9609 = vmatpush3.bf16.msra.mxu0 %v1584_v35  ;;  %v13750_v50 = vpop.f32.mrb[124].mxu1 }
 0x52e   : > { %17048 = vst [vmem:[#allocation82_spill] sm:$0xff] %v13750_v50  ;;  %v13752_v38 = vpop.f32.mrb[125].mxu1  ;;  %v13774_v50 = vpop.eup %10521 }
 0x52f   : > { %17049 = vst [vmem:[#allocation50_spill] sm:$0xff] %v13752_v38  ;;  %v1586_v41 = vpop.permute.xlu0 %1585  ;;  %v13754_v16 = vpop.f32.mrb[126].mxu1  ;;  %17056 = vst [vmem:[#allocation136_spill] sm:$0xff] %v13774_v50  ;;  %v17064_v38 = vld [vmem:[#allocation81_spill] sm:$0xff] }
 0x530   : > { %17050 = vst [vmem:[#allocation51_spill] sm:$0xff] %v13754_v16  ;;  %9610 = vmatprep.subr.bf16.mxu0 %v1586_v41  ;;  %v13760_v43 = vpop.f32.mrb[127].mxu1  ;;  %v13786_v16 = vpop.eup %10523 }
 0x531   : > { %17052 = vst [vmem:[#allocation129_spill] sm:$0xff] %v13760_v43  ;;  %9611 = vmatpush3.bf16.msra.mxu0 %v1586_v41  ;;  %17059 = vst [vmem:[#allocation90_spill] sm:$0xff] %v13786_v16  ;;  %v4289_v19 = vsel %vm3238_vm1, %v13786_v16, 0.0 }
 0x533   : > { %v1598_v8 = vpop.permute.xlu0 %1597 }
 0x534   : > { %4260 = vadd.xlane.f32.xlu1 %v4259_v42  ;;  %9626 = vmatprep.subr.bf16.mxu1 %v1598_v8  ;;  %v4283_v42 = vsel %vm3238_vm1, %v13774_v50, 0.0  ;;  %v17071_v50 = vld [vmem:[#allocation132_spill] sm:$0xff] }
 0x535   : > { %9627 = vmatpush3.bf16.msra.mxu1 %v1598_v8  ;;  %v13768_v29 = vpop.f32.mrb[116].mxu0 }
 0x536   : > { %17054 = vst [vmem:[#allocation125_spill] sm:$0xff] %v13768_v29  ;;  %v13770_v15 = vpop.f32.mrb[117].mxu0  ;;  %v17061_v29 = vld [vmem:[#allocation58_spill] sm:$0xff] }
 0x537   : > { %17055 = vst [vmem:[#allocation77_spill] sm:$0xff] %v13770_v15  ;;  %v13776_v55 = vpop.f32.mrb[118].mxu0 }
 0x538   : > { %4266 = vadd.xlane.f32.xlu1 %v4265_v4  ;;  %17057 = vst [vmem:[#allocation95_spill] sm:$0xff] %v13776_v55  ;;  %v13780_v35 = vpop.f32.mrb[119].mxu0  ;;  %v17062_v55 = vld [vmem:[#allocation85_spill] sm:$0xff] }
 0x539   : > { %17058 = vst [vmem:[#allocation111_spill] sm:$0xff] %v13780_v35  ;;  %v3708_v8 = vsub.f32 %v17062_v55, %v17061_v29  ;;  %v17063_v35 = vld [vmem:[#allocation48_spill] sm:$0xff]  ;;  %v10526_v29 = vpop.eup %10525  ;;  %v3716_v55 = vsub.f32 %v17065_v9, %v13376_v44  ;;  %v17069_v44 = vld [vmem:[#allocation119_spill] sm:$0xff] }
 0x53a   : > { %v3710_v43 = vsub.f32 %v17064_v38, %v17063_v35  ;;  %v17066_v38 = vld [vmem:[#allocation16_spill] sm:$0xff] }
 0x53b   : > { %v3921_v15 = vmul.f32 1.442695, %v3708_v8  ;;  %v10528_v8 = vpop.eup %10527 }
 0x53c   : > { %4284 = vadd.xlane.f32.xlu1 %v4283_v42  ;;  %v3925_v14 = vmul.f32 1.442695, %v3710_v43  ;;  %v10530_v63 = vpop.eup %10529 }
 0x53d   : > { %10533 = vpow2.f32 %v3921_v15  ;;  %v3937_v15 = vmul.f32 1.442695, %v3716_v55  ;;  %v4577_v34 = vmul.f32 %v10530_v63, %v17071_v50  ;;  %v17075_v63 = vld [vmem:[#allocation55_spill] sm:$0xff] }
 0x53e   : > { %1613 = vrot.lane.b32.xlu0 %v17060_v10, %s10953_s19  ;;  %10535 = vrcp.f32 %v13647_v56  ;;  %v10532_v56 = vpop.eup %10531 }
 0x53f   : > { %v13790_v4 = vpop.xlane.xlu1 %4212  ;;  %10537 = vrcp.f32 %v4225_v2  ;;  %v4578_v2 = vmul.f32 %v10526_v29, %v13337_v27  ;;  %v17073_v27 = vld [vmem:[#allocation139_spill] sm:$0xff] }
 0x540   : > { %4290 = vadd.xlane.f32.xlu1 %v4289_v19  ;;  %10539 = vrcp.f32 %v13580_v31  ;;  %v3718_v31 = vsub.f32 %v17069_v44, %v13355_v22  ;;  %v4579_v29 = vmul.f32 %v10532_v56, %v17073_v27 }
 0x541   : > { %10541 = vrcp.f32 %v13678_v36  ;;  %v4580_v36 = vmul.f32 %v10528_v8, %v13364_v6  ;;  %v4676_v22 = vpack.c.bf16 %v4578_v2, %v4577_v34 }
 0x542   : > { %10543 = vpow2.f32 %v3925_v14  ;;  %v3941_v44 = vmul.f32 1.442695, %v3718_v31 }
 0x543   : > { %v13794_v41 = vpop.xlane.xlu1 %4221  ;;  %10545 = vpow2.f32 %v3937_v15  ;;  %v17077_v15 = vld [vmem:[#allocation137_spill] sm:$0xff] }
 0x544   : > { %10547 = vpow2.f32 %v3941_v44 }
 0x545   : > { %10549 = vrcp.f32 %v13592_v37 }
 0x546   : > { %10551 = vrcp.f32 %v13622_v18 }
 0x547   : > { %v13801_v42 = vpop.xlane.xlu1 %4239  ;;  %v13833_v14 = vpop.eup %10533  ;;  %10553 = vrcp.f32 %v13562_v23  ;;  %v17082_v23 = vld [vmem:[#allocation122_spill] sm:$0xff] }
 0x548   : > { %v10536_v55 = vpop.eup %10535  ;;  %v4262_v31 = vsel %vm3238_vm1, %v13833_v14, 0.0  ;;  %10555 = vrcp.f32 %v13535_v54  ;;  %v3728_v18 = vsub.f32 %v17082_v23, %v13444_v5  ;;  %v17084_v5 = vld [vmem:[#allocation118_spill] sm:$0xff]  ;;  %v17087_v23 = vld [vmem:[#allocation133_spill] sm:$0xff] }
 0x54b   : > { %v13806_v19 = vpop.xlane.xlu1 %4242 }
 0x54f   : > { %v13812_v39 = vpop.xlane.xlu1 %4245 }
 0x551   : > { %1615 = vrot.lane.b32.xlu1 %v17066_v38, %s10953_s19  ;;  %v13817_v35 = vpop.f32.mrb[120].mxu0 }
 0x552   : > { %17067 = vst [vmem:[#allocation135_spill] sm:$0xff] %v13817_v35  ;;  %v13820_v43 = vpop.f32.mrb[121].mxu0  ;;  %v4677_v35 = vpack.c.bf16 %v4580_v36, %v4579_v29 }
 0x553   : > { %17068 = vst [vmem:[#allocation15_spill] sm:$0xff] %v13820_v43  ;;  %v1600_v9 = vpop.permute.xlu1 %1599  ;;  %v13824_v16 = vpop.f32.mrb[122].mxu0  ;;  %v17089_v43 = vld [vmem:[#allocation121_spill] sm:$0xff] }
 0x554   : > { %17070 = vst [vmem:[#allocation24_spill] sm:$0xff] %v13824_v16  ;;  %9628 = vmatprep.subr.bf16.mxu1 %v1600_v9  ;;  %v13828_v47 = vpop.f32.mrb[123].mxu0  ;;  %v10538_v16 = vpop.eup %10537 }
 0x555   : > { %17072 = vst [vmem:[#allocation76_spill] sm:$0xff] %v13828_v47  ;;  %1633 = vrot.lane.b32.xlu1 %v17018_v59, %s10954_s29  ;;  %9629 = vmatpush3.bf16.msra.mxu1 %v1600_v9  ;;  %v10540_v6 = vpop.eup %10539  ;;  %v4582_v9 = vmul.f32 %v10536_v55, %v17075_v63  ;;  %v4591_v34 = vmul.f32 %v10538_v16, %v13490_v49  ;;  %v17078_v63 = vld [vmem:[#allocation138_spill] sm:$0xff]  ;;  %v17118_v47 = vld [vmem:[#allocation103_spill] sm:$0xff] }
 0x556   : > { %v10542_v50 = vpop.eup %10541  ;;  %v4581_v36 = vmul.f32 %v10540_v6, %v17077_v15  ;;  %v17079_v15 = vld [vmem:[#allocation97_spill] sm:$0xff] }
 0x557   : > { %v13848_v27 = vpop.eup %10543 }
 0x558   : > { %9631 = vmatmul.mubr.msk.bf16.vlgmr.msra.gmra.mrb[144].mxu1 %vm3238_vm1, %v4676_v22  ;;  %v4592_v22 = vmul.f32 %v10542_v50, %v13408_v3  ;;  %v4678_v16 = vpack.c.bf16 %v4582_v9, %v4581_v36  ;;  %v4268_v44 = vsel %vm3238_vm1, %v13848_v27, 0.0  ;;  %v13860_v6 = vpop.eup %10545  ;;  %v17081_v36 = vld [vmem:[#allocation104_spill] sm:$0xff] }
 0x559   : > { %9634 = vmatprep.mubr.msk.bf16.mxu1 %vm3238_vm1, %v4677_v35  ;;  %v13837_v8 = vpop.f32.mrb[128].mxu1  ;;  %v3719_v35 = vsub.f32 %v17079_v15, %v17078_v63  ;;  %v4286_v50 = vsel %vm3238_vm1, %v13860_v6, 0.0  ;;  %v13870_v9 = vpop.eup %10547  ;;  %v3961_v63 = vmul.f32 1.442695, %v3728_v18  ;;  %v17088_v18 = vld [vmem:[#allocation62_spill] sm:$0xff] }
 0x55a   : > { %17074 = vst [vmem:[#allocation99_spill] sm:$0xff] %v13837_v8  ;;  %v13840_v56 = vpop.f32.mrb[129].mxu1  ;;  %v4683_v55 = vpack.c.bf16 %v4592_v22, %v4591_v34  ;;  %v4292_v37 = vsel %vm3238_vm1, %v13870_v9, 0.0 }
 0x55b   : > { %v13843_v2 = vpop.f32.mrb[130].mxu1  ;;  %v3943_v34 = vmul.f32 1.442695, %v3719_v35  ;;  %v10550_v35 = vpop.eup %10549 }
 0x55c   : > { %17076 = vst [vmem:[#allocation72_spill] sm:$0xff] %v13843_v2  ;;  %v13852_v29 = vpop.f32.mrb[131].mxu1  ;;  %v17189_v2 = vld [vmem:[#allocation54_spill] sm:$0xff] }
 0x55d   : > { %4263 = vadd.xlane.f32.xlu0 %v4262_v31  ;;  %v17080_v31 = vld [vmem:[#allocation53_spill] sm:$0xff]  ;;  %10557 = vpow2.f32 %v3943_v34  ;;  %v17083_v34 = vld [vmem:[#allocation98_spill] sm:$0xff] }
 0x55e   : > { %v3722_v22 = vsub.f32 %v17081_v36, %v17080_v31  ;;  %10559 = vrcp.f32 %v13627_v24  ;;  %v3729_v31 = vsub.f32 %v17084_v5, %v17083_v34  ;;  %v17085_v36 = vld [vmem:[#allocation140_spill] sm:$0xff]  ;;  %v3730_v34 = vsub.f32 %v17089_v43, %v13424_v17 }
 0x55f   : > { %10561 = vrcp.f32 %v13730_v57  ;;  %v4570_v24 = vmul.f32 %v10550_v35, %v17085_v36  ;;  %v17091_v36 = vld [vmem:[#allocation66_spill] sm:$0xff] }
 0x560   : > { %9635 = vmatmul.mubr.msk.bf16.gmra.mrb[148].mxu1 %vm3238_vm1, %v4678_v16  ;;  %10563 = vrcp.f32 %v13544_v48  ;;  %v3965_v43 = vmul.f32 1.442695, %v3730_v34 }
 0x561   : > { %9662 = vmatprep.mubr.msk.bf16.mxu1 %vm3238_vm1, %v4683_v55  ;;  %4269 = vadd.xlane.f32.xlu0 %v4268_v44  ;;  %v3949_v55 = vmul.f32 1.442695, %v3722_v22  ;;  %v10552_v44 = vpop.eup %10551  ;;  %10565 = vrcp.f32 %v13666_v1 }
 0x562   : > { %v10554_v15 = vpop.eup %10553 }
 0x563   : > { %10567 = vpow2.f32 %v3949_v55  ;;  %v4569_v48 = vmul.f32 %v10554_v15, %v17087_v23  ;;  %v3963_v55 = vmul.f32 1.442695, %v3729_v31 }
 0x564   : > { %v4216_v3 = vpop.xlane.xlu0 %4215  ;;  %10569 = vpow2.f32 %v3961_v63 }
 0x565   : > { %4287 = vadd.xlane.f32.xlu0 %v4286_v50  ;;  %v10556_v50 = vpop.eup %10555  ;;  %10571 = vrcp.f32 %v13738_v30  ;;  %v4672_v5 = vpack.c.bf16 %v4570_v24, %v4569_v48 }
 0x566   : > { %v4571_v1 = vmul.f32 %v10556_v50, %v17088_v18  ;;  %10573 = vrcp.f32 %v4216_v3 }
 0x567   : > { %v13892_v49 = vpop.eup %10557  ;;  %10575 = vrcp.f32 %v13672_v33  ;;  %v17090_v33 = vld [vmem:[#allocation94_spill] sm:$0xff] }
 0x568   : > { %v4219_v16 = vpop.xlane.xlu0 %4218  ;;  %v10560_v35 = vpop.eup %10559  ;;  %10577 = vrcp.f32 %v13790_v4  ;;  %v4295_v50 = vsel %vm3238_vm1, %v13892_v49, 0.0 }
 0x569   : > { %4293 = vadd.xlane.f32.xlu0 %v4292_v37  ;;  %v17086_v37 = vld [vmem:[#allocation49_spill] sm:$0xff]  ;;  %v10562_v15 = vpop.eup %10561  ;;  %10579 = vpow2.f32 %v3963_v55  ;;  %v4574_v3 = vmul.f32 %v10560_v35, %v17090_v33 }
 0x56a   : > { %v4572_v57 = vmul.f32 %v10552_v44, %v17086_v37  ;;  %v10564_v30 = vpop.eup %10563  ;;  %v4584_v4 = vmul.f32 %v10562_v15, %v13465_v20  ;;  %10581 = vrcp.f32 %v4219_v16 }
 0x56b   : > { %v10566_v17 = vpop.eup %10565  ;;  %v4573_v24 = vmul.f32 %v10564_v30, %v17091_v36  ;;  %10583 = vpow2.f32 %v3965_v43 }
 0x56c   : > { %v13882_v54 = vpop.xlane.xlu0 %4236  ;;  %v4673_v63 = vpack.c.bf16 %v4572_v57, %v4571_v1  ;;  %10585 = vrcp.f32 %v13794_v41 }
 0x56d   : > { %v13907_v31 = vpop.eup %10567  ;;  %v4674_v57 = vpack.c.bf16 %v4574_v3, %v4573_v24  ;;  %v17096_v3 = vld [vmem:[#allocation88_spill] sm:$0xff] }
 0x56e   : > { %v13912_v37 = vpop.eup %10569  ;;  %v4304_v20 = vsel %vm3238_vm1, %v13907_v31, 0.0 }
 0x56f   : > { %v10572_v23 = vpop.eup %10571  ;;  %v4322_v41 = vsel %vm3238_vm1, %v13912_v37, 0.0 }
 0x570   : > { %v1588_v22 = vpop.permute.xlu0 %1587  ;;  %v10574_v18 = vpop.eup %10573  ;;  %v4585_v1 = vmul.f32 %v10572_v23, %v13478_v21 }
 0x571   : > { %9612 = vmatprep.subr.bf16.mxu0 %v1588_v22  ;;  %v10576_v16 = vpop.eup %10575  ;;  %v4588_v55 = vmul.f32 %v10574_v18, %v13616_v12  ;;  %v17100_v18 = vld [vmem:[#allocation93_spill] sm:$0xff] }
 0x572   : > { %9613 = vmatpush3.bf16.msra.mxu0 %v1588_v22  ;;  %v4583_v22 = vmul.f32 %v10566_v17, %v13396_v58  ;;  %v10578_v58 = vpop.eup %10577 }
 0x573   : > { %9638 = vmatprep.subr.bf16.mxu0 %v17018_v59  ;;  %v13928_v34 = vpop.eup %10579  ;;  %v4587_v21 = vmul.f32 %v10578_v58, %v13537_v61 }
 0x574   : > { %v1610_v44 = vpop.permute.xlu0 %1609  ;;  %v4679_v48 = vpack.c.bf16 %v4584_v4, %v4583_v22  ;;  %v4325_v12 = vsel %vm3238_vm1, %v13928_v34, 0.0 }
 0x575   : > { %9615 = vmatmul.mubr.msk.bf16.vlgmr.msra.gmra.mrb[128].mxu0 %vm3238_vm1, %v4672_v5  ;;  %9654 = vmatprep.subr.bf16.mxu1 %v1610_v44  ;;  %v4586_v5 = vmul.f32 %v10576_v16, %v13402_v0  ;;  %v4681_v17 = vpack.c.bf16 %v4588_v55, %v4587_v21  ;;  %v17102_v21 = vld [vmem:[#allocation27_spill] sm:$0xff] }
 0x576   : > { %9618 = vmatprep.mubr.msk.bf16.mxu0 %vm3238_vm1, %v4673_v63  ;;  %9639 = vmatpush3.bf16.msra.mxu0 %v17018_v59  ;;  %v10582_v63 = vpop.eup %10581 }
 0x577   : > { %9655 = vmatpush3.bf16.msra.mxu1 %v1610_v44  ;;  %9640 = vmatprep.subr.bf16.mxu0 %v17030_v46  ;;  %v4680_v44 = vpack.c.bf16 %v4586_v5, %v4585_v1  ;;  %v13941_v43 = vpop.eup %10583  ;;  %v4589_v61 = vmul.f32 %v10582_v63, %v13620_v40 }
 0x578   : > { %v10586_v33 = vpop.eup %10585  ;;  %v4328_v24 = vsel %vm3238_vm1, %v13941_v43, 0.0 }
 0x579   : > { %4296 = vadd.xlane.f32.xlu1 %v4295_v50  ;;  %v17097_v50 = vld [vmem:[#allocation109_spill] sm:$0xff]  ;;  %v4590_v22 = vmul.f32 %v10586_v33, %v13551_v26 }
 0x57a   : > { %9641 = vmatpush3.bf16.msra.mxu0 %v17030_v46  ;;  %v3720_v4 = vsub.f32 %v17097_v50, %v17096_v3 }
 0x57b   : > { %9642 = vmatprep.subr.bf16.mxu0 %v17060_v10 }
 0x57c   : > { %v3945_v40 = vmul.f32 1.442695, %v3720_v4 }
 0x57d   : > { %4305 = vadd.xlane.f32.xlu1 %v4304_v20  ;;  %9619 = vmatmul.mubr.msk.bf16.gmra.mrb[132].mxu0 %vm3238_vm1, %v4674_v57  ;;  %v4682_v20 = vpack.c.bf16 %v4590_v22, %v4589_v61  ;;  %v17109_v22 = vld [vmem:[#allocation34_spill] sm:$0xff] }
 0x57e   : > { %9643 = vmatpush3.bf16.msra.mxu0 %v17060_v10  ;;  %9646 = vmatprep.mubr.msk.bf16.mxu0 %vm3238_vm1, %v4679_v48  ;;  %v17099_v48 = vld [vmem:[#allocation134_spill] sm:$0xff]  ;;  %10587 = vpow2.f32 %v3945_v40 }
 0x57f   : > { %1621 = vrot.lane.b32.xlu0 %v17018_v59, %s10952_s25  ;;  %9644 = vmatprep.subr.bf16.mxu0 %v17066_v38  ;;  %v3721_v16 = vsub.f32 %v17100_v18, %v17099_v48 }
 0x580   : > { %v13931_v35 = vpop.f32.mrb[124].mxu0 }
 0x581   : > { %4323 = vadd.xlane.f32.xlu1 %v4322_v41  ;;  %17092 = vst [vmem:[#allocation25_spill] sm:$0xff] %v13931_v35  ;;  %v13935_v59 = vpop.f32.mrb[125].mxu0  ;;  %v3947_v5 = vmul.f32 1.442695, %v3721_v16  ;;  %v17110_v35 = vld [vmem:[#allocation44_spill] sm:$0xff] }
 0x582   : > { %9645 = vmatpush3.bf16.msra.mxu0 %v17066_v38  ;;  %17093 = vst [vmem:[#allocation73_spill] sm:$0xff] %v13935_v59  ;;  %v13937_v15 = vpop.f32.mrb[126].mxu0 }
 0x583   : > { %17094 = vst [vmem:[#allocation106_spill] sm:$0xff] %v13937_v15  ;;  %v13943_v0 = vpop.f32.mrb[127].mxu0  ;;  %10589 = vpow2.f32 %v3947_v5  ;;  %v3732_v15 = vsub.f32 %v17110_v35, %v13539_v25 }
 0x584   : > { %v4252_v30 = vpop.xlane.xlu1 %4251  ;;  %17095 = vst [vmem:[#allocation14_spill] sm:$0xff] %v13943_v0 }
 0x585   : > { %4326 = vadd.xlane.f32.xlu1 %v4325_v12  ;;  %9647 = vmatmul.mubr.msk.bf16.vlgmr.msra.gmra.mrb[136].mxu0 %vm3238_vm1, %v4680_v44  ;;  %v17103_v44 = vld [vmem:[#allocation29_spill] sm:$0xff]  ;;  %v3969_v0 = vmul.f32 1.442695, %v3732_v15 }
 0x586   : > { %9650 = vmatprep.mubr.msk.bf16.mxu0 %vm3238_vm1, %v4681_v17  ;;  %v3727_v63 = vsub.f32 %v17103_v44, %v17102_v21  ;;  %v17106_v21 = vld [vmem:[#allocation89_spill] sm:$0xff] }
 0x587   : > { %v17107_v44 = vld [vmem:[#allocation117_spill] sm:$0xff] }
 0x588   : > { %v13950_v36 = vpop.xlane.xlu1 %4272  ;;  %v3959_v17 = vmul.f32 1.442695, %v3727_v63  ;;  %v13974_v33 = vpop.eup %10587  ;;  %v3723_v63 = vsub.f32 %v17107_v44, %v17106_v21 }
 0x589   : > { %4329 = vadd.xlane.f32.xlu1 %v4328_v24  ;;  %v13955_v57 = vpop.f32.mrb[132].mxu1  ;;  %v4298_v61 = vsel %vm3238_vm1, %v13974_v33, 0.0 }
 0x58a   : > { %17098 = vst [vmem:[#allocation141_spill] sm:$0xff] %v13955_v57  ;;  %v13957_v23 = vpop.f32.mrb[133].mxu1  ;;  %10591 = vpow2.f32 %v3959_v17  ;;  %v3951_v17 = vmul.f32 1.442695, %v3723_v63  ;;  %v17142_v57 = vld [vmem:[#allocation18_spill] sm:$0xff] }
 0x58b   : > { %v13963_v1 = vpop.f32.mrb[134].mxu1  ;;  %10593 = vrcp.f32 %v4252_v30 }
 0x58c   : > { %v13961_v58 = vpop.xlane.xlu1 %4278  ;;  %17101 = vst [vmem:[#allocation101_spill] sm:$0xff] %v13963_v1  ;;  %v13967_v55 = vpop.f32.mrb[135].mxu1 }
 0x58d   : > { %9651 = vmatmul.mubr.msk.bf16.gmra.mrb[140].mxu0 %vm3238_vm1, %v4682_v20  ;;  %v13982_v50 = vpop.eup %10589 }
 0x58e   : > { %v4301_v18 = vsel %vm3238_vm1, %v13982_v50, 0.0 }
 0x590   : > { %v1612_v12 = vpop.permute.xlu1 %1611 }
 0x591   : > { %9656 = vmatprep.subr.bf16.mxu1 %v1612_v12 }
 0x592   : > { %9657 = vmatpush3.bf16.msra.mxu1 %v1612_v12 }
 0x594   : > { %v13996_v16 = vpop.eup %10591 }
 0x595   : > { %v4319_v5 = vsel %vm3238_vm1, %v13996_v16, 0.0  ;;  %v10594_v26 = vpop.eup %10593 }
 0x596   : > { %v4600_v21 = vmul.f32 %v10594_v26, %v13656_v53  ;;  %v17114_v26 = vld [vmem:[#allocation107_spill] sm:$0xff] }
 0x59a   : > { %1635 = vrot.lane.b32.xlu1 %v17030_v46, %s10954_s29 }
 0x59d   : > { %v13980_v3 = vpop.f32.mrb[136].mxu1 }
 0x59e   : > { %17104 = vst [vmem:[#allocation38_spill] sm:$0xff] %v13980_v3  ;;  %4299 = vadd.xlane.f32.xlu0 %v4298_v61  ;;  %v13984_v4 = vpop.f32.mrb[137].mxu1  ;;  %v17108_v61 = vld [vmem:[#allocation28_spill] sm:$0xff] }
 0x59f   : > { %v13986_v24 = vpop.f32.mrb[138].mxu1  ;;  %v3726_v41 = vsub.f32 %v17109_v22, %v17108_v61  ;;  %v17112_v22 = vld [vmem:[#allocation124_spill] sm:$0xff] }
 0x5a0   : > { %17105 = vst [vmem:[#allocation84_spill] sm:$0xff] %v13986_v24  ;;  %v13990_v20 = vpop.f32.mrb[139].mxu1  ;;  %v3733_v61 = vsub.f32 %v17112_v22, %v13474_v52  ;;  %v17141_v24 = vld [vmem:[#allocation92_spill] sm:$0xff] }
 0x5a1   : > { %v3957_v30 = vmul.f32 1.442695, %v3726_v41 }
 0x5a2   : > { %4302 = vadd.xlane.f32.xlu0 %v4301_v18  ;;  %v3971_v41 = vmul.f32 1.442695, %v3733_v61 }
 0x5a5   : > { %v4249_v40 = vpop.xlane.xlu0 %4248 }
 0x5a6   : > { %10595 = vrcp.f32 %v4249_v40  ;;  %4320 = vadd.xlane.f32.xlu0 %v4319_v5 }
 0x5a7   : > { %10597 = vpow2.f32 %v3951_v17 }
 0x5a8   : > { %10599 = vpow2.f32 %v3957_v30 }
 0x5a9   : > { %v14002_v12 = vpop.xlane.xlu0 %4254  ;;  %10601 = vpow2.f32 %v3969_v0 }
 0x5aa   : > { %10603 = vpow2.f32 %v3971_v41 }
 0x5ad   : > { %v14006_v48 = vpop.xlane.xlu0 %4257 }
 0x5b0   : > { %v10596_v18 = vpop.eup %10595 }
 0x5b1   : > { %v4276_v40 = vpop.xlane.xlu0 %4275  ;;  %v4599_v5 = vmul.f32 %v10596_v18, %v13712_v28  ;;  %v3734_v18 = vsub.f32 %v17114_v26, %v13529_v32  ;;  %v14031_v15 = vpop.eup %10597 }
 0x5b2   : > { %v14012_v44 = vpop.f32.mrb[140].mxu1 }
 0x5b3   : > { %17111 = vst [vmem:[#allocation128_spill] sm:$0xff] %v14012_v44  ;;  %v14014_v63 = vpop.f32.mrb[141].mxu1  ;;  %v4687_v59 = vpack.c.bf16 %v4600_v21, %v4599_v5  ;;  %v3973_v30 = vmul.f32 1.442695, %v3734_v18  ;;  %v14037_v5 = vpop.eup %10599  ;;  %v17119_v44 = vld [vmem:[#allocation130_spill] sm:$0xff] }
 0x5b4   : > { %v14018_v17 = vpop.f32.mrb[142].mxu1  ;;  %v4316_v0 = vsel %vm3238_vm1, %v14037_v5, 0.0  ;;  %v14045_v21 = vpop.eup %10601 }
 0x5b5   : > { %17113 = vst [vmem:[#allocation80_spill] sm:$0xff] %v14018_v17  ;;  %v14022_v35 = vpop.xlane.xlu0 %4281  ;;  %v14024_v28 = vpop.f32.mrb[143].mxu1  ;;  %9678 = vmatprep.mubr.msk.bf16.mxu0 %vm3238_vm1, %v4687_v59  ;;  %v4307_v59 = vsel %vm3238_vm1, %v14031_v15, 0.0  ;;  %10605 = vpow2.f32 %v3973_v30  ;;  %v4334_v22 = vsel %vm3238_vm1, %v14045_v21, 0.0 }
 0x5b6   : > { %10607 = vrcp.f32 %v13686_v7  ;;  %v14056_v61 = vpop.eup %10603 }
 0x5b7   : > { %10609 = vrcp.f32 %v13882_v54  ;;  %v4337_v7 = vsel %vm3238_vm1, %v14056_v61, 0.0 }
 0x5b8   : > { %10611 = vrcp.f32 %v13682_v62 }
 0x5b9   : > { %v1614_v52 = vpop.permute.xlu0 %1613  ;;  %10613 = vrcp.f32 %v13801_v42 }
 0x5ba   : > { %9658 = vmatprep.subr.bf16.mxu1 %v1614_v52  ;;  %10615 = vrcp.f32 %v13812_v39 }
 0x5bb   : > { %9659 = vmatpush3.bf16.msra.mxu1 %v1614_v52  ;;  %10617 = vrcp.f32 %v4276_v40  ;;  %v17116_v40 = vld [vmem:[#allocation86_spill] sm:$0xff] }
 0x5bc   : > { %1623 = vrot.lane.b32.xlu0 %v17030_v46, %s10952_s25  ;;  %10619 = vrcp.f32 %v13806_v19 }
 0x5bd   : > { %10621 = vrcp.f32 %v13950_v36 }
 0x5be   : > { %4308 = vadd.xlane.f32.xlu1 %v4307_v59 }
 0x5bf   : > { %v14063_v54 = vpop.eup %10605 }
 0x5c0   : > { %1625 = vrot.lane.b32.xlu0 %v17060_v10, %s10952_s25  ;;  %v10608_v62 = vpop.eup %10607  ;;  %v4340_v42 = vsel %vm3238_vm1, %v14063_v54, 0.0 }
 0x5c1   : > { %v14041_v32 = vpop.xlane.xlu1 %4260  ;;  %v10610_v52 = vpop.eup %10609  ;;  %v4594_v39 = vmul.f32 %v10608_v62, %v13422_v51  ;;  %v3731_v51 = vsub.f32 %v17119_v44, %v17118_v47  ;;  %v17123_v47 = vld [vmem:[#allocation35_spill] sm:$0xff] }
 0x5c2   : > { %4317 = vadd.xlane.f32.xlu1 %v4316_v0  ;;  %v10612_v30 = vpop.eup %10611  ;;  %v17117_v0 = vld [vmem:[#allocation113_spill] sm:$0xff]  ;;  %v4595_v19 = vmul.f32 %v10610_v52, %v13633_v60 }
 0x5c3   : > { %v10614_v59 = vpop.eup %10613  ;;  %v3967_v52 = vmul.f32 1.442695, %v3731_v51  ;;  %v17125_v51 = vld [vmem:[#allocation22_spill] sm:$0xff] }
 0x5c4   : > { %1637 = vrot.lane.b32.xlu0 %v17060_v10, %s10954_s29  ;;  %v17115_v10 = vld [vmem:[#allocation91_spill] sm:$0xff]  ;;  %v4596_v25 = vmul.f32 %v10614_v59, %v13564_v45  ;;  %v10616_v36 = vpop.eup %10615 }
 0x5c5   : > { %v14052_v46 = vpop.xlane.xlu1 %4266  ;;  %v3724_v26 = vsub.f32 %v17115_v10, %v13386_v11  ;;  %v4593_v10 = vmul.f32 %v10612_v30, %v13412_v13  ;;  %v17121_v30 = vld [vmem:[#allocation43_spill] sm:$0xff] }
 0x5c6   : > { %4335 = vadd.xlane.f32.xlu1 %v4334_v22  ;;  %v3725_v22 = vsub.f32 %v17117_v0, %v17116_v40  ;;  %v4685_v17 = vpack.c.bf16 %v4596_v25, %v4595_v19  ;;  %v10618_v40 = vpop.eup %10617 }
 0x5c7   : > { %v4684_v53 = vpack.c.bf16 %v4594_v39, %v4593_v10  ;;  %v10620_v60 = vpop.eup %10619  ;;  %v4608_v59 = vmul.f32 %v10618_v40, %v17121_v30  ;;  %v17122_v39 = vld [vmem:[#allocation56_spill] sm:$0xff]  ;;  %v17128_v30 = vld [vmem:[#allocation31_spill] sm:$0xff] }
 0x5c8   : > { %v10622_v13 = vpop.eup %10621  ;;  %v4597_v0 = vmul.f32 %v10620_v60, %v17122_v39 }
 0x5c9   : > { %v14059_v41 = vpop.xlane.xlu1 %4284  ;;  %v4607_v44 = vmul.f32 %v10622_v13, %v17123_v47  ;;  %v17126_v13 = vld [vmem:[#allocation12_spill] sm:$0xff] }
 0x5ca   : > { %4338 = vadd.xlane.f32.xlu1 %v4337_v7  ;;  %v3953_v7 = vmul.f32 1.442695, %v3724_v26  ;;  %v17120_v26 = vld [vmem:[#allocation116_spill] sm:$0xff] }
 0x5cb   : > { %v4598_v45 = vmul.f32 %v10616_v36, %v17120_v26  ;;  %v17127_v26 = vld [vmem:[#allocation123_spill] sm:$0xff] }
 0x5cc   : > { %10623 = vpow2.f32 %v3953_v7 }
 0x5cd   : > { %v14069_v18 = vpop.xlane.xlu1 %4290  ;;  %v4686_v25 = vpack.c.bf16 %v4598_v45, %v4597_v0  ;;  %v3743_v45 = vsub.f32 %v17127_v26, %v17126_v13  ;;  %v17134_v13 = vld [vmem:[#allocation59_spill] sm:$0xff] }
 0x5ce   : > { %4341 = vadd.xlane.f32.xlu1 %v4340_v42  ;;  %v3955_v42 = vmul.f32 1.442695, %v3725_v22  ;;  %v4691_v22 = vpack.c.bf16 %v4608_v59, %v4607_v44  ;;  %v17129_v59 = vld [vmem:[#allocation45_spill] sm:$0xff]  ;;  %v17135_v26 = vld [vmem:[#allocation11_spill] sm:$0xff] }
 0x5cf   : > { %v3745_v39 = vsub.f32 %v17129_v59, %v17128_v30  ;;  %v3991_v0 = vmul.f32 1.442695, %v3743_v45  ;;  %v3735_v45 = vsub.f32 %v17135_v26, %v17134_v13  ;;  %v17136_v59 = vld [vmem:[#allocation87_spill] sm:$0xff] }
 0x5d0   : > { %10625 = vpow2.f32 %v3955_v42  ;;  %v17124_v42 = vld [vmem:[#allocation13_spill] sm:$0xff] }
 0x5d1   : > { %v1616_v11 = vpop.permute.xlu1 %1615  ;;  %10627 = vpow2.f32 %v3967_v52  ;;  %v3995_v44 = vmul.f32 1.442695, %v3745_v39  ;;  %v17137_v39 = vld [vmem:[#allocation26_spill] sm:$0xff] }
 0x5d2   : > { %9660 = vmatprep.subr.bf16.mxu1 %v1616_v11 }
 0x5d3   : > { %9661 = vmatpush3.bf16.msra.mxu1 %v1616_v11 }
 0x5d5   : > { %v1634_v62 = vpop.permute.xlu1 %1633 }
 0x5d6   : > { %9663 = vmatmul.mubr.msk.bf16.vlgmr.msra.gmra.mrb[152].mxu1 %vm3238_vm1, %v4684_v53  ;;  %9686 = vmatprep.subr.bf16.mxu1 %v1634_v62  ;;  %v14089_v53 = vpop.eup %10623 }
 0x5d7   : > { %9666 = vmatprep.mubr.msk.bf16.mxu1 %vm3238_vm1, %v4685_v17  ;;  %9687 = vmatpush3.bf16.msra.mxu1 %v1634_v62  ;;  %v4310_v17 = vsel %vm3238_vm1, %v14089_v53, 0.0  ;;  %v3736_v62 = vsub.f32 %v17125_v51, %v17124_v42 }
 0x5d9   : > { %v3977_v60 = vmul.f32 1.442695, %v3736_v62 }
 0x5da   : > { %v14096_v7 = vpop.eup %10625 }
 0x5db   : > { %v4313_v11 = vsel %vm3238_vm1, %v14096_v7, 0.0  ;;  %v14100_v19 = vpop.eup %10627  ;;  %10629 = vpow2.f32 %v3977_v60 }
 0x5dc   : > { %v4331_v36 = vsel %vm3238_vm1, %v14100_v19, 0.0  ;;  %10631 = vpow2.f32 %v3991_v0  ;;  %v3737_v0 = vsub.f32 %v17137_v39, %v17136_v59  ;;  %v17144_v59 = vld [vmem:[#allocation142_spill] sm:$0xff] }
 0x5dd   : > { %10633 = vpow2.f32 %v3995_v44  ;;  %v3975_v44 = vmul.f32 1.442695, %v3735_v45  ;;  %v17143_v45 = vld [vmem:[#allocation74_spill] sm:$0xff] }
 0x5de   : > { %9667 = vmatmul.mubr.msk.bf16.gmra.mrb[156].mxu1 %vm3238_vm1, %v4686_v25  ;;  %v3746_v39 = vsub.f32 %v17144_v59, %v17143_v45 }
 0x5df   : > { %1639 = vrot.lane.b32.xlu1 %v17066_v38, %s10954_s29  ;;  %9694 = vmatprep.mubr.msk.bf16.mxu1 %vm3238_vm1, %v4691_v22 }
 0x5e3   : > { %4311 = vadd.xlane.f32.xlu0 %v4310_v17 }
 0x5e5   : > { %v14118_v22 = vpop.eup %10629 }
 0x5e6   : > { %17130 = vst [vmem:[#allocation115_spill] sm:$0xff] %v14118_v22  ;;  %v4346_v17 = vsel %vm3238_vm1, %v14118_v22, 0.0 }
 0x5e7   : > { %4314 = vadd.xlane.f32.xlu0 %v4313_v11  ;;  %v14124_v11 = vpop.eup %10631 }
 0x5e8   : > { %17131 = vst [vmem:[#allocation110_spill] sm:$0xff] %v14124_v11  ;;  %v4367_v51 = vsel %vm3238_vm1, %v14124_v11, 0.0  ;;  %v14130_v62 = vpop.eup %10633  ;;  %v17138_v11 = vld [vmem:[#allocation63_spill] sm:$0xff] }
 0x5e9   : > { %17133 = vst [vmem:[#allocation17_spill] sm:$0xff] %v14130_v62 }
 0x5ea   : > { %v14102_v10 = vpop.xlane.xlu0 %4263 }
 0x5eb   : > { %4332 = vadd.xlane.f32.xlu0 %v4331_v36  ;;  %v17132_v36 = vld [vmem:[#allocation19_spill] sm:$0xff] }
 0x5ee   : > { %v14108_v40 = vpop.xlane.xlu0 %4269 }
 0x5f2   : > { %v14112_v52 = vpop.xlane.xlu0 %4287 }
 0x5f6   : > { %v14116_v47 = vpop.xlane.xlu0 %4293 }
 0x5fa   : > { %v1622_v25 = vpop.permute.xlu0 %1621 }
 0x5fb   : > { %9670 = vmatprep.subr.bf16.mxu0 %v1622_v25 }
 0x5fc   : > { %9671 = vmatpush3.bf16.msra.mxu0 %v1622_v25 }
 0x601   : > { %1627 = vrot.lane.b32.xlu0 %v17066_v38, %s10952_s25  ;;  %v4373_v38 = vsel %vm3238_vm1, %v14130_v62, 0.0  ;;  %v17140_v62 = vld [vmem:[#allocation40_spill] sm:$0xff] }
 0x602   : > { %v3744_v13 = vsub.f32 %v17141_v24, %v17140_v62 }
 0x603   : > { %4347 = vadd.xlane.f32.xlu1 %v4346_v17  ;;  %v3979_v17 = vmul.f32 1.442695, %v3737_v0 }
 0x604   : > { %v3993_v0 = vmul.f32 1.442695, %v3744_v13 }
 0x605   : > { %1649 = vrot.lane.b32.xlu0 %v17132_v36, %s10953_s19 }
 0x606   : > { %v4297_v42 = vpop.xlane.xlu1 %4296 }
 0x607   : > { %4368 = vadd.xlane.f32.xlu1 %v4367_v51  ;;  %v17139_v51 = vld [vmem:[#allocation30_spill] sm:$0xff] }
 0x608   : > { %v3738_v22 = vsub.f32 %v17139_v51, %v17138_v11 }
 0x60a   : > { %v4306_v60 = vpop.xlane.xlu1 %4305 }
 0x60b   : > { %4374 = vadd.xlane.f32.xlu1 %v4373_v38  ;;  %v3981_v38 = vmul.f32 1.442695, %v3738_v22 }
 0x60e   : > { %v14136_v30 = vpop.xlane.xlu1 %4323 }
 0x612   : > { %v4327_v25 = vpop.xlane.xlu1 %4326 }
 0x613   : > { %10635 = vrcp.f32 %v4327_v25  ;;  %v3997_v25 = vmul.f32 1.442695, %v3746_v39 }
 0x614   : > { %10637 = vpow2.f32 %v3975_v44 }
 0x616   : > { %v4330_v3 = vpop.xlane.xlu1 %4329 }
 0x617   : > { %10639 = vrcp.f32 %v4330_v3 }
 0x618   : > { %10641 = vpow2.f32 %v3979_v17 }
 0x619   : > { %10643 = vpow2.f32 %v3981_v38 }
 0x61a   : > { %v1636_v26 = vpop.permute.xlu1 %1635  ;;  %10645 = vpow2.f32 %v3993_v0 }
 0x61b   : > { %9688 = vmatprep.subr.bf16.mxu1 %v1636_v26  ;;  %10647 = vpow2.f32 %v3997_v25 }
 0x61c   : > { %1651 = vrot.lane.b32.xlu1 %v17142_v57, %s10953_s19  ;;  %9689 = vmatpush3.bf16.msra.mxu1 %v1636_v26  ;;  %v17151_v26 = vld [vmem:[#allocation33_spill] sm:$0xff]  ;;  %10649 = vrcp.f32 %v4297_v42 }
 0x61d   : > { %v10636_v44 = vpop.eup %10635 }
 0x61e   : > { %v14148_v11 = vpop.eup %10637  ;;  %v14151_v22 = vmul.f32 %v10636_v44, %v13928_v34  ;;  %v17150_v34 = vld [vmem:[#allocation36_spill] sm:$0xff] }
 0x61f   : > { %17145 = vst [vmem:[#allocation58_spill] sm:$0xff] %v14148_v11  ;;  %v4343_v62 = vsel %vm3238_vm1, %v14148_v11, 0.0 }
 0x620   : > { %17146 = vst [vmem:[#allocation85_spill] sm:$0xff] %v14151_v22 }
 0x621   : > { %v10640_v3 = vpop.eup %10639 }
 0x622   : > { %v14154_v24 = vmul.f32 %v10640_v3, %v13941_v43  ;;  %v14158_v17 = vpop.eup %10641  ;;  %v3739_v43 = vsub.f32 %v17151_v26, %v17150_v34 }
 0x623   : > { %17148 = vst [vmem:[#allocation81_spill] sm:$0xff] %v14158_v17  ;;  %v4349_v38 = vsel %vm3238_vm1, %v14158_v17, 0.0  ;;  %v14164_v13 = vpop.eup %10643 }
 0x624   : > { %17147 = vst [vmem:[#allocation48_spill] sm:$0xff] %v14154_v24  ;;  %4344 = vadd.xlane.f32.xlu0 %v4343_v62  ;;  %17149 = vst [vmem:[#allocation120_spill] sm:$0xff] %v14164_v13  ;;  %v4352_v39 = vsel %vm3238_vm1, %v14164_v13, 0.0  ;;  %v14172_v0 = vpop.eup %10645  ;;  %v3983_v25 = vmul.f32 1.442695, %v3739_v43  ;;  %v17155_v62 = vld [vmem:[#allocation57_spill] sm:$0xff] }
 0x625   : > { %17153 = vst [vmem:[#allocation119_spill] sm:$0xff] %v14172_v0 }
 0x628   : > { %4350 = vadd.xlane.f32.xlu0 %v4349_v38  ;;  %v17156_v38 = vld [vmem:[#allocation127_spill] sm:$0xff] }
 0x629   : > { %v3741_v51 = vsub.f32 %v17156_v38, %v17155_v62  ;;  %v17158_v62 = vld [vmem:[#allocation41_spill] sm:$0xff] }
 0x62b   : > { %v14168_v45 = vpop.f32.mrb[144].mxu1  ;;  %v4300_v59 = vpop.xlane.xlu0 %4299  ;;  %v3987_v43 = vmul.f32 1.442695, %v3741_v51 }
 0x62c   : > { %17152 = vst [vmem:[#allocation16_spill] sm:$0xff] %v14168_v45  ;;  %10651 = vrcp.f32 %v4300_v59  ;;  %v14174_v44 = vpop.f32.mrb[145].mxu1  ;;  %4353 = vadd.xlane.f32.xlu0 %v4352_v39  ;;  %v4370_v59 = vsel %vm3238_vm1, %v14172_v0, 0.0  ;;  %v14188_v39 = vpop.eup %10647 }
 0x62d   : > { %v14176_v3 = vpop.f32.mrb[146].mxu1  ;;  %10653 = vrcp.f32 %v4306_v60  ;;  %17157 = vst [vmem:[#allocation139_spill] sm:$0xff] %v14188_v39  ;;  %v17159_v60 = vld [vmem:[#allocation96_spill] sm:$0xff]  ;;  %v4376_v26 = vsel %vm3238_vm1, %v14188_v39, 0.0  ;;  %v10650_v13 = vpop.eup %10649 }
 0x62e   : > { %17154 = vst [vmem:[#allocation132_spill] sm:$0xff] %v14176_v3  ;;  %v14182_v34 = vpop.f32.mrb[147].mxu1  ;;  %v3747_v38 = vsub.f32 %v17159_v60, %v17158_v62  ;;  %v14211_v3 = vmul.f32 %v10650_v13, %v13892_v49 }
 0x62f   : > { %v4303_v22 = vpop.xlane.xlu0 %4302 }
 0x630   : > { %10655 = vrcp.f32 %v4303_v22  ;;  %4371 = vadd.xlane.f32.xlu0 %v4370_v59  ;;  %v17163_v59 = vld [vmem:[#allocation100_spill] sm:$0xff]  ;;  %v3999_v11 = vmul.f32 1.442695, %v3747_v38 }
 0x631   : > { %10657 = vpow2.f32 %v3983_v25  ;;  %v17164_v25 = vld [vmem:[#allocation126_spill] sm:$0xff] }
 0x632   : > { %v3749_v51 = vsub.f32 %v17164_v25, %v17163_v59  ;;  %10659 = vpow2.f32 %v3987_v43  ;;  %v17173_v43 = vld [vmem:[#allocation61_spill] sm:$0xff] }
 0x633   : > { %v14192_v24 = vpop.f32.mrb[148].mxu1  ;;  %v14194_v42 = vpop.xlane.xlu0 %4320  ;;  %10661 = vpow2.f32 %v3999_v11 }
 0x634   : > { %17160 = vst [vmem:[#allocation55_spill] sm:$0xff] %v14192_v24  ;;  %v14198_v17 = vpop.f32.mrb[149].mxu1  ;;  %4377 = vadd.xlane.f32.xlu0 %v4376_v26  ;;  %v4003_v59 = vmul.f32 1.442695, %v3749_v51 }
 0x635   : > { %17161 = vst [vmem:[#allocation137_spill] sm:$0xff] %v14198_v17  ;;  %v14200_v0 = vpop.f32.mrb[150].mxu1 }
 0x636   : > { %17162 = vst [vmem:[#allocation138_spill] sm:$0xff] %v14200_v0  ;;  %v10652_v22 = vpop.eup %10651  ;;  %v14206_v60 = vpop.f32.mrb[151].mxu1  ;;  %10663 = vpow2.f32 %v4003_v59 }
 0x637   : > { %17165 = vst [vmem:[#allocation97_spill] sm:$0xff] %v14206_v60  ;;  %v1624_v45 = vpop.permute.xlu0 %1623  ;;  %v14214_v26 = vmul.f32 %v10652_v22, %v13974_v33  ;;  %v10654_v1 = vpop.eup %10653  ;;  %10665 = vrcp.f32 %v14022_v35  ;;  %v17190_v60 = vld [vmem:[#allocation68_spill] sm:$0xff] }
 0x638   : > { %9672 = vmatprep.subr.bf16.mxu0 %v1624_v45  ;;  %v14219_v25 = vmul.f32 %v10654_v1, %v13907_v31  ;;  %10667 = vrcp.f32 %v14112_v52 }
 0x639   : > { %9673 = vmatpush3.bf16.msra.mxu0 %v1624_v45  ;;  %10669 = vrcp.f32 %v13961_v58 }
 0x63a   : > { %v10656_v38 = vpop.eup %10655  ;;  %10671 = vrcp.f32 %v14059_v41 }
 0x63b   : > { %v14222_v62 = vmul.f32 %v10656_v38, %v13982_v50  ;;  %v1626_v49 = vpop.permute.xlu0 %1625  ;;  %v14224_v13 = vpop.eup %10657 }
 0x63c   : > { %17166 = vst [vmem:[#allocation53_spill] sm:$0xff] %v14224_v13  ;;  %9674 = vmatprep.subr.bf16.mxu0 %v1626_v49  ;;  %v4355_v22 = vsel %vm3238_vm1, %v14224_v13, 0.0  ;;  %v14230_v11 = vpop.eup %10659 }
 0x63d   : > { %9675 = vmatpush3.bf16.msra.mxu0 %v1626_v49  ;;  %17167 = vst [vmem:[#allocation104_spill] sm:$0xff] %v14230_v11  ;;  %v4361_v31 = vsel %vm3238_vm1, %v14230_v11, 0.0  ;;  %v14234_v1 = vpop.eup %10661  ;;  %v17171_v49 = vld [vmem:[#allocation21_spill] sm:$0xff] }
 0x63e   : > { %17168 = vst [vmem:[#allocation122_spill] sm:$0xff] %v14234_v1  ;;  %v4379_v50 = vsel %vm3238_vm1, %v14234_v1, 0.0  ;;  %v17174_v11 = vld [vmem:[#allocation37_spill] sm:$0xff] }
 0x63f   : > { %v1638_v45 = vpop.permute.xlu0 %1637  ;;  %v3740_v1 = vsub.f32 %v17174_v11, %v17173_v43  ;;  %v17178_v11 = vld [vmem:[#allocation10_spill] sm:$0xff] }
 0x640   : > { %4356 = vadd.xlane.f32.xlu1 %v4355_v22  ;;  %9690 = vmatprep.subr.bf16.mxu1 %v1638_v45  ;;  %v14238_v51 = vpop.eup %10663 }
 0x641   : > { %9691 = vmatpush3.bf16.msra.mxu1 %v1638_v45  ;;  %17169 = vst [vmem:[#allocation98_spill] sm:$0xff] %v14238_v51  ;;  %v4385_v33 = vsel %vm3238_vm1, %v14238_v51, 0.0  ;;  %v3985_v0 = vmul.f32 1.442695, %v3740_v1  ;;  %v17179_v1 = vld [vmem:[#allocation23_spill] sm:$0xff] }
 0x642   : > { %v3742_v51 = vsub.f32 %v17179_v1, %v17178_v11  ;;  %v17184_v11 = vld [vmem:[#allocation71_spill] sm:$0xff]  ;;  %v17185_v1 = vld [vmem:[#allocation42_spill] sm:$0xff] }
 0x643   : > { %10673 = vpow2.f32 %v3985_v0 }
 0x644   : > { %4362 = vadd.xlane.f32.xlu1 %v4361_v31  ;;  %10675 = vrcp.f32 %v14069_v18 }
 0x645   : > { %10677 = vrcp.f32 %v14116_v47  ;;  %v3748_v47 = vsub.f32 %v17185_v1, %v17184_v11 }
 0x646   : > { %10679 = vrcp.f32 %v14194_v42  ;;  %v17186_v42 = vld [vmem:[#allocation20_spill] sm:$0xff] }
 0x647   : > { %v4001_v17 = vmul.f32 1.442695, %v3748_v47 }
 0x648   : > { %4380 = vadd.xlane.f32.xlu1 %v4379_v50  ;;  %v14240_v38 = vpop.f32.mrb[128].mxu0 }
 0x649   : > { %17170 = vst [vmem:[#allocation118_spill] sm:$0xff] %v14240_v38  ;;  %v14242_v59 = vpop.f32.mrb[129].mxu0 }
 0x64a   : > { %1653 = vrot.lane.b32.xlu0 %v17171_v49, %s10953_s19  ;;  %v14246_v45 = vpop.f32.mrb[130].mxu0 }
 0x64b   : > { %17172 = vst [vmem:[#allocation140_spill] sm:$0xff] %v14246_v45  ;;  %v14250_v39 = vpop.xlane.xlu1 %4308  ;;  %v14252_v31 = vpop.f32.mrb[131].mxu0 }
 0x64c   : > { %4386 = vadd.xlane.f32.xlu1 %v4385_v33 }
 0x64f   : > { %v14260_v13 = vpop.xlane.xlu1 %4317 }
 0x650   : > { %v14262_v24 = vpop.f32.mrb[132].mxu0 }
 0x651   : > { %17175 = vst [vmem:[#allocation49_spill] sm:$0xff] %v14262_v24  ;;  %v14265_v22 = vpop.f32.mrb[133].mxu0  ;;  %v10666_v24 = vpop.eup %10665 }
 0x652   : > { %17176 = vst [vmem:[#allocation133_spill] sm:$0xff] %v14265_v22  ;;  %v14268_v38 = vpop.f32.mrb[134].mxu0  ;;  %v10668_v35 = vpop.eup %10667 }
 0x653   : > { %17177 = vst [vmem:[#allocation62_spill] sm:$0xff] %v14268_v38  ;;  %v14273_v50 = vpop.xlane.xlu1 %4335  ;;  %v14275_v43 = vpop.f32.mrb[135].mxu0  ;;  %v3989_v38 = vmul.f32 1.442695, %v3742_v51  ;;  %v4612_v8 = vmul.f32 %v10668_v35, %v13860_v6  ;;  %v17192_v6 = vld [vmem:[#allocation136_spill] sm:$0xff] }
 0x657   : > { %v4339_v52 = vpop.xlane.xlu1 %4338 }
 0x658   : > { %v14284_v58 = vpop.f32.mrb[136].mxu0  ;;  %10681 = vrcp.f32 %v4339_v52  ;;  %v17187_v52 = vld [vmem:[#allocation131_spill] sm:$0xff] }
 0x659   : > { %17180 = vst [vmem:[#allocation121_spill] sm:$0xff] %v14284_v58  ;;  %v14287_v33 = vpop.f32.mrb[137].mxu0  ;;  %10683 = vrcp.f32 %v14136_v30  ;;  %v10670_v58 = vpop.eup %10669  ;;  %v4610_v45 = vmul.f32 %v10666_v24, %v17187_v52 }
 0x65a   : > { %17181 = vst [vmem:[#allocation94_spill] sm:$0xff] %v14287_v33  ;;  %v14289_v41 = vpop.f32.mrb[138].mxu0  ;;  %v10672_v33 = vpop.eup %10671  ;;  %v4609_v11 = vmul.f32 %v10670_v58, %v17190_v60 }
 0x65b   : > { %17182 = vst [vmem:[#allocation66_spill] sm:$0xff] %v14289_v41  ;;  %v4342_v0 = vpop.xlane.xlu1 %4341  ;;  %v14292_v18 = vpop.f32.mrb[139].mxu0  ;;  %v4611_v35 = vmul.f32 %v10672_v33, %v17192_v6 }
 0x65c   : > { %17183 = vst [vmem:[#allocation88_spill] sm:$0xff] %v14292_v18  ;;  %10685 = vrcp.f32 %v4342_v0  ;;  %v14300_v30 = vpop.eup %10673  ;;  %v17188_v18 = vld [vmem:[#allocation70_spill] sm:$0xff] }
 0x65d   : > { %1655 = vrot.lane.b32.xlu1 %v17186_v42, %s10953_s19  ;;  %10687 = vpow2.f32 %v3989_v38  ;;  %v3750_v51 = vsub.f32 %v17189_v2, %v17188_v18  ;;  %v10676_v1 = vpop.eup %10675  ;;  %v4692_v38 = vpack.c.bf16 %v4610_v45, %v4609_v11  ;;  %v4693_v60 = vpack.c.bf16 %v4612_v8, %v4611_v35 }
 0x65e   : > { %v10678_v52 = vpop.eup %10677  ;;  %10689 = vpow2.f32 %v4001_v17  ;;  %v4358_v17 = vsel %vm3238_vm1, %v14300_v30, 0.0 }
 0x65f   : > { %v1640_v41 = vpop.permute.xlu1 %1639  ;;  %v10680_v2 = vpop.eup %10679  ;;  %v4005_v47 = vmul.f32 1.442695, %v3750_v51  ;;  %v4614_v45 = vmul.f32 %v10678_v52, %v13870_v9  ;;  %v17193_v51 = vld [vmem:[#allocation90_spill] sm:$0xff] }
 0x660   : > { %9692 = vmatprep.subr.bf16.mxu1 %v1640_v41  ;;  %v14305_v0 = vpop.f32.mrb[140].mxu0  ;;  %v4613_v6 = vmul.f32 %v10676_v1, %v17193_v51 }
 0x661   : > { %17191 = vst [vmem:[#allocation109_spill] sm:$0xff] %v14305_v0  ;;  %1673 = vrot.lane.b32.xlu1 %v17132_v36, %s10954_s29  ;;  %9693 = vmatpush3.bf16.msra.mxu1 %v1640_v41  ;;  %v14309_v24 = vpop.f32.mrb[141].mxu0  ;;  %v4623_v41 = vmul.f32 %v10680_v2, %v13996_v16  ;;  %10691 = vpow2.f32 %v4005_v47  ;;  %v17197_v47 = vld [vmem:[#allocation64_spill] sm:$0xff] }
 0x662   : > { %v14312_v22 = vpop.f32.mrb[142].mxu0  ;;  %v10682_v58 = vpop.eup %10681  ;;  %v4694_v35 = vpack.c.bf16 %v4614_v45, %v4613_v6  ;;  %10693 = vrcp.f32 %v14006_v48 }
 0x663   : > { %v14314_v18 = vpop.f32.mrb[143].mxu0  ;;  %v10684_v0 = vpop.eup %10683  ;;  %v14323_v11 = vmul.f32 %v10682_v58, %v14056_v61  ;;  %10695 = vrcp.f32 %v14102_v10  ;;  %v17198_v10 = vld [vmem:[#allocation32_spill] sm:$0xff] }
 0x664   : > { %9695 = vmatmul.mubr.msk.bf16.vlgmr.msra.gmra.mrb[160].mxu1 %vm3238_vm1, %v4692_v38  ;;  %v4624_v9 = vmul.f32 %v10684_v0, %v13912_v37  ;;  %10697 = vrcp.f32 %v14002_v12  ;;  %v17194_v0 = vld [vmem:[#allocation79_spill] sm:$0xff] }
 0x665   : > { %1663 = vrot.lane.b32.xlu1 %v17142_v57, %s10952_s25  ;;  %9698 = vmatprep.mubr.msk.bf16.mxu1 %vm3238_vm1, %v4693_v60  ;;  %10699 = vrcp.f32 %v14041_v32  ;;  %v17195_v38 = vld [vmem:[#allocation83_spill] sm:$0xff] }
 0x666   : > { %v10686_v33 = vpop.eup %10685  ;;  %v17196_v2 = vpack.i.bf16 %v17194_v0, %v17195_v38  ;;  %10701 = vrcp.f32 %v14108_v40  ;;  %v17203_v0 = vld [vmem:[#allocation129_spill] sm:$0xff] }
 0x667   : > { %v14326_v8 = vmul.f32 %v10686_v33, %v14063_v54  ;;  %v14336_v61 = vpop.eup %10687  ;;  %v4699_v54 = vpack.c.bf16 %v4624_v9, %v4623_v41  ;;  %v17199_v33 = vpack.i.bf16 %v17197_v47, %v17198_v10  ;;  %10703 = vrcp.f32 %v14273_v50  ;;  %v17201_v9 = vld [vmem:[#allocation47_spill] sm:$0xff] }
 0x668   : > { %v4364_v1 = vsel %vm3238_vm1, %v14336_v61, 0.0  ;;  %v14344_v52 = vpop.eup %10689  ;;  %10705 = vrcp.f32 %v14052_v46  ;;  %v17204_v46 = vld [vmem:[#allocation50_spill] sm:$0xff] }
 0x669   : > { %1665 = vrot.lane.b32.xlu1 %v17171_v49, %s10952_s25  ;;  %4359 = vadd.xlane.f32.xlu0 %v4358_v17  ;;  %v4702_v16 = vpack.c.bf16 %v14326_v8, %v14323_v11  ;;  %v4382_v60 = vsel %vm3238_vm1, %v14344_v52, 0.0  ;;  %v17200_v17 = vpack.i.bf16 %v13852_v29, %v13840_v56  ;;  %v17205_v38 = vpack.i.bf16 %v17203_v0, %v17204_v46  ;;  %v17229_v0 = vld [vmem:[#allocation72_spill] sm:$0xff]  ;;  %v17230_v46 = vld [vmem:[#allocation99_spill] sm:$0xff] }
 0x66b   : > { %v14356_v58 = vpop.eup %10691 }
 0x66c   : > { %9699 = vmatmul.mubr.msk.bf16.gmra.mrb[164].mxu1 %vm3238_vm1, %v4694_v35  ;;  %v4388_v12 = vsel %vm3238_vm1, %v14356_v58, 0.0  ;;  %v10694_v32 = vpop.eup %10693 }
 0x66d   : > { %1667 = vrot.lane.b32.xlu1 %v17186_v42, %s10952_s25  ;;  %9726 = vmatprep.mubr.msk.bf16.mxu1 %vm3238_vm1, %v4699_v54  ;;  %v10696_v41 = vpop.eup %10695  ;;  %v4602_v35 = vmul.f32 %v10694_v32, %v17201_v9 }
 0x66e   : > { %4365 = vadd.xlane.f32.xlu0 %v4364_v1  ;;  %v10698_v51 = vpop.eup %10697  ;;  %v4604_v40 = vmul.f32 %v10696_v41, %v13833_v14  ;;  %v17202_v1 = vld [vmem:[#allocation46_spill] sm:$0xff]  ;;  %v17207_v14 = vld [vmem:[#allocation111_spill] sm:$0xff] }
 0x66f   : > { %v10700_v6 = vpop.eup %10699  ;;  %v4601_v50 = vmul.f32 %v10698_v51, %v17202_v1 }
 0x670   : > { %v4312_v37 = vpop.xlane.xlu0 %4311  ;;  %v10702_v29 = vpop.eup %10701 }
 0x671   : > { %9918 = vrot.lane.b32.xlu1 %v17196_v2, %s10954_s29  ;;  %v17206_v2 = vld [vmem:[#allocation52_spill] sm:$0xff]  ;;  %v4688_v56 = vpack.c.bf16 %v4602_v35, %v4601_v50  ;;  %v17227_v50 = vld [vmem:[#allocation9_spill] sm:$0xff] }
 0x672   : > { %4383 = vadd.xlane.f32.xlu0 %v4382_v60  ;;  %v4603_v60 = vmul.f32 %v10700_v6, %v17206_v2  ;;  %v17211_v6 = vld [vmem:[#allocation102_spill] sm:$0xff]  ;;  %v17232_v2 = vld [vmem:[#allocation51_spill] sm:$0xff] }
 0x674   : > { %v4315_v48 = vpop.xlane.xlu0 %4314  ;;  %v4689_v10 = vpack.c.bf16 %v4604_v40, %v4603_v60  ;;  %v17233_v60 = vld [vmem:[#allocation82_spill] sm:$0xff] }
 0x675   : > { %9928 = vrot.lane.b32.xlu1 %v17199_v33, %s10952_s25  ;;  %v10704_v33 = vpop.eup %10703 }
 0x676   : > { %4389 = vadd.xlane.f32.xlu0 %v4388_v12  ;;  %v17208_v12 = vld [vmem:[#allocation77_spill] sm:$0xff]  ;;  %v14394_v51 = vmul.f32 %v10704_v33, %v14045_v21  ;;  %v17212_v21 = vpack.i.bf16 %v13990_v20, %v13984_v4  ;;  %v17214_v4 = vpack.i.bf16 %v14252_v31, %v14242_v59  ;;  %v17216_v59 = vpack.c.bf16 %v14219_v25, %v14222_v62 }
 0x677   : > { %v17209_v32 = vpack.i.bf16 %v17207_v14, %v17208_v12  ;;  %v17218_v31 = vld [vmem:[#allocation133_spill] sm:$0xff]  ;;  %v17235_v14 = vld [vmem:[#allocation95_spill] sm:$0xff] }
 0x678   : > { %v4333_v45 = vpop.xlane.xlu0 %4332  ;;  %v17236_v12 = vld [vmem:[#allocation125_spill] sm:$0xff] }
 0x679   : > { %10707 = vrcp.f32 %v4333_v45  ;;  %9938 = vrot.lane.b32.xlu1 %v17200_v17, %s10953_s19  ;;  %v10706_v45 = vpop.eup %10705 }
 0x67a   : > { %10709 = vrcp.f32 %v4312_v37  ;;  %v4606_v37 = vmul.f32 %v10702_v29, %v13848_v27  ;;  %v4605_v9 = vmul.f32 %v10706_v45, %v17211_v6 }
 0x67b   : > { %10711 = vrcp.f32 %v14250_v39  ;;  %v17210_v39 = vpack.i.bf16 %v13967_v55, %v13957_v23  ;;  %v17213_v55 = vpack.c.bf16 %v14214_v26, %v14211_v3 }
 0x67c   : > { %v1628_v54 = vpop.permute.xlu0 %1627  ;;  %10713 = vrcp.f32 %v4315_v48  ;;  %v4690_v27 = vpack.c.bf16 %v4606_v37, %v4605_v9  ;;  %v17238_v37 = vld [vmem:[#allocation101_spill] sm:$0xff] }
 0x67d   : > { %9948 = vrot.lane.b32.xlu1 %v17205_v38, %s10954_s29  ;;  %9676 = vmatprep.subr.bf16.mxu0 %v1628_v54  ;;  %10715 = vrcp.f32 %v14260_v13  ;;  %v17231_v38 = vpack.i.bf16 %v17229_v0, %v17230_v46  ;;  %v17255_v46 = vld [vmem:[#allocation62_spill] sm:$0xff] }
 0x67e   : > { %9677 = vmatpush3.bf16.msra.mxu0 %v1628_v54  ;;  %v17221_v54 = vld [vmem:[#allocation65_spill] sm:$0xff] }
 0x67f   : > { %9702 = vmatprep.subr.bf16.mxu0 %v17132_v36 }
 0x680   : > { %v1650_v47 = vpop.permute.xlu0 %1649 }
 0x681   : > { %9958 = vrot.lane.b32.xlu1 %v17209_v32, %s10952_s25  ;;  %9679 = vmatmul.mubr.msk.bf16.vlgmr.msra.gmra.mrb[144].mxu0 %vm3238_vm1, %v4688_v56  ;;  %v17234_v56 = vpack.i.bf16 %v17232_v2, %v17233_v60  ;;  %v17237_v32 = vpack.i.bf16 %v17235_v14, %v17236_v12  ;;  %v17258_v60 = vld [vmem:[#allocation81_spill] sm:$0xff]  ;;  %v17260_v14 = vld [vmem:[#allocation138_spill] sm:$0xff]  ;;  %v17261_v12 = vld [vmem:[#allocation55_spill] sm:$0xff] }
 0x682   : > { %9718 = vmatprep.subr.bf16.mxu1 %v1650_v47  ;;  %9682 = vmatprep.mubr.msk.bf16.mxu0 %vm3238_vm1, %v4689_v10 }
 0x683   : > { %v10708_v41 = vpop.eup %10707  ;;  %9703 = vmatpush3.bf16.msra.mxu0 %v17132_v36  ;;  %9719 = vmatpush3.bf16.msra.mxu1 %v1650_v47 }
 0x684   : > { %9704 = vmatprep.subr.bf16.mxu0 %v17142_v57  ;;  %v14391_v17 = vmul.f32 %v10708_v41, %v14100_v19  ;;  %v10710_v23 = vpop.eup %10709 }
 0x685   : > { %9968 = vrot.lane.b32.xlu1 %v17210_v39, %s10953_s19  ;;  %v10712_v19 = vpop.eup %10711  ;;  %v4620_v20 = vmul.f32 %v10710_v23, %v14089_v53  ;;  %v17239_v39 = vld [vmem:[#allocation141_spill] sm:$0xff] }
 0x686   : > { %v4701_v35 = vpack.c.bf16 %v14394_v51, %v14391_v17  ;;  %v4619_v3 = vmul.f32 %v10712_v19, %v14031_v15  ;;  %v10714_v13 = vpop.eup %10713  ;;  %v17240_v6 = vpack.i.bf16 %v17238_v37, %v17239_v39  ;;  %v17241_v19 = vld [vmem:[#allocation84_spill] sm:$0xff]  ;;  %v17263_v37 = vld [vmem:[#allocation17_spill] sm:$0xff] }
 0x687   : > { %9705 = vmatpush3.bf16.msra.mxu0 %v17142_v57  ;;  %v10716_v53 = vpop.eup %10715  ;;  %v4621_v15 = vmul.f32 %v10714_v13, %v14096_v7  ;;  %v17220_v7 = vld [vmem:[#allocation78_spill] sm:$0xff] }
 0x688   : > { %9706 = vmatprep.subr.bf16.mxu0 %v17171_v49  ;;  %v4697_v48 = vpack.c.bf16 %v4620_v20, %v4619_v3  ;;  %v17222_v40 = vpack.i.bf16 %v17220_v7, %v17221_v54  ;;  %v17250_v7 = vld [vmem:[#allocation58_spill] sm:$0xff] }
 0x689   : > { %9978 = vrot.lane.b32.xlu1 %v17212_v21, %s10954_s29  ;;  %9683 = vmatmul.mubr.msk.bf16.gmra.mrb[148].mxu0 %vm3238_vm1, %v4690_v27 }
 0x68a   : > { %9710 = vmatprep.mubr.msk.bf16.mxu0 %vm3238_vm1, %v17213_v55 }
 0x68b   : > { %9707 = vmatpush3.bf16.msra.mxu0 %v17171_v49 }
 0x68c   : > { %1661 = vrot.lane.b32.xlu0 %v17132_v36, %s10952_s25  ;;  %9708 = vmatprep.subr.bf16.mxu0 %v17186_v42  ;;  %v17215_v36 = vpack.i.bf16 %v14182_v34, %v14174_v44  ;;  %v17217_v44 = vpack.i.bf16 %v14024_v28, %v14014_v63  ;;  %v4622_v34 = vmul.f32 %v10716_v53, %v14037_v5  ;;  %v17223_v28 = vld [vmem:[#allocation97_spill] sm:$0xff] }
 0x68d   : > { %9988 = vrot.lane.b32.xlu1 %v17214_v4, %s10952_s25  ;;  %v17224_v5 = vld [vmem:[#allocation137_spill] sm:$0xff]  ;;  %v17242_v4 = vld [vmem:[#allocation38_spill] sm:$0xff] }
 0x68e   : > { %v4698_v25 = vpack.c.bf16 %v4622_v34, %v4621_v15  ;;  %v17225_v1 = vpack.i.bf16 %v17223_v28, %v17224_v5  ;;  %v17243_v20 = vpack.i.bf16 %v17241_v19, %v17242_v4  ;;  %v17247_v34 = vld [vmem:[#allocation132_spill] sm:$0xff] }
 0x68f   : > { %9709 = vmatpush3.bf16.msra.mxu0 %v17186_v42  ;;  %v17252_v5 = vld [vmem:[#allocation80_spill] sm:$0xff] }
 0x690   : > { %1675 = vrot.lane.b32.xlu0 %v17142_v57, %s10954_s29  ;;  %v4348_v26 = vpop.xlane.xlu1 %4347 }
 0x691   : > { %9998 = vrot.lane.b32.xlu1 %v17215_v36, %s10953_s19  ;;  %10717 = vrcp.f32 %v4348_v26  ;;  %v17244_v36 = vld [vmem:[#allocation140_spill] sm:$0xff] }
 0x692   : > { %9711 = vmatmul.mubr.msk.bf16.vlgmr.msra.gmra.mrb[152].mxu0 %vm3238_vm1, %v17216_v59 }
 0x693   : > { %9714 = vmatprep.mubr.msk.bf16.mxu0 %vm3238_vm1, %v4697_v48  ;;  %v17245_v48 = vld [vmem:[#allocation118_spill] sm:$0xff] }
 0x694   : > { %1677 = vrot.lane.b32.xlu0 %v17171_v49, %s10954_s29  ;;  %v14439_v57 = vpop.xlane.xlu1 %4368  ;;  %v17219_v49 = vpack.i.bf16 %v14275_v43, %v17218_v31  ;;  %v17246_v59 = vpack.i.bf16 %v17244_v36, %v17245_v48 }
 0x695   : > { %10008 = vrot.lane.b32.xlu1 %v17217_v44, %s10954_s29 }
 0x698   : > { %1679 = vrot.lane.b32.xlu0 %v17186_v42, %s10954_s29  ;;  %v4375_v62 = vpop.xlane.xlu1 %4374  ;;  %v17226_v42 = vld [vmem:[#allocation69_spill] sm:$0xff] }
 0x699   : > { %10018 = vrot.lane.b32.xlu1 %v17219_v49, %s10952_s25  ;;  %v17228_v43 = vpack.i.bf16 %v17226_v42, %v17227_v50 }
 0x69a   : > { %9715 = vmatmul.mubr.msk.bf16.gmra.mrb[156].mxu0 %vm3238_vm1, %v4698_v25  ;;  %v17248_v25 = vld [vmem:[#allocation16_spill] sm:$0xff] }
 0x69b   : > { %v10718_v15 = vpop.eup %10717  ;;  %v17249_v31 = vpack.i.bf16 %v17247_v34, %v17248_v25 }
 0x69c   : > { %9923 = vrot.lane.b32.xlu0 %v17222_v40, %s10954_s29  ;;  %v1652_v63 = vpop.permute.xlu1 %1651  ;;  %v17251_v40 = vld [vmem:[#allocation115_spill] sm:$0xff] }
 0x69d   : > { %10028 = vrot.lane.b32.xlu1 %v17225_v1, %s10953_s19  ;;  %9720 = vmatprep.subr.bf16.mxu1 %v1652_v63  ;;  %v17253_v1 = vld [vmem:[#allocation128_spill] sm:$0xff] }
 0x69e   : > { %9721 = vmatpush3.bf16.msra.mxu1 %v1652_v63  ;;  %v4632_v63 = vmul.f32 %v10718_v15, %v17251_v40  ;;  %v17254_v42 = vpack.i.bf16 %v17252_v5, %v17253_v1  ;;  %v17266_v15 = vld [vmem:[#allocation85_spill] sm:$0xff] }
 0x6a0   : > { %9933 = vrot.lane.b32.xlu0 %v17228_v43, %s10952_s25 }
 0x6a4   : > { %9943 = vrot.lane.b32.xlu0 %v17231_v38, %s10953_s19  ;;  %v17256_v38 = vld [vmem:[#allocation49_spill] sm:$0xff] }
 0x6a5   : > { %v17257_v2 = vpack.i.bf16 %v17255_v46, %v17256_v38  ;;  %v17271_v46 = vld [vmem:[#allocation39_spill] sm:$0xff] }
 0x6a8   : > { %9953 = vrot.lane.b32.xlu0 %v17234_v56, %s10954_s29 }
 0x6a9   : > { %v9664_v29 = vpop.f32.mrb[152].mxu1 }
 0x6aa   : > { %v5450_v47 = vpop.f32.mrb[153].mxu1 }
 0x6ab   : > { %v9665_v10 = vpop.f32.mrb[154].mxu1 }
 0x6ac   : > { %v10042_v33 = vpack.i.bf16 %v9665_v10, %v9664_v29  ;;  %9963 = vrot.lane.b32.xlu0 %v17237_v32, %s10952_s25  ;;  %v5453_v45 = vpop.f32.mrb[155].mxu1  ;;  %v17262_v32 = vpack.i.bf16 %v17260_v14, %v17261_v12 }
 0x6ad   : > { %v10037_v41 = vpack.i.bf16 %v5453_v45, %v5450_v47 }
 0x6af   : > { %10038 = vrot.lane.b32.xlu1 %v10037_v41, %s10954_s29 }
 0x6b0   : > { %9973 = vrot.lane.b32.xlu0 %v17240_v6, %s10953_s19  ;;  %v17264_v6 = vld [vmem:[#allocation139_spill] sm:$0xff] }
 0x6b1   : > { %v14483_v9 = vpop.f32.mrb[156].mxu1  ;;  %v4345_v27 = vpop.xlane.xlu0 %4344 }
 0x6b2   : > { %10719 = vrcp.f32 %v4345_v27  ;;  %v14485_v21 = vpop.f32.mrb[157].mxu1 }
 0x6b3   : > { %v14487_v23 = vpop.f32.mrb[158].mxu1 }
 0x6b4   : > { %v10072_v55 = vpack.i.bf16 %v14487_v23, %v14483_v9  ;;  %9983 = vrot.lane.b32.xlu0 %v17243_v20, %s10954_s29  ;;  %v14495_v3 = vpop.f32.mrb[159].mxu1 }
 0x6b5   : > { %v10067_v26 = vpack.i.bf16 %v14495_v3, %v14485_v21  ;;  %v4351_v13 = vpop.xlane.xlu0 %4350 }
 0x6b6   : > { %10721 = vrcp.f32 %v4351_v13 }
 0x6b8   : > { %9993 = vrot.lane.b32.xlu0 %v17246_v59, %s10952_s25 }
 0x6b9   : > { %v4354_v53 = vpop.xlane.xlu0 %4353 }
 0x6ba   : > { %10723 = vrcp.f32 %v4354_v53  ;;  %v17265_v53 = vld [vmem:[#allocation48_spill] sm:$0xff] }
 0x6bb   : > { %10725 = vrcp.f32 %v4375_v62  ;;  %v17259_v62 = vld [vmem:[#allocation120_spill] sm:$0xff] }
 0x6bc   : > { %v10720_v44 = vpop.eup %10719  ;;  %10003 = vrot.lane.b32.xlu0 %v17249_v31, %s10953_s19 }
 0x6bd   : > { %v4372_v49 = vpop.xlane.xlu0 %4371  ;;  %v4631_v54 = vmul.f32 %v10720_v44, %v17250_v7  ;;  %v17267_v44 = vpack.c.bf16 %v17265_v53, %v17266_v15 }
 0x6bf   : > { %v4703_v28 = vpack.c.bf16 %v4632_v63, %v4631_v54 }
 0x6c0   : > { %10013 = vrot.lane.b32.xlu0 %v17254_v42, %s10954_s29  ;;  %v10722_v43 = vpop.eup %10721 }
 0x6c1   : > { %v4378_v50 = vpop.xlane.xlu0 %4377  ;;  %9742 = vmatprep.mubr.msk.bf16.mxu0 %vm3238_vm1, %v4703_v28  ;;  %v14519_v56 = vmul.f32 %v10722_v43, %v17258_v60  ;;  %v17270_v43 = vld [vmem:[#allocation105_spill] sm:$0xff] }
 0x6c2   : > { %10727 = vrcp.f32 %v4378_v50 }
 0x6c3   : > { %10729 = vrcp.f32 %v4372_v49  ;;  %v17269_v49 = vld [vmem:[#allocation110_spill] sm:$0xff] }
 0x6c4   : > { %v10724_v0 = vpop.eup %10723  ;;  %10023 = vrot.lane.b32.xlu0 %v17257_v2, %s10952_s25  ;;  %10731 = vrcp.f32 %v14439_v57  ;;  %v17268_v57 = vld [vmem:[#allocation119_spill] sm:$0xff] }
 0x6c5   : > { %v14522_v29 = vmul.f32 %v10724_v0, %v17259_v62  ;;  %v1654_v47 = vpop.permute.xlu0 %1653  ;;  %v10726_v45 = vpop.eup %10725 }
 0x6c6   : > { %9722 = vmatprep.subr.bf16.mxu1 %v1654_v47  ;;  %v14532_v39 = vmul.f32 %v10726_v45, %v17263_v37 }
 0x6c7   : > { %v4704_v10 = vpack.c.bf16 %v14522_v29, %v14519_v56  ;;  %9723 = vmatpush3.bf16.msra.mxu1 %v1654_v47  ;;  %v17278_v56 = vld [vmem:[#allocation104_spill] sm:$0xff] }
 0x6c8   : > { %10033 = vrot.lane.b32.xlu0 %v17262_v32, %s10953_s19 }
 0x6cc   : > { %v10728_v41 = vpop.eup %10727  ;;  %10043 = vrot.lane.b32.xlu0 %v10042_v33, %s10954_s29 }
 0x6cd   : > { %v14535_v27 = vmul.f32 %v10728_v41, %v17264_v6  ;;  %v4357_v19 = vpop.xlane.xlu1 %4356  ;;  %v10730_v59 = vpop.eup %10729 }
 0x6ce   : > { %v10732_v34 = vpop.eup %10731  ;;  %v4640_v31 = vmul.f32 %v10730_v59, %v17268_v57  ;;  %v17272_v59 = vld [vmem:[#allocation75_spill] sm:$0xff] }
 0x6cf   : > { %v4708_v4 = vpack.c.bf16 %v14535_v27, %v14532_v39  ;;  %v4639_v7 = vmul.f32 %v10732_v34, %v17269_v49 }
 0x6d1   : > { %v14539_v20 = vpop.xlane.xlu1 %4362  ;;  %v4707_v40 = vpack.c.bf16 %v4640_v31, %v4639_v7 }
 0x6d5   : > { %v4381_v13 = vpop.xlane.xlu1 %4380 }
 0x6d9   : > { %v14541_v36 = vpop.xlane.xlu1 %4386 }
 0x6dd   : > { %v1656_v48 = vpop.permute.xlu1 %1655 }
 0x6de   : > { %9724 = vmatprep.subr.bf16.mxu1 %v1656_v48 }
 0x6df   : > { %9725 = vmatpush3.bf16.msra.mxu1 %v1656_v48 }
 0x6e1   : > { %v1674_v33 = vpop.permute.xlu1 %1673 }
 0x6e2   : > { %9727 = vmatmul.mubr.msk.bf16.vlgmr.msra.gmra.mrb[168].mxu1 %vm3238_vm1, %v17267_v44  ;;  %9750 = vmatprep.subr.bf16.mxu1 %v1674_v33  ;;  %v17273_v44 = vld [vmem:[#allocation114_spill] sm:$0xff] }
 0x6e3   : > { %9730 = vmatprep.mubr.msk.bf16.mxu1 %vm3238_vm1, %v4701_v35  ;;  %9751 = vmatpush3.bf16.msra.mxu1 %v1674_v33 }
 0x6e5   : > { %v1664_v25 = vpop.permute.xlu1 %1663 }
 0x6e9   : > { %v14554_v54 = vpop.permute.xlu1 %1665 }
 0x6ea   : > { %9731 = vmatmul.mubr.msk.bf16.gmra.mrb[172].mxu1 %vm3238_vm1, %v4702_v16 }
 0x6eb   : > { %9758 = vmatprep.mubr.msk.bf16.mxu1 %vm3238_vm1, %v4707_v40 }
 0x6ed   : > { %v14561_v17 = vpop.permute.xlu1 %1667 }
 0x6f1   : > { %v9919_v51 = vpop.permute.xlu1 %9918 }
 0x6f2   : > { %v9921_v63 = vunpack.i.h.bf16 %v9919_v51  ;;  %v9920_v28 = vunpack.i.l.bf16 %v9919_v51 }
 0x6f4   : > { %v6040_v0 = vsel %vm1685_vm0, %v17270_v43, %v9921_v63  ;;  %v6039_v11 = vsel %vm1685_vm0, %v17271_v46, %v9920_v28 }
 0x6f5   : > { %v9929_v35 = vpop.permute.xlu1 %9928 }
 0x6f6   : > { %v4360_v5 = vpop.xlane.xlu0 %4359  ;;  %v9931_v1 = vunpack.i.h.bf16 %v9929_v35  ;;  %v9930_v42 = vunpack.i.l.bf16 %v9929_v35 }
 0x6f7   : > { %10733 = vrcp.f32 %v4360_v5 }
 0x6f8   : > { %v6047_v38 = vsel %vm3238_vm1, %v6039_v11, %v9930_v42  ;;  %v6048_v2 = vsel %vm3238_vm1, %v6040_v0, %v9931_v1 }
 0x6f9   : > { %v9939_v50 = vpop.permute.xlu1 %9938 }
 0x6fa   : > { %v9941_v8 = vunpack.i.h.bf16 %v9939_v50  ;;  %v9940_v16 = vunpack.i.l.bf16 %v9939_v50 }
 0x6fb   : > { %v4366_v60 = vpop.xlane.xlu0 %4365 }
 0x6fc   : > { %v14570_v62 = vsel %vm6055_vm2, %v6047_v38, %v9940_v16  ;;  %v14573_v47 = vsel %vm6055_vm2, %v6048_v2, %v9941_v8  ;;  %v17275_v16 = vld [vmem:[#allocation15_spill] sm:$0xff] }
 0x6fd   : > { %v9949_v14 = vpop.permute.xlu1 %9948  ;;  %v6424_v12 = vpack.c.bf16 %v14573_v47, %v14570_v62  ;;  %v10194_v62 = vld [vmem:[%s11048_s16 + $0x28] sm:$0xff]  }
 0x6fe   : > { %v9951_v45 = vunpack.i.h.bf16 %v9949_v14  ;;  %v9950_v37 = vunpack.i.l.bf16 %v9949_v14  ;;  %v10189_v14 = vld [vmem:[%s11048_s16] sm:$0xff]  }
 0x6ff   : > { %v4384_v32 = vpop.xlane.xlu0 %4383 }
 0x700   : > { %v6044_v53 = vsel %vm1685_vm0, %v17272_v59, %v9951_v45  ;;  %v6043_v34 = vsel %vm1685_vm0, %v17273_v44, %v9950_v37  ;;  %10735 = vrcp.f32 %v4384_v32 }
 0x701   : > { %v9959_v41 = vpop.permute.xlu1 %9958  ;;  %10737 = vrcp.f32 %v4357_v19  ;;  %v10734_v42 = vpop.eup %10733 }
 0x702   : > { %v9961_v6 = vunpack.i.h.bf16 %v9959_v41  ;;  %v9960_v48 = vunpack.i.l.bf16 %v9959_v41  ;;  %10739 = vrcp.f32 %v4381_v13 }
 0x703   : > { %v4390_v33 = vpop.xlane.xlu0 %4389  ;;  %10741 = vrcp.f32 %v14539_v20 }
 0x704   : > { %v6051_v49 = vsel %vm3238_vm1, %v6043_v34, %v9960_v48  ;;  %v6052_v7 = vsel %vm3238_vm1, %v6044_v53, %v9961_v6  ;;  %10743 = vrcp.f32 %v4366_v60  ;;  %v17277_v34 = vld [vmem:[#allocation122_spill] sm:$0xff] }
 0x705   : > { %v9969_v15 = vpop.permute.xlu1 %9968  ;;  %10745 = vrcp.f32 %v4390_v33 }
 0x706   : > { %v9971_v57 = vunpack.i.h.bf16 %v9969_v15  ;;  %v9970_v31 = vunpack.i.l.bf16 %v9969_v15  ;;  %10747 = vrcp.f32 %v14541_v36  ;;  %v17276_v15 = vld [vmem:[#allocation53_spill] sm:$0xff] }
 0x707   : > { %v1662_v40 = vpop.permute.xlu0 %1661 }
 0x708   : > { %9734 = vmatprep.subr.bf16.mxu0 %v1662_v40  ;;  %v14584_v51 = vsel %vm6055_vm2, %v6051_v49, %v9970_v31  ;;  %v14587_v35 = vsel %vm6055_vm2, %v6052_v7, %v9971_v57 }
 0x709   : > { %9735 = vmatpush3.bf16.msra.mxu0 %v1662_v40  ;;  %v9979_v63 = vpop.permute.xlu1 %9978  ;;  %v6426_v28 = vpack.c.bf16 %v14587_v35, %v14584_v51 }
 0x70a   : > { %9736 = vmatprep.subr.bf16.mxu0 %v1664_v25  ;;  %v9981_v5 = vunpack.i.h.bf16 %v9979_v63  ;;  %v9980_v1 = vunpack.i.l.bf16 %v9979_v63  ;;  %v10736_v20 = vpop.eup %10735  ;;  %v10190_v63 = vld [vmem:[%s11048_s16 + $0x8] sm:$0xff]  }
 0x70b   : > { %v1676_v19 = vpop.permute.xlu0 %1675  ;;  %v10738_v46 = vpop.eup %10737  ;;  %v4644_v37 = vmul.f32 %v10736_v20, %v14344_v52 }
 0x70c   : > { %9752 = vmatprep.subr.bf16.mxu1 %v1676_v19  ;;  %v10740_v36 = vpop.eup %10739  ;;  %v6160_v38 = vsel %vm1685_vm0, %v17275_v16, %v9980_v1  ;;  %v4635_v44 = vmul.f32 %v10738_v46, %v17276_v15 }
 0x70d   : > { %9737 = vmatpush3.bf16.msra.mxu0 %v1664_v25  ;;  %9753 = vmatpush3.bf16.msra.mxu1 %v1676_v19  ;;  %v9989_v13 = vpop.permute.xlu1 %9988  ;;  %v17274_v25 = vld [vmem:[#allocation76_spill] sm:$0xff]  ;;  %v10742_v6 = vpop.eup %10741 }
 0x70e   : > { %9738 = vmatprep.subr.bf16.mxu0 %v14554_v54  ;;  %v9991_v50 = vunpack.i.h.bf16 %v9989_v13  ;;  %v9990_v43 = vunpack.i.l.bf16 %v9989_v13  ;;  %v6161_v8 = vsel %vm1685_vm0, %v17274_v25, %v9981_v5  ;;  %v10744_v59 = vpop.eup %10743  ;;  %v4637_v29 = vmul.f32 %v10742_v6, %v17278_v56  ;;  %v10192_v6 = vld [vmem:[%s11048_s16 + $0x18] sm:$0xff]   ;;  %v10195_v56 = vld [vmem:[%s11048_s16 + $0x30] sm:$0xff]  }
 0x70f   : > { %v1678_v0 = vpop.permute.xlu0 %1677  ;;  %v10746_v57 = vpop.eup %10745  ;;  %v4638_v19 = vmul.f32 %v10744_v59, %v14336_v61 }
 0x710   : > { %9754 = vmatprep.subr.bf16.mxu1 %v1678_v0  ;;  %v6168_v32 = vsel %vm3238_vm1, %v6160_v38, %v9990_v43  ;;  %v6169_v45 = vsel %vm3238_vm1, %v6161_v8, %v9991_v50  ;;  %v10748_v31 = vpop.eup %10747  ;;  %v4646_v13 = vmul.f32 %v10746_v57, %v14356_v58  ;;  %v17281_v8 = vld [vmem:[#allocation73_spill] sm:$0xff] }
 0x711   : > { %9739 = vmatpush3.bf16.msra.mxu0 %v14554_v54  ;;  %9755 = vmatpush3.bf16.msra.mxu1 %v1678_v0  ;;  %v9999_v11 = vpop.permute.xlu1 %9998  ;;  %v4636_v54 = vmul.f32 %v10734_v42, %v14300_v30  ;;  %v4643_v30 = vmul.f32 %v10740_v36, %v17277_v34  ;;  %v10191_v0 = vld [vmem:[%s11048_s16 + $0x10] sm:$0xff]   ;;  %v17280_v36 = vld [vmem:[#allocation14_spill] sm:$0xff] }
 0x712   : > { %v10001_v2 = vunpack.i.h.bf16 %v9999_v11  ;;  %v10000_v60 = vunpack.i.l.bf16 %v9999_v11  ;;  %9740 = vmatprep.subr.bf16.mxu0 %v14561_v17  ;;  %v4706_v11 = vpack.c.bf16 %v4638_v19, %v4637_v29  ;;  %v17285_v29 = vld [vmem:[#allocation108_spill] sm:$0xff] }
 0x713   : > { %v1680_v41 = vpop.permute.xlu0 %1679  ;;  %v4705_v7 = vpack.c.bf16 %v4636_v54, %v4635_v44  ;;  %v4709_v40 = vpack.c.bf16 %v4644_v37, %v4643_v30 }
 0x714   : > { %9756 = vmatprep.subr.bf16.mxu1 %v1680_v41  ;;  %v14606_v48 = vsel %vm6055_vm2, %v6168_v32, %v10000_v60  ;;  %v14609_v33 = vsel %vm6055_vm2, %v6169_v45, %v10001_v2  ;;  %v17282_v60 = vld [vmem:[#allocation112_spill] sm:$0xff]  ;;  %v17283_v32 = vld [vmem:[#allocation67_spill] sm:$0xff] }
 0x715   : > { %9741 = vmatpush3.bf16.msra.mxu0 %v14561_v17  ;;  %9757 = vmatpush3.bf16.msra.mxu1 %v1680_v41  ;;  %v10009_v53 = vpop.permute.xlu1 %10008  ;;  %v6428_v52 = vpack.c.bf16 %v14609_v33, %v14606_v48 }
 0x716   : > { %9766 = vmatprep.subr.bf16.mxu0 %v10189_v14  ;;  %v10011_v5 = vunpack.i.h.bf16 %v10009_v53  ;;  %v10010_v1 = vunpack.i.l.bf16 %v10009_v53 }
 0x717   : > { %v9924_v49 = vpop.permute.xlu0 %9923 }
 0x718   : > { %9743 = vmatmul.mubr.msk.bf16.vlgmr.msra.gmra.mrb[160].mxu0 %vm3238_vm1, %v4704_v10  ;;  %9759 = vmatmul.mubr.msk.bf16.vlgmr.msra.gmra.mrb[176].mxu1 %vm3238_vm1, %v4708_v4  ;;  %v17279_v10 = vld [vmem:[#allocation98_spill] sm:$0xff]  ;;  %v9926_v39 = vunpack.i.h.bf16 %v9924_v49  ;;  %v9925_v27 = vunpack.i.l.bf16 %v9924_v49  ;;  %v6165_v25 = vsel %vm1685_vm0, %v17280_v36, %v10011_v5  ;;  %v6164_v16 = vsel %vm1685_vm0, %v17281_v8, %v10010_v1 }
 0x719   : > { %9746 = vmatprep.mubr.msk.bf16.mxu0 %vm3238_vm1, %v4705_v7  ;;  %9762 = vmatprep.mubr.msk.bf16.mxu1 %vm3238_vm1, %v4709_v40  ;;  %v10019_v17 = vpop.permute.xlu1 %10018  ;;  %v4645_v42 = vmul.f32 %v10748_v31, %v17279_v10  ;;  %v17284_v31 = vmov 0  }
 0x71a   : > { %9767 = vmatpush3.bf16.msra.mxu0 %v10189_v14  ;;  %v10021_v4 = vunpack.i.h.bf16 %v10019_v17  ;;  %v10020_v50 = vunpack.i.l.bf16 %v10019_v17  ;;  %v6042_v14 = vsel %vm1685_vm0, %v17282_v60, %v9926_v39  ;;  %v6041_v45 = vsel %vm1685_vm0, %v17283_v32, %v9925_v27  ;;  %v10193_v17 = vld [vmem:[%s11048_s16 + $0x20] sm:$0xff]   ;;  %v17287_v60 = vld [vmem:[#allocation24_spill] sm:$0xff] }
 0x71b   : > { %v9934_v43 = vpop.permute.xlu0 %9933  ;;  %9768 = vmatprep.subr.bf16.mxu0 %v10190_v63  ;;  %v4710_v58 = vpack.c.bf16 %v4646_v13, %v4645_v42  ;;  %v17286_v42 = vld [vmem:[#allocation60_spill] sm:$0xff]  ;;  %v17288_v32 = vld [vmem:[#allocation135_spill] sm:$0xff] }
 0x71c   : > { %v9936_v20 = vunpack.i.h.bf16 %v9934_v43  ;;  %v9935_v46 = vunpack.i.l.bf16 %v9934_v43  ;;  %v6172_v41 = vsel %vm3238_vm1, %v6164_v16, %v10020_v50  ;;  %v6173_v54 = vsel %vm3238_vm1, %v6165_v25, %v10021_v4 }
 0x71d   : > { %v10029_v61 = vpop.permute.xlu1 %10028 }
 0x71e   : > { %9769 = vmatpush3.bf16.msra.mxu0 %v10190_v63  ;;  %v10031_v38 = vunpack.i.h.bf16 %v10029_v61  ;;  %v10030_v2 = vunpack.i.l.bf16 %v10029_v61  ;;  %v6049_v34 = vsel %vm3238_vm1, %v6041_v45, %v9935_v46  ;;  %v6050_v30 = vsel %vm3238_vm1, %v6042_v14, %v9936_v20  ;;  %v10196_v61 = vld [vmem:[%s11048_s16 + $0x38] sm:$0xff]  }
 0x71f   : > { %v9944_v37 = vpop.permute.xlu0 %9943  ;;  %9770 = vmatprep.subr.bf16.mxu0 %v10191_v0 }
 0x720   : > { %v9946_v59 = vunpack.i.h.bf16 %v9944_v37  ;;  %v9945_v53 = vunpack.i.l.bf16 %v9944_v37  ;;  %9747 = vmatmul.mubr.msk.bf16.gmra.mrb[164].mxu0 %vm3238_vm1, %v4706_v11  ;;  %9763 = vmatmul.mubr.msk.bf16.gmra.mrb[180].mxu1 %vm3238_vm1, %v4710_v58  ;;  %v14646_v15 = vsel %vm6055_vm2, %v6172_v41, %v10030_v2  ;;  %v14649_v44 = vsel %vm6055_vm2, %v6173_v54, %v10031_v38 }
 0x721   : > { %9782 = vmatprep.mubr.bf16.mxu0 %v6424_v12  ;;  %v6430_v57 = vpack.c.bf16 %v14649_v44, %v14646_v15  ;;  %7054 = vmatprep.mubr.bf16.mxu1 %v17284_v31 }
 0x722   : > { %v6058_v49 = vsel %vm6055_vm2, %v6049_v34, %v9945_v53  ;;  %v6059_v7 = vsel %vm6055_vm2, %v6050_v30, %v9946_v59  ;;  %9771 = vmatpush3.bf16.msra.mxu0 %v10191_v0 }
 0x723   : > { %v6425_v40 = vpack.c.bf16 %v6059_v7, %v6058_v49  ;;  %v9954_v63 = vpop.permute.xlu0 %9953  ;;  %9772 = vmatprep.subr.bf16.mxu0 %v10192_v6 }
 0x724   : > { %v9956_v47 = vunpack.i.h.bf16 %v9954_v63  ;;  %v9955_v12 = vunpack.i.l.bf16 %v9954_v63 }
 0x726   : > { %9773 = vmatpush3.bf16.msra.mxu0 %v10192_v6  ;;  %v6046_v10 = vsel %vm1685_vm0, %v17285_v29, %v9956_v47  ;;  %v6045_v39 = vsel %vm1685_vm0, %v17286_v42, %v9955_v12 }
 0x727   : > { %v9964_v19 = vpop.permute.xlu0 %9963  ;;  %9774 = vmatprep.subr.bf16.mxu0 %v10193_v17 }
 0x728   : > { %v9966_v13 = vunpack.i.h.bf16 %v9964_v19  ;;  %v9965_v5 = vunpack.i.l.bf16 %v9964_v19 }
 0x72a   : > { %9775 = vmatpush3.bf16.msra.mxu0 %v10193_v17  ;;  %v6053_v50 = vsel %vm3238_vm1, %v6045_v39, %v9965_v5  ;;  %v6054_v43 = vsel %vm3238_vm1, %v6046_v10, %v9966_v13  ;;  %v17289_v10 = vld [vmem:[#allocation106_spill] sm:$0xff]  ;;  %v17290_v39 = vld [vmem:[#allocation25_spill] sm:$0xff] }
 0x72b   : > { %v9974_v1 = vpop.permute.xlu0 %9973  ;;  %9776 = vmatprep.subr.bf16.mxu0 %v10194_v62 }
 0x72c   : > { %v9976_v27 = vunpack.i.h.bf16 %v9974_v1  ;;  %v9975_v4 = vunpack.i.l.bf16 %v9974_v1 }
 0x72e   : > { %9777 = vmatpush3.bf16.msra.mxu0 %v10194_v62  ;;  %v6062_v0 = vsel %vm6055_vm2, %v6053_v50, %v9975_v4  ;;  %v6063_v20 = vsel %vm6055_vm2, %v6054_v43, %v9976_v27 }
 0x72f   : > { %v9984_v46 = vpop.permute.xlu0 %9983  ;;  %9778 = vmatprep.subr.bf16.mxu0 %v10195_v56  ;;  %v6427_v11 = vpack.c.bf16 %v6063_v20, %v6062_v0 }
 0x730   : > { %v9986_v36 = vunpack.i.h.bf16 %v9984_v46  ;;  %v9985_v25 = vunpack.i.l.bf16 %v9984_v46 }
 0x732   : > { %9779 = vmatpush3.bf16.msra.mxu0 %v10195_v56  ;;  %v6163_v14 = vsel %vm1685_vm0, %v17287_v60, %v9986_v36  ;;  %v6162_v45 = vsel %vm1685_vm0, %v17288_v32, %v9985_v25 }
 0x733   : > { %v9994_v58 = vpop.permute.xlu0 %9993  ;;  %9780 = vmatprep.subr.bf16.mxu0 %v10196_v61 }
 0x734   : > { %v9996_v8 = vunpack.i.h.bf16 %v9994_v58  ;;  %v9995_v16 = vunpack.i.l.bf16 %v9994_v58 }
 0x736   : > { %9781 = vmatpush3.bf16.msra.mxu0 %v10196_v61  ;;  %v6170_v6 = vsel %vm3238_vm1, %v6162_v45, %v9995_v16  ;;  %v6171_v59 = vsel %vm3238_vm1, %v6163_v14, %v9996_v8 }
 0x737   : > { %v10004_v38 = vpop.permute.xlu0 %10003  ;;  %v9696_v2 = vpop.f32.mrb[160].mxu1 }
 0x738   : > { %v10006_v41 = vunpack.i.h.bf16 %v10004_v38  ;;  %v10005_v54 = vunpack.i.l.bf16 %v10004_v38  ;;  %v5604_v37 = vpop.f32.mrb[161].mxu1 }
 0x739   : > { %9783 = vmatmul.mubr.bf16.vlgmr.msra.gmra.mrb[168].mxu0 %v6425_v40  ;;  %v9697_v53 = vpop.f32.mrb[162].mxu1 }
 0x73a   : > { %v10062_v34 = vpack.i.bf16 %v9697_v53, %v9696_v2  ;;  %9786 = vmatprep.mubr.bf16.mxu0 %v6426_v28  ;;  %v5607_v30 = vpop.f32.mrb[163].mxu1  ;;  %v6178_v49 = vsel %vm6055_vm2, %v6170_v6, %v10005_v54  ;;  %v6179_v7 = vsel %vm6055_vm2, %v6171_v59, %v10006_v41 }
 0x73b   : > { %v10057_v63 = vpack.i.bf16 %v5607_v30, %v5604_v37  ;;  %v10014_v17 = vpop.permute.xlu0 %10013  ;;  %v6429_v19 = vpack.c.bf16 %v6179_v7, %v6178_v49  ;;  %v10039_v7 = vpop.permute.xlu1 %10038 }
 0x73c   : > { %v10016_v12 = vunpack.i.h.bf16 %v10014_v17  ;;  %v10015_v13 = vunpack.i.l.bf16 %v10014_v17  ;;  %v10040_v17 = vunpack.i.l.bf16 %v10039_v7 }
 0x73e   : > { %v6167_v42 = vsel %vm1685_vm0, %v17289_v10, %v10016_v12  ;;  %v6166_v27 = vsel %vm1685_vm0, %v17290_v39, %v10015_v13  ;;  %v17293_v10 = vld [vmem:[#allocation66_spill] sm:$0xff]  ;;  %v17294_v39 = vld [vmem:[#allocation121_spill] sm:$0xff] }
 0x73f   : > { %v10024_v62 = vpop.permute.xlu0 %10023  ;;  %v9700_v47 = vpop.f32.mrb[164].mxu1 }
 0x740   : > { %v5620_v5 = vpop.f32.mrb[165].mxu1  ;;  %v10026_v40 = vunpack.i.h.bf16 %v10024_v62  ;;  %v10025_v1 = vunpack.i.l.bf16 %v10024_v62 }
 0x741   : > { %9787 = vmatmul.mubr.bf16.gmra.mrb[172].mxu0 %v6427_v11  ;;  %v9701_v56 = vpop.f32.mrb[166].mxu1 }
 0x742   : > { %v10092_v29 = vpack.i.bf16 %v9701_v56, %v9700_v47  ;;  %9790 = vmatprep.mubr.bf16.mxu0 %v6428_v52  ;;  %v5623_v51 = vpop.f32.mrb[167].mxu1  ;;  %v6174_v43 = vsel %vm3238_vm1, %v6166_v27, %v10025_v1  ;;  %v6175_v0 = vsel %vm3238_vm1, %v6167_v42, %v10026_v40  ;;  %v17291_v56 = vld [vmem:[#allocation88_spill] sm:$0xff] }
 0x743   : > { %v10087_v35 = vpack.i.bf16 %v5623_v51, %v5620_v5  ;;  %v10034_v28 = vpop.permute.xlu0 %10033  ;;  %v17292_v51 = vld [vmem:[#allocation94_spill] sm:$0xff] }
 0x744   : > { %v10036_v4 = vunpack.i.h.bf16 %v10034_v28  ;;  %v10035_v50 = vunpack.i.l.bf16 %v10034_v28 }
 0x746   : > { %v6182_v20 = vsel %vm6055_vm2, %v6174_v43, %v10035_v50  ;;  %v6183_v48 = vsel %vm6055_vm2, %v6175_v0, %v10036_v4 }
 0x747   : > { %v6431_v33 = vpack.c.bf16 %v6183_v48, %v6182_v20  ;;  %v10044_v49 = vpop.permute.xlu0 %10043 }
 0x748   : > { %v10046_v62 = vunpack.i.h.bf16 %v10044_v49  ;;  %v10045_v47 = vunpack.i.l.bf16 %v10044_v49 }
 0x749   : > { %9791 = vmatmul.mubr.bf16.gmra.mrb[176].mxu0 %v6429_v19 }
 0x74a   : > { %9794 = vmatprep.mubr.bf16.mxu0 %v6430_v57  ;;  %v6283_v42 = vsel %vm1685_vm0, %v17293_v10, %v10046_v62  ;;  %v6282_v27 = vsel %vm1685_vm0, %v17294_v39, %v10045_v47 }
 0x751   : > { %9795 = vmatmul.mubr.bf16.gmra.mrb[180].mxu0 %v6431_v33 }
 0x754   : > { %v9680_v52 = vpop.f32.mrb[144].mxu0 }
 0x755   : > { %v5527_v46 = vpop.f32.mrb[145].mxu0 }
 0x756   : > { %v9681_v61 = vpop.f32.mrb[146].mxu0 }
 0x757   : > { %v10052_v11 = vpack.i.bf16 %v9681_v61, %v9680_v52  ;;  %v5530_v58 = vpop.f32.mrb[147].mxu0 }
 0x758   : > { %v10047_v36 = vpack.i.bf16 %v5530_v58, %v5527_v46 }
 0x759   : > { %10053 = vrot.lane.b32.xlu0 %v10052_v11, %s10952_s25 }
 0x75a   : > { %10048 = vrot.lane.b32.xlu1 %v10047_v36, %s10952_s25 }
 0x75c   : > { %v9684_v25 = vpop.f32.mrb[148].mxu0 }
 0x75d   : > { %v5543_v8 = vpop.f32.mrb[149].mxu0  ;;  %10063 = vrot.lane.b32.xlu0 %v10062_v34, %s10953_s19 }
 0x75e   : > { %v9685_v16 = vpop.f32.mrb[150].mxu0  ;;  %10058 = vrot.lane.b32.xlu1 %v10057_v63, %s10953_s19  ;;  %v10041_v63 = vunpack.i.h.bf16 %v10039_v7 }
 0x75f   : > { %v10082_v15 = vpack.i.bf16 %v9685_v16, %v9684_v25  ;;  %v5546_v44 = vpop.f32.mrb[151].mxu0 }
 0x760   : > { %v10077_v57 = vpack.i.bf16 %v5546_v44, %v5543_v8 }
 0x761   : > { %10073 = vrot.lane.b32.xlu0 %v10072_v55, %s10954_s29 }
 0x762   : > { %10068 = vrot.lane.b32.xlu1 %v10067_v26, %s10954_s29 }
 0x765   : > { %v14710_v38 = vpop.f32.mrb[152].mxu0  ;;  %10083 = vrot.lane.b32.xlu0 %v10082_v15, %s10952_s25 }
 0x766   : > { %v14713_v2 = vpop.f32.mrb[153].mxu0  ;;  %10078 = vrot.lane.b32.xlu1 %v10077_v57, %s10952_s25 }
 0x767   : > { %v14716_v60 = vpop.f32.mrb[154].mxu0 }
 0x768   : > { %v14718_v14 = vpop.f32.mrb[155].mxu0 }
 0x769   : > { %10093 = vrot.lane.b32.xlu0 %v10092_v29, %s10953_s19  ;;  %v6281_v29 = vsel %vm1685_vm0, %v17291_v56, %v10041_v63 }
 0x76a   : > { %10088 = vrot.lane.b32.xlu1 %v10087_v35, %s10953_s19  ;;  %v6280_v35 = vsel %vm1685_vm0, %v17292_v51, %v10040_v17  ;;  %v17295_v17 = vld [vmem:[#allocation109_spill] sm:$0xff] }
 0x76d   : > { %v14722_v9 = vpop.f32.mrb[156].mxu0 }
 0x76e   : > { %v14724_v21 = vpop.f32.mrb[157].mxu0 }
 0x76f   : > { %v14726_v23 = vpop.f32.mrb[158].mxu0 }
 0x770   : > { %v14728_v55 = vpop.f32.mrb[159].mxu0 }
 0x7b5   : > { %v9728_v3 = vpop.f32.mrb[168].mxu1 }
 0x7b6   : > { %v5758_v26 = vpop.f32.mrb[169].mxu1 }
 0x7b7   : > { %v9729_v32 = vpop.f32.mrb[170].mxu1 }
 0x7b8   : > { %v10102_v45 = vpack.i.bf16 %v9729_v32, %v9728_v3  ;;  %v5761_v41 = vpop.f32.mrb[171].mxu1 }
 0x7b9   : > { %v10097_v54 = vpack.i.bf16 %v5761_v41, %v5758_v26 }
 0x7ba   : > { %10103 = vrot.lane.b32.xlu0 %v10102_v45, %s10954_s29 }
 0x7bb   : > { %10098 = vrot.lane.b32.xlu1 %v10097_v54, %s10954_s29 }
 0x7bd   : > { %v14732_v37 = vpop.f32.mrb[172].mxu1 }
 0x7be   : > { %v14734_v6 = vpop.f32.mrb[173].mxu1 }
 0x7bf   : > { %v14736_v59 = vpop.f32.mrb[174].mxu1 }
 0x7c0   : > { %v10132_v53 = vpack.i.bf16 %v14736_v59, %v14732_v37  ;;  %v14740_v34 = vpop.f32.mrb[175].mxu1 }
 0x7c1   : > { %v10127_v30 = vpack.i.bf16 %v14740_v34, %v14734_v6 }
 0x7cb   : > { %v10054_v19 = vpop.permute.xlu0 %10053 }
 0x7cc   : > { %v10049_v12 = vpop.permute.xlu1 %10048  ;;  %v10056_v13 = vunpack.i.h.bf16 %v10054_v19  ;;  %v10055_v5 = vunpack.i.l.bf16 %v10054_v19 }
 0x7cd   : > { %v10051_v40 = vunpack.i.h.bf16 %v10049_v12  ;;  %v10050_v1 = vunpack.i.l.bf16 %v10049_v12 }
 0x7ce   : > { %v6290_v0 = vsel %vm3238_vm1, %v6282_v27, %v10055_v5  ;;  %v6291_v20 = vsel %vm3238_vm1, %v6283_v42, %v10056_v13 }
 0x7cf   : > { %v10064_v28 = vpop.permute.xlu0 %10063  ;;  %v6288_v52 = vsel %vm3238_vm1, %v6280_v35, %v10050_v1  ;;  %v6289_v46 = vsel %vm3238_vm1, %v6281_v29, %v10051_v40 }
 0x7d0   : > { %v10066_v4 = vunpack.i.h.bf16 %v10064_v28  ;;  %v10065_v50 = vunpack.i.l.bf16 %v10064_v28  ;;  %v10059_v43 = vpop.permute.xlu1 %10058 }
 0x7d1   : > { %v10061_v48 = vunpack.i.h.bf16 %v10059_v43  ;;  %v10060_v33 = vunpack.i.l.bf16 %v10059_v43 }
 0x7d2   : > { %v6298_v61 = vsel %vm6055_vm2, %v6290_v0, %v10065_v50  ;;  %v6299_v11 = vsel %vm6055_vm2, %v6291_v20, %v10066_v4 }
 0x7d3   : > { %v10074_v58 = vpop.permute.xlu0 %10073  ;;  %v6296_v36 = vsel %vm6055_vm2, %v6288_v52, %v10060_v33  ;;  %v6297_v25 = vsel %vm6055_vm2, %v6289_v46, %v10061_v48  ;;  %v6433_v8 = vpack.c.bf16 %v6299_v11, %v6298_v61 }
 0x7d4   : > { %v10069_v16 = vpop.permute.xlu1 %10068  ;;  %v6432_v15 = vpack.c.bf16 %v6297_v25, %v6296_v36  ;;  %v10076_v44 = vunpack.i.h.bf16 %v10074_v58  ;;  %v10075_v57 = vunpack.i.l.bf16 %v10074_v58 }
 0x7d5   : > { %v10071_v26 = vunpack.i.h.bf16 %v10069_v16  ;;  %v10070_v32 = vunpack.i.l.bf16 %v10069_v16 }
 0x7d6   : > { %9798 = vmatprep.mubr.bf16.mxu0 %v6432_v15  ;;  %v6287_v63 = vsel %vm1685_vm0, %v14312_v22, %v10076_v44  ;;  %v6286_v19 = vsel %vm1685_vm0, %v17295_v17, %v10075_v57 }
 0x7d7   : > { %v10084_v3 = vpop.permute.xlu0 %10083  ;;  %9799 = vmatmul.mubr.bf16.gmra.mrb[184].mxu0 %v6433_v8  ;;  %v6285_v47 = vsel %vm1685_vm0, %v14314_v18, %v10071_v26  ;;  %v6284_v12 = vsel %vm1685_vm0, %v14309_v24, %v10070_v32 }
 0x7d8   : > { %v10079_v45 = vpop.permute.xlu1 %10078  ;;  %v10086_v41 = vunpack.i.h.bf16 %v10084_v3  ;;  %v10085_v54 = vunpack.i.l.bf16 %v10084_v3 }
 0x7d9   : > { %v10081_v49 = vunpack.i.h.bf16 %v10079_v45  ;;  %v10080_v7 = vunpack.i.l.bf16 %v10079_v45 }
 0x7da   : > { %v6294_v1 = vsel %vm3238_vm1, %v6286_v19, %v10085_v54  ;;  %v6295_v56 = vsel %vm3238_vm1, %v6287_v63, %v10086_v41 }
 0x7db   : > { %v10094_v62 = vpop.permute.xlu0 %10093  ;;  %v6292_v22 = vsel %vm3238_vm1, %v6284_v12, %v10080_v7  ;;  %v6293_v35 = vsel %vm3238_vm1, %v6285_v47, %v10081_v49 }
 0x7dc   : > { %v10096_v13 = vunpack.i.h.bf16 %v10094_v62  ;;  %v10095_v5 = vunpack.i.l.bf16 %v10094_v62  ;;  %v10089_v40 = vpop.permute.xlu1 %10088 }
 0x7dd   : > { %v10091_v29 = vunpack.i.h.bf16 %v10089_v40  ;;  %v10090_v51 = vunpack.i.l.bf16 %v10089_v40 }
 0x7de   : > { %v6302_v28 = vsel %vm6055_vm2, %v6294_v1, %v10095_v5  ;;  %v6303_v18 = vsel %vm6055_vm2, %v6295_v56, %v10096_v13 }
 0x7df   : > { %v6300_v10 = vsel %vm6055_vm2, %v6292_v22, %v10090_v51  ;;  %v6301_v24 = vsel %vm6055_vm2, %v6293_v35, %v10091_v29  ;;  %v6435_v42 = vpack.c.bf16 %v6303_v18, %v6302_v28 }
 0x7e0   : > { %v6434_v39 = vpack.c.bf16 %v6301_v24, %v6300_v10 }
 0x7e2   : > { %9802 = vmatprep.mubr.bf16.mxu0 %v6434_v39 }
 0x7e3   : > { %9803 = vmatmul.mubr.bf16.gmra.mrb[188].mxu0 %v6435_v42 }
 0x7eb   : > { %v9744_v27 = vpop.f32.mrb[160].mxu0  ;;  %v9760_v4 = vpop.f32.mrb[176].mxu1 }
 0x7ec   : > { %v5835_v50 = vpop.f32.mrb[161].mxu0  ;;  %v5912_v43 = vpop.f32.mrb[177].mxu1 }
 0x7ed   : > { %v9745_v0 = vpop.f32.mrb[162].mxu0  ;;  %v9761_v20 = vpop.f32.mrb[178].mxu1 }
 0x7ee   : > { %v10112_v48 = vpack.i.bf16 %v9745_v0, %v9744_v27  ;;  %v10122_v33 = vpack.i.bf16 %v9761_v20, %v9760_v4  ;;  %v5838_v52 = vpop.f32.mrb[163].mxu0  ;;  %v5915_v46 = vpop.f32.mrb[179].mxu1 }
 0x7ef   : > { %v10107_v61 = vpack.i.bf16 %v5838_v52, %v5835_v50  ;;  %v10117_v11 = vpack.i.bf16 %v5915_v46, %v5912_v43 }
 0x7f0   : > { %10113 = vrot.lane.b32.xlu0 %v10112_v48, %s10952_s25 }
 0x7f1   : > { %10108 = vrot.lane.b32.xlu1 %v10107_v61, %s10952_s25 }
 0x7f3   : > { %v9748_v58 = vpop.f32.mrb[164].mxu0  ;;  %v9764_v36 = vpop.f32.mrb[180].mxu1 }
 0x7f4   : > { %v5928_v25 = vpop.f32.mrb[181].mxu1  ;;  %10123 = vrot.lane.b32.xlu0 %v10122_v33, %s10953_s19  ;;  %v5851_v8 = vpop.f32.mrb[165].mxu0 }
 0x7f5   : > { %v9765_v16 = vpop.f32.mrb[182].mxu1  ;;  %10118 = vrot.lane.b32.xlu1 %v10117_v11, %s10953_s19  ;;  %v9749_v15 = vpop.f32.mrb[166].mxu0 }
 0x7f6   : > { %v10152_v44 = vpack.i.bf16 %v9765_v16, %v9764_v36  ;;  %v10142_v57 = vpack.i.bf16 %v9749_v15, %v9748_v58  ;;  %v5854_v3 = vpop.f32.mrb[167].mxu0  ;;  %v5931_v26 = vpop.f32.mrb[183].mxu1 }
 0x7f7   : > { %v10137_v32 = vpack.i.bf16 %v5854_v3, %v5851_v8  ;;  %v10147_v45 = vpack.i.bf16 %v5931_v26, %v5928_v25 }
 0x7f8   : > { %10133 = vrot.lane.b32.xlu0 %v10132_v53, %s10954_s29 }
 0x7f9   : > { %10128 = vrot.lane.b32.xlu1 %v10127_v30, %s10954_s29 }
 0x7fc   : > { %10143 = vrot.lane.b32.xlu0 %v10142_v57, %s10952_s25 }
 0x7fd   : > { %10138 = vrot.lane.b32.xlu1 %v10137_v32, %s10952_s25 }
 0x800   : > { %10153 = vrot.lane.b32.xlu0 %v10152_v44, %s10953_s19 }
 0x801   : > { %10148 = vrot.lane.b32.xlu1 %v10147_v45, %s10953_s19 }
 0x80c   : > { %v14792_v41 = vpop.f32.mrb[168].mxu0 }
 0x80d   : > { %v14794_v54 = vpop.f32.mrb[169].mxu0 }
 0x80e   : > { %v14796_v49 = vpop.f32.mrb[170].mxu0 }
 0x80f   : > { %v14798_v37 = vpop.f32.mrb[171].mxu0 }
 0x814   : > { %v14800_v59 = vpop.f32.mrb[172].mxu0 }
 0x815   : > { %v14802_v6 = vpop.f32.mrb[173].mxu0 }
 0x816   : > { %v14804_v53 = vpop.f32.mrb[174].mxu0 }
 0x817   : > { %v14806_v34 = vpop.f32.mrb[175].mxu0 }
 0x81c   : > { %v14808_v30 = vpop.f32.mrb[176].mxu0 }
 0x81d   : > { %v14810_v7 = vpop.f32.mrb[177].mxu0 }
 0x81e   : > { %v14812_v63 = vpop.f32.mrb[178].mxu0 }
 0x81f   : > { %v14814_v17 = vpop.f32.mrb[179].mxu0 }
 0x824   : > { %v14816_v19 = vpop.f32.mrb[180].mxu0 }
 0x825   : > { %v14818_v62 = vpop.f32.mrb[181].mxu0 }
 0x826   : > { %v14820_v47 = vpop.f32.mrb[182].mxu0 }
 0x827   : > { %v14822_v12 = vpop.f32.mrb[183].mxu0 }
 0x82c   : > { %v10104_v13 = vpop.permute.xlu0 %10103 }
 0x82d   : > { %v10099_v5 = vpop.permute.xlu1 %10098  ;;  %v10106_v40 = vunpack.i.h.bf16 %v10104_v13  ;;  %v10105_v1 = vunpack.i.l.bf16 %v10104_v13 }
 0x82e   : > { %v10101_v29 = vunpack.i.h.bf16 %v10099_v5  ;;  %v10100_v51 = vunpack.i.l.bf16 %v10099_v5 }
 0x82f   : > { %v6403_v24 = vsel %vm1685_vm0, %v14716_v60, %v10106_v40  ;;  %v6402_v42 = vsel %vm1685_vm0, %v14710_v38, %v10105_v1 }
 0x830   : > { %v6401_v27 = vsel %vm1685_vm0, %v14718_v14, %v10101_v29  ;;  %v6400_v4 = vsel %vm1685_vm0, %v14713_v2, %v10100_v51 }
 0x862   : > { %v10114_v56 = vpop.permute.xlu0 %10113 }
 0x863   : > { %v10109_v22 = vpop.permute.xlu1 %10108  ;;  %v10116_v35 = vunpack.i.h.bf16 %v10114_v56  ;;  %v10115_v28 = vunpack.i.l.bf16 %v10114_v56 }
 0x864   : > { %v10111_v18 = vunpack.i.h.bf16 %v10109_v22  ;;  %v10110_v10 = vunpack.i.l.bf16 %v10109_v22 }
 0x865   : > { %v6411_v20 = vsel %vm3238_vm1, %v6403_v24, %v10116_v35  ;;  %v6410_v48 = vsel %vm3238_vm1, %v6402_v42, %v10115_v28 }
 0x866   : > { %v10124_v39 = vpop.permute.xlu0 %10123  ;;  %v6408_v60 = vsel %vm3238_vm1, %v6400_v4, %v10110_v10  ;;  %v6409_v38 = vsel %vm3238_vm1, %v6401_v27, %v10111_v18 }
 0x867   : > { %v10126_v50 = vunpack.i.h.bf16 %v10124_v39  ;;  %v10125_v43 = vunpack.i.l.bf16 %v10124_v39  ;;  %v10119_v0 = vpop.permute.xlu1 %10118 }
 0x868   : > { %v10121_v33 = vunpack.i.h.bf16 %v10119_v0  ;;  %v10120_v52 = vunpack.i.l.bf16 %v10119_v0 }
 0x869   : > { %v6418_v46 = vsel %vm6055_vm2, %v6410_v48, %v10125_v43  ;;  %v6419_v14 = vsel %vm6055_vm2, %v6411_v20, %v10126_v50 }
 0x86a   : > { %v10134_v61 = vpop.permute.xlu0 %10133  ;;  %v6416_v2 = vsel %vm6055_vm2, %v6408_v60, %v10120_v52  ;;  %v6417_v11 = vsel %vm6055_vm2, %v6409_v38, %v10121_v33  ;;  %v6437_v58 = vpack.c.bf16 %v6419_v14, %v6418_v46  ;;  %v14877_v38 = vld [vmem:[%s17296_s22] ss:$0 sm:$0xff] }
 0x86b   : > { %v10129_v36 = vpop.permute.xlu1 %10128  ;;  %v6436_v25 = vpack.c.bf16 %v6417_v11, %v6416_v2  ;;  %v10136_v8 = vunpack.i.h.bf16 %v10134_v61  ;;  %v10135_v16 = vunpack.i.l.bf16 %v10134_v61  ;;  %v6549_v46 = vadd.f32 %v14877_v38, %v14798_v37  ;;  %v10881_v61 = vld [vmem:[#allocation2 + $0x8] sm:$0xff]  ;;  %v10883_v37 = vld [vmem:[#allocation2 + $0x10] sm:$0xff] }
 0x86c   : > { %v10131_v44 = vunpack.i.h.bf16 %v10129_v36  ;;  %v10130_v57 = vunpack.i.l.bf16 %v10129_v36  ;;  %v6546_v14 = vadd.f32 %v14877_v38, %v14794_v54  ;;  %v6554_v11 = vadd.f32 %v14792_v41, %v14877_v38 }
 0x86d   : > { %9806 = vmatprep.mubr.bf16.mxu0 %v6436_v25  ;;  %v6407_v5 = vsel %vm1685_vm0, %v14726_v23, %v10136_v8  ;;  %v6406_v40 = vsel %vm1685_vm0, %v14722_v9, %v10135_v16  ;;  %v14883_v2 = vadd.f32 %v10881_v61, %v6549_v46  ;;  %v10199_v8 = vld [vmem:[%s11076_s1 + $0x4] ss:$8 sps:$4 sm:$0xff]   ;;  %v10197_v16 = vld [vmem:[%s11076_s1] ss:$8 sps:$4 sm:$0xff]  }
 0x86e   : > { %v10144_v15 = vpop.permute.xlu0 %10143  ;;  %9807 = vmatmul.mubr.bf16.gmra.mrb[192].mxu0 %v6437_v58  ;;  %v6405_v56 = vsel %vm1685_vm0, %v14728_v55, %v10131_v44  ;;  %v6404_v29 = vsel %vm1685_vm0, %v14724_v21, %v10130_v57  ;;  %v10882_v58 = vld [vmem:[#allocation2] sm:$0xff]  ;;  %v6557_v44 = vadd.f32 %v14796_v49, %v14877_v38  ;;  %7022 = vmatprep.subr.bf16.mxu1 %v10199_v8 }
 0x86f   : > { %v10139_v3 = vpop.permute.xlu1 %10138  ;;  %v10146_v26 = vunpack.i.h.bf16 %v10144_v15  ;;  %v10145_v32 = vunpack.i.l.bf16 %v10144_v15  ;;  %v14887_v36 = vadd.f32 %v10882_v58, %v6546_v14  ;;  %v6745_v25 = vmul.f32 %v14883_v2, %v14883_v2  ;;  %7023 = vmatpush1.bf16.msra.mxu1 %v10197_v16  ;;  %v10214_v58 = vld [vmem:[%s11076_s1 + $0x54] ss:$8 sps:$4 sm:$0xff]  }
 0x870   : > { %v10141_v45 = vunpack.i.h.bf16 %v10139_v3  ;;  %v10140_v13 = vunpack.i.l.bf16 %v10139_v3  ;;  %v14893_v15 = vadd.f32 %v10883_v37, %v6554_v11  ;;  %v6562_v3 = vadd.f32 %v14877_v38, %v14802_v6  ;;  %v10888_v16 = vld [vmem:[#allocation2 + $0x38] sm:$0xff] }
 0x871   : > { %v6415_v28 = vsel %vm3238_vm1, %v6407_v5, %v10146_v26  ;;  %v6414_v18 = vsel %vm3238_vm1, %v6406_v40, %v10145_v32  ;;  %v6744_v54 = vmul.f32 %v14887_v36, %v14887_v36  ;;  %v6706_v41 = vadd.f32 %v14883_v2, %v14887_v36  ;;  %v10202_v26 = vld [vmem:[%s11076_s1 + $0x14] ss:$8 sps:$4 sm:$0xff]   ;;  %v10200_v32 = vld [vmem:[%s11076_s1 + $0x10] ss:$8 sps:$4 sm:$0xff]  }
 0x872   : > { %v10154_v1 = vpop.permute.xlu0 %10153  ;;  %v6412_v23 = vsel %vm3238_vm1, %v6404_v29, %v10140_v13  ;;  %v6413_v9 = vsel %vm3238_vm1, %v6405_v56, %v10141_v45  ;;  %v6746_v45 = vmul.f32 %v14893_v15, %v14893_v15  ;;  %v10884_v13 = vld [vmem:[#allocation2 + $0x18] sm:$0xff]  ;;  %7024 = vmatprep.subr.bf16.mxu1 %v10202_v26  ;;  %v6565_v6 = vadd.f32 %v14877_v38, %v14806_v34  ;;  %v10205_v29 = vld [vmem:[%s11076_s1 + $0x24] ss:$8 sps:$4 sm:$0xff]  }
 0x873   : > { %v10156_v51 = vunpack.i.h.bf16 %v10154_v1  ;;  %v10155_v22 = vunpack.i.l.bf16 %v10154_v1  ;;  %v10149_v35 = vpop.permute.xlu1 %10148  ;;  %v6776_v57 = vadd.f32 %v6745_v25, %v6744_v54  ;;  %v14907_v5 = vadd.f32 %v10884_v13, %v6557_v44  ;;  %7025 = vmatpush1.bf16.msra.mxu1 %v10200_v32  ;;  %v10885_v1 = vld [vmem:[#allocation2 + $0x20] sm:$0xff]  ;;  %v10206_v34 = vld [vmem:[%s11076_s1 + $0x30] ss:$8 sps:$4 sm:$0xff]  }
 0x874   : > { %v10151_v10 = vunpack.i.h.bf16 %v10149_v35  ;;  %v10150_v24 = vunpack.i.l.bf16 %v10149_v35  ;;  %v6707_v49 = vadd.f32 %v6706_v41, %v14893_v15  ;;  %v14910_v56 = vadd.f32 %v10885_v1, %v6562_v3  ;;  %7026 = vmatprep.subr.bf16.mxu1 %v10205_v29  ;;  %v10212_v25 = vld [vmem:[%s11076_s1 + $0x50] ss:$8 sps:$4 sm:$0xff]   ;;  %v10889_v44 = vld [vmem:[#allocation2 + $0x40] sm:$0xff] }
 0x875   : > { %v6422_v42 = vsel %vm6055_vm2, %v6414_v18, %v10155_v22  ;;  %v6423_v55 = vsel %vm6055_vm2, %v6415_v28, %v10156_v51  ;;  %v6777_v40 = vadd.f32 %v6776_v57, %v6746_v45  ;;  %v10203_v51 = vld [vmem:[%s11076_s1 + $0x20] ss:$8 sps:$4 sm:$0xff]   ;;  %v6747_v22 = vmul.f32 %v14907_v5, %v14907_v5  ;;  %v10217_v57 = vld [vmem:[%s11076_s1 + $0x64] ss:$8 sps:$4 sm:$0xff]   ;;  %v10218_v1 = vld [vmem:[%s11076_s1 + $0x70] ss:$8 sps:$4 sm:$0xff]  }
 0x876   : > { %v6420_v21 = vsel %vm6055_vm2, %v6412_v23, %v10150_v24  ;;  %v6421_v39 = vsel %vm6055_vm2, %v6413_v9, %v10151_v10  ;;  %v6439_v27 = vpack.c.bf16 %v6423_v55, %v6422_v42  ;;  %v6708_v35 = vadd.f32 %v6707_v49, %v14907_v5  ;;  %v10886_v10 = vld [vmem:[#allocation2 + $0x28] sm:$0xff]  ;;  %v10208_v23 = vld [vmem:[%s11076_s1 + $0x34] ss:$8 sps:$4 sm:$0xff]  }
 0x877   : > { %v6438_v4 = vpack.c.bf16 %v6421_v39, %v6420_v21  ;;  %7027 = vmatpush1.bf16.msra.mxu1 %v10203_v51  ;;  %v6748_v28 = vmul.f32 %v14910_v56, %v14910_v56  ;;  %v6778_v18 = vadd.f32 %v6777_v40, %v6747_v22  ;;  %v14921_v24 = vadd.f32 %v10886_v10, %v6565_v6  ;;  %v10211_v39 = vld [vmem:[%s11076_s1 + $0x44] ss:$8 sps:$4 sm:$0xff]   ;;  %v10215_v3 = vld [vmem:[%s11076_s1 + $0x60] ss:$8 sps:$4 sm:$0xff]   ;;  %v10220_v6 = vld [vmem:[%s11076_s1 + $0x74] ss:$8 sps:$4 sm:$0xff]  }
 0x878   : > { %v6570_v9 = vadd.f32 %v14800_v59, %v14877_v38  ;;  %7028 = vmatprep.subr.bf16.mxu1 %v10208_v23  ;;  %v6709_v42 = vadd.f32 %v6708_v35, %v14910_v56  ;;  %v6573_v14 = vadd.f32 %v14804_v53, %v14877_v38  ;;  %v6578_v11 = vadd.f32 %v14877_v38, %v14810_v7  ;;  %v10890_v49 = vld [vmem:[#allocation2 + $0x48] sm:$0xff]  ;;  %v10891_v35 = vld [vmem:[#allocation2 + $0x50] sm:$0xff] }
 0x879   : > { %9810 = vmatprep.mubr.bf16.mxu0 %v6438_v4  ;;  %v6779_v55 = vadd.f32 %v6778_v18, %v6748_v28  ;;  %v6749_v21 = vmul.f32 %v14921_v24, %v14921_v24  ;;  %v10887_v4 = vld [vmem:[#allocation2 + $0x30] sm:$0xff]  ;;  %v6581_v7 = vadd.f32 %v14877_v38, %v14814_v17  ;;  %v6586_v17 = vadd.f32 %v14808_v30, %v14877_v38 }
 0x87a   : > { %9811 = vmatmul.mubr.bf16.gmra.mrb[196].mxu0 %v6439_v27  ;;  %v10209_v27 = vld [vmem:[%s11076_s1 + $0x40] ss:$8 sps:$4 sm:$0xff]   ;;  %v14932_v46 = vadd.f32 %v10887_v4, %v6570_v9  ;;  %v6710_v59 = vadd.f32 %v6709_v42, %v14921_v24  ;;  %v14943_v37 = vadd.f32 %v10888_v16, %v6573_v14  ;;  %v14946_v41 = vadd.f32 %v10889_v44, %v6578_v11  ;;  %v10892_v9 = vld [vmem:[#allocation2 + $0x58] sm:$0xff]  ;;  %v10895_v16 = vld [vmem:[#allocation2 + $0x70] sm:$0xff] }
 0x87b   : > { %7029 = vmatpush1.bf16.msra.mxu1 %v10206_v34  ;;  %v6780_v61 = vadd.f32 %v6779_v55, %v6749_v21  ;;  %v14957_v40 = vadd.f32 %v10890_v49, %v6581_v7  ;;  %v14966_v28 = vadd.f32 %v10891_v35, %v6586_v17  ;;  %v6589_v18 = vadd.f32 %v14812_v63, %v14877_v38 }
 0x87c   : > { %7030 = vmatprep.subr.bf16.mxu1 %v10211_v39  ;;  %v6750_v8 = vmul.f32 %v14932_v46, %v14932_v46  ;;  %v6711_v53 = vadd.f32 %v6710_v59, %v14932_v46  ;;  %v6751_v26 = vmul.f32 %v14943_v37, %v14943_v37  ;;  %v6752_v45 = vmul.f32 %v14946_v41, %v14946_v41  ;;  %v10893_v39 = vld [vmem:[#allocation2 + $0x60] sm:$0xff] }
 0x87d   : > { %v6753_v22 = vmul.f32 %v14957_v40, %v14957_v40  ;;  %v6594_v30 = vadd.f32 %v14877_v38, %v14818_v62  ;;  %v6754_v34 = vmul.f32 %v14966_v28, %v14966_v28  ;;  %v14975_v42 = vadd.f32 %v10892_v9, %v6589_v18 }
 0x87e   : > { %v6781_v54 = vadd.f32 %v6780_v61, %v6750_v8  ;;  %v6712_v32 = vadd.f32 %v6711_v53, %v14943_v37  ;;  %v6597_v63 = vadd.f32 %v14877_v38, %v14822_v12  ;;  %v10894_v61 = vld [vmem:[#allocation2 + $0x68] sm:$0xff] }
 0x87f   : > { %7031 = vmatpush1.bf16.msra.mxu1 %v10209_v27  ;;  %v14978_v27 = vadd.f32 %v10893_v39, %v6594_v30  ;;  %v6755_v4 = vmul.f32 %v14975_v42, %v14975_v42 }
 0x880   : > { %7032 = vmatprep.subr.bf16.mxu1 %v10214_v58  ;;  %v6782_v13 = vadd.f32 %v6781_v54, %v6751_v26  ;;  %v6713_v29 = vadd.f32 %v6712_v32, %v14946_v41  ;;  %v14987_v11 = vadd.f32 %v10894_v61, %v6597_v63  ;;  %v6602_v58 = vadd.f32 %v14816_v19, %v14877_v38  ;;  %v10897_v32 = vld [vmem:[#allocation2 + $0x80] sm:$0xff]  ;;  %v10902_v61 = vld [vmem:[#allocation2 + $0xa8] sm:$0xff] }
 0x881   : > { %v6756_v14 = vmul.f32 %v14978_v27, %v14978_v27  ;;  %v6605_v54 = vadd.f32 %v14820_v47, %v14877_v38  ;;  %v10901_v63 = vld [vmem:[#allocation2 + $0xa0] sm:$0xff] }
 0x882   : > { %v6783_v51 = vadd.f32 %v6782_v13, %v6752_v45  ;;  %v6714_v10 = vadd.f32 %v6713_v29, %v14957_v40  ;;  %v6757_v12 = vmul.f32 %v14987_v11, %v14987_v11  ;;  %v14994_v53 = vadd.f32 %v10895_v16, %v6602_v58 }
 0x883   : > { %7033 = vmatpush1.bf16.msra.mxu1 %v10212_v25 }
 0x884   : > { %7034 = vmatprep.subr.bf16.mxu1 %v10217_v57  ;;  %v6784_v23 = vadd.f32 %v6783_v51, %v6753_v22  ;;  %v6715_v55 = vadd.f32 %v6714_v10, %v14966_v28  ;;  %v6758_v19 = vmul.f32 %v14994_v53, %v14994_v53  ;;  %v10899_v10 = vld [vmem:[#allocation2 + $0x90] sm:$0xff] }
 0x886   : > { %v6785_v21 = vadd.f32 %v6784_v23, %v6754_v34  ;;  %v6716_v62 = vadd.f32 %v6715_v55, %v14975_v42 }
 0x887   : > { %7035 = vmatpush1.bf16.msra.mxu1 %v10215_v3  ;;  %v10896_v3 = vld [vmem:[#allocation2 + $0x78] sm:$0xff] }
 0x888   : > { %7036 = vmatprep.subr.bf16.mxu1 %v10220_v6  ;;  %v6786_v59 = vadd.f32 %v6785_v21, %v6755_v4  ;;  %v6717_v25 = vadd.f32 %v6716_v62, %v14978_v27  ;;  %v15003_v26 = vadd.f32 %v10896_v3, %v6605_v54  ;;  %v10898_v6 = vld [vmem:[#allocation2 + $0x88] sm:$0xff]  ;;  %v10900_v21 = vld [vmem:[#allocation2 + $0x98] sm:$0xff] }
 0x88a   : > { %v6787_v8 = vadd.f32 %v6786_v59, %v6756_v14  ;;  %v6718_v7 = vadd.f32 %v6717_v25, %v14987_v11 }
 0x88b   : > { %7037 = vmatpush1.bf16.msra.mxu1 %v10218_v1 }
 0x88c   : > { %v6788_v57 = vadd.f32 %v6787_v8, %v6757_v12  ;;  %v6719_v47 = vadd.f32 %v6718_v7, %v14994_v53 }
 0x88e   : > { %v6789_v49 = vadd.f32 %v6788_v57, %v6758_v19  ;;  %v6720_v29 = vadd.f32 %v6719_v47, %v15003_v26 }
 0x8aa   : > { %v14856_v50 = vpop.f32.mrb[184].mxu0 }
 0x8ab   : > { %v14858_v43 = vpop.f32.mrb[185].mxu0  ;;  %v6618_v51 = vadd.f32 %v14856_v50, %v14877_v38 }
 0x8ac   : > { %v14860_v0 = vpop.f32.mrb[186].mxu0  ;;  %v6610_v44 = vadd.f32 %v14877_v38, %v14858_v43  ;;  %v6759_v43 = vmul.f32 %v15003_v26, %v15003_v26 }
 0x8ad   : > { %v14862_v20 = vpop.f32.mrb[187].mxu0  ;;  %v15022_v23 = vadd.f32 %v10899_v10, %v6618_v51  ;;  %v6621_v30 = vadd.f32 %v14860_v0, %v14877_v38 }
 0x8ae   : > { %v15005_v45 = vadd.f32 %v10897_v32, %v6610_v44  ;;  %v6613_v13 = vadd.f32 %v14877_v38, %v14862_v20  ;;  %v6790_v22 = vadd.f32 %v6789_v49, %v6759_v43  ;;  %v10903_v44 = vld [vmem:[#allocation2 + $0xb0] sm:$0xff] }
 0x8af   : > { %v6762_v50 = vmul.f32 %v15022_v23, %v15022_v23  ;;  %v15031_v39 = vadd.f32 %v10900_v21, %v6621_v30 }
 0x8b0   : > { %v6760_v1 = vmul.f32 %v15005_v45, %v15005_v45  ;;  %v15014_v17 = vadd.f32 %v10898_v6, %v6613_v13  ;;  %v6721_v20 = vadd.f32 %v6720_v29, %v15005_v45 }
 0x8b2   : > { %v6791_v35 = vadd.f32 %v6790_v22, %v6760_v1  ;;  %v6761_v18 = vmul.f32 %v15014_v17, %v15014_v17  ;;  %v6722_v9 = vadd.f32 %v6721_v20, %v15014_v17  ;;  %v10905_v20 = vld [vmem:[#allocation2 + $0xc0] sm:$0xff] }
 0x8b4   : > { %v6792_v55 = vadd.f32 %v6791_v35, %v6761_v18  ;;  %v6723_v0 = vadd.f32 %v6722_v9, %v15022_v23  ;;  %v10906_v9 = vld [vmem:[#allocation2 + $0xd0] sm:$0xff] }
 0x8b6   : > { %v14864_v48 = vpop.f32.mrb[188].mxu0  ;;  %v6793_v14 = vadd.f32 %v6792_v55, %v6762_v50  ;;  %v6724_v25 = vadd.f32 %v6723_v0, %v15031_v39 }
 0x8b7   : > { %v14866_v33 = vpop.f32.mrb[189].mxu0  ;;  %v6634_v8 = vadd.f32 %v14864_v48, %v14877_v38  ;;  %v10904_v48 = vld [vmem:[#allocation2 + $0xb8] sm:$0xff] }
 0x8b8   : > { %v14868_v52 = vpop.f32.mrb[190].mxu0  ;;  %v6626_v34 = vadd.f32 %v14877_v38, %v14866_v33  ;;  %v6763_v33 = vmul.f32 %v15031_v39, %v15031_v39 }
 0x8b9   : > { %v14870_v60 = vpop.f32.mrb[191].mxu0  ;;  %v15050_v7 = vadd.f32 %v10903_v44, %v6634_v8  ;;  %v6637_v57 = vadd.f32 %v14868_v52, %v14877_v38 }
 0x8ba   : > { %v15033_v4 = vadd.f32 %v10901_v63, %v6626_v34  ;;  %v6629_v62 = vadd.f32 %v14877_v38, %v14870_v60  ;;  %v6794_v12 = vadd.f32 %v6793_v14, %v6763_v33  ;;  %v10907_v63 = vld [vmem:[#allocation2 + $0xc8] sm:$0xff]  ;;  %v10908_v14 = vld [vmem:[#allocation2 + $0xd8] sm:$0xff] }
 0x8bb   : > { %v6766_v32 = vmul.f32 %v15050_v7, %v15050_v7  ;;  %v15057_v13 = vadd.f32 %v10904_v48, %v6637_v57 }
 0x8bc   : > { %v6764_v59 = vmul.f32 %v15033_v4, %v15033_v4  ;;  %v15042_v58 = vadd.f32 %v10902_v61, %v6629_v62  ;;  %v6725_v60 = vadd.f32 %v6724_v25, %v15033_v4 }
 0x8bd   : > { %v6767_v52 = vmul.f32 %v15057_v13, %v15057_v13 }
 0x8be   : > { %v6795_v16 = vadd.f32 %v6794_v12, %v6764_v59  ;;  %v6765_v54 = vmul.f32 %v15042_v58, %v15042_v58  ;;  %v6726_v19 = vadd.f32 %v6725_v60, %v15042_v58 }
 0x8c0   : > { %v6796_v3 = vadd.f32 %v6795_v16, %v6765_v54  ;;  %v6727_v47 = vadd.f32 %v6726_v19, %v15050_v7 }
 0x8c2   : > { %v6797_v43 = vadd.f32 %v6796_v3, %v6766_v32  ;;  %v6728_v18 = vadd.f32 %v6727_v47, %v15057_v13 }
 0x8c4   : > { %v6798_v34 = vadd.f32 %v6797_v43, %v6767_v52 }
 0x941   : > { %v9808_v49 = vpop.f32.mrb[192].mxu0 }
 0x942   : > { %v6641_v1 = vpop.f32.mrb[193].mxu0  ;;  %v6650_v6 = vadd.f32 %v9808_v49, %v14877_v38  ;;  %v10909_v49 = vld [vmem:[#allocation2 + $0xe0] sm:$0xff] }
 0x943   : > { %v6642_v29 = vadd.f32 %v14877_v38, %v6641_v1  ;;  %v9809_v51 = vpop.f32.mrb[194].mxu0 }
 0x944   : > { %v6644_v22 = vpop.f32.mrb[195].mxu0  ;;  %v6653_v10 = vadd.f32 %v9809_v51, %v14877_v38  ;;  %v15069_v55 = vadd.f32 %v10906_v9, %v6650_v6 }
 0x945   : > { %v15064_v35 = vadd.f32 %v10905_v20, %v6642_v29  ;;  %v6645_v30 = vadd.f32 %v14877_v38, %v6644_v22  ;;  %v10910_v29 = vld [vmem:[#allocation2 + $0xf0] sm:$0xff]  ;;  %v10911_v20 = vld [vmem:[#allocation2 + $0xe8] sm:$0xff] }
 0x946   : > { %v15076_v33 = vadd.f32 %v10908_v14, %v6653_v10  ;;  %v6770_v25 = vmul.f32 %v15069_v55, %v15069_v55 }
 0x947   : > { %v6729_v50 = vadd.f32 %v6728_v18, %v15064_v35  ;;  %v6768_v21 = vmul.f32 %v15064_v35, %v15064_v35  ;;  %v15074_v62 = vadd.f32 %v10907_v63, %v6645_v30  ;;  %v10912_v30 = vld [vmem:[#allocation2 + $0xf8] sm:$0xff] }
 0x948   : > { %v6771_v60 = vmul.f32 %v15076_v33, %v15076_v33 }
 0x949   : > { %v6799_v0 = vadd.f32 %v6798_v34, %v6768_v21  ;;  %v6730_v59 = vadd.f32 %v6729_v50, %v15074_v62  ;;  %v6769_v61 = vmul.f32 %v15074_v62, %v15074_v62 }
 0x94b   : > { %v6731_v8 = vadd.f32 %v6730_v59, %v15069_v55  ;;  %v6800_v12 = vadd.f32 %v6799_v0, %v6769_v61 }
 0x94d   : > { %v6801_v16 = vadd.f32 %v6800_v12, %v6770_v25  ;;  %v9812_v54 = vpop.f32.mrb[196].mxu0  ;;  %v6732_v44 = vadd.f32 %v6731_v8, %v15076_v33 }
 0x94e   : > { %v6657_v57 = vpop.f32.mrb[197].mxu0  ;;  %v6666_v19 = vadd.f32 %v9812_v54, %v14877_v38 }
 0x94f   : > { %v6658_v3 = vadd.f32 %v14877_v38, %v6657_v57  ;;  %v6802_v32 = vadd.f32 %v6801_v16, %v6771_v60  ;;  %v9813_v48 = vpop.f32.mrb[198].mxu0 }
 0x950   : > { %v6660_v47 = vpop.f32.mrb[199].mxu0  ;;  %v6669_v1 = vadd.f32 %v9813_v48, %v14877_v38  ;;  %v15093_v51 = vadd.f32 %v10910_v29, %v6666_v19 }
 0x951   : > { %v15089_v43 = vadd.f32 %v10909_v49, %v6658_v3  ;;  %v6661_v6 = vadd.f32 %v14877_v38, %v6660_v47 }
 0x952   : > { %v15098_v34 = vadd.f32 %v10912_v30, %v6669_v1  ;;  %v6774_v21 = vmul.f32 %v15093_v51, %v15093_v51  ;;  %v6705_v30 = vld [vmem:[%s17298_s13] sm:$0x1] }
 0x953   : > { %v6733_v52 = vadd.f32 %v6732_v44, %v15089_v43  ;;  %v6772_v22 = vmul.f32 %v15089_v43, %v15089_v43  ;;  %v6701_v18 = vadd.f32 %v10911_v20, %v6661_v6 }
 0x954   : > { %v6775_v0 = vmul.f32 %v15098_v34, %v15098_v34 }
 0x955   : > { %v6803_v10 = vadd.f32 %v6802_v32, %v6772_v22  ;;  %v6734_v9 = vadd.f32 %v6733_v52, %v6701_v18  ;;  %v6773_v50 = vmul.f32 %v6701_v18, %v6701_v18  ;;  %v6704_v22 = vld [vmem:[%s17297_s17] sm:$0x1] }
 0x957   : > { %v6735_v38 = vadd.f32 %v6734_v9, %v15093_v51  ;;  %v6804_v63 = vadd.f32 %v6803_v10, %v6773_v50  ;;  %v17299_v9 = vld [vmem:[#allocation8_spill] sm:$0xff] }
 0x959   : > { %v6736_v14 = vadd.f32 %v6735_v38, %v15098_v34  ;;  %v6805_v59 = vadd.f32 %v6804_v63, %v6774_v21 }
 0x95b   : > { %v6737_v61 = vrot.slane %v6736_v14, 4  ;;  %v6806_v25 = vadd.f32 %v6805_v59, %v6775_v0 }
 0x95d   : > { %v6738_v8 = vadd.f32 %v6737_v61, %v6736_v14  ;;  %v6807_v12 = vrot.slane %v6806_v25, 4 }
 0x95f   : > { %v6739_v60 = vrot.slane %v6738_v8, 2  ;;  %v6808_v16 = vadd.f32 %v6807_v12, %v6806_v25 }
 0x961   : > { %v6740_v54 = vadd.f32 %v6739_v60, %v6738_v8  ;;  %v6809_v44 = vrot.slane %v6808_v16, 2  ;;  %v10221_v60 = vld [vmem:[%s11087_s0 + $0x40] sm:$0xff]  }
 0x962   : > { %9094 = vmatprep.subr.bf16.mxu0 %v10221_v60 }
 0x963   : > { %v6741_v57 = vrot.slane %v6740_v54, 1  ;;  %v6810_v19 = vadd.f32 %v6809_v44, %v6808_v16  ;;  %v10223_v16 = vld [vmem:[%s11087_s0 + $0x48] sm:$0xff]  }
 0x965   : > { %v6742_v3 = vadd.f32 %v6741_v57, %v6740_v54  ;;  %v6811_v32 = vrot.slane %v6810_v19, 1 }
 0x967   : > { %v6743_v48 = vmul.f32 0.00390625, %v6742_v3  ;;  %v6812_v47 = vadd.f32 %v6811_v32, %v6810_v19 }
 0x969   : > { %v6813_v49 = vmul.f32 0.00390625, %v6812_v47  ;;  %v6814_v1 = vmul.f32 %v6743_v48, %v6743_v48 }
 0x96b   : > { %v6815_v6 = vsub.f32 %v6813_v49, %v6814_v1 }
 0x96d   : > { %v6816_v29 = vmax.f32 %v6815_v6, 0.0 }
 0x96f   : > { %v6817_v52 = vadd.f32 1e-05, %v6816_v29 }
 0x971   : > { %10749 = vrsqrt.f32 %v6817_v52 }
 0x97b   : > { %v10750_v20 = vpop.eup %10749 }
 0x97c   : > { %v6819_v10 = vmul.f32 %v10750_v20, %v6704_v22 }
 0x97e   : > { %v15117_v50 = vrot.slane %v6819_v10, %v17299_v9  ;;  %v6858_v21 = vmul.f32 %v6819_v10, %v6743_v48 }
 0x980   : > { %v15120_v38 = vmul.f32 %v15117_v50, %v6701_v18  ;;  %v6859_v63 = vsub.f32 %v6705_v30, %v6858_v21  ;;  %v6826_v0 = vmul.f32 %v15117_v50, %v14887_v36  ;;  %v6827_v14 = vmul.f32 %v15117_v50, %v14883_v2 }
 0x981   : > { %v6828_v59 = vmul.f32 %v15117_v50, %v14893_v15  ;;  %v6829_v25 = vmul.f32 %v15117_v50, %v14907_v5  ;;  %v6830_v18 = vmul.f32 %v15117_v50, %v14910_v56  ;;  %v6831_v8 = vmul.f32 %v15117_v50, %v14921_v24  ;;  %v10222_v5 = vld [vmem:[%s11087_s0] sm:$0xff]  }
 0x982   : > { %v15129_v61 = vrot.slane %v6859_v63, %v17299_v9  ;;  %v6832_v36 = vmul.f32 %v15117_v50, %v14932_v46  ;;  %v6833_v2 = vmul.f32 %v15117_v50, %v14943_v37  ;;  %v6834_v15 = vmul.f32 %v15117_v50, %v14946_v41  ;;  %9095 = vmatpush3.bf16.msra.mxu0 %v10222_v5 }
 0x983   : > { %v6835_v12 = vmul.f32 %v15117_v50, %v14957_v40  ;;  %v6836_v56 = vmul.f32 %v15117_v50, %v14966_v28  ;;  %v6837_v24 = vmul.f32 %v15117_v50, %v14975_v42  ;;  %v6838_v46 = vmul.f32 %v15117_v50, %v14978_v27  ;;  %9096 = vmatprep.subr.bf16.mxu0 %v10223_v16 }
 0x984   : > { %v6839_v37 = vmul.f32 %v15117_v50, %v14987_v11  ;;  %v6840_v41 = vmul.f32 %v15117_v50, %v14994_v53  ;;  %v6841_v40 = vmul.f32 %v15117_v50, %v15003_v26  ;;  %v6842_v54 = vmul.f32 %v15117_v50, %v15005_v45  ;;  %v10224_v26 = vld [vmem:[%s11087_s0 + $0x8] sm:$0xff]  }
 0x985   : > { %v6850_v28 = vmul.f32 %v15117_v50, %v15064_v35  ;;  %v6843_v42 = vmul.f32 %v15117_v50, %v15014_v17  ;;  %v6851_v27 = vmul.f32 %v15117_v50, %v15074_v62  ;;  %v6853_v11 = vmul.f32 %v15117_v50, %v15076_v33 }
 0x986   : > { %v6854_v53 = vmul.f32 %v15117_v50, %v15089_v43  ;;  %v6856_v45 = vmul.f32 %v15117_v50, %v15093_v51  ;;  %v6857_v35 = vmul.f32 %v15117_v50, %v15098_v34  ;;  %v15178_v44 = vadd.f32 %v15129_v61, %v6826_v0  ;;  %9097 = vmatpush3.bf16.msra.mxu0 %v10224_v26  ;;  %v10231_v26 = vld [vmem:[%s11087_s0 + $0x68] sm:$0xff]  }
 0x987   : > { %v15181_v17 = vadd.f32 %v15129_v61, %v6827_v14  ;;  %v15184_v62 = vadd.f32 %v15129_v61, %v6828_v59  ;;  %v15187_v33 = vadd.f32 %v15129_v61, %v6829_v25  ;;  %v15190_v43 = vadd.f32 %v15129_v61, %v6830_v18 }
 0x988   : > { %17300 = vst [vmem:[#allocation134_spill] sm:$0xff] %v15178_v44  ;;  %v15193_v51 = vadd.f32 %v15129_v61, %v6831_v8  ;;  %v15198_v57 = vadd.f32 %v15129_v61, %v6832_v36  ;;  %v15201_v19 = vadd.f32 %v15129_v61, %v6833_v2  ;;  %v15204_v3 = vadd.f32 %v15129_v61, %v6834_v15 }
 0x989   : > { %17301 = vst [vmem:[#allocation93_spill] sm:$0xff] %v15184_v62  ;;  %17302 = vst [vmem:[#allocation27_spill] sm:$0xff] %v15187_v33  ;;  %v6898_v34 = vpack.c.bf16 %v15181_v17, %v15178_v44  ;;  %v6844_v32 = vmul.f32 %v15117_v50, %v15022_v23  ;;  %v6845_v48 = vmul.f32 %v15117_v50, %v15031_v39 }
 0x98a   : > { %17303 = vst [vmem:[#allocation29_spill] sm:$0xff] %v15190_v43  ;;  %17304 = vst [vmem:[#allocation89_spill] sm:$0xff] %v15193_v51  ;;  %v15211_v47 = vadd.f32 %v15129_v61, %v6835_v12  ;;  %v15214_v49 = vadd.f32 %v15129_v61, %v6836_v56  ;;  %v6846_v1 = vmul.f32 %v15117_v50, %v15033_v4 }
 0x98b   : > { %17305 = vst [vmem:[#allocation117_spill] sm:$0xff] %v15198_v57  ;;  %17306 = vst [vmem:[#allocation28_spill] sm:$0xff] %v15201_v19  ;;  %7055 = vmatmul.mubr.bf16.vlgmr.msra.gmra.mrb[184].mxu1 %v6898_v34  ;;  %v15219_v6 = vadd.f32 %v15129_v61, %v6837_v24  ;;  %v15222_v29 = vadd.f32 %v15129_v61, %v6838_v46  ;;  %v15225_v23 = vadd.f32 %v15129_v61, %v6839_v37  ;;  %v10233_v34 = vld [vmem:[%s11087_s0 + $0x70] sm:$0xff]  }
 0x98c   : > { %17307 = vst [vmem:[#allocation34_spill] sm:$0xff] %v15204_v3  ;;  %17308 = vst [vmem:[#allocation44_spill] sm:$0xff] %v15211_v47  ;;  %v6847_v39 = vmul.f32 %v15117_v50, %v15042_v58  ;;  %7064 = vmatprep.mubr.bf16.mxu1 %v17284_v31  ;;  %v15231_v52 = vadd.f32 %v15129_v61, %v6840_v41  ;;  %v15234_v4 = vadd.f32 %v15129_v61, %v6841_v40  ;;  %v10225_v40 = vld [vmem:[%s11087_s0 + $0x50] sm:$0xff]  }
 0x98d   : > { %17309 = vst [vmem:[#allocation124_spill] sm:$0xff] %v15214_v49  ;;  %17310 = vst [vmem:[#allocation107_spill] sm:$0xff] %v15219_v6  ;;  %v15237_v22 = vadd.f32 %v15129_v61, %v6842_v54  ;;  %v6848_v20 = vmul.f32 %v15117_v50, %v15050_v7  ;;  %v6849_v10 = vmul.f32 %v15117_v50, %v15057_v13  ;;  %v10226_v54 = vld [vmem:[%s11087_s0 + $0x10] sm:$0xff]   ;;  %9098 = vmatprep.subr.bf16.mxu0 %v10225_v40 }
 0x98e   : > { %17311 = vst [vmem:[#allocation91_spill] sm:$0xff] %v15222_v29  ;;  %17312 = vst [vmem:[#allocation86_spill] sm:$0xff] %v15225_v23  ;;  %v15244_v30 = vadd.f32 %v15129_v61, %v6843_v42  ;;  %v15247_v58 = vadd.f32 %v15129_v61, %v6844_v32  ;;  %v6852_v21 = vmul.f32 %v15117_v50, %v15069_v55  ;;  %9099 = vmatpush3.bf16.msra.mxu0 %v10226_v54  ;;  %v10228_v42 = vld [vmem:[%s11087_s0 + $0x18] sm:$0xff]   ;;  %v10234_v32 = vld [vmem:[%s11087_s0 + $0x30] sm:$0xff]  }
 0x98f   : > { %17313 = vst [vmem:[#allocation113_spill] sm:$0xff] %v15231_v52  ;;  %17314 = vst [vmem:[#allocation103_spill] sm:$0xff] %v15234_v4  ;;  %v15252_v63 = vadd.f32 %v15129_v61, %v6845_v48  ;;  %v15255_v0 = vadd.f32 %v15129_v61, %v6846_v1  ;;  %v15258_v7 = vadd.f32 %v15129_v61, %v6847_v39  ;;  %v10235_v48 = vld [vmem:[%s11087_s0 + $0x78] sm:$0xff]  }
 0x990   : > { %17315 = vst [vmem:[#allocation130_spill] sm:$0xff] %v15237_v22  ;;  %17316 = vst [vmem:[#allocation116_spill] sm:$0xff] %v15244_v30  ;;  %v15261_v13 = vadd.f32 %v15129_v61, %v6848_v20  ;;  %v15264_v14 = vadd.f32 %v15129_v61, %v6849_v10  ;;  %v15267_v59 = vadd.f32 %v15129_v61, %v6850_v28  ;;  %v10227_v28 = vld [vmem:[%s11087_s0 + $0x58] sm:$0xff]   ;;  %v6930_v20 = vld [vmem:[%s11082_s30] sm:$0x3] }
 0x991   : > { %17317 = vst [vmem:[#allocation43_spill] sm:$0xff] %v15247_v58  ;;  %17318 = vst [vmem:[#allocation56_spill] sm:$0xff] %v15252_v63  ;;  %v15270_v55 = vadd.f32 %v15129_v61, %v6851_v27  ;;  %v15273_v50 = vadd.f32 %v15129_v61, %v6852_v21  ;;  %v6899_v25 = vpack.c.bf16 %v15187_v33, %v15184_v62  ;;  %9100 = vmatprep.subr.bf16.mxu0 %v10227_v28  ;;  %v10236_v39 = vld [vmem:[%s11087_s0 + $0x38] sm:$0xff]   ;;  %v17331_v21 = vld [vmem:[#allocation7_spill] sm:$0xff] }
 0x992   : > { %17319 = vst [vmem:[#allocation35_spill] sm:$0xff] %v15255_v0  ;;  %17320 = vst [vmem:[#allocation13_spill] sm:$0xff] %v15258_v7  ;;  %v15278_v18 = vadd.f32 %v15129_v61, %v6853_v11  ;;  %v15281_v8 = vadd.f32 %v15129_v61, %v6854_v53  ;;  %v15285_v36 = vadd.f32 %v15129_v61, %v15120_v38  ;;  %9101 = vmatpush3.bf16.msra.mxu0 %v10228_v42  ;;  %v10229_v11 = vld [vmem:[%s11087_s0 + $0x60] sm:$0xff]  }
 0x993   : > { %17321 = vst [vmem:[#allocation22_spill] sm:$0xff] %v15261_v13  ;;  %17322 = vst [vmem:[#allocation12_spill] sm:$0xff] %v15264_v14  ;;  %v15288_v2 = vadd.f32 %v15129_v61, %v6856_v45  ;;  %v15291_v15 = vadd.f32 %v15129_v61, %v6857_v35  ;;  %7065 = vmatmul.mubr.bf16.gmra.mrb[188].mxu1 %v6899_v25  ;;  %v6900_v12 = vpack.c.bf16 %v15193_v51, %v15190_v43  ;;  %v10230_v53 = vld [vmem:[%s11087_s0 + $0x20] sm:$0xff]   ;;  %v10232_v35 = vld [vmem:[%s11087_s0 + $0x28] sm:$0xff]  }
 0x994   : > { %17323 = vst [vmem:[#allocation123_spill] sm:$0xff] %v15267_v59  ;;  %17324 = vst [vmem:[#allocation31_spill] sm:$0xff] %v15270_v55  ;;  %7074 = vmatprep.mubr.bf16.mxu1 %v17284_v31  ;;  %v6901_v60 = vpack.c.bf16 %v15201_v19, %v15198_v57  ;;  %v6902_v38 = vpack.c.bf16 %v15211_v47, %v15204_v3  ;;  %v6903_v61 = vpack.c.bf16 %v15219_v6, %v15214_v49 }
 0x995   : > { %17325 = vst [vmem:[#allocation45_spill] sm:$0xff] %v15273_v50  ;;  %17326 = vst [vmem:[#allocation19_spill] sm:$0xff] %v15278_v18  ;;  %v6904_v5 = vpack.c.bf16 %v15225_v23, %v15222_v29  ;;  %v6905_v16 = vpack.c.bf16 %v15234_v4, %v15231_v52  ;;  %v6906_v56 = vpack.c.bf16 %v15244_v30, %v15237_v22  ;;  %9102 = vmatprep.subr.bf16.mxu0 %v10229_v11 }
 0x996   : > { %17327 = vst [vmem:[#allocation59_spill] sm:$0xff] %v15281_v8  ;;  %17328 = vst [vmem:[#allocation11_spill] sm:$0xff] %v15285_v36  ;;  %v6907_v24 = vpack.c.bf16 %v15252_v63, %v15247_v58  ;;  %v6908_v46 = vpack.c.bf16 %v15258_v7, %v15255_v0  ;;  %v6909_v37 = vpack.c.bf16 %v15264_v14, %v15261_v13  ;;  %9103 = vmatpush3.bf16.msra.mxu0 %v10230_v53 }
 0x997   : > { %17329 = vst [vmem:[#allocation87_spill] sm:$0xff] %v15288_v2  ;;  %17330 = vst [vmem:[#allocation26_spill] sm:$0xff] %v15291_v15  ;;  %v6910_v41 = vpack.c.bf16 %v15270_v55, %v15267_v59  ;;  %v6911_v27 = vpack.c.bf16 %v15278_v18, %v15273_v50  ;;  %v6912_v45 = vpack.c.bf16 %v15285_v36, %v15281_v8  ;;  %9104 = vmatprep.subr.bf16.mxu0 %v10231_v26 }
 0x998   : > { %v6913_v1 = vpack.c.bf16 %v15291_v15, %v15288_v2  ;;  %v15349_v10 = vrot.slane %v6930_v20, %v17299_v9  ;;  %v17332_v25 = vsub.s32 1, %v17331_v21 }
 0x99a   : > { %9105 = vmatpush3.bf16.msra.mxu0 %v10232_v35 }
 0x99b   : > { %7075 = vmatmul.mubr.bf16.gmra.mrb[192].mxu1 %v6900_v12  ;;  %9106 = vmatprep.subr.bf16.mxu0 %v10233_v34 }
 0x99c   : > { %7084 = vmatprep.mubr.bf16.mxu1 %v17284_v31 }
 0x99e   : > { %9107 = vmatpush3.bf16.msra.mxu0 %v10234_v32 }
 0x99f   : > { %9108 = vmatprep.subr.bf16.mxu0 %v10235_v48 }
 0x9a2   : > { %9109 = vmatpush3.bf16.msra.mxu0 %v10236_v39 }
 0x9a3   : > { %7085 = vmatmul.mubr.bf16.gmra.mrb[196].mxu1 %v6901_v60 }
 0x9a4   : > { %7094 = vmatprep.mubr.bf16.mxu1 %v17284_v31 }
 0x9ab   : > { %7095 = vmatmul.mubr.bf16.gmra.mrb[200].mxu1 %v6902_v38 }
 0x9ac   : > { %7104 = vmatprep.mubr.bf16.mxu1 %v17284_v31 }
 0x9b3   : > { %7105 = vmatmul.mubr.bf16.gmra.mrb[204].mxu1 %v6903_v61 }
 0x9b4   : > { %7114 = vmatprep.mubr.bf16.mxu1 %v17284_v31 }
 0x9bb   : > { %7115 = vmatmul.mubr.bf16.gmra.mrb[208].mxu1 %v6904_v5 }
 0x9bc   : > { %7124 = vmatprep.mubr.bf16.mxu1 %v17284_v31 }
 0x9c3   : > { %7125 = vmatmul.mubr.bf16.gmra.mrb[212].mxu1 %v6905_v16 }
 0x9c4   : > { %7134 = vmatprep.mubr.bf16.mxu1 %v17284_v31 }
 0x9cb   : > { %7135 = vmatmul.mubr.bf16.gmra.mrb[216].mxu1 %v6906_v56 }
 0x9cc   : > { %7144 = vmatprep.mubr.bf16.mxu1 %v17284_v31 }
 0x9d3   : > { %7145 = vmatmul.mubr.bf16.gmra.mrb[220].mxu1 %v6907_v24 }
 0x9d4   : > { %7154 = vmatprep.mubr.bf16.mxu1 %v17284_v31 }
 0x9db   : > { %7155 = vmatmul.mubr.bf16.gmra.mrb[224].mxu1 %v6908_v46 }
 0x9dc   : > { %7164 = vmatprep.mubr.bf16.mxu1 %v17284_v31 }
 0x9e3   : > { %7165 = vmatmul.mubr.bf16.gmra.mrb[228].mxu1 %v6909_v37 }
 0x9e4   : > { %7174 = vmatprep.mubr.bf16.mxu1 %v17284_v31 }
 0x9eb   : > { %7175 = vmatmul.mubr.bf16.gmra.mrb[232].mxu1 %v6910_v41 }
 0x9ec   : > { %7184 = vmatprep.mubr.bf16.mxu1 %v17284_v31 }
 0x9f3   : > { %7185 = vmatmul.mubr.bf16.gmra.mrb[236].mxu1 %v6911_v27 }
 0x9f4   : > { %7194 = vmatprep.mubr.bf16.mxu1 %v17284_v31 }
 0x9fb   : > { %7195 = vmatmul.mubr.bf16.gmra.mrb[240].mxu1 %v6912_v45 }
 0x9fc   : > { %7204 = vmatprep.mubr.bf16.mxu1 %v17284_v31  ;;  %v15353_v31 = vrot.slane %v6930_v20, %v17332_v25 }
 0xa03   : > { %7205 = vmatmul.mubr.bf16.gmra.mrb[244].mxu1 %v6913_v1 }
 0xa5e   : > { %v7056_v12 = vpop.f32.mrb[184].mxu1 }
 0xa5f   : > { %v15356_v60 = vadd.f32 %v7056_v12, %v15349_v10  ;;  %v7058_v38 = vpop.f32.mrb[185].mxu1 }
 0xa60   : > { %v15359_v61 = vadd.f32 %v7058_v38, %v15353_v31  ;;  %v7060_v5 = vpop.f32.mrb[186].mxu1 }
 0xa61   : > { %v7279_v16 = vmul.f32 0.044715, %v15356_v60  ;;  %v15363_v56 = vadd.f32 %v7060_v5, %v15349_v10  ;;  %v7062_v24 = vpop.f32.mrb[187].mxu1 }
 0xa62   : > { %v7280_v46 = vmul.f32 0.044715, %v15359_v61  ;;  %v15367_v37 = vadd.f32 %v7062_v24, %v15353_v31 }
 0xa63   : > { %v7343_v41 = vmul.f32 %v7279_v16, %v15356_v60  ;;  %v7281_v40 = vmul.f32 0.044715, %v15363_v56 }
 0xa64   : > { %v7344_v54 = vmul.f32 %v7280_v46, %v15359_v61  ;;  %v7282_v28 = vmul.f32 0.044715, %v15367_v37 }
 0xa65   : > { %v7407_v42 = vmul.f32 %v7343_v41, %v15356_v60  ;;  %v7345_v27 = vmul.f32 %v7281_v40, %v15363_v56 }
 0xa66   : > { %v7408_v11 = vmul.f32 %v7344_v54, %v15359_v61  ;;  %v7346_v53 = vmul.f32 %v7282_v28, %v15367_v37  ;;  %v7066_v26 = vpop.f32.mrb[188].mxu1 }
 0xa67   : > { %v7471_v45 = vadd.f32 %v7407_v42, %v15356_v60  ;;  %v7409_v35 = vmul.f32 %v7345_v27, %v15363_v56  ;;  %v15380_v34 = vadd.f32 %v7066_v26, %v15349_v10  ;;  %v7068_v32 = vpop.f32.mrb[189].mxu1 }
 0xa68   : > { %v7410_v48 = vmul.f32 %v7346_v53, %v15367_v37  ;;  %v15384_v1 = vadd.f32 %v7068_v32, %v15353_v31  ;;  %v7070_v39 = vpop.f32.mrb[190].mxu1  ;;  %v7472_v20 = vadd.f32 %v7408_v11, %v15359_v61 }
 0xa69   : > { %v7535_v21 = vmul.f32 0.7978846, %v7471_v45  ;;  %v7473_v25 = vadd.f32 %v7409_v35, %v15363_v56  ;;  %v7283_v12 = vmul.f32 0.044715, %v15380_v34  ;;  %v15390_v38 = vadd.f32 %v7070_v39, %v15349_v10  ;;  %v7072_v5 = vpop.f32.mrb[191].mxu1 }
 0xa6a   : > { %v7284_v16 = vmul.f32 0.044715, %v15384_v1  ;;  %v15394_v24 = vadd.f32 %v7072_v5, %v15353_v31  ;;  %v7474_v46 = vadd.f32 %v7410_v48, %v15367_v37  ;;  %v7536_v41 = vmul.f32 0.7978846, %v7472_v20 }
 0xa6b   : > { %10751 = vtanh.f32 %v7535_v21  ;;  %v7537_v40 = vmul.f32 0.7978846, %v7473_v25  ;;  %v7347_v54 = vmul.f32 %v7283_v12, %v15380_v34  ;;  %v7285_v28 = vmul.f32 0.044715, %v15390_v38 }
 0xa6c   : > { %v7348_v42 = vmul.f32 %v7284_v16, %v15384_v1  ;;  %v7286_v27 = vmul.f32 0.044715, %v15394_v24  ;;  %v7538_v11 = vmul.f32 0.7978846, %v7474_v46  ;;  %10753 = vtanh.f32 %v7536_v41 }
 0xa6d   : > { %10755 = vtanh.f32 %v7537_v40  ;;  %v7411_v53 = vmul.f32 %v7347_v54, %v15380_v34  ;;  %v7349_v26 = vmul.f32 %v7285_v28, %v15390_v38 }
 0xa6e   : > { %v7412_v45 = vmul.f32 %v7348_v42, %v15384_v1  ;;  %v7350_v35 = vmul.f32 %v7286_v27, %v15394_v24  ;;  %v7076_v32 = vpop.f32.mrb[192].mxu1  ;;  %10757 = vtanh.f32 %v7538_v11 }
 0xa6f   : > { %v7413_v48 = vmul.f32 %v7349_v26, %v15390_v38  ;;  %v7078_v39 = vpop.f32.mrb[193].mxu1  ;;  %v7475_v5 = vadd.f32 %v7411_v53, %v15380_v34  ;;  %v15419_v42 = vadd.f32 %v7076_v32, %v15349_v10 }
 0xa70   : > { %v7414_v20 = vmul.f32 %v7350_v35, %v15394_v24  ;;  %v15408_v21 = vadd.f32 %v7078_v39, %v15353_v31  ;;  %v7080_v25 = vpop.f32.mrb[194].mxu1  ;;  %v7476_v12 = vadd.f32 %v7412_v45, %v15384_v1  ;;  %v7215_v39 = vmul.f32 0.5, %v15356_v60 }
 0xa71   : > { %v7082_v16 = vpop.f32.mrb[195].mxu1  ;;  %v7477_v46 = vadd.f32 %v7413_v48, %v15390_v38  ;;  %v15422_v27 = vadd.f32 %v7080_v25, %v15349_v10  ;;  %v7539_v11 = vmul.f32 0.7978846, %v7475_v5  ;;  %v7218_v5 = vmul.f32 0.5, %v15367_v37 }
 0xa72   : > { %v7288_v41 = vmul.f32 0.044715, %v15408_v21  ;;  %v15415_v40 = vadd.f32 %v7082_v16, %v15353_v31  ;;  %v7478_v54 = vadd.f32 %v7414_v20, %v15394_v24  ;;  %v7540_v28 = vmul.f32 0.7978846, %v7476_v12 }
 0xa73   : > { %v7541_v26 = vmul.f32 0.7978846, %v7477_v46  ;;  %v7217_v20 = vmul.f32 0.5, %v15363_v56  ;;  %v7216_v12 = vmul.f32 0.5, %v15359_v61  ;;  %v7289_v61 = vmul.f32 0.044715, %v15422_v27 }
 0xa74   : > { %v7352_v53 = vmul.f32 %v7288_v41, %v15408_v21  ;;  %v7290_v45 = vmul.f32 0.044715, %v15415_v40  ;;  %v7542_v35 = vmul.f32 0.7978846, %v7478_v54  ;;  %10759 = vtanh.f32 %v7540_v28 }
 0xa75   : > { %v10752_v48 = vpop.eup %10751  ;;  %10761 = vtanh.f32 %v7539_v11  ;;  %v7287_v54 = vmul.f32 0.044715, %v15419_v42  ;;  %v7353_v50 = vmul.f32 %v7289_v61, %v15422_v27 }
 0xa76   : > { %v10754_v32 = vpop.eup %10753  ;;  %v7354_v25 = vmul.f32 %v7290_v45, %v15415_v40  ;;  %v7086_v16 = vpop.f32.mrb[196].mxu1  ;;  %v7663_v46 = vadd.f32 1.0, %v10752_v48  ;;  %10763 = vtanh.f32 %v7542_v35  ;;  %v7416_v28 = vmul.f32 %v7352_v53, %v15408_v21 }
 0xa77   : > { %v10756_v41 = vpop.eup %10755  ;;  %v7088_v9 = vpop.f32.mrb[197].mxu1  ;;  %v7664_v60 = vadd.f32 1.0, %v10754_v32  ;;  %10765 = vtanh.f32 %v7541_v26  ;;  %v15439_v35 = vadd.f32 %v7086_v16, %v15349_v10  ;;  %v7220_v53 = vmul.f32 0.5, %v15384_v1 }
 0xa78   : > { %v10758_v56 = vpop.eup %10757  ;;  %v7418_v11 = vmul.f32 %v7354_v25, %v15415_v40  ;;  %v15436_v45 = vadd.f32 %v7088_v9, %v15353_v31  ;;  %v7090_v15 = vpop.f32.mrb[198].mxu1  ;;  %v7665_v37 = vadd.f32 1.0, %v10756_v41  ;;  %v7222_v32 = vmul.f32 0.5, %v15394_v24 }
 0xa79   : > { %v7092_v48 = vpop.f32.mrb[199].mxu1  ;;  %v7666_v2 = vadd.f32 1.0, %v10758_v56  ;;  %v7727_v25 = vmul.f32 %v7663_v46, %v7215_v39  ;;  %v7351_v9 = vmul.f32 %v7287_v54, %v15419_v42  ;;  %v7728_v18 = vmul.f32 %v7664_v60, %v7216_v12 }
 0xa7a   : > { %v7292_v26 = vmul.f32 0.044715, %v15436_v45  ;;  %v15445_v36 = vadd.f32 %v7092_v48, %v15353_v31  ;;  %v7729_v8 = vmul.f32 %v7665_v37, %v7217_v20  ;;  %v7480_v16 = vadd.f32 %v7416_v28, %v15408_v21 }
 0xa7b   : > { %v7730_v41 = vmul.f32 %v7666_v2, %v7218_v5  ;;  %v7219_v1 = vmul.f32 0.5, %v15380_v34  ;;  %v7482_v24 = vadd.f32 %v7418_v11, %v15415_v40  ;;  %v7291_v55 = vmul.f32 0.044715, %v15439_v35 }
 0xa7c   : > { %v7791_v56 = vpack.c.bf16 %v7729_v8, %v7727_v25  ;;  %v7294_v48 = vmul.f32 0.044715, %v15445_v36  ;;  %v7544_v39 = vmul.f32 0.7978846, %v7480_v16  ;;  %v7356_v46 = vmul.f32 %v7292_v26, %v15436_v45 }
 0xa7d   : > { %v7792_v59 = vpack.c.bf16 %v7730_v41, %v7728_v18  ;;  %v15456_v2 = vadd.f32 %v7090_v15, %v15349_v10  ;;  %v7221_v5 = vmul.f32 0.5, %v15390_v38  ;;  %v7546_v8 = vmul.f32 0.7978846, %v7482_v24 }
 0xa7e   : > { %v10760_v20 = vpop.eup %10759  ;;  %v7096_v12 = vpop.f32.mrb[200].mxu1  ;;  %v7415_v34 = vmul.f32 %v7351_v9, %v15419_v42  ;;  %10767 = vtanh.f32 %v7544_v39  ;;  %v7417_v11 = vmul.f32 %v7353_v50, %v15422_v27  ;;  %v15465_v38 = vmul.f32 0.5, %v15419_v42 }
 0xa7f   : > { %v10762_v54 = vpop.eup %10761  ;;  %v15461_v28 = vadd.f32 %v7096_v12, %v15349_v10  ;;  %v7098_v60 = vpop.f32.mrb[201].mxu1  ;;  %7990 = vmatprep.mubr.bf16.mxu0 %v7792_v59  ;;  %v7668_v18 = vadd.f32 1.0, %v10760_v20  ;;  %10769 = vtanh.f32 %v7546_v8  ;;  %v7355_v25 = vmul.f32 %v7291_v55, %v15439_v35 }
 0xa80   : > { %v10764_v61 = vpop.eup %10763  ;;  %v7100_v37 = vpop.f32.mrb[202].mxu1  ;;  %7991 = vmatmul.mubr.bf16.vlgmr.msra.gmra.mrb[200].mxu0 %v7791_v56  ;;  %v7667_v15 = vadd.f32 1.0, %v10762_v54  ;;  %v7358_v9 = vmul.f32 %v7294_v48, %v15445_v36  ;;  %v15470_v41 = vadd.f32 %v7098_v60, %v15353_v31  ;;  %v7420_v24 = vmul.f32 %v7356_v46, %v15436_v45 }
 0xa81   : > { %v10766_v26 = vpop.eup %10765  ;;  %v7102_v59 = vpop.f32.mrb[203].mxu1  ;;  %v7670_v16 = vadd.f32 1.0, %v10764_v61  ;;  %v7293_v50 = vmul.f32 0.044715, %v15456_v2  ;;  %v15475_v56 = vadd.f32 %v7100_v37, %v15349_v10  ;;  %v7295_v20 = vmul.f32 0.044715, %v15461_v28 }
 0xa82   : > { %v7669_v39 = vadd.f32 1.0, %v10766_v26  ;;  %v7732_v12 = vmul.f32 %v7668_v18, %v7220_v53  ;;  %v7479_v55 = vadd.f32 %v7415_v34, %v15419_v42  ;;  %v15480_v48 = vadd.f32 %v7102_v59, %v15353_v31 }
 0xa83   : > { %v7734_v8 = vmul.f32 %v7670_v16, %v7222_v32  ;;  %v7731_v54 = vmul.f32 %v7667_v15, %v7219_v1  ;;  %v7481_v61 = vadd.f32 %v7417_v11, %v15422_v27  ;;  %v7422_v46 = vmul.f32 %v7358_v9, %v15445_v36 }
 0xa84   : > { %v7733_v60 = vmul.f32 %v7669_v39, %v7221_v5  ;;  %v7296_v14 = vmul.f32 0.044715, %v15470_v41  ;;  %v7543_v13 = vmul.f32 0.7978846, %v7479_v55  ;;  %v7297_v26 = vmul.f32 0.044715, %v15475_v56 }
 0xa85   : > { %v7794_v37 = vpack.c.bf16 %v7734_v8, %v7732_v12  ;;  %v7224_v32 = vmul.f32 0.5, %v15408_v21  ;;  %v7545_v42 = vmul.f32 0.7978846, %v7481_v61  ;;  %v7357_v34 = vmul.f32 %v7293_v50, %v15456_v2 }
 0xa86   : > { %v7106_v7 = vpop.f32.mrb[204].mxu1  ;;  %v7793_v53 = vpack.c.bf16 %v7733_v60, %v7731_v54  ;;  %v7359_v1 = vmul.f32 %v7295_v20, %v15461_v28  ;;  %v7226_v18 = vmul.f32 0.5, %v15415_v40  ;;  %10771 = vtanh.f32 %v7543_v13 }
 0xa87   : > { %v7108_v5 = vpop.f32.mrb[205].mxu1  ;;  %7998 = vmatprep.mubr.bf16.mxu0 %v7794_v37  ;;  %v7419_v11 = vmul.f32 %v7355_v25, %v15439_v35  ;;  %v7298_v15 = vmul.f32 0.044715, %v15480_v48  ;;  %v15493_v9 = vadd.f32 %v7106_v7, %v15349_v10  ;;  %10773 = vtanh.f32 %v7545_v42 }
 0xa88   : > { %v7110_v59 = vpop.f32.mrb[206].mxu1  ;;  %7999 = vmatmul.mubr.bf16.gmra.mrb[204].mxu0 %v7793_v53  ;;  %v10768_v21 = vpop.eup %10767  ;;  %v7360_v16 = vmul.f32 %v7296_v14, %v15470_v41  ;;  %v7225_v39 = vmul.f32 0.5, %v15422_v27  ;;  %v7484_v20 = vadd.f32 %v7420_v24, %v15436_v45  ;;  %v7486_v13 = vadd.f32 %v7422_v46, %v15445_v36 }
 0xa89   : > { %v7112_v50 = vpop.f32.mrb[207].mxu1  ;;  %v10770_v40 = vpop.eup %10769  ;;  %v7361_v25 = vmul.f32 %v7297_v26, %v15475_v56  ;;  %v15501_v12 = vadd.f32 %v7108_v5, %v15353_v31  ;;  %v15504_v7 = vadd.f32 %v7110_v59, %v15349_v10  ;;  %v7672_v8 = vadd.f32 1.0, %v10768_v21 }
 0xa8a   : > { %v7421_v55 = vmul.f32 %v7357_v34, %v15456_v2  ;;  %v15508_v14 = vmul.f32 %v7359_v1, %v15461_v28  ;;  %v7674_v27 = vadd.f32 1.0, %v10770_v40  ;;  %v7548_v54 = vmul.f32 0.7978846, %v7484_v20 }
 0xa8b   : > { %v7362_v24 = vmul.f32 %v7298_v15, %v15480_v48  ;;  %v7299_v60 = vmul.f32 0.044715, %v15493_v9  ;;  %v15513_v61 = vadd.f32 %v7112_v50, %v15353_v31  ;;  %v7550_v46 = vmul.f32 0.7978846, %v7486_v13 }
 0xa8c   : > { %v7424_v37 = vmul.f32 %v7360_v16, %v15470_v41  ;;  %v7736_v26 = vmul.f32 %v7672_v8, %v7224_v32  ;;  %v7738_v53 = vmul.f32 %v7674_v27, %v7226_v18  ;;  %10775 = vtanh.f32 %v7548_v54 }
 0xa8d   : > { %v15517_v42 = vmul.f32 %v7361_v25, %v15475_v56  ;;  %v7300_v34 = vmul.f32 0.044715, %v15501_v12  ;;  %v7301_v1 = vmul.f32 0.044715, %v15504_v7  ;;  %10777 = vtanh.f32 %v7550_v46 }
 0xa8e   : > { %v7116_v5 = vpop.f32.mrb[208].mxu1  ;;  %v7796_v21 = vpack.c.bf16 %v7738_v53, %v7736_v26  ;;  %v7228_v50 = vmul.f32 0.5, %v15436_v45  ;;  %v7483_v32 = vadd.f32 %v7419_v11, %v15439_v35  ;;  %v7426_v18 = vmul.f32 %v7362_v24, %v15480_v48 }
 0xa8f   : > { %v15522_v15 = vadd.f32 %v7116_v5, %v15349_v10  ;;  %v7118_v59 = vpop.f32.mrb[209].mxu1  ;;  %v7363_v16 = vmul.f32 %v7299_v60, %v15493_v9  ;;  %v7302_v20 = vmul.f32 0.044715, %v15513_v61  ;;  %v7485_v40 = vadd.f32 %v7421_v55, %v15456_v2 }
 0xa90   : > { %v7120_v13 = vpop.f32.mrb[210].mxu1  ;;  %v10772_v25 = vpop.eup %10771  ;;  %v15531_v8 = vadd.f32 %v7118_v59, %v15353_v31  ;;  %8006 = vmatprep.mubr.bf16.mxu0 %v7796_v21  ;;  %v7230_v54 = vmul.f32 0.5, %v15445_v36  ;;  %v15535_v45 = vmul.f32 0.5, %v15439_v35  ;;  %v7547_v11 = vmul.f32 0.7978846, %v7483_v32 }
 0xa91   : > { %v7122_v27 = vpop.f32.mrb[211].mxu1  ;;  %v10774_v24 = vpop.eup %10773  ;;  %v7364_v60 = vmul.f32 %v7300_v34, %v15501_v12  ;;  %v7365_v46 = vmul.f32 %v7301_v1, %v15504_v7  ;;  %v7671_v26 = vadd.f32 1.0, %v10772_v25  ;;  %v7549_v53 = vmul.f32 0.7978846, %v7485_v40 }
 0xa92   : > { %v7303_v55 = vmul.f32 0.044715, %v15522_v15  ;;  %v15541_v5 = vadd.f32 %v7120_v13, %v15349_v10  ;;  %v7673_v59 = vadd.f32 1.0, %v10774_v24  ;;  %10779 = vtanh.f32 %v7547_v11 }
 0xa93   : > { %v15544_v36 = vmul.f32 %v7363_v16, %v15493_v9  ;;  %v7366_v35 = vmul.f32 %v7302_v20, %v15513_v61  ;;  %v15548_v21 = vadd.f32 %v7122_v27, %v15353_v31  ;;  %10781 = vtanh.f32 %v7549_v53 }
 0xa94   : > { %v7304_v34 = vmul.f32 0.044715, %v15531_v8  ;;  %v7735_v1 = vmul.f32 %v7671_v26, %v15465_v38  ;;  %v7737_v32 = vmul.f32 %v7673_v59, %v7225_v39  ;;  %v7488_v40 = vadd.f32 %v7424_v37, %v15470_v41 }
 0xa95   : > { %v15554_v13 = vmul.f32 %v7364_v60, %v15501_v12  ;;  %v15557_v25 = vmul.f32 %v7365_v46, %v15504_v7  ;;  %v7229_v20 = vmul.f32 0.5, %v15456_v2  ;;  %v7490_v27 = vadd.f32 %v7426_v18, %v15480_v48 }
 0xa96   : > { %v7126_v16 = vpop.f32.mrb[212].mxu1  ;;  %v10776_v11 = vpop.eup %10775  ;;  %v7367_v24 = vmul.f32 %v7303_v55, %v15522_v15  ;;  %v7305_v53 = vmul.f32 0.044715, %v15541_v5  ;;  %v7795_v38 = vpack.c.bf16 %v7737_v32, %v7735_v1  ;;  %v7552_v26 = vmul.f32 0.7978846, %v7488_v40 }
 0xa97   : > { %v7128_v39 = vpop.f32.mrb[213].mxu1  ;;  %v10778_v37 = vpop.eup %10777  ;;  %v7430_v60 = vmul.f32 %v7366_v35, %v15513_v61  ;;  %v7306_v59 = vmul.f32 0.044715, %v15548_v21  ;;  %v7676_v46 = vadd.f32 1.0, %v10776_v11  ;;  %v7554_v63 = vmul.f32 0.7978846, %v7490_v27 }
 0xa98   : > { %v7130_v0 = vpop.f32.mrb[214].mxu1  ;;  %v7368_v2 = vmul.f32 %v7304_v34, %v15531_v8  ;;  %8007 = vmatmul.mubr.bf16.gmra.mrb[208].mxu0 %v7795_v38  ;;  %v15567_v18 = vadd.f32 %v7126_v16, %v15349_v10  ;;  %v7678_v55 = vadd.f32 1.0, %v10778_v37  ;;  %10783 = vtanh.f32 %v7552_v26 }
 0xa99   : > { %v7132_v58 = vpop.f32.mrb[215].mxu1  ;;  %v15570_v1 = vadd.f32 %v7128_v39, %v15353_v31  ;;  %v7232_v32 = vmul.f32 0.5, %v15470_v41  ;;  %v7234_v35 = vmul.f32 0.5, %v15480_v48  ;;  %10785 = vtanh.f32 %v7554_v63 }
 0xa9a   : > { %v15575_v40 = vmul.f32 %v7367_v24, %v15522_v15  ;;  %v7369_v34 = vmul.f32 %v7305_v53, %v15541_v5  ;;  %v7740_v27 = vmul.f32 %v7676_v46, %v7228_v50  ;;  %v7742_v11 = vmul.f32 %v7678_v55, %v7230_v54 }
 0xa9b   : > { %v7370_v16 = vmul.f32 %v7306_v59, %v15548_v21  ;;  %v15580_v38 = vadd.f32 %v7130_v0, %v15349_v10  ;;  %v7487_v39 = vadd.f32 %v15508_v14, %v15461_v28  ;;  %v7489_v41 = vadd.f32 %v15517_v42, %v15475_v56 }
 0xa9c   : > { %v10780_v48 = vpop.eup %10779  ;;  %v15587_v63 = vmul.f32 %v7368_v2, %v15531_v8  ;;  %v7307_v24 = vmul.f32 0.044715, %v15567_v18  ;;  %v7798_v53 = vpack.c.bf16 %v7742_v11, %v7740_v27  ;;  %v15591_v50 = vmul.f32 0.5, %v15461_v28 }
 0xa9d   : > { %v10782_v54 = vpop.eup %10781  ;;  %v7308_v0 = vmul.f32 0.044715, %v15570_v1  ;;  %v7675_v26 = vadd.f32 1.0, %v10780_v48  ;;  %v15595_v37 = vadd.f32 %v7132_v58, %v15353_v31  ;;  %v7551_v59 = vmul.f32 0.7978846, %v7487_v39 }
 0xa9e   : > { %v7136_v14 = vpop.f32.mrb[216].mxu1  ;;  %v15598_v42 = vmul.f32 %v7369_v34, %v15541_v5  ;;  %8014 = vmatprep.mubr.bf16.mxu0 %v7798_v53  ;;  %v7677_v46 = vadd.f32 1.0, %v10782_v54  ;;  %v7553_v28 = vmul.f32 0.7978846, %v7489_v41  ;;  %v15604_v27 = vmul.f32 %v7370_v16, %v15548_v21 }
 0xa9f   : > { %v15601_v2 = vadd.f32 %v7136_v14, %v15349_v10  ;;  %v7138_v55 = vpop.f32.mrb[217].mxu1  ;;  %v7309_v11 = vmul.f32 0.044715, %v15580_v38  ;;  %10787 = vtanh.f32 %v7551_v59  ;;  %v7371_v34 = vmul.f32 %v7307_v24, %v15567_v18 }
 0xaa0   : > { %v15608_v58 = vadd.f32 %v7138_v55, %v15353_v31  ;;  %v7140_v48 = vpop.f32.mrb[218].mxu1  ;;  %v7739_v39 = vmul.f32 %v7675_v26, %v15535_v45  ;;  %v7741_v53 = vmul.f32 %v7677_v46, %v7229_v20  ;;  %10789 = vtanh.f32 %v7553_v28 }
 0xaa1   : > { %v7142_v54 = vpop.f32.mrb[219].mxu1  ;;  %v7372_v14 = vmul.f32 %v7308_v0, %v15570_v1  ;;  %v7310_v41 = vmul.f32 0.044715, %v15595_v37  ;;  %v15615_v16 = vadd.f32 %v7140_v48, %v15349_v10  ;;  %v7492_v55 = vadd.f32 %v15554_v13, %v15501_v12 }
 0xaa2   : > { %v10784_v30 = vpop.eup %10783  ;;  %v7797_v22 = vpack.c.bf16 %v7741_v53, %v7739_v39  ;;  %v7311_v59 = vmul.f32 0.044715, %v15601_v2  ;;  %v15621_v24 = vadd.f32 %v7142_v54, %v15353_v31  ;;  %v7494_v45 = vadd.f32 %v7430_v60, %v15513_v61 }
 0xaa3   : > { %v10786_v20 = vpop.eup %10785  ;;  %v7373_v0 = vmul.f32 %v7309_v11, %v15580_v38  ;;  %v7312_v26 = vmul.f32 0.044715, %v15608_v58  ;;  %v7680_v46 = vadd.f32 1.0, %v10784_v30  ;;  %v7556_v28 = vmul.f32 0.7978846, %v7492_v55 }
 0xaa4   : > { %v15627_v48 = vmul.f32 %v7371_v34, %v15567_v18  ;;  %8015 = vmatmul.mubr.bf16.gmra.mrb[212].mxu0 %v7797_v22  ;;  %v7682_v13 = vadd.f32 1.0, %v10786_v20  ;;  %v7233_v39 = vmul.f32 0.5, %v15475_v56  ;;  %v7558_v53 = vmul.f32 0.7978846, %v7494_v45 }
 0xaa5   : > { %v7374_v54 = vmul.f32 %v7310_v41, %v15595_v37  ;;  %v7313_v4 = vmul.f32 0.044715, %v15615_v16  ;;  %v15633_v52 = vmul.f32 0.5, %v15501_v12  ;;  %10791 = vtanh.f32 %v7556_v28 }
 0xaa6   : > { %v7146_v60 = vpop.f32.mrb[220].mxu1  ;;  %v7744_v11 = vmul.f32 %v7680_v46, %v7232_v32  ;;  %v7746_v30 = vmul.f32 %v7682_v13, %v7234_v35  ;;  %v7314_v55 = vmul.f32 0.044715, %v15621_v24  ;;  %10793 = vtanh.f32 %v7558_v53 }
 0xaa7   : > { %v7148_v34 = vpop.f32.mrb[221].mxu1  ;;  %v15637_v22 = vmul.f32 %v7372_v14, %v15570_v1  ;;  %v15640_v56 = vmul.f32 %v7373_v0, %v15580_v38  ;;  %v7375_v41 = vmul.f32 %v7311_v59, %v15601_v2  ;;  %v7376_v45 = vmul.f32 %v7312_v26, %v15608_v58 }
 0xaa8   : > { %v7150_v20 = vpop.f32.mrb[222].mxu1  ;;  %v7800_v12 = vpack.c.bf16 %v7746_v30, %v7744_v11  ;;  %v15645_v28 = vadd.f32 %v7146_v60, %v15349_v10  ;;  %v15648_v32 = vadd.f32 %v7148_v34, %v15353_v31  ;;  %v7491_v35 = vadd.f32 %v15544_v36, %v15493_v9 }
 0xaa9   : > { %v7152_v14 = vpop.f32.mrb[223].mxu1  ;;  %v10788_v46 = vpop.eup %10787  ;;  %v15653_v0 = vmul.f32 %v7374_v54, %v15595_v37  ;;  %v7377_v59 = vmul.f32 %v7313_v4, %v15615_v16  ;;  %v15657_v26 = vadd.f32 %v7150_v20, %v15349_v10  ;;  %v7493_v13 = vadd.f32 %v15557_v25, %v15504_v7 }
 0xaaa   : > { %v10790_v53 = vpop.eup %10789  ;;  %8022 = vmatprep.mubr.bf16.mxu0 %v7800_v12  ;;  %v7679_v60 = vadd.f32 1.0, %v10788_v46  ;;  %v7378_v11 = vmul.f32 %v7314_v55, %v15621_v24  ;;  %v7555_v30 = vmul.f32 0.7978846, %v7491_v35  ;;  %v15663_v36 = vadd.f32 %v7152_v14, %v15353_v31 }
 0xaab   : > { %v15666_v54 = vmul.f32 %v7375_v41, %v15601_v2  ;;  %v7681_v34 = vadd.f32 1.0, %v10790_v53  ;;  %v7238_v4 = vmul.f32 0.5, %v15513_v61  ;;  %v7557_v20 = vmul.f32 0.7978846, %v7493_v13 }
 0xaac   : > { %v15670_v23 = vmul.f32 %v7376_v45, %v15608_v58  ;;  %v7315_v25 = vmul.f32 0.044715, %v15645_v28  ;;  %v7316_v12 = vmul.f32 0.044715, %v15648_v32  ;;  %10795 = vtanh.f32 %v7555_v30 }
 0xaad   : > { %v7743_v55 = vmul.f32 %v7679_v60, %v15591_v50  ;;  %v7745_v35 = vmul.f32 %v7681_v34, %v7233_v39  ;;  %v7317_v14 = vmul.f32 0.044715, %v15657_v26  ;;  %10797 = vtanh.f32 %v7557_v20 }
 0xaae   : > { %v7156_v41 = vpop.f32.mrb[224].mxu1  ;;  %v15677_v46 = vmul.f32 %v7377_v59, %v15615_v16  ;;  %v15680_v61 = vmul.f32 %v7378_v11, %v15621_v24  ;;  %v7318_v45 = vmul.f32 0.044715, %v15663_v36  ;;  %v7496_v53 = vadd.f32 %v15587_v63, %v15531_v8 }
 0xaaf   : > { %v7158_v13 = vpop.f32.mrb[225].mxu1  ;;  %v10792_v30 = vpop.eup %10791  ;;  %v7799_v29 = vpack.c.bf16 %v7745_v35, %v7743_v55  ;;  %v7235_v50 = vmul.f32 0.5, %v15493_v9  ;;  %v7237_v39 = vmul.f32 0.5, %v15504_v7  ;;  %v7498_v60 = vadd.f32 %v15604_v27, %v15548_v21 }
 0xab0   : > { %v7160_v59 = vpop.f32.mrb[226].mxu1  ;;  %v10794_v34 = vpop.eup %10793  ;;  %v7379_v11 = vmul.f32 %v7315_v25, %v15645_v28  ;;  %v7684_v20 = vadd.f32 1.0, %v10792_v30  ;;  %v15691_v6 = vadd.f32 %v7156_v41, %v15349_v10  ;;  %v7560_v49 = vmul.f32 0.7978846, %v7496_v53 }
 0xab1   : > { %v7162_v47 = vpop.f32.mrb[227].mxu1  ;;  %8023 = vmatmul.mubr.bf16.gmra.mrb[216].mxu0 %v7799_v29  ;;  %v7380_v63 = vmul.f32 %v7316_v12, %v15648_v32  ;;  %v7686_v55 = vadd.f32 1.0, %v10794_v34  ;;  %v7381_v9 = vmul.f32 %v7317_v14, %v15657_v26  ;;  %v7562_v7 = vmul.f32 0.7978846, %v7498_v60 }
 0xab2   : > { %v7382_v35 = vmul.f32 %v7318_v45, %v15663_v36  ;;  %v15697_v27 = vadd.f32 %v7158_v13, %v15353_v31  ;;  %v15700_v25 = vmul.f32 0.5, %v15531_v8  ;;  %10799 = vtanh.f32 %v7560_v49 }
 0xab3   : > { %v7748_v41 = vmul.f32 %v7684_v20, %v15633_v52  ;;  %v7750_v53 = vmul.f32 %v7686_v55, %v7238_v4  ;;  %10801 = vtanh.f32 %v7562_v7  ;;  %v15704_v29 = vadd.f32 %v7160_v59, %v15349_v10 }
 0xab4   : > { %v15707_v12 = vmul.f32 %v7379_v11, %v15645_v28  ;;  %v7319_v14 = vmul.f32 0.044715, %v15691_v6  ;;  %v7495_v45 = vadd.f32 %v15575_v40, %v15522_v15  ;;  %v7497_v8 = vadd.f32 %v15598_v42, %v15541_v5 }
 0xab5   : > { %v15715_v49 = vmul.f32 %v7380_v63, %v15648_v32  ;;  %v7802_v52 = vpack.c.bf16 %v7750_v53, %v7748_v41  ;;  %v15718_v4 = vmul.f32 %v7381_v9, %v15657_v26  ;;  %v15721_v13 = vadd.f32 %v7162_v47, %v15353_v31 }
 0xab6   : > { %v7166_v30 = vpop.f32.mrb[228].mxu1  ;;  %v10796_v60 = vpop.eup %10795  ;;  %v15724_v59 = vmul.f32 %v7382_v35, %v15663_v36  ;;  %v7242_v40 = vmul.f32 0.5, %v15548_v21  ;;  %v7559_v34 = vmul.f32 0.7978846, %v7495_v45  ;;  %v7561_v11 = vmul.f32 0.7978846, %v7497_v8 }
 0xab7   : > { %v7168_v42 = vpop.f32.mrb[229].mxu1  ;;  %v10798_v20 = vpop.eup %10797  ;;  %8030 = vmatprep.mubr.bf16.mxu0 %v7802_v52  ;;  %v7683_v63 = vadd.f32 1.0, %v10796_v60  ;;  %v7320_v55 = vmul.f32 0.044715, %v15697_v27  ;;  %v7321_v9 = vmul.f32 0.044715, %v15704_v29  ;;  %v15730_v47 = vadd.f32 %v7166_v30, %v15349_v10 }
 0xab8   : > { %v7170_v7 = vpop.f32.mrb[230].mxu1  ;;  %v7685_v41 = vadd.f32 1.0, %v10798_v20  ;;  %v7383_v35 = vmul.f32 %v7319_v14, %v15691_v6  ;;  %10803 = vtanh.f32 %v7559_v34  ;;  %v7500_v21 = vadd.f32 %v15637_v22, %v15570_v1 }
 0xab9   : > { %v7172_v53 = vpop.f32.mrb[231].mxu1  ;;  %v15736_v45 = vmul.f32 0.5, %v15522_v15  ;;  %10805 = vtanh.f32 %v7561_v11  ;;  %v7322_v8 = vmul.f32 0.044715, %v15721_v13  ;;  %v15740_v52 = vadd.f32 %v7168_v42, %v15353_v31 }
 0xaba   : > { %v7747_v30 = vmul.f32 %v7683_v63, %v7235_v50  ;;  %v7749_v60 = vmul.f32 %v7685_v41, %v7237_v39  ;;  %v7502_v20 = vadd.f32 %v15653_v0, %v15595_v37  ;;  %v7564_v14 = vmul.f32 0.7978846, %v7500_v21 }
 0xabb   : > { %v7384_v34 = vmul.f32 %v7320_v55, %v15697_v27  ;;  %v7385_v22 = vmul.f32 %v7321_v9, %v15704_v29  ;;  %v7241_v3 = vmul.f32 0.5, %v15541_v5  ;;  %v7323_v15 = vmul.f32 0.044715, %v15730_v47 }
 0xabc   : > { %v10800_v11 = vpop.eup %10799  ;;  %v7801_v19 = vpack.c.bf16 %v7749_v60, %v7747_v30  ;;  %v15749_v57 = vmul.f32 %v7383_v35, %v15691_v6  ;;  %v7566_v42 = vmul.f32 0.7978846, %v7502_v20  ;;  %10807 = vtanh.f32 %v7564_v14 }
 0xabd   : > { %v10802_v50 = vpop.eup %10801  ;;  %v7688_v39 = vadd.f32 1.0, %v10800_v11  ;;  %v7386_v0 = vmul.f32 %v7322_v8, %v15721_v13  ;;  %v7324_v63 = vmul.f32 0.044715, %v15740_v52  ;;  %v15754_v55 = vadd.f32 %v7170_v7, %v15349_v10 }
 0xabe   : > { %v7176_v9 = vpop.f32.mrb[232].mxu1  ;;  %8031 = vmatmul.mubr.bf16.gmra.mrb[220].mxu0 %v7801_v19  ;;  %v7690_v5 = vadd.f32 1.0, %v10802_v50  ;;  %10809 = vtanh.f32 %v7566_v42  ;;  %v7499_v41 = vadd.f32 %v15627_v48, %v15567_v18  ;;  %v7501_v35 = vadd.f32 %v15640_v56, %v15580_v38 }
 0xabf   : > { %v7178_v21 = vpop.f32.mrb[233].mxu1  ;;  %v15761_v30 = vmul.f32 %v7384_v34, %v15697_v27  ;;  %v15764_v8 = vmul.f32 %v7385_v22, %v15704_v29  ;;  %v7387_v7 = vmul.f32 %v7323_v15, %v15730_v47  ;;  %v7244_v60 = vmul.f32 0.5, %v15570_v1 }
 0xac0   : > { %v7180_v19 = vpop.f32.mrb[234].mxu1  ;;  %v7752_v20 = vmul.f32 %v7688_v39, %v15700_v25  ;;  %v7754_v14 = vmul.f32 %v7690_v5, %v7242_v40  ;;  %v7563_v11 = vmul.f32 0.7978846, %v7499_v41  ;;  %v7565_v48 = vmul.f32 0.7978846, %v7501_v35 }
 0xac1   : > { %v7182_v42 = vpop.f32.mrb[235].mxu1  ;;  %v7388_v56 = vmul.f32 %v7324_v63, %v15740_v52  ;;  %v7325_v50 = vmul.f32 0.044715, %v15754_v55  ;;  %v15772_v34 = vadd.f32 %v7172_v53, %v15353_v31  ;;  %v15775_v22 = vadd.f32 %v7176_v9, %v15349_v10 }
 0xac2   : > { %v10804_v15 = vpop.eup %10803  ;;  %v7804_v51 = vpack.c.bf16 %v7754_v14, %v7752_v20  ;;  %v15778_v1 = vmul.f32 %v7386_v0, %v15721_v13  ;;  %v7246_v25 = vmul.f32 0.5, %v15595_v37  ;;  %10811 = vtanh.f32 %v7563_v11 }
 0xac3   : > { %v10806_v40 = vpop.eup %10805  ;;  %v7687_v39 = vadd.f32 1.0, %v10804_v15  ;;  %v15782_v63 = vmul.f32 0.5, %v15567_v18  ;;  %10813 = vtanh.f32 %v7565_v48  ;;  %v15785_v53 = vadd.f32 %v7178_v21, %v15353_v31 }
 0xac4   : > { %8038 = vmatprep.mubr.bf16.mxu0 %v7804_v51  ;;  %v7689_v9 = vadd.f32 1.0, %v10806_v40  ;;  %v15788_v5 = vmul.f32 %v7387_v7, %v15730_v47  ;;  %v7504_v0 = vadd.f32 %v15670_v23, %v15608_v58  ;;  %v7506_v37 = vadd.f32 %v15680_v61, %v15621_v24 }
 0xac5   : > { %v15795_v41 = vmul.f32 %v7388_v56, %v15740_v52  ;;  %v7389_v18 = vmul.f32 %v7325_v50, %v15754_v55  ;;  %v7326_v35 = vmul.f32 0.044715, %v15772_v34  ;;  %v7327_v21 = vmul.f32 0.044715, %v15775_v22 }
 0xac6   : > { %v7186_v51 = vpop.f32.mrb[236].mxu1  ;;  %v10808_v20 = vpop.eup %10807  ;;  %v7751_v7 = vmul.f32 %v7687_v39, %v15736_v45  ;;  %v7753_v14 = vmul.f32 %v7689_v9, %v7241_v3  ;;  %v7568_v11 = vmul.f32 0.7978846, %v7504_v0  ;;  %v7570_v48 = vmul.f32 0.7978846, %v7506_v37 }
 0xac7   : > { %v7188_v23 = vpop.f32.mrb[237].mxu1  ;;  %v7692_v15 = vadd.f32 1.0, %v10808_v20  ;;  %v7245_v61 = vmul.f32 0.5, %v15580_v38  ;;  %v7328_v56 = vmul.f32 0.044715, %v15785_v53  ;;  %v15804_v40 = vadd.f32 %v7180_v19, %v15349_v10 }
 0xac8   : > { %v15806_v50 = vpop.f32.mrb[238].mxu1  ;;  %v10810_v43 = vpop.eup %10809  ;;  %v7803_v33 = vpack.c.bf16 %v7753_v14, %v7751_v7  ;;  %10815 = vtanh.f32 %v7568_v11  ;;  %v7503_v45 = vadd.f32 %v15666_v54, %v15601_v2  ;;  %v7505_v3 = vadd.f32 %v15677_v46, %v15615_v16 }
 0xac9   : > { %v15812_v39 = vpop.f32.mrb[239].mxu1  ;;  %v7694_v9 = vadd.f32 1.0, %v10810_v43  ;;  %v15815_v38 = vmul.f32 %v7389_v18, %v15754_v55  ;;  %v7390_v19 = vmul.f32 %v7326_v35, %v15772_v34  ;;  %10817 = vtanh.f32 %v7570_v48 }
 0xaca   : > { %8039 = vmatmul.mubr.bf16.gmra.mrb[224].mxu0 %v7803_v33  ;;  %v7391_v0 = vmul.f32 %v7327_v21, %v15775_v22  ;;  %v7567_v37 = vmul.f32 0.7978846, %v7503_v45  ;;  %v7569_v20 = vmul.f32 0.7978846, %v7505_v3  ;;  %v15820_v7 = vadd.f32 %v7182_v42, %v15353_v31 }
 0xacb   : > { %v7756_v54 = vmul.f32 %v7692_v15, %v7244_v60  ;;  %v7758_v14 = vmul.f32 %v7694_v9, %v7246_v25  ;;  %v7392_v46 = vmul.f32 %v7328_v56, %v15785_v53  ;;  %v15824_v43 = vadd.f32 %v7186_v51, %v15349_v10 }
 0xacc   : > { %v10812_v18 = vpop.eup %10811  ;;  %v7248_v11 = vmul.f32 0.5, %v15608_v58  ;;  %v7250_v35 = vmul.f32 0.5, %v15621_v24  ;;  %v7329_v33 = vmul.f32 0.044715, %v15804_v40  ;;  %10819 = vtanh.f32 %v7567_v37 }
 0xacd   : > { %v10814_v21 = vpop.eup %10813  ;;  %v7806_v48 = vpack.c.bf16 %v7758_v14, %v7756_v54  ;;  %v7691_v45 = vadd.f32 1.0, %v10812_v18  ;;  %10821 = vtanh.f32 %v7569_v20  ;;  %v15830_v60 = vadd.f32 %v7188_v23, %v15353_v31 }
 0xace   : > { %v7196_v42 = vpop.f32.mrb[240].mxu1  ;;  %v7693_v25 = vadd.f32 1.0, %v10814_v21  ;;  %v15833_v51 = vmul.f32 %v7390_v19, %v15772_v34  ;;  %v7330_v15 = vmul.f32 0.044715, %v15820_v7  ;;  %v7508_v58 = vadd.f32 %v15715_v49, %v15648_v32 }
 0xacf   : > { %v15838_v24 = vpop.f32.mrb[241].mxu1  ;;  %8046 = vmatprep.mubr.bf16.mxu0 %v7806_v48  ;;  %v15841_v56 = vmul.f32 %v7391_v0, %v15775_v22  ;;  %v15844_v3 = vmul.f32 %v7392_v46, %v15785_v53  ;;  %v7331_v23 = vmul.f32 0.044715, %v15824_v43  ;;  %v7510_v9 = vadd.f32 %v15724_v59, %v15663_v36 }
 0xad0   : > { %v7200_v19 = vpop.f32.mrb[242].mxu1  ;;  %v7755_v37 = vmul.f32 %v7691_v45, %v15782_v63  ;;  %v7757_v20 = vmul.f32 %v7693_v25, %v7245_v61  ;;  %v7247_v49 = vmul.f32 0.5, %v15601_v2  ;;  %v7572_v54 = vmul.f32 0.7978846, %v7508_v58 }
 0xad1   : > { %v15851_v14 = vpop.f32.mrb[243].mxu1  ;;  %v7393_v0 = vmul.f32 %v7329_v33, %v15804_v40  ;;  %v7249_v18 = vmul.f32 0.5, %v15615_v16  ;;  %v7332_v46 = vmul.f32 0.044715, %v15830_v60  ;;  %v7574_v21 = vmul.f32 0.7978846, %v7510_v9 }
 0xad2   : > { %v10816_v48 = vpop.eup %10815  ;;  %v7805_v62 = vpack.c.bf16 %v7757_v20, %v7755_v37  ;;  %v7394_v59 = vmul.f32 %v7330_v15, %v15820_v7  ;;  %10823 = vtanh.f32 %v7572_v54  ;;  %v7507_v63 = vadd.f32 %v15707_v12, %v15645_v28 }
 0xad3   : > { %v10818_v61 = vpop.eup %10817  ;;  %v7696_v2 = vadd.f32 1.0, %v10816_v48  ;;  %v7395_v45 = vmul.f32 %v7331_v23, %v15824_v43  ;;  %10825 = vtanh.f32 %v7574_v21  ;;  %v7509_v33 = vadd.f32 %v15718_v4, %v15657_v26 }
 0xad4   : > { %8047 = vmatmul.mubr.bf16.gmra.mrb[228].mxu0 %v7805_v62  ;;  %v7698_v16 = vadd.f32 1.0, %v10818_v61  ;;  %v15864_v25 = vadd.f32 %v15806_v50, %v15349_v10  ;;  %v7571_v58 = vmul.f32 0.7978846, %v7507_v63  ;;  %v15867_v15 = vadd.f32 %v7196_v42, %v15349_v10 }
 0xad5   : > { %v15870_v12 = vmul.f32 %v7393_v0, %v15804_v40  ;;  %v7396_v9 = vmul.f32 %v7332_v46, %v15830_v60  ;;  %v7252_v23 = vmul.f32 0.5, %v15648_v32  ;;  %v7573_v37 = vmul.f32 0.7978846, %v7509_v33 }
 0xad6   : > { %v7206_v20 = vpop.f32.mrb[244].mxu1  ;;  %v10820_v4 = vpop.eup %10819  ;;  %v7760_v62 = vmul.f32 %v7696_v2, %v7248_v11  ;;  %v7762_v54 = vmul.f32 %v7698_v16, %v7250_v35  ;;  %v7254_v21 = vmul.f32 0.5, %v15663_v36  ;;  %10827 = vtanh.f32 %v7571_v58 }
 0xad7   : > { %v15875_v50 = vpop.f32.mrb[245].mxu1  ;;  %v10822_v48 = vpop.eup %10821  ;;  %v7695_v42 = vadd.f32 1.0, %v10820_v4  ;;  %v15878_v63 = vmul.f32 %v7394_v59, %v15820_v7  ;;  %10829 = vtanh.f32 %v7573_v37  ;;  %v7335_v0 = vmul.f32 0.044715, %v15867_v15 }
 0xad8   : > { %v15881_v46 = vpop.f32.mrb[246].mxu1  ;;  %v7808_v32 = vpack.c.bf16 %v7762_v54, %v7760_v62  ;;  %v7697_v61 = vadd.f32 1.0, %v10822_v48  ;;  %v15884_v11 = vmul.f32 %v7395_v45, %v15824_v43  ;;  %v7333_v36 = vmul.f32 0.044715, %v15864_v25 }
 0xad9   : > { %v15887_v35 = vpop.f32.mrb[247].mxu1  ;;  %v15890_v2 = vmul.f32 %v7396_v9, %v15830_v60  ;;  %v7251_v59 = vmul.f32 0.5, %v15645_v28  ;;  %v15895_v33 = vadd.f32 %v15812_v39, %v15353_v31  ;;  %v7399_v16 = vmul.f32 %v7335_v0, %v15867_v15 }
 0xada   : > { %8054 = vmatprep.mubr.bf16.mxu0 %v7808_v32  ;;  %v7759_v58 = vmul.f32 %v7695_v42, %v7247_v49  ;;  %v7761_v37 = vmul.f32 %v7697_v61, %v7249_v18  ;;  %v7512_v45 = vadd.f32 %v15761_v30, %v15697_v27  ;;  %v7514_v4 = vadd.f32 %v15778_v1, %v15721_v13 }
 0xadb   : > { %v7253_v9 = vmul.f32 0.5, %v15657_v26  ;;  %v7463_v62 = vmul.f32 %v7399_v16, %v15867_v15  ;;  %v15906_v28 = vadd.f32 %v15838_v24, %v15353_v31  ;;  %v15909_v39 = vadd.f32 %v7200_v19, %v15349_v10 }
 0xadc   : > { %v10824_v54 = vpop.eup %10823  ;;  %v7807_v49 = vpack.c.bf16 %v7761_v37, %v7759_v58  ;;  %v7397_v18 = vmul.f32 %v7333_v36, %v15864_v25  ;;  %v7576_v48 = vmul.f32 0.7978846, %v7512_v45  ;;  %v7578_v30 = vmul.f32 0.7978846, %v7514_v4 }
 0xadd   : > { %v10826_v42 = vpop.eup %10825  ;;  %v7700_v0 = vadd.f32 1.0, %v10824_v54  ;;  %v7334_v1 = vmul.f32 0.044715, %v15895_v33  ;;  %v7527_v26 = vadd.f32 %v7463_v62, %v15867_v15  ;;  %v7337_v32 = vmul.f32 0.044715, %v15909_v39 }
 0xade   : > { %8055 = vmatmul.mubr.bf16.gmra.mrb[232].mxu0 %v7807_v49  ;;  %v7702_v24 = vadd.f32 1.0, %v10826_v42  ;;  %10831 = vtanh.f32 %v7576_v48  ;;  %v7511_v19 = vadd.f32 %v15749_v57, %v15691_v6  ;;  %v7513_v61 = vadd.f32 %v15764_v8, %v15704_v29 }
 0xadf   : > { %v7591_v36 = vmul.f32 0.7978846, %v7527_v26  ;;  %v7336_v16 = vmul.f32 0.044715, %v15906_v28  ;;  %10833 = vtanh.f32 %v7578_v30  ;;  %v7401_v58 = vmul.f32 %v7337_v32, %v15909_v39 }
 0xae0   : > { %v10828_v37 = vpop.eup %10827  ;;  %v7764_v45 = vmul.f32 %v7700_v0, %v7252_v23  ;;  %v7766_v4 = vmul.f32 %v7702_v24, %v7254_v21  ;;  %v7575_v62 = vmul.f32 0.7978846, %v7511_v19  ;;  %v7577_v54 = vmul.f32 0.7978846, %v7513_v61 }
 0xae1   : > { %v10830_v49 = vpop.eup %10829  ;;  %v7699_v42 = vadd.f32 1.0, %v10828_v37  ;;  %10835 = vtanh.f32 %v7591_v36  ;;  %v7465_v48 = vmul.f32 %v7401_v58, %v15909_v39  ;;  %v15923_v57 = vadd.f32 %v7206_v20, %v15349_v10 }
 0xae2   : > { %v7810_v8 = vpack.c.bf16 %v7766_v4, %v7764_v45  ;;  %v7701_v26 = vadd.f32 1.0, %v10830_v49  ;;  %v7398_v44 = vmul.f32 %v7334_v1, %v15895_v33  ;;  %10837 = vtanh.f32 %v7575_v62 }
 0xae3   : > { %v15927_v30 = vmul.f32 %v7397_v18, %v15864_v25  ;;  %v15930_v23 = vmul.f32 0.5, %v15867_v15  ;;  %v7529_v21 = vadd.f32 %v7465_v48, %v15909_v39  ;;  %10839 = vtanh.f32 %v7577_v54 }
 0xae4   : > { %8062 = vmatprep.mubr.bf16.mxu0 %v7810_v8  ;;  %v7763_v0 = vmul.f32 %v7699_v42, %v7251_v59  ;;  %v7765_v32 = vmul.f32 %v7701_v26, %v7253_v9  ;;  %v7400_v20 = vmul.f32 %v7336_v16, %v15906_v28  ;;  %v7339_v24 = vmul.f32 0.044715, %v15923_v57 }
 0xae5   : > { %v7256_v19 = vmul.f32 0.5, %v15697_v27  ;;  %v7593_v1 = vmul.f32 0.7978846, %v7529_v21  ;;  %v15938_v18 = vadd.f32 %v15851_v14, %v15353_v31  ;;  %v7516_v15 = vadd.f32 %v15795_v41, %v15740_v52 }
 0xae6   : > { %v7809_v61 = vpack.c.bf16 %v7765_v32, %v7763_v0  ;;  %v15943_v36 = vmul.f32 %v7398_v44, %v15895_v33  ;;  %v7258_v59 = vmul.f32 0.5, %v15721_v13  ;;  %v7403_v9 = vmul.f32 %v7339_v24, %v15923_v57 }
 0xae7   : > { %10841 = vtanh.f32 %v7593_v1  ;;  %v7518_v27 = vadd.f32 %v15833_v51, %v15772_v34  ;;  %v7580_v16 = vmul.f32 0.7978846, %v7516_v15  ;;  %v15951_v14 = vadd.f32 %v15881_v46, %v15349_v10 }
 0xae8   : > { %v10832_v58 = vpop.eup %10831  ;;  %8063 = vmatmul.mubr.bf16.gmra.mrb[236].mxu0 %v7809_v61  ;;  %v15954_v41 = vmul.f32 %v7400_v20, %v15906_v28  ;;  %v7255_v44 = vmul.f32 0.5, %v15691_v6  ;;  %v7257_v13 = vmul.f32 0.5, %v15704_v29  ;;  %v7467_v37 = vmul.f32 %v7403_v9, %v15923_v57 }
 0xae9   : > { %v10834_v45 = vpop.eup %10833  ;;  %v7704_v4 = vadd.f32 1.0, %v10832_v58  ;;  %v7338_v51 = vmul.f32 0.044715, %v15938_v18  ;;  %v7582_v62 = vmul.f32 0.7978846, %v7518_v27  ;;  %10843 = vtanh.f32 %v7580_v16 }
 0xaea   : > { %v7706_v54 = vadd.f32 1.0, %v10834_v45  ;;  %v7273_v10 = vmul.f32 0.5, %v15909_v39  ;;  %v7531_v46 = vadd.f32 %v7467_v37, %v15923_v57  ;;  %v7341_v49 = vmul.f32 0.044715, %v15951_v14 }
 0xaeb   : > { %v10836_v42 = vpop.eup %10835  ;;  %v15965_v6 = vadd.f32 %v15875_v50, %v15353_v31  ;;  %10845 = vtanh.f32 %v7582_v62  ;;  %v7515_v29 = vadd.f32 %v15788_v5, %v15730_v47  ;;  %v7517_v48 = vadd.f32 %v15815_v38, %v15754_v55 }
 0xaec   : > { %v10838_v8 = vpop.eup %10837  ;;  %v7768_v26 = vmul.f32 %v7704_v4, %v7256_v19  ;;  %v7770_v21 = vmul.f32 %v7706_v54, %v7258_v59  ;;  %v7595_v39 = vmul.f32 0.7978846, %v7531_v46  ;;  %v7405_v0 = vmul.f32 %v7341_v49, %v15951_v14 }
 0xaed   : > { %v10840_v32 = vpop.eup %10839  ;;  %v7703_v20 = vadd.f32 1.0, %v10838_v8  ;;  %v7402_v24 = vmul.f32 %v7338_v51, %v15938_v18  ;;  %v7579_v1 = vmul.f32 0.7978846, %v7515_v29  ;;  %v7581_v50 = vmul.f32 0.7978846, %v7517_v48 }
 0xaee   : > { %v7812_v15 = vpack.c.bf16 %v7770_v21, %v7768_v26  ;;  %v7705_v61 = vadd.f32 1.0, %v10840_v32  ;;  %v7260_v9 = vmul.f32 0.5, %v15740_v52  ;;  %v15976_v5 = vadd.f32 %v15887_v35, %v15353_v31 }
 0xaef   : > { %v7719_v38 = vadd.f32 1.0, %v10836_v42  ;;  %v7262_v19 = vmul.f32 0.5, %v15772_v34  ;;  %v7469_v59 = vmul.f32 %v7405_v0, %v15951_v14  ;;  %10847 = vtanh.f32 %v7579_v1 }
 0xaf0   : > { %8070 = vmatprep.mubr.bf16.mxu0 %v7812_v15  ;;  %v7767_v27 = vmul.f32 %v7703_v20, %v7255_v44  ;;  %v7769_v16 = vmul.f32 %v7705_v61, %v7257_v13  ;;  %v7340_v58 = vmul.f32 0.044715, %v15965_v6  ;;  %10849 = vtanh.f32 %v7581_v50 }
 0xaf1   : > { %v10842_v37 = vpop.eup %10841  ;;  %10851 = vtanh.f32 %v7595_v39  ;;  %v7533_v52 = vadd.f32 %v7469_v59, %v15951_v14  ;;  %v7520_v31 = vadd.f32 %v15844_v3, %v15785_v53  ;;  %v7522_v35 = vadd.f32 %v15878_v63, %v15820_v7 }
 0xaf2   : > { %v7721_v34 = vadd.f32 1.0, %v10842_v37  ;;  %v7811_v45 = vpack.c.bf16 %v7769_v16, %v7767_v27  ;;  %v7466_v4 = vmul.f32 %v7402_v24, %v15938_v18  ;;  %v7342_v44 = vmul.f32 0.044715, %v15976_v5 }
 0xaf3   : > { %v10844_v13 = vpop.eup %10843  ;;  %v15989_v51 = vmul.f32 %v7719_v38, %v15930_v23  ;;  %v7597_v62 = vmul.f32 0.7978846, %v7533_v52  ;;  %v7584_v54 = vmul.f32 0.7978846, %v7520_v31  ;;  %v7586_v46 = vmul.f32 0.7978846, %v7522_v35 }
 0xaf4   : > { %v15991_v49 = vmul.f32 %v7721_v34, %v7273_v10  ;;  %8071 = vmatmul.mubr.bf16.gmra.mrb[240].mxu0 %v7811_v45  ;;  %v7708_v3 = vadd.f32 1.0, %v10844_v13  ;;  %v7519_v63 = vadd.f32 %v15841_v56, %v15775_v22  ;;  %v7521_v42 = vadd.f32 %v15870_v12, %v15804_v40 }
 0xaf5   : > { %v10846_v29 = vpop.eup %10845  ;;  %v7404_v48 = vmul.f32 %v7340_v58, %v15965_v6  ;;  %10853 = vtanh.f32 %v7597_v62  ;;  %v7259_v23 = vmul.f32 0.5, %v15730_v47  ;;  %v7524_v8 = vadd.f32 %v15890_v2, %v15830_v60 }
 0xaf6   : > { %v7819_v10 = vpack.c.bf16 %v15991_v49, %v15989_v51  ;;  %v7710_v26 = vadd.f32 1.0, %v10846_v29  ;;  %v7406_v21 = vmul.f32 %v7342_v44, %v15976_v5  ;;  %10855 = vtanh.f32 %v7584_v54 }
 0xaf7   : > { %10857 = vtanh.f32 %v7586_v46  ;;  %v7583_v56 = vmul.f32 0.7978846, %v7519_v63  ;;  %v7585_v39 = vmul.f32 0.7978846, %v7521_v42  ;;  %v7526_v12 = vadd.f32 %v15943_v36, %v15895_v33 }
 0xaf8   : > { %v7772_v0 = vmul.f32 %v7708_v3, %v7260_v9  ;;  %v7774_v32 = vmul.f32 %v7710_v26, %v7262_v19  ;;  %v7261_v47 = vmul.f32 0.5, %v15754_v55  ;;  %v7588_v20 = vmul.f32 0.7978846, %v7524_v8 }
 0xaf9   : > { %v10848_v24 = vpop.eup %10847  ;;  %v7468_v2 = vmul.f32 %v7404_v48, %v15965_v6  ;;  %10859 = vtanh.f32 %v7583_v56  ;;  %v7590_v1 = vmul.f32 0.7978846, %v7526_v12  ;;  %v7523_v50 = vadd.f32 %v15884_v11, %v15824_v43 }
 0xafa   : > { %v10850_v15 = vpop.eup %10849  ;;  %v7814_v61 = vpack.c.bf16 %v7774_v32, %v7772_v0  ;;  %v7707_v38 = vadd.f32 1.0, %v10848_v24  ;;  %10861 = vtanh.f32 %v7585_v39  ;;  %v7525_v36 = vadd.f32 %v15927_v30, %v15864_v25 }
 0xafb   : > { %v10852_v9 = vpop.eup %10851  ;;  %v7709_v19 = vadd.f32 1.0, %v10850_v15  ;;  %v7470_v55 = vmul.f32 %v7406_v21, %v15976_v5  ;;  %10863 = vtanh.f32 %v7588_v20  ;;  %v7587_v59 = vmul.f32 0.7978846, %v7523_v50 }
 0xafc   : > { %v7275_v27 = vmul.f32 0.5, %v15923_v57  ;;  %8078 = vmatprep.mubr.bf16.mxu0 %v7814_v61  ;;  %10865 = vtanh.f32 %v7590_v1  ;;  %v7589_v16 = vmul.f32 0.7978846, %v7525_v36  ;;  %v7771_v58 = vmul.f32 %v7707_v38, %v7259_v23 }
 0xafd   : > { %v7773_v11 = vmul.f32 %v7709_v19, %v7261_v47  ;;  %10867 = vtanh.f32 %v7587_v59  ;;  %v7528_v37 = vadd.f32 %v15954_v41, %v15906_v28  ;;  %v7723_v52 = vadd.f32 1.0, %v10852_v9 }
 0xafe   : > { %v7277_v30 = vmul.f32 0.5, %v15951_v14  ;;  %10869 = vtanh.f32 %v7589_v16  ;;  %v7530_v31 = vadd.f32 %v7466_v4, %v15938_v18  ;;  %v7532_v57 = vadd.f32 %v7468_v2, %v15965_v6 }
 0xaff   : > { %v10854_v35 = vpop.eup %10853  ;;  %v7813_v34 = vpack.c.bf16 %v7773_v11, %v7771_v58  ;;  %v7592_v45 = vmul.f32 0.7978846, %v7528_v37  ;;  %v7534_v44 = vadd.f32 %v7470_v55, %v15976_v5  ;;  %v7264_v54 = vmul.f32 0.5, %v15785_v53 }
 0xb00   : > { %v10856_v13 = vpop.eup %10855  ;;  %v7725_v62 = vadd.f32 1.0, %v10854_v35  ;;  %v7266_v46 = vmul.f32 0.5, %v15820_v7  ;;  %v7594_v41 = vmul.f32 0.7978846, %v7530_v31  ;;  %v7596_v63 = vmul.f32 0.7978846, %v7532_v57 }
 0xb01   : > { %v10858_v3 = vpop.eup %10857  ;;  %8079 = vmatmul.mubr.bf16.gmra.mrb[244].mxu0 %v7813_v34  ;;  %v7712_v14 = vadd.f32 1.0, %v10856_v13  ;;  %10871 = vtanh.f32 %v7592_v45  ;;  %v7598_v4 = vmul.f32 0.7978846, %v7534_v44  ;;  %v7787_v42 = vmul.f32 %v7723_v52, %v7275_v27 }
 0xb02   : > { %v7789_v29 = vmul.f32 %v7725_v62, %v7277_v30  ;;  %v7714_v48 = vadd.f32 1.0, %v10858_v3  ;;  %10873 = vtanh.f32 %v7594_v41  ;;  %v7263_v39 = vmul.f32 0.5, %v15775_v22 }
 0xb03   : > { %v10860_v23 = vpop.eup %10859  ;;  %v7776_v8 = vmul.f32 %v7712_v14, %v7264_v54  ;;  %10875 = vtanh.f32 %v7596_v63  ;;  %v7265_v12 = vmul.f32 0.5, %v15804_v40  ;;  %v7268_v20 = vmul.f32 0.5, %v15830_v60 }
 0xb04   : > { %v10862_v26 = vpop.eup %10861  ;;  %v7821_v21 = vpack.c.bf16 %v7789_v29, %v7787_v42  ;;  %v7778_v56 = vmul.f32 %v7714_v48, %v7266_v46  ;;  %v7711_v53 = vadd.f32 1.0, %v10860_v23  ;;  %10877 = vtanh.f32 %v7598_v4 }
 0xb05   : > { %v10864_v7 = vpop.eup %10863  ;;  %v7713_v0 = vadd.f32 1.0, %v10862_v26  ;;  %v7270_v15 = vmul.f32 0.5, %v15895_v33  ;;  %v7267_v36 = vmul.f32 0.5, %v15824_v43  ;;  %v7269_v22 = vmul.f32 0.5, %v15864_v25 }
 0xb06   : > { %v10866_v32 = vpop.eup %10865  ;;  %v7816_v47 = vpack.c.bf16 %v7778_v56, %v7776_v8  ;;  %v7716_v24 = vadd.f32 1.0, %v10864_v7  ;;  %v7775_v1 = vmul.f32 %v7711_v53, %v7263_v39  ;;  %v7272_v30 = vmul.f32 0.5, %v15906_v28 }
 0xb07   : > { %v10868_v2 = vpop.eup %10867  ;;  %v7777_v50 = vmul.f32 %v7713_v0, %v7265_v12  ;;  %v7718_v61 = vadd.f32 1.0, %v10866_v32  ;;  %v7274_v43 = vmul.f32 0.5, %v15938_v18  ;;  %v7276_v35 = vmul.f32 0.5, %v15965_v6 }
 0xb08   : > { %v10870_v38 = vpop.eup %10869  ;;  %8086 = vmatprep.mubr.bf16.mxu0 %v7816_v47  ;;  %v7715_v9 = vadd.f32 1.0, %v10868_v2  ;;  %v7780_v19 = vmul.f32 %v7716_v24, %v7268_v20  ;;  %v7278_v44 = vmul.f32 0.5, %v15976_v5 }
 0xb09   : > { %v7815_v40 = vpack.c.bf16 %v7777_v50, %v7775_v1  ;;  %v7782_v55 = vmul.f32 %v7718_v61, %v7270_v15  ;;  %v7717_v59 = vadd.f32 1.0, %v10870_v38  ;;  %v16040_v61 = vld [vmem:[%s598_s15] ss:$0 sm:$0xff] }
 0xb0a   : > { %v7779_v16 = vmul.f32 %v7715_v9, %v7267_v36 }
 0xb0b   : > { %v10872_v27 = vpop.eup %10871  ;;  %8087 = vmatmul.mubr.bf16.gmra.mrb[248].mxu0 %v7815_v40  ;;  %v7818_v60 = vpack.c.bf16 %v7782_v55, %v7780_v19  ;;  %v7781_v58 = vmul.f32 %v7717_v59, %v7269_v22 }
 0xb0c   : > { %v10874_v11 = vpop.eup %10873  ;;  %v7720_v37 = vadd.f32 1.0, %v10872_v27  ;;  %v17333_v27 = vld [vmem:[#allocation134_spill] sm:$0xff] }
 0xb0d   : > { %v10876_v33 = vpop.eup %10875  ;;  %8094 = vmatprep.mubr.bf16.mxu0 %v7818_v60  ;;  %v7817_v52 = vpack.c.bf16 %v7781_v58, %v7779_v16  ;;  %v7722_v25 = vadd.f32 1.0, %v10874_v11  ;;  %v17334_v16 = vld [vmem:[#allocation93_spill] sm:$0xff] }
 0xb0e   : > { %v10878_v31 = vpop.eup %10877  ;;  %v7724_v34 = vadd.f32 1.0, %v10876_v33  ;;  %v7784_v45 = vmul.f32 %v7720_v37, %v7272_v30 }
 0xb0f   : > { %v7786_v57 = vmul.f32 %v7722_v25, %v7274_v43  ;;  %v7726_v13 = vadd.f32 1.0, %v10878_v31  ;;  %v17335_v25 = vld [vmem:[#allocation27_spill] sm:$0xff] }
 0xb10   : > { %v7788_v54 = vmul.f32 %v7724_v34, %v7276_v35 }
 0xb11   : > { %v7820_v62 = vpack.c.bf16 %v7786_v57, %v7784_v45  ;;  %v7790_v46 = vmul.f32 %v7726_v13, %v7278_v44  ;;  %v17336_v13 = vld [vmem:[#allocation29_spill] sm:$0xff] }
 0xb13   : > { %8095 = vmatmul.mubr.bf16.gmra.mrb[252].mxu0 %v7817_v52  ;;  %v7822_v41 = vpack.c.bf16 %v7790_v46, %v7788_v54 }
 0xb14   : > { %8102 = vmatprep.mubr.bf16.mxu0 %v7820_v62 }
 0xb1b   : > { %8103 = vmatmul.mubr.bf16.gmra.mrb[0].mxu0 %v7819_v10 }
 0xb1c   : > { %8110 = vmatprep.mubr.bf16.mxu0 %v7822_v41 }
 0xb23   : > { %8111 = vmatmul.mubr.bf16.gmra.mrb[4].mxu0 %v7821_v21 }
 0xb53   : > { %v9110_v28 = vpop.f32.mrb[200].mxu0 }
 0xb54   : > { %v9111_v18 = vpop.f32.mrb[201].mxu0 }
 0xb55   : > { %v9112_v6 = vadd.f32 %v9111_v18, %v9110_v28  ;;  %v9113_v3 = vpop.f32.mrb[202].mxu0 }
 0xb56   : > { %v9114_v14 = vpop.f32.mrb[203].mxu0 }
 0xb57   : > { %v9115_v63 = vadd.f32 %v9114_v14, %v9113_v3  ;;  %v7993_v19 = vadd.f32 %v9112_v6, %v16040_v61 }
 0xb59   : > { %v7996_v22 = vadd.f32 %v9115_v63, %v16040_v61  ;;  %v16049_v60 = vadd.f32 %v7993_v19, %v17333_v27  ;;  %v17337_v63 = vld [vmem:[#allocation89_spill] sm:$0xff] }
 0xb5b   : > { %v9116_v5 = vpop.f32.mrb[204].mxu0  ;;  %v16046_v59 = vadd.f32 %v7996_v22, %v15181_v17  ;;  %v8191_v30 = vmul.f32 %v16049_v60, %v16049_v60 }
 0xb5c   : > { %v9117_v4 = vpop.f32.mrb[205].mxu0 }
 0xb5d   : > { %v9118_v42 = vadd.f32 %v9117_v4, %v9116_v5  ;;  %v9119_v29 = vpop.f32.mrb[206].mxu0  ;;  %v8192_v37 = vmul.f32 %v16046_v59, %v16046_v59  ;;  %v8153_v17 = vadd.f32 %v16046_v59, %v16049_v60 }
 0xb5e   : > { %v9120_v48 = vpop.f32.mrb[207].mxu0 }
 0xb5f   : > { %v9121_v23 = vadd.f32 %v9120_v48, %v9119_v29  ;;  %v8001_v55 = vadd.f32 %v9118_v42, %v16040_v61  ;;  %v8223_v57 = vadd.f32 %v8192_v37, %v8191_v30  ;;  %v17338_v29 = vld [vmem:[#allocation117_spill] sm:$0xff] }
 0xb61   : > { %v16052_v58 = vadd.f32 %v8001_v55, %v17334_v16  ;;  %v8004_v11 = vadd.f32 %v9121_v23, %v16040_v61  ;;  %v17341_v55 = vld [vmem:[#allocation44_spill] sm:$0xff] }
 0xb63   : > { %v8193_v43 = vmul.f32 %v16052_v58, %v16052_v58  ;;  %v16065_v31 = vadd.f32 %v8004_v11, %v17335_v25  ;;  %v8154_v44 = vadd.f32 %v8153_v17, %v16052_v58 }
 0xb65   : > { %v8224_v28 = vadd.f32 %v8223_v57, %v8193_v43  ;;  %v8194_v18 = vmul.f32 %v16065_v31, %v16065_v31  ;;  %v8155_v3 = vadd.f32 %v8154_v44, %v16065_v31 }
 0xb67   : > { %v8225_v4 = vadd.f32 %v8224_v28, %v8194_v18  ;;  %v17344_v18 = vld [vmem:[#allocation91_spill] sm:$0xff] }
 0xb6b   : > { %v9122_v8 = vpop.f32.mrb[208].mxu0 }
 0xb6c   : > { %v9123_v26 = vpop.f32.mrb[209].mxu0 }
 0xb6d   : > { %v9124_v56 = vadd.f32 %v9123_v26, %v9122_v8  ;;  %v9125_v53 = vpop.f32.mrb[210].mxu0 }
 0xb6e   : > { %v9126_v51 = vpop.f32.mrb[211].mxu0 }
 0xb6f   : > { %v9127_v49 = vadd.f32 %v9126_v51, %v9125_v53  ;;  %v8009_v33 = vadd.f32 %v9124_v56, %v16040_v61 }
 0xb71   : > { %v16069_v62 = vadd.f32 %v8009_v33, %v17336_v13  ;;  %v8012_v54 = vadd.f32 %v9127_v49, %v16040_v61  ;;  %v17342_v33 = vld [vmem:[#allocation124_spill] sm:$0xff] }
 0xb73   : > { %v8195_v14 = vmul.f32 %v16069_v62, %v16069_v62  ;;  %v16079_v5 = vadd.f32 %v8012_v54, %v17337_v63  ;;  %v8156_v42 = vadd.f32 %v8155_v3, %v16069_v62  ;;  %v17343_v54 = vld [vmem:[#allocation107_spill] sm:$0xff] }
 0xb75   : > { %v8226_v26 = vadd.f32 %v8225_v4, %v8195_v14  ;;  %v8196_v56 = vmul.f32 %v16079_v5, %v16079_v5 }
 0xb77   : > { %v9128_v10 = vpop.f32.mrb[212].mxu0 }
 0xb78   : > { %v9129_v21 = vpop.f32.mrb[213].mxu0 }
 0xb79   : > { %v9130_v7 = vadd.f32 %v9129_v21, %v9128_v10  ;;  %v9131_v39 = vpop.f32.mrb[214].mxu0  ;;  %v8157_v21 = vadd.f32 %v8156_v42, %v16079_v5 }
 0xb7a   : > { %v9132_v12 = vpop.f32.mrb[215].mxu0 }
 0xb7b   : > { %v9133_v0 = vadd.f32 %v9132_v12, %v9131_v39  ;;  %v8017_v6 = vadd.f32 %v9130_v7, %v16040_v61  ;;  %v17339_v39 = vld [vmem:[#allocation28_spill] sm:$0xff] }
 0xb7d   : > { %v16083_v48 = vadd.f32 %v8017_v6, %v17338_v29  ;;  %v8020_v23 = vadd.f32 %v9133_v0, %v16040_v61 }
 0xb7f   : > { %v8197_v7 = vmul.f32 %v16083_v48, %v16083_v48  ;;  %v16093_v12 = vadd.f32 %v8020_v23, %v17339_v39  ;;  %v17345_v23 = vld [vmem:[#allocation86_spill] sm:$0xff] }
 0xb84   : > { %v9134_v32 = vpop.f32.mrb[216].mxu0 }
 0xb85   : > { %v9135_v47 = vpop.f32.mrb[217].mxu0 }
 0xb86   : > { %v9136_v20 = vadd.f32 %v9135_v47, %v9134_v32  ;;  %v9137_v24 = vpop.f32.mrb[218].mxu0  ;;  %v8227_v47 = vadd.f32 %v8226_v26, %v8196_v56 }
 0xb87   : > { %v9138_v2 = vpop.f32.mrb[219].mxu0 }
 0xb88   : > { %v9139_v1 = vadd.f32 %v9138_v2, %v9137_v24  ;;  %v8025_v53 = vadd.f32 %v9136_v20, %v16040_v61  ;;  %v8158_v24 = vadd.f32 %v8157_v21, %v16083_v48  ;;  %v17340_v2 = vld [vmem:[#allocation34_spill] sm:$0xff] }
 0xb8a   : > { %v8028_v20 = vadd.f32 %v9139_v1, %v16040_v61 }
 0xb8c   : > { %v16107_v27 = vadd.f32 %v8028_v20, %v17341_v55 }
 0xb8e   : > { %v8200_v25 = vmul.f32 %v16107_v27, %v16107_v27 }
 0xb91   : > { %v9140_v50 = vpop.f32.mrb[220].mxu0 }
 0xb92   : > { %v9141_v15 = vpop.f32.mrb[221].mxu0 }
 0xb93   : > { %v9142_v38 = vadd.f32 %v9141_v15, %v9140_v50  ;;  %v9143_v36 = vpop.f32.mrb[222].mxu0  ;;  %v16097_v50 = vadd.f32 %v8025_v53, %v17340_v2  ;;  %v8228_v15 = vadd.f32 %v8227_v47, %v8197_v7 }
 0xb94   : > { %v9144_v9 = vpop.f32.mrb[223].mxu0 }
 0xb95   : > { %v9145_v40 = vadd.f32 %v9144_v9, %v9143_v36  ;;  %v8198_v36 = vmul.f32 %v16093_v12, %v16093_v12  ;;  %v8033_v22 = vadd.f32 %v9142_v38, %v16040_v61  ;;  %v8159_v9 = vadd.f32 %v8158_v24, %v16093_v12 }
 0xb96   : > { %v8199_v19 = vmul.f32 %v16097_v50, %v16097_v50 }
 0xb97   : > { %v8229_v11 = vadd.f32 %v8228_v15, %v8198_v36  ;;  %v8160_v37 = vadd.f32 %v8159_v9, %v16097_v50  ;;  %v16111_v1 = vadd.f32 %v8033_v22, %v17342_v33  ;;  %v17347_v15 = vld [vmem:[#allocation103_spill] sm:$0xff] }
 0xb99   : > { %v8230_v43 = vadd.f32 %v8229_v11, %v8199_v19  ;;  %v8161_v44 = vadd.f32 %v8160_v37, %v16107_v27  ;;  %v8201_v13 = vmul.f32 %v16111_v1, %v16111_v1 }
 0xb9b   : > { %v8162_v28 = vadd.f32 %v8161_v44, %v16111_v1  ;;  %v17350_v44 = vld [vmem:[#allocation43_spill] sm:$0xff] }
 0xb9d   : > { %v9146_v52 = vpop.f32.mrb[224].mxu0 }
 0xb9e   : > { %v9147_v35 = vpop.f32.mrb[225].mxu0 }
 0xb9f   : > { %v9148_v34 = vadd.f32 %v9147_v35, %v9146_v52  ;;  %v9149_v45 = vpop.f32.mrb[226].mxu0  ;;  %v8036_v52 = vadd.f32 %v9145_v40, %v16040_v61  ;;  %v8231_v40 = vadd.f32 %v8230_v43, %v8200_v25 }
 0xba0   : > { %v9150_v46 = vpop.f32.mrb[227].mxu0 }
 0xba1   : > { %v9151_v41 = vadd.f32 %v9150_v46, %v9149_v45  ;;  %v8041_v35 = vadd.f32 %v9148_v34, %v16040_v61  ;;  %v16121_v46 = vadd.f32 %v8036_v52, %v17343_v54  ;;  %v8232_v14 = vadd.f32 %v8231_v40, %v8201_v13 }
 0xba3   : > { %v16125_v6 = vadd.f32 %v8041_v35, %v17344_v18  ;;  %v8044_v3 = vadd.f32 %v9151_v41, %v16040_v61  ;;  %v8202_v34 = vmul.f32 %v16121_v46, %v16121_v46  ;;  %v8163_v42 = vadd.f32 %v8162_v28, %v16121_v46 }
 0xba5   : > { %v8203_v29 = vmul.f32 %v16125_v6, %v16125_v6  ;;  %v8164_v41 = vadd.f32 %v8163_v42, %v16125_v6 }
 0xba7   : > { %v9152_v8 = vpop.f32.mrb[228].mxu0 }
 0xba8   : > { %v9153_v51 = vpop.f32.mrb[229].mxu0 }
 0xba9   : > { %v9154_v49 = vadd.f32 %v9153_v51, %v9152_v8  ;;  %v9155_v10 = vpop.f32.mrb[230].mxu0  ;;  %v16135_v8 = vadd.f32 %v8044_v3, %v17345_v23  ;;  %v8233_v51 = vadd.f32 %v8232_v14, %v8202_v34 }
 0xbaa   : > { %v9156_v32 = vpop.f32.mrb[231].mxu0 }
 0xbab   : > { %v9157_v0 = vadd.f32 %v9156_v32, %v9155_v10  ;;  %v8049_v63 = vadd.f32 %v9154_v49, %v16040_v61  ;;  %v17346_v10 = vld [vmem:[#allocation113_spill] sm:$0xff]  ;;  %v8234_v32 = vadd.f32 %v8233_v51, %v8203_v29  ;;  %v8204_v47 = vmul.f32 %v16135_v8, %v16135_v8 }
 0xbac   : > { %v8165_v2 = vadd.f32 %v8164_v41, %v16135_v8 }
 0xbad   : > { %v16139_v21 = vadd.f32 %v8049_v63, %v17346_v10  ;;  %v8052_v49 = vadd.f32 %v9157_v0, %v16040_v61  ;;  %v8235_v22 = vadd.f32 %v8234_v32, %v8204_v47  ;;  %v17348_v0 = vld [vmem:[#allocation130_spill] sm:$0xff] }
 0xbaf   : > { %v8205_v20 = vmul.f32 %v16139_v21, %v16139_v21  ;;  %v16149_v36 = vadd.f32 %v8052_v49, %v17347_v15  ;;  %v8166_v9 = vadd.f32 %v8165_v2, %v16139_v21 }
 0xbb1   : > { %v9158_v16 = vpop.f32.mrb[232].mxu0  ;;  %v8206_v11 = vmul.f32 %v16149_v36, %v16149_v36  ;;  %v8167_v52 = vadd.f32 %v8166_v9, %v16149_v36 }
 0xbb2   : > { %v9159_v30 = vpop.f32.mrb[233].mxu0 }
 0xbb3   : > { %v9160_v17 = vadd.f32 %v9159_v30, %v9158_v16  ;;  %v9161_v38 = vpop.f32.mrb[234].mxu0  ;;  %v8236_v16 = vadd.f32 %v8235_v22, %v8205_v20 }
 0xbb4   : > { %v9162_v45 = vpop.f32.mrb[235].mxu0 }
 0xbb5   : > { %v9163_v57 = vadd.f32 %v9162_v45, %v9161_v38  ;;  %v8057_v24 = vadd.f32 %v9160_v17, %v16040_v61  ;;  %v17349_v17 = vld [vmem:[#allocation116_spill] sm:$0xff]  ;;  %v8237_v45 = vadd.f32 %v8236_v16, %v8206_v11 }
 0xbb7   : > { %v16153_v19 = vadd.f32 %v8057_v24, %v17348_v0  ;;  %v8060_v55 = vadd.f32 %v9163_v57, %v16040_v61 }
 0xbb9   : > { %v8207_v30 = vmul.f32 %v16153_v19, %v16153_v19  ;;  %v16163_v38 = vadd.f32 %v8060_v55, %v17349_v17  ;;  %v8168_v57 = vadd.f32 %v8167_v52, %v16153_v19 }
 0xbbb   : > { %v9164_v4 = vpop.f32.mrb[236].mxu0  ;;  %v8238_v18 = vadd.f32 %v8237_v45, %v8207_v30  ;;  %v8208_v3 = vmul.f32 %v16163_v38, %v16163_v38  ;;  %v8169_v34 = vadd.f32 %v8168_v57, %v16163_v38 }
 0xbbc   : > { %v9165_v26 = vpop.f32.mrb[237].mxu0 }
 0xbbd   : > { %v9166_v56 = vadd.f32 %v9165_v26, %v9164_v4  ;;  %v9167_v53 = vpop.f32.mrb[238].mxu0  ;;  %v17351_v4 = vld [vmem:[#allocation56_spill] sm:$0xff]  ;;  %v8239_v29 = vadd.f32 %v8238_v18, %v8208_v3  ;;  %v17352_v26 = vld [vmem:[#allocation35_spill] sm:$0xff] }
 0xbbe   : > { %v9168_v7 = vpop.f32.mrb[239].mxu0 }
 0xbbf   : > { %v9169_v39 = vadd.f32 %v9168_v7, %v9167_v53  ;;  %v8065_v37 = vadd.f32 %v9166_v56, %v16040_v61  ;;  %v17353_v7 = vld [vmem:[#allocation13_spill] sm:$0xff] }
 0xbc1   : > { %v16167_v13 = vadd.f32 %v8065_v37, %v17350_v44  ;;  %v8068_v54 = vadd.f32 %v9169_v39, %v16040_v61  ;;  %v17354_v37 = vld [vmem:[#allocation22_spill] sm:$0xff] }
 0xbc3   : > { %v8209_v63 = vmul.f32 %v16167_v13, %v16167_v13  ;;  %v16177_v42 = vadd.f32 %v8068_v54, %v17351_v4  ;;  %v8170_v23 = vadd.f32 %v8169_v34, %v16167_v13  ;;  %v17356_v4 = vld [vmem:[#allocation123_spill] sm:$0xff] }
 0xbc5   : > { %v8240_v51 = vadd.f32 %v8239_v29, %v8209_v63  ;;  %v8210_v41 = vmul.f32 %v16177_v42, %v16177_v42  ;;  %v8171_v10 = vadd.f32 %v8170_v23, %v16177_v42 }
 0xbc7   : > { %v9170_v33 = vpop.f32.mrb[240].mxu0  ;;  %v8241_v24 = vadd.f32 %v8240_v51, %v8210_v41  ;;  %v17357_v51 = vld [vmem:[#allocation31_spill] sm:$0xff] }
 0xbc8   : > { %v9171_v43 = vpop.f32.mrb[241].mxu0 }
 0xbc9   : > { %v9172_v25 = vadd.f32 %v9171_v43, %v9170_v33  ;;  %v9173_v35 = vpop.f32.mrb[242].mxu0 }
 0xbca   : > { %v9174_v40 = vpop.f32.mrb[243].mxu0 }
 0xbcb   : > { %v9175_v28 = vadd.f32 %v9174_v40, %v9173_v35  ;;  %v8073_v14 = vadd.f32 %v9172_v25, %v16040_v61  ;;  %v17355_v25 = vld [vmem:[#allocation12_spill] sm:$0xff] }
 0xbcd   : > { %v16181_v56 = vadd.f32 %v8073_v14, %v17352_v26  ;;  %v8076_v53 = vadd.f32 %v9175_v28, %v16040_v61 }
 0xbcf   : > { %v8211_v49 = vmul.f32 %v16181_v56, %v16181_v56  ;;  %v16190_v39 = vadd.f32 %v8076_v53, %v17353_v7  ;;  %v8172_v2 = vadd.f32 %v8171_v10, %v16181_v56 }
 0xbd1   : > { %v8242_v9 = vadd.f32 %v8241_v24, %v8211_v49  ;;  %v8212_v0 = vmul.f32 %v16190_v39, %v16190_v39  ;;  %v8173_v11 = vadd.f32 %v8172_v2, %v16190_v39 }
 0xbd3   : > { %v8243_v30 = vadd.f32 %v8242_v9, %v8212_v0  ;;  %v17358_v0 = vld [vmem:[#allocation45_spill] sm:$0xff] }
 0xbd4   : > { %v9176_v32 = vpop.f32.mrb[244].mxu0 }
 0xbd5   : > { %v9177_v47 = vpop.f32.mrb[245].mxu0 }
 0xbd6   : > { %v9178_v20 = vadd.f32 %v9177_v47, %v9176_v32  ;;  %v9179_v15 = vpop.f32.mrb[246].mxu0 }
 0xbd7   : > { %v9180_v22 = vpop.f32.mrb[247].mxu0 }
 0xbd8   : > { %v8081_v55 = vadd.f32 %v9178_v20, %v16040_v61  ;;  %v9181_v16 = vadd.f32 %v9180_v22, %v9179_v15 }
 0xbda   : > { %v16198_v33 = vadd.f32 %v8081_v55, %v17354_v37  ;;  %v8084_v52 = vadd.f32 %v9181_v16, %v16040_v61 }
 0xbdc   : > { %v8174_v17 = vadd.f32 %v8173_v11, %v16198_v33  ;;  %v8213_v43 = vmul.f32 %v16198_v33, %v16198_v33  ;;  %v16205_v35 = vadd.f32 %v8084_v52, %v17355_v25  ;;  %v17359_v52 = vld [vmem:[#allocation19_spill] sm:$0xff] }
 0xbde   : > { %v8244_v45 = vadd.f32 %v8243_v30, %v8213_v43  ;;  %v8175_v57 = vadd.f32 %v8174_v17, %v16205_v35  ;;  %v8214_v44 = vmul.f32 %v16205_v35, %v16205_v35  ;;  %v9182_v54 = vpop.f32.mrb[248].mxu0 }
 0xbdf   : > { %v9183_v40 = vpop.f32.mrb[249].mxu0 }
 0xbe0   : > { %v8245_v28 = vadd.f32 %v8244_v45, %v8214_v44  ;;  %v9184_v18 = vadd.f32 %v9183_v40, %v9182_v54  ;;  %v9185_v3 = vpop.f32.mrb[250].mxu0 }
 0xbe1   : > { %v9186_v14 = vpop.f32.mrb[251].mxu0 }
 0xbe2   : > { %v8089_v34 = vadd.f32 %v9184_v18, %v16040_v61  ;;  %v9187_v63 = vadd.f32 %v9186_v14, %v9185_v3  ;;  %v17360_v14 = vld [vmem:[#allocation59_spill] sm:$0xff] }
 0xbe4   : > { %v16212_v29 = vadd.f32 %v8089_v34, %v17356_v4  ;;  %v8092_v23 = vadd.f32 %v9187_v63, %v16040_v61 }
 0xbe6   : > { %v8176_v26 = vadd.f32 %v8175_v57, %v16212_v29  ;;  %v8215_v53 = vmul.f32 %v16212_v29, %v16212_v29  ;;  %v16219_v41 = vadd.f32 %v8092_v23, %v17357_v51  ;;  %v9188_v10 = vpop.f32.mrb[252].mxu0 }
 0xbe7   : > { %v9189_v49 = vpop.f32.mrb[253].mxu0 }
 0xbe8   : > { %v8246_v7 = vadd.f32 %v8245_v28, %v8215_v53  ;;  %v8177_v32 = vadd.f32 %v8176_v26, %v16219_v41  ;;  %v8216_v47 = vmul.f32 %v16219_v41, %v16219_v41  ;;  %v9190_v24 = vadd.f32 %v9189_v49, %v9188_v10  ;;  %v9191_v2 = vpop.f32.mrb[254].mxu0  ;;  %v17361_v26 = vld [vmem:[#allocation11_spill] sm:$0xff] }
 0xbe9   : > { %v9192_v20 = vpop.f32.mrb[255].mxu0 }
 0xbea   : > { %v8247_v15 = vadd.f32 %v8246_v7, %v8216_v47  ;;  %v8097_v22 = vadd.f32 %v9190_v24, %v16040_v61  ;;  %v9193_v9 = vadd.f32 %v9192_v20, %v9191_v2 }
 0xbec   : > { %v16226_v55 = vadd.f32 %v8097_v22, %v17358_v0  ;;  %v8100_v16 = vadd.f32 %v9193_v9, %v16040_v61  ;;  %v17362_v9 = vld [vmem:[#allocation87_spill] sm:$0xff] }
 0xbee   : > { %v8178_v11 = vadd.f32 %v8177_v32, %v16226_v55  ;;  %v8217_v37 = vmul.f32 %v16226_v55, %v16226_v55  ;;  %v16233_v30 = vadd.f32 %v8100_v16, %v17359_v52  ;;  %v9194_v17 = vpop.f32.mrb[0].mxu0  ;;  %v17363_v52 = vld [vmem:[#allocation26_spill] sm:$0xff] }
 0xbef   : > { %v9195_v43 = vpop.f32.mrb[1].mxu0 }
 0xbf0   : > { %v8248_v25 = vadd.f32 %v8247_v15, %v8217_v37  ;;  %v8179_v45 = vadd.f32 %v8178_v11, %v16233_v30  ;;  %v8218_v57 = vmul.f32 %v16233_v30, %v16233_v30  ;;  %v9196_v44 = vadd.f32 %v9195_v43, %v9194_v17  ;;  %v9197_v54 = vpop.f32.mrb[2].mxu0 }
 0xbf1   : > { %v9198_v40 = vpop.f32.mrb[3].mxu0 }
 0xbf2   : > { %v8249_v28 = vadd.f32 %v8248_v25, %v8218_v57  ;;  %v8105_v18 = vadd.f32 %v9196_v44, %v16040_v61  ;;  %v9199_v3 = vadd.f32 %v9198_v40, %v9197_v54 }
 0xbf4   : > { %v16240_v34 = vadd.f32 %v8105_v18, %v17360_v14  ;;  %v8108_v63 = vadd.f32 %v9199_v3, %v16040_v61 }
 0xbf6   : > { %v8180_v4 = vadd.f32 %v8179_v45, %v16240_v34  ;;  %v8219_v23 = vmul.f32 %v16240_v34, %v16240_v34  ;;  %v8148_v53 = vadd.f32 %v8108_v63, %v17361_v26  ;;  %v9200_v51 = vpop.f32.mrb[4].mxu0 }
 0xbf7   : > { %v9201_v10 = vpop.f32.mrb[5].mxu0 }
 0xbf8   : > { %v8250_v49 = vadd.f32 %v8249_v28, %v8219_v23  ;;  %v8181_v7 = vadd.f32 %v8180_v4, %v8148_v53  ;;  %v8220_v32 = vmul.f32 %v8148_v53, %v8148_v53  ;;  %v9202_v47 = vadd.f32 %v9201_v10, %v9200_v51  ;;  %v9203_v24 = vpop.f32.mrb[6].mxu0 }
 0xbf9   : > { %v9204_v2 = vpop.f32.mrb[7].mxu0 }
 0xbfa   : > { %v8251_v20 = vadd.f32 %v8250_v49, %v8220_v32  ;;  %v8113_v15 = vadd.f32 %v9202_v47, %v16040_v61  ;;  %v9205_v22 = vadd.f32 %v9204_v2, %v9203_v24  ;;  %v8151_v24 = vld [vmem:[%s601_s28] sm:$0x1] }
 0xbfc   : > { %v8149_v0 = vadd.f32 %v8113_v15, %v17362_v9  ;;  %v8116_v16 = vadd.f32 %v9205_v22, %v16040_v61  ;;  %v17364_v22 = vld [vmem:[#allocation8_spill] sm:$0xff] }
 0xbfe   : > { %v8182_v11 = vadd.f32 %v8181_v7, %v8149_v0  ;;  %v8221_v37 = vmul.f32 %v8149_v0, %v8149_v0  ;;  %v8150_v17 = vadd.f32 %v8116_v16, %v17363_v52 }
 0xc00   : > { %v8252_v43 = vadd.f32 %v8251_v20, %v8221_v37  ;;  %v8183_v25 = vadd.f32 %v8182_v11, %v8150_v17  ;;  %v8222_v45 = vmul.f32 %v8150_v17, %v8150_v17 }
 0xc02   : > { %v8184_v57 = vrot.slane %v8183_v25, 4  ;;  %v8253_v44 = vadd.f32 %v8252_v43, %v8222_v45  ;;  %v8152_v45 = vld [vmem:[%s604_s7] sm:$0x1] }
 0xc04   : > { %v8185_v54 = vadd.f32 %v8184_v57, %v8183_v25  ;;  %v8254_v40 = vrot.slane %v8253_v44, 4 }
 0xc06   : > { %v8186_v28 = vrot.slane %v8185_v54, 2  ;;  %v8255_v18 = vadd.f32 %v8254_v40, %v8253_v44 }
 0xc08   : > { %v8187_v3 = vadd.f32 %v8186_v28, %v8185_v54  ;;  %v8256_v14 = vrot.slane %v8255_v18, 2 }
 0xc0a   : > { %v8188_v63 = vrot.slane %v8187_v3, 1  ;;  %v8257_v4 = vadd.f32 %v8256_v14, %v8255_v18 }
 0xc0c   : > { %v8189_v23 = vadd.f32 %v8188_v63, %v8187_v3  ;;  %v8258_v61 = vrot.slane %v8257_v4, 1 }
 0xc0e   : > { %v8190_v26 = vmul.f32 0.00390625, %v8189_v23  ;;  %v8259_v51 = vadd.f32 %v8258_v61, %v8257_v4 }
 0xc10   : > { %v8260_v10 = vmul.f32 0.00390625, %v8259_v51  ;;  %v8261_v49 = vmul.f32 %v8190_v26, %v8190_v26 }
 0xc12   : > { %v8262_v7 = vsub.f32 %v8260_v10, %v8261_v49 }
 0xc14   : > { %v8263_v32 = vmax.f32 %v8262_v7, 0.0 }
 0xc16   : > { %v8264_v47 = vadd.f32 1e-05, %v8263_v32 }
 0xc18   : > { %10879 = vrsqrt.f32 %v8264_v47 }
 0xc22   : > { %v10880_v2 = vpop.eup %10879 }
 0xc23   : > { %v8266_v20 = vmul.f32 %v10880_v2, %v8151_v24 }
 0xc25   : > { %v8305_v15 = vmul.f32 %v8266_v20, %v8190_v26  ;;  %v8271_v9 = vrot.slane %v8266_v20, %v17364_v22 }
 0xc27   : > { %v8273_v16 = vmul.f32 %v8271_v9, %v16049_v60  ;;  %v8274_v11 = vmul.f32 %v8271_v9, %v16046_v59  ;;  %v8275_v37 = vmul.f32 %v8271_v9, %v16052_v58  ;;  %v8276_v52 = vmul.f32 %v8271_v9, %v16065_v31 }
 0xc28   : > { %v8277_v43 = vmul.f32 %v8271_v9, %v16069_v62  ;;  %v8278_v25 = vmul.f32 %v8271_v9, %v16079_v5  ;;  %v8279_v57 = vmul.f32 %v8271_v9, %v16083_v48  ;;  %v8280_v44 = vmul.f32 %v8271_v9, %v16093_v12 }
 0xc29   : > { %v8295_v60 = vmul.f32 %v8271_v9, %v16198_v33  ;;  %v8296_v59 = vmul.f32 %v8271_v9, %v16205_v35  ;;  %v16273_v58 = vmul.f32 %v8271_v9, %v16212_v29  ;;  %v16276_v31 = vmul.f32 %v8271_v9, %v16219_v41 }
 0xc2a   : > { %v16279_v62 = vmul.f32 %v8271_v9, %v16226_v55  ;;  %v16282_v5 = vmul.f32 %v8271_v9, %v16233_v30  ;;  %v16285_v48 = vmul.f32 %v8271_v9, %v16240_v34  ;;  %v16287_v12 = vmul.f32 %v8271_v9, %v8148_v53 }
 0xc2b   : > { %v16289_v33 = vmul.f32 %v8271_v9, %v8149_v0  ;;  %v16291_v35 = vmul.f32 %v8271_v9, %v8150_v17  ;;  %v8281_v29 = vmul.f32 %v8271_v9, %v16097_v50  ;;  %v8282_v41 = vmul.f32 %v8271_v9, %v16107_v27 }
 0xc2c   : > { %v8283_v54 = vmul.f32 %v8271_v9, %v16111_v1  ;;  %v8306_v55 = vsub.f32 %v8152_v45, %v8305_v15  ;;  %v8284_v40 = vmul.f32 %v8271_v9, %v16121_v46  ;;  %v8285_v30 = vmul.f32 %v8271_v9, %v16125_v6 }
 0xc2d   : > { %v8286_v34 = vmul.f32 %v8271_v9, %v16135_v8  ;;  %v8287_v53 = vmul.f32 %v8271_v9, %v16139_v21  ;;  %v8288_v0 = vmul.f32 %v8271_v9, %v16149_v36  ;;  %v8289_v17 = vmul.f32 %v8271_v9, %v16153_v19 }
 0xc2e   : > { %v8290_v28 = vmul.f32 %v8271_v9, %v16163_v38  ;;  %v8311_v50 = vrot.slane %v8306_v55, %v17364_v22  ;;  %v8291_v27 = vmul.f32 %v8271_v9, %v16167_v13  ;;  %v8292_v1 = vmul.f32 %v8271_v9, %v16177_v42 }
 0xc2f   : > { %v8293_v46 = vmul.f32 %v8271_v9, %v16181_v56  ;;  %v8294_v6 = vmul.f32 %v8271_v9, %v16190_v39 }
 0xc30   : > { %v16308_v18 = vadd.f32 %v8311_v50, %v8273_v16  ;;  %v16310_v8 = vadd.f32 %v8311_v50, %v8274_v11  ;;  %v16312_v21 = vadd.f32 %v8311_v50, %v8275_v37  ;;  %v16314_v36 = vadd.f32 %v8311_v50, %v8276_v52 }
 0xc31   : > { %v16316_v19 = vadd.f32 %v8311_v50, %v8277_v43  ;;  %v16318_v38 = vadd.f32 %v8311_v50, %v8278_v25  ;;  %v16320_v3 = vadd.f32 %v8311_v50, %v8279_v57  ;;  %v16322_v13 = vadd.f32 %v8311_v50, %v8280_v44 }
 0xc32   : > { %v16324_v42 = vadd.f32 %v8311_v50, %v8281_v29  ;;  %v16326_v56 = vadd.f32 %v8311_v50, %v8282_v41  ;;  %v16328_v39 = vadd.f32 %v8311_v50, %v8283_v54  ;;  %v16330_v14 = vadd.f32 %v8311_v50, %v8284_v40  ;;  %8345 = vst [vmem:[#allocation2] sm:$0xff] %v16308_v18 }
 0xc33   : > { %8346 = vst [vmem:[#allocation2 + $0x8] sm:$0xff] %v16310_v8  ;;  %8347 = vst [vmem:[#allocation2 + $0x10] sm:$0xff] %v16312_v21  ;;  %v8325_v63 = vadd.f32 %v8311_v50, %v8285_v30  ;;  %v8326_v4 = vadd.f32 %v8311_v50, %v8286_v34  ;;  %v8327_v23 = vadd.f32 %v8311_v50, %v8287_v53 }
 0xc34   : > { %8348 = vst [vmem:[#allocation2 + $0x18] sm:$0xff] %v16314_v36  ;;  %v8328_v61 = vadd.f32 %v8311_v50, %v8288_v0  ;;  %8349 = vst [vmem:[#allocation2 + $0x20] sm:$0xff] %v16316_v19  ;;  %v8329_v26 = vadd.f32 %v8311_v50, %v8289_v17  ;;  %v8330_v51 = vadd.f32 %v8311_v50, %v8290_v28 }
 0xc35   : > { %8350 = vst [vmem:[#allocation2 + $0x28] sm:$0xff] %v16318_v38  ;;  %8351 = vst [vmem:[#allocation2 + $0x30] sm:$0xff] %v16320_v3  ;;  %v8331_v10 = vadd.f32 %v8311_v50, %v8291_v27  ;;  %v8332_v49 = vadd.f32 %v8311_v50, %v8292_v1  ;;  %v8333_v7 = vadd.f32 %v8311_v50, %v8293_v46 }
 0xc36   : > { %8352 = vst [vmem:[#allocation2 + $0x38] sm:$0xff] %v16322_v13  ;;  %8353 = vst [vmem:[#allocation2 + $0x40] sm:$0xff] %v16324_v42  ;;  %v8334_v32 = vadd.f32 %v8311_v50, %v8294_v6  ;;  %v8335_v47 = vadd.f32 %v8311_v50, %v8295_v60  ;;  %v8336_v24 = vadd.f32 %v8311_v50, %v8296_v59 }
 0xc37   : > { %8354 = vst [vmem:[#allocation2 + $0x48] sm:$0xff] %v16326_v56  ;;  %8355 = vst [vmem:[#allocation2 + $0x50] sm:$0xff] %v16328_v39  ;;  %v8337_v2 = vadd.f32 %v8311_v50, %v16273_v58  ;;  %v8338_v20 = vadd.f32 %v8311_v50, %v16276_v31  ;;  %v8339_v15 = vadd.f32 %v8311_v50, %v16279_v62 }
 0xc38   : > { %8356 = vst [vmem:[#allocation2 + $0x58] sm:$0xff] %v16330_v14  ;;  %8357 = vst [vmem:[#allocation2 + $0x60] sm:$0xff] %v8325_v63  ;;  %v8340_v22 = vadd.f32 %v8311_v50, %v16282_v5  ;;  %v8341_v9 = vadd.f32 %v8311_v50, %v16285_v48  ;;  %v8342_v16 = vadd.f32 %v8311_v50, %v16287_v12 }
 0xc39   : > { %8358 = vst [vmem:[#allocation2 + $0x68] sm:$0xff] %v8326_v4  ;;  %8359 = vst [vmem:[#allocation2 + $0x70] sm:$0xff] %v8327_v23  ;;  %v8343_v11 = vadd.f32 %v8311_v50, %v16289_v33  ;;  %v8344_v37 = vadd.f32 %v8311_v50, %v16291_v35 }
 0xc3a   : > { %8360 = vst [vmem:[#allocation2 + $0x78] sm:$0xff] %v8328_v61  ;;  %8361 = vst [vmem:[#allocation2 + $0x80] sm:$0xff] %v8329_v26 }
 0xc3b   : > { %8362 = vst [vmem:[#allocation2 + $0x88] sm:$0xff] %v8330_v51  ;;  %8363 = vst [vmem:[#allocation2 + $0x90] sm:$0xff] %v8331_v10 }
 0xc3c   : > { %8364 = vst [vmem:[#allocation2 + $0x98] sm:$0xff] %v8332_v49  ;;  %8365 = vst [vmem:[#allocation2 + $0xa0] sm:$0xff] %v8333_v7  ;;  %8380 = sbr.rel (%p8782_p5) target bundleno = 3155 (0xc53), region = 80 }
 0xc3d   : > { %8366 = vst [vmem:[#allocation2 + $0xa8] sm:$0xff] %v8334_v32  ;;  %8367 = vst [vmem:[#allocation2 + $0xb0] sm:$0xff] %v8335_v47 }
 0xc3e   : > { %8368 = vst [vmem:[#allocation2 + $0xb8] sm:$0xff] %v8336_v24  ;;  %8369 = vst [vmem:[#allocation2 + $0xc0] sm:$0xff] %v8337_v2 }
 0xc3f   : > { %8370 = vst [vmem:[#allocation2 + $0xc8] sm:$0xff] %v8338_v20  ;;  %8371 = vst [vmem:[#allocation2 + $0xd0] sm:$0xff] %v8339_v15 }
 0xc40   : > { %8372 = vst [vmem:[#allocation2 + $0xd8] sm:$0xff] %v8340_v22  ;;  %8373 = vst [vmem:[#allocation2 + $0xe0] sm:$0xff] %v8341_v9 }
 0xc41   : > { %8374 = vst [vmem:[#allocation2 + $0xe8] sm:$0xff] %v8342_v16  ;;  %8375 = vst [vmem:[#allocation2 + $0xf0] sm:$0xff] %v8343_v11 }
 0xc42   : > { %8376 = vst [vmem:[#allocation2 + $0xf8] sm:$0xff] %v8344_v37  ;;  %8381 = vst [vmem:[#allocation3] sm:$0xff] (!%p8782_p5), %v16308_v18 }
 0xc43   : > { %8382 = vst [vmem:[#allocation3 + $0x8] sm:$0xff] %v16310_v8  ;;  %8383 = vst [vmem:[#allocation3 + $0x10] sm:$0xff] %v16312_v21 }
 0xc44   : > { %8384 = vst [vmem:[#allocation3 + $0x18] sm:$0xff] %v16314_v36  ;;  %8385 = vst [vmem:[#allocation3 + $0x20] sm:$0xff] %v16316_v19 }
 0xc45   : > { %8386 = vst [vmem:[#allocation3 + $0x28] sm:$0xff] %v16318_v38  ;;  %8387 = vst [vmem:[#allocation3 + $0x30] sm:$0xff] %v16320_v3 }
 0xc46   : > { %8388 = vst [vmem:[#allocation3 + $0x38] sm:$0xff] %v16322_v13  ;;  %8389 = vst [vmem:[#allocation3 + $0x40] sm:$0xff] %v16324_v42 }
 0xc47   : > { %8390 = vst [vmem:[#allocation3 + $0x48] sm:$0xff] %v16326_v56  ;;  %8391 = vst [vmem:[#allocation3 + $0x50] sm:$0xff] %v16328_v39 }
 0xc48   : > { %8392 = vst [vmem:[#allocation3 + $0x58] sm:$0xff] %v16330_v14  ;;  %8393 = vst [vmem:[#allocation3 + $0x60] sm:$0xff] %v8325_v63 }
 0xc49   : > { %8394 = vst [vmem:[#allocation3 + $0x68] sm:$0xff] %v8326_v4  ;;  %8395 = vst [vmem:[#allocation3 + $0x70] sm:$0xff] %v8327_v23 }
 0xc4a   : > { %8396 = vst [vmem:[#allocation3 + $0x78] sm:$0xff] %v8328_v61  ;;  %8397 = vst [vmem:[#allocation3 + $0x80] sm:$0xff] %v8329_v26 }
 0xc4b   : > { %8398 = vst [vmem:[#allocation3 + $0x88] sm:$0xff] %v8330_v51  ;;  %8399 = vst [vmem:[#allocation3 + $0x90] sm:$0xff] %v8331_v10 }
 0xc4c   : > { %8400 = vst [vmem:[#allocation3 + $0x98] sm:$0xff] %v8332_v49  ;;  %8401 = vst [vmem:[#allocation3 + $0xa0] sm:$0xff] %v8333_v7 }
 0xc4d   : > { %8402 = vst [vmem:[#allocation3 + $0xa8] sm:$0xff] %v8334_v32  ;;  %8403 = vst [vmem:[#allocation3 + $0xb0] sm:$0xff] %v8335_v47 }
 0xc4e   : > { %8404 = vst [vmem:[#allocation3 + $0xb8] sm:$0xff] %v8336_v24  ;;  %8405 = vst [vmem:[#allocation3 + $0xc0] sm:$0xff] %v8337_v2 }
 0xc4f   : > { %8406 = vst [vmem:[#allocation3 + $0xc8] sm:$0xff] %v8338_v20  ;;  %8407 = vst [vmem:[#allocation3 + $0xd0] sm:$0xff] %v8339_v15 }
 0xc50   : > { %8408 = vst [vmem:[#allocation3 + $0xd8] sm:$0xff] %v8340_v22  ;;  %8409 = vst [vmem:[#allocation3 + $0xe0] sm:$0xff] %v8341_v9 }
 0xc51   : > { %8410 = vst [vmem:[#allocation3 + $0xe8] sm:$0xff] %v8342_v16  ;;  %8411 = vst [vmem:[#allocation3 + $0xf0] sm:$0xff] %v8343_v11 }
 0xc52   : > { %8412 = vst [vmem:[#allocation3 + $0xf8] sm:$0xff] %v8344_v37 }
 0xc53 PF: > { %p9900_p6 = scmp.eq.s32.totalorder %s11034_s26, 1  ;;  %s10955_s7 = smov [#allocation3]  }
 0xc54   : > { %s8419_s27 = sshll.u32 %s10955_s7, 4  ;;  %s8420_s27 = int_to_ptr.vmem [resolvable:$true] %s8419_s27 }
 0xc55   : > { %s10913_s28 = scalar_lea.vmem %s8420_s27, 4096  ;;  %p10920_p10 = scmp.lt.s32.totalorder %s8420_s27, %s8420_s27 }
 0xc56   : > { %p10914_p7 = scmp.ne.s32.totalorder %s8420_s27, %s10913_s28  ;;  %p10921_p11 = scmp.lt.s32.totalorder %s10913_s28, %s10913_s28 }
 0xc58   : > { %p10915_p8 = pnand %p10914_p7, %p9900_p6  ;;  %p10922_p12 = por %p10921_p11, %p10920_p10 }
 0xc5a   : > { %p10916_p9 = pneg %p10915_p8 }
 0xc5c   : > { %p10923_p13 = pnand %p10922_p12, %p10916_p9 }
 0xc5e   : > { %10926 = shalt.err (!%p10923_p13)
}
 0xc5f   : > { %s17365_s29 = sld [smem:[#allocation148_spill]] }
 0xc65   : > { %s10927_s16 = scalar_lea.hbm %s17365_s29, 4096 }
 0xc66   : > { %p10928_p0 = scmp.ne.s32.totalorder %s17365_s29, %s10927_s16  ;;  %p10933_p3 = scmp.lt.u32.totalorder %s10927_s16, %s17365_s29 }
 0xc68   : > { %p10929_p1 = pnand %p10928_p0, %p9900_p6 }
 0xc6a   : > { %p10930_p2 = pneg %p10929_p1 }
 0xc6c   : > { %p10935_p4 = pnand %p10933_p3, %p10930_p2 }
 0xc6e   : > { %10938 = shalt.err (!%p10935_p4)
}
 0xc6f   : > { %s10956_s17 = smov 128   ;;  %s10957_s23 = smov 8  }
 0xc70   : > { %9897 = dma.vmem_to_hbm [thread:$0]  (%p9900_p6), %s8420_s27, 4096, %s17365_s29, [#allocation4], %s10956_s17, %s10956_s17, %s10957_s23  }
 0xc71   : > { %10944 = dma.done.wait (%p9900_p6), [#allocation4], 4096  }
 0xc72   : > { %10946 = vsyncadd (%p9900_p6), [#allocation4], 4294963200 }
 0xc73 PF: > { %s17366_s30 = sld [smem:[#allocation6_spill]] }
 0xc79   : > { %s24_s25 = sadd.s32 1, %s17366_s30  }
 0xc7a   : > { %p21_p5 = scmp.ge.s32.totalorder %s24_s25, 4  }
 0xc7c   :  { %23 = sbr.rel (!%p21_p5) target bundleno = 8 (0x8), region = 140 }
 0xc83   :  { %8435 = vsyncpa [#allocation4], 1 }
 0xc84   :  { %8437 = vsyncpa [#allocation4 + $0x1], 1 }

</bundles_post_ra>
